<compile_context>
chip_gen: v6e
topology: v6e:2x2x1
jax: 0.10.0
libtpu: 0.0.40
codegen_flags: <defaults>
</compile_context>

<pallas_src>
import jax
import jax.numpy as jnp
from jax.experimental import pallas as pl
from jax.experimental.pallas import tpu as pltpu


VMEM_LIMIT_BYTES = 32 * 1024 * 1024   # explicit scoped-VMEM budget (safe on v5e/v6e/v7x)


# ----------------------------------------------------------------------------
# Kernel 1: CNN feature encoder (conv3x3 + BN(folded) + ReLU [+ 2x2 maxpool])
# ----------------------------------------------------------------------------

def cnn_encoder(x_nhwc, conv_params):
    """x_nhwc: (B, T, F, Cin) f32.
    conv_params: [(w bf16 (Kpad, cout) with rows >= 9*cin zeroed,
                   b f32 (1, cout) with BN folded), ...].
    Returns the LSTM-ready sequence (B, T'*F', C_last) f32, reproducing
    PyTorch's permute(0,2,1,3) + reshape(B,-1,C) exactly."""
    B, T, F, Cin = x_nhwc.shape
    n_layers = len(conv_params)

    # Static per-layer geometry: (h_in, w_in, cin, cout, kpad, pooled_after)
    sizes = []
    h, w, cin = T, F, Cin
    for i, (wm, _) in enumerate(conv_params):
        kpad, cout = wm.shape
        pooled = i < n_layers - 1
        sizes.append((h, w, cin, cout, kpad, pooled))
        if pooled:
            h //= 2
            w //= 2
        cin = cout
    out_h, out_w, out_c = h, w, cin

    def kernel(x_ref, *refs):
        o_ref = refs[2 * n_layers]
        xps = refs[2 * n_layers + 1:]

        y = x_ref[0]                                      # (T, F, Cin) f32
        for i, (h_i, w_i, cin_i, cout_i, kpad_i, pooled) in enumerate(sizes):
            wm = refs[2 * i][...]                         # (Kpad, cout) bf16
            bm = refs[2 * i + 1][...]                     # (1, cout)    f32
            xp = xps[i]                                   # (h+2, w+2, cin)

            # Zero only the 1-pixel halo border; the interior is fully
            # overwritten below, so a full-buffer clear is unnecessary.
            zr = jnp.zeros((1, w_i + 2, cin_i), jnp.float32)
            zc = jnp.zeros((h_i + 2, 1, cin_i), jnp.float32)
            xp[0:1, :, :] = zr
            xp[h_i + 1:h_i + 2, :, :] = zr
            xp[:, 0:1, :] = zc
            xp[:, w_i + 1:w_i + 2, :] = zc
            xp[1:h_i + 1, 1:w_i + 1, :] = y

            # In-kernel im2col: 9 shifted windows + zero pad to the
            # lane-aligned K used by the (zero-row-padded) weight.
            taps = [xp[dh:dh + h_i, dw:dw + w_i, :]
                    for dh in range(3) for dw in range(3)]
            if kpad_i > 9 * cin_i:
                taps.append(jnp.zeros((h_i, w_i, kpad_i - 9 * cin_i), jnp.float32))
            patches = jnp.concatenate(taps, axis=-1)      # (h, w, Kpad)
            p2 = patches.reshape(h_i * w_i, kpad_i).astype(jnp.bfloat16)

            acc = jnp.dot(p2, wm, preferred_element_type=jnp.float32)
            acc = jnp.maximum(acc + bm, 0.0)              # conv + BN + ReLU

            if pooled:
                # 2x2 max-pool done on values (no scratch round trip).
                # Rows of `acc` are (h, w) with w fastest.
                aw = acc.reshape(h_i * w_i // 2, 2, cout_i)
                wp = jnp.maximum(aw[:, 0, :], aw[:, 1, :])      # pool along W
                hp = wp.reshape(h_i // 2, 2, w_i // 2, cout_i)
                y = jnp.maximum(hp[:, 0], hp[:, 1])             # pool along H
            else:
                y = acc.reshape(h_i, w_i, cout_i)

        # Fused sequence construction: (T',F',C) -> (T',C,F')  (this is the
        # PyTorch permute(0,2,1,3)); the remaining regroup into (N, C) is a
        # free row-major reshape in the wrapper.
        o_ref[0] = jnp.transpose(y, (0, 2, 1)).reshape(out_h * out_c, out_w)

    in_specs = [pl.BlockSpec((1, T, F, Cin), lambda b: (b, 0, 0, 0))]
    operands = [x_nhwc]
    for wm, bm in conv_params:
        in_specs.append(pl.BlockSpec(wm.shape, lambda b: (0, 0)))
        operands.append(wm)
        in_specs.append(pl.BlockSpec(bm.shape, lambda b: (0, 0)))
        operands.append(bm)

    scratch = [pltpu.VMEM((s[0] + 2, s[1] + 2, s[2]), jnp.float32) for s in sizes]

    feat = pl.pallas_call(
        kernel,
        out_shape=jax.ShapeDtypeStruct((B, out_h * out_c, out_w), jnp.float32),
        grid=(B,),
        in_specs=in_specs,
        out_specs=pl.BlockSpec((1, out_h * out_c, out_w), lambda b: (b, 0, 0)),
        scratch_shapes=scratch,
        compiler_params=pltpu.CompilerParams(
            dimension_semantics=("parallel",),
            vmem_limit_bytes=VMEM_LIMIT_BYTES),
    )(*operands)

    # Free (layout-compatible) row-major reshape -> PyTorch reshape(B,-1,C).
    return feat.reshape(B, out_h * out_w, out_c)


# ----------------------------------------------------------------------------
# Kernel 2: 2-layer BiLSTM + attention + FC + sigmoid (all fused)
# ----------------------------------------------------------------------------

def lstm_attn_head(seq, lstm_params, wqkv, bqkv, wf, bf, batch_tile=None):
    """seq: (B, N, C) f32.  Returns sigmoid pitch activations (B, N, P)."""
    B, N, C = seq.shape
    H = lstm_params[0][0][1].shape[0]            # w_hh: (H, 4H)
    two_h = 2 * H
    A = (wqkv.shape[1] - two_h) // 2             # attention dim
    P = wf.shape[1]                              # num_pitches
    inv_scale = 1.0 / (float(A) ** 0.5)

    if batch_tile is None:
        # Keep a >=2-long parallel grid for v7x's two TensorCores.  On
        # single-TC v5e/v6e pass batch_tile=B to collapse the grid into one
        # step and fill the recurrent matmul's M dimension with the batch.
        batch_tile = B // 2 if (B >= 2 and B % 2 == 0) else B
    bt = batch_tile
    assert B % bt == 0

    def kernel(x_ref, *refs):
        lstm_refs = refs[:12]
        wqkv_ref, bqkv_ref, wf_ref, bf_ref = refs[12:16]
        o_ref = refs[16]

        def run_direction(x_val, w_ih_ref, w_hh_ref, b_ref, reverse):
            """One LSTM direction.  One (bt,H)x(H,4H) matmul per step; the
            four gates are lane slices of the 4H-wide result.  Hidden states
            stay as live values (no scratch stores)."""
            din = x_val.shape[-1]
            wih = w_ih_ref[...]                  # (Din, 4H) bf16
            whh = w_hh_ref[...]                  # (H, 4H)   bf16
            bias = b_ref[...]                    # (1, 4H)   f32 (b_ih + b_hh)
            # Hoisted input projection: one matmul for the whole (bt*N, Din).
            xproj = (jnp.dot(x_val.reshape(bt * N, din).astype(jnp.bfloat16),
                             wih, preferred_element_type=jnp.float32)
                     + bias).reshape(bt, N, 4 * H)
            h = jnp.zeros((bt, H), jnp.float32)
            c = jnp.zeros((bt, H), jnp.float32)
            hs = [None] * N
            # TODO(synk): for long sequences (N >> 16) switch this fully
            # unrolled recurrence to lax.fori_loop with a small unroll.
            for s in range(N):
                t = N - 1 - s if reverse else s
                g = xproj[:, t, :] + jnp.dot(h.astype(jnp.bfloat16), whh,
                                             preferred_element_type=jnp.float32)
                i_g = jax.nn.sigmoid(g[:, 0:H])              # PyTorch gate
                f_g = jax.nn.sigmoid(g[:, H:2 * H])          # order i,f,g,o
                g_g = jnp.tanh(g[:, 2 * H:3 * H])
                o_g = jax.nn.sigmoid(g[:, 3 * H:4 * H])
                c = f_g * c + i_g * g_g
                h = o_g * jnp.tanh(c)
                hs[t] = h
            return jnp.stack(hs, axis=1)         # (bt, N, H)

        x0 = x_ref[...]                          # (bt, N, C)
        h1 = jnp.concatenate(
            [run_direction(x0, lstm_refs[0], lstm_refs[1], lstm_refs[2], False),
             run_direction(x0, lstm_refs[3], lstm_refs[4], lstm_refs[5], True)],
            axis=-1)                             # (bt, N, 2H)
        # TODO(synk): inter-layer LSTM dropout is inactive in eval mode.
        h2 = jnp.concatenate(
            [run_direction(h1, lstm_refs[6], lstm_refs[7], lstm_refs[8], False),
             run_direction(h1, lstm_refs[9], lstm_refs[10], lstm_refs[11], True)],
            axis=-1)                             # (bt, N, 2H)

        # Fused Q|K|V projection (single matmul) + scaled-dot-product attn.
        qkv = (jnp.dot(h2.reshape(bt * N, two_h).astype(jnp.bfloat16),
                       wqkv_ref[...], preferred_element_type=jnp.float32)
               + bqkv_ref[...]).reshape(bt, N, 2 * A + two_h)
        q = qkv[:, :, 0:A]
        k = qkv[:, :, A:2 * A]
        v = qkv[:, :, 2 * A:]
        s = jnp.einsum('bqd,bkd->bqk', q.astype(jnp.bfloat16),
                       k.astype(jnp.bfloat16),
                       preferred_element_type=jnp.float32) * inv_scale
        s = s - jnp.max(s, axis=-1, keepdims=True)
        p = jnp.exp(s)
        p = p * pl.reciprocal(jnp.sum(p, axis=-1, keepdims=True), approx=True)
        attn = jnp.einsum('bqk,bkd->bqd', p.astype(jnp.bfloat16),
                          v.astype(jnp.bfloat16),
                          preferred_element_type=jnp.float32)    # (bt, N, 2H)
        # Final FC (num_pitches = 128 -> lane-dense output) + sigmoid.
        logits = (jnp.dot(attn.reshape(bt * N, two_h).astype(jnp.bfloat16),
                          wf_ref[...], preferred_element_type=jnp.float32)
                  + bf_ref[...])
        o_ref[...] = jax.nn.sigmoid(logits).reshape(bt, N, P)

    operands = [seq]
    in_specs = [pl.BlockSpec((bt, N, C), lambda b: (b, 0, 0))]
    flat_params = []
    for layer in lstm_params:
        for (w_ih, w_hh, bias) in layer:
            flat_params += [w_ih, w_hh, bias]
    flat_params += [wqkv, bqkv, wf, bf]
    for p_arr in flat_params:
        operands.append(p_arr)
        in_specs.append(pl.BlockSpec(p_arr.shape, lambda b: (0, 0)))

    return pl.pallas_call(
        kernel,
        out_shape=jax.ShapeDtypeStruct((B, N, P), jnp.float32),
        grid=(B // bt,),
        in_specs=in_specs,
        out_specs=pl.BlockSpec((bt, N, P), lambda b: (b, 0, 0)),
        compiler_params=pltpu.CompilerParams(
            dimension_semantics=("parallel",),
            vmem_limit_bytes=VMEM_LIMIT_BYTES),
    )(*operands)


# ----------------------------------------------------------------------------
# Forward pass (eval-mode semantics of PitchDetectionModule)
# ----------------------------------------------------------------------------

def pitch_forward(x_nchw, params):
    x = jnp.transpose(x_nchw, (0, 2, 3, 1))               # NCHW -> NHWC
    seq = cnn_encoder(x, params["conv"])                   # (B, N, C)
    return lstm_attn_head(seq, params["lstm"], params["wqkv"], params["bqkv"],
                          params["wf"], params["bf"])


# ----------------------------------------------------------------------------
# Deterministic parameter construction (BN folded, K-padded bf16 weights)
# ----------------------------------------------------------------------------

def fold_bn(w_mat, b, gamma, beta, mean, var, eps=1e-5):
    s = gamma / jnp.sqrt(var + eps)
    return w_mat * s[None, :], (b - mean) * s + beta


def make_params(key, input_channels, hidden_channels, lstm_hidden, attn_dim,
                num_pitches):
    keys = iter(jax.random.split(key, 64))

    def rnd(shape, scale=0.1):
        return (scale * jax.random.normal(next(keys), shape)).astype(jnp.float32)

    params = {}

    # Conv layers: weight rows ordered (kh, kw, cin), BN folded, then rows
    # zero-padded up to a lane-aligned K (multiple of 128), bf16.
    conv = []
    cin = input_channels
    for cout in hidden_channels:
        w = rnd((9 * cin, cout))
        b = rnd((cout,))
        gamma = 1.0 + rnd((cout,))
        beta = rnd((cout,))
        mean = rnd((cout,))
        var = 1.0 + jnp.abs(rnd((cout,)))
        w_f, b_f = fold_bn(w, b, gamma, beta, mean, var)
        kpad = max(128, ((9 * cin + 127) // 128) * 128)
        w_p = jnp.zeros((kpad, cout), jnp.float32).at[:9 * cin, :].set(w_f)
        conv.append((w_p.astype(jnp.bfloat16), b_f.reshape(1, cout)))
        cin = cout
    params["conv"] = conv

    # 2-layer bidirectional LSTM (gate order i, f, g, o; bias = b_ih + b_hh).
    lstm = []
    din = hidden_channels[-1]
    for _layer in range(2):
        layer = []
        for _direction in range(2):
            w_ih = rnd((din, 4 * lstm_hidden)).astype(jnp.bfloat16)
            w_hh = rnd((lstm_hidden, 4 * lstm_hidden)).astype(jnp.bfloat16)
            bias = rnd((4 * lstm_hidden,)).reshape(1, -1)
            layer.append((w_ih, w_hh, bias))
        lstm.append(tuple(layer))
        din = 2 * lstm_hidden
    params["lstm"] = lstm

    feat = 2 * lstm_hidden
    wq, wk, wv = rnd((feat, attn_dim)), rnd((feat, attn_dim)), rnd((feat, feat))
    bq, bk, bv = rnd((attn_dim,)), rnd((attn_dim,)), rnd((feat,))
    params["wqkv"] = jnp.concatenate([wq, wk, wv], axis=1).astype(jnp.bfloat16)
    params["bqkv"] = jnp.concatenate([bq, bk, bv]).reshape(1, -1)
    params["wf"] = rnd((feat, num_pitches)).astype(jnp.bfloat16)
    params["bf"] = rnd((num_pitches,)).reshape(1, -1)
    return params


# ----------------------------------------------------------------------------
# Main
# ----------------------------------------------------------------------------

if __name__ == "__main__":
    key = jax.random.PRNGKey(0)
    k_in, k_par = jax.random.split(key)

    batch = 2
    input_channels = 1
    hidden_channels = [8, 8, 8, 8]
    lstm_hidden = 16
    attn_dim = 8
    num_pitches = 128
    time_steps, freq_bins = 16, 16

    x = jax.random.normal(
        k_in, (batch, input_channels, time_steps, freq_bins), dtype=jnp.float32)
    params = make_params(k_par, input_channels, hidden_channels,
                         lstm_hidden, attn_dim, num_pitches)

    forward = jax.jit(pitch_forward)
    out = jax.block_until_ready(forward(x, params))

    # After 3 maxpools: T'=2, F'=2 -> sequence length 4; output is per-pitch
    # sigmoid probabilities.
    n_seq = (time_steps // 8) * (freq_bins // 8)
    assert out.shape == (batch, n_seq, num_pitches), out.shape
    assert bool(jnp.all(jnp.isfinite(out)))
    assert bool(jnp.all((out >= 0.0) & (out <= 1.0)))
    print("KERNEL_OK")
</pallas_src>

<mosaic_0001>
module attributes {stable_mosaic.version = 11 : i64} {
  func.func @kernel(%arg0: i32, %arg1: memref<1x16x16x1xf32, #tpu.memory_space<vmem>>, %arg2: memref<128x8xbf16, #tpu.memory_space<vmem>>, %arg3: memref<1x8xf32, #tpu.memory_space<vmem>>, %arg4: memref<128x8xbf16, #tpu.memory_space<vmem>>, %arg5: memref<1x8xf32, #tpu.memory_space<vmem>>, %arg6: memref<128x8xbf16, #tpu.memory_space<vmem>>, %arg7: memref<1x8xf32, #tpu.memory_space<vmem>>, %arg8: memref<128x8xbf16, #tpu.memory_space<vmem>>, %arg9: memref<1x8xf32, #tpu.memory_space<vmem>>, %arg10: memref<1x16x2xf32, #tpu.memory_space<vmem>>, %arg11: memref<18x18x1xf32, #tpu.memory_space<vmem>>, %arg12: memref<10x10x8xf32, #tpu.memory_space<vmem>>, %arg13: memref<6x6x8xf32, #tpu.memory_space<vmem>>, %arg14: memref<4x4x8xf32, #tpu.memory_space<vmem>>) attributes {dimension_semantics = [#tpu.dimension_semantics<parallel>], iteration_bounds = array<i64: 2>, scalar_prefetch = 0 : i64, scratch_operands = 4 : i64, tpu.core_type = #tpu.core_type<tc>, window_params = [{transform_indices = @transform_0, window_bounds = array<i64: 1, 16, 16, 1>}, {pipeline_mode = #tpu.pipeline_mode<synchronous>, transform_indices = @transform_1, window_bounds = array<i64: 128, 8>}, {pipeline_mode = #tpu.pipeline_mode<synchronous>, transform_indices = @transform_2, window_bounds = array<i64: 1, 8>}, {pipeline_mode = #tpu.pipeline_mode<synchronous>, transform_indices = @transform_3, window_bounds = array<i64: 128, 8>}, {pipeline_mode = #tpu.pipeline_mode<synchronous>, transform_indices = @transform_4, window_bounds = array<i64: 1, 8>}, {pipeline_mode = #tpu.pipeline_mode<synchronous>, transform_indices = @transform_5, window_bounds = array<i64: 128, 8>}, {pipeline_mode = #tpu.pipeline_mode<synchronous>, transform_indices = @transform_6, window_bounds = array<i64: 1, 8>}, {pipeline_mode = #tpu.pipeline_mode<synchronous>, transform_indices = @transform_7, window_bounds = array<i64: 128, 8>}, {pipeline_mode = #tpu.pipeline_mode<synchronous>, transform_indices = @transform_8, window_bounds = array<i64: 1, 8>}, {transform_indices = @transform_9, window_bounds = array<i64: 1, 16, 2>}]} {
    %c0 = arith.constant 0 : index
    %c0_0 = arith.constant 0 : index
    %c0_1 = arith.constant 0 : index
    %c0_2 = arith.constant 0 : index
    %0 = vector.load %arg1[%c0, %c0_0, %c0_1, %c0_2] : memref<1x16x16x1xf32, #tpu.memory_space<vmem>>, vector<1x16x16x1xf32>
    %1 = vector.shape_cast %0 : vector<1x16x16x1xf32> to vector<16x16x1xf32>
    %c0_3 = arith.constant 0 : index
    %c0_4 = arith.constant 0 : index
    %2 = vector.load %arg2[%c0_3, %c0_4] : memref<128x8xbf16, #tpu.memory_space<vmem>>, vector<128x8xbf16>
    %c0_5 = arith.constant 0 : index
    %c0_6 = arith.constant 0 : index
    %3 = vector.load %arg3[%c0_5, %c0_6] : memref<1x8xf32, #tpu.memory_space<vmem>>, vector<1x8xf32>
    %cst = arith.constant 0.000000e+00 : f32
    %4 = vector.broadcast %cst : f32 to vector<1x18x1xf32>
    %cst_7 = arith.constant 0.000000e+00 : f32
    %5 = vector.broadcast %cst_7 : f32 to vector<18x1x1xf32>
    %c0_8 = arith.constant 0 : index
    %c0_9 = arith.constant 0 : index
    %c0_10 = arith.constant 0 : index
    %6 = vector.load %arg11[%c0_8, %c0_9, %c0_10] : memref<18x18x1xf32, #tpu.memory_space<vmem>>, vector<1x18x1xf32>
    tpu.vector_store %arg11[%c0_8, %c0_9, %c0_10], %4 {strides = array<i32>} : memref<18x18x1xf32, #tpu.memory_space<vmem>>, vector<1x18x1xf32>,
    %c17 = arith.constant 17 : index
    %c0_11 = arith.constant 0 : index
    %c0_12 = arith.constant 0 : index
    %7 = vector.load %arg11[%c17, %c0_11, %c0_12] : memref<18x18x1xf32, #tpu.memory_space<vmem>>, vector<1x18x1xf32>
    tpu.vector_store %arg11[%c17, %c0_11, %c0_12], %4 {strides = array<i32>} : memref<18x18x1xf32, #tpu.memory_space<vmem>>, vector<1x18x1xf32>,
    %c0_13 = arith.constant 0 : index
    %c0_14 = arith.constant 0 : index
    %c0_15 = arith.constant 0 : index
    %8 = vector.load %arg11[%c0_13, %c0_14, %c0_15] : memref<18x18x1xf32, #tpu.memory_space<vmem>>, vector<18x1x1xf32>
    tpu.vector_store %arg11[%c0_13, %c0_14, %c0_15], %5 {strides = array<i32>} : memref<18x18x1xf32, #tpu.memory_space<vmem>>, vector<18x1x1xf32>,
    %c0_16 = arith.constant 0 : index
    %c17_17 = arith.constant 17 : index
    %c0_18 = arith.constant 0 : index
    %9 = vector.load %arg11[%c0_16, %c17_17, %c0_18] : memref<18x18x1xf32, #tpu.memory_space<vmem>>, vector<18x1x1xf32>
    tpu.vector_store %arg11[%c0_16, %c17_17, %c0_18], %5 {strides = array<i32>} : memref<18x18x1xf32, #tpu.memory_space<vmem>>, vector<18x1x1xf32>,
    %c1 = arith.constant 1 : index
    %c1_19 = arith.constant 1 : index
    %c0_20 = arith.constant 0 : index
    %10 = vector.load %arg11[%c1, %c1_19, %c0_20] : memref<18x18x1xf32, #tpu.memory_space<vmem>>, vector<16x16x1xf32>
    tpu.vector_store %arg11[%c1, %c1_19, %c0_20], %1 {strides = array<i32>} : memref<18x18x1xf32, #tpu.memory_space<vmem>>, vector<16x16x1xf32>,
    %c0_21 = arith.constant 0 : index
    %c0_22 = arith.constant 0 : index
    %c0_23 = arith.constant 0 : index
    %11 = vector.load %arg11[%c0_21, %c0_22, %c0_23] : memref<18x18x1xf32, #tpu.memory_space<vmem>>, vector<16x16x1xf32>
    %c0_24 = arith.constant 0 : index
    %c1_25 = arith.constant 1 : index
    %c0_26 = arith.constant 0 : index
    %12 = vector.load %arg11[%c0_24, %c1_25, %c0_26] : memref<18x18x1xf32, #tpu.memory_space<vmem>>, vector<16x16x1xf32>
    %c0_27 = arith.constant 0 : index
    %c2 = arith.constant 2 : index
    %c0_28 = arith.constant 0 : index
    %13 = vector.load %arg11[%c0_27, %c2, %c0_28] : memref<18x18x1xf32, #tpu.memory_space<vmem>>, vector<16x16x1xf32>
    %c1_29 = arith.constant 1 : index
    %c0_30 = arith.constant 0 : index
    %c0_31 = arith.constant 0 : index
    %14 = vector.load %arg11[%c1_29, %c0_30, %c0_31] : memref<18x18x1xf32, #tpu.memory_space<vmem>>, vector<16x16x1xf32>
    %c1_32 = arith.constant 1 : index
    %c1_33 = arith.constant 1 : index
    %c0_34 = arith.constant 0 : index
    %15 = vector.load %arg11[%c1_32, %c1_33, %c0_34] : memref<18x18x1xf32, #tpu.memory_space<vmem>>, vector<16x16x1xf32>
    %c1_35 = arith.constant 1 : index
    %c2_36 = arith.constant 2 : index
    %c0_37 = arith.constant 0 : index
    %16 = vector.load %arg11[%c1_35, %c2_36, %c0_37] : memref<18x18x1xf32, #tpu.memory_space<vmem>>, vector<16x16x1xf32>
    %c2_38 = arith.constant 2 : index
    %c0_39 = arith.constant 0 : index
    %c0_40 = arith.constant 0 : index
    %17 = vector.load %arg11[%c2_38, %c0_39, %c0_40] : memref<18x18x1xf32, #tpu.memory_space<vmem>>, vector<16x16x1xf32>
    %c2_41 = arith.constant 2 : index
    %c1_42 = arith.constant 1 : index
    %c0_43 = arith.constant 0 : index
    %18 = vector.load %arg11[%c2_41, %c1_42, %c0_43] : memref<18x18x1xf32, #tpu.memory_space<vmem>>, vector<16x16x1xf32>
    %c2_44 = arith.constant 2 : index
    %c2_45 = arith.constant 2 : index
    %c0_46 = arith.constant 0 : index
    %19 = vector.load %arg11[%c2_44, %c2_45, %c0_46] : memref<18x18x1xf32, #tpu.memory_space<vmem>>, vector<16x16x1xf32>
    %cst_47 = arith.constant 0.000000e+00 : f32
    %20 = vector.broadcast %cst_47 : f32 to vector<16x16x119xf32>
    %21 = tpu.concatenate %11, %12, %13, %14, %15, %16, %17, %18, %19, %20 in 2 : vector<16x16x1xf32>, vector<16x16x1xf32>, vector<16x16x1xf32>, vector<16x16x1xf32>, vector<16x16x1xf32>, vector<16x16x1xf32>, vector<16x16x1xf32>, vector<16x16x1xf32>, vector<16x16x1xf32>, vector<16x16x119xf32> -> vector<16x16x128xf32>
    %22 = vector.shape_cast %21 : vector<16x16x128xf32> to vector<256x128xf32>
    %23 = arith.truncf %22 : vector<256x128xf32> to vector<256x128xbf16>
    %cst_48 = arith.constant dense<0.000000e+00> : vector<256x8xf32>
    %24 = tpu.matmul %23, %2, %cst_48 {dimension_numbers = #tpu.dot_dimension_numbers<[1], [0], [0], [1], [0, 0, 1, 1], [], []>} : vector<256x128xbf16>, vector<128x8xbf16>, vector<256x8xf32> -> vector<256x8xf32>
    %25 = vector.broadcast %3 : vector<1x8xf32> to vector<256x8xf32>
    %26 = arith.addf %24, %25 : vector<256x8xf32>
    %cst_49 = arith.constant 0.000000e+00 : f32
    %27 = vector.broadcast %cst_49 : f32 to vector<256x8xf32>
    %28 = arith.maximumf %26, %27 : vector<256x8xf32>
    %29 = vector.shape_cast %28 : vector<256x8xf32> to vector<128x2x8xf32>
    %30 = vector.extract_strided_slice %29 {offsets = [0, 0, 0], sizes = [128, 1, 8], strides = [1, 1, 1]} : vector<128x2x8xf32> to vector<128x1x8xf32>
    %31 = vector.shape_cast %30 : vector<128x1x8xf32> to vector<128x8xf32>
    %32 = vector.extract_strided_slice %29 {offsets = [0, 1, 0], sizes = [128, 1, 8], strides = [1, 1, 1]} : vector<128x2x8xf32> to vector<128x1x8xf32>
    %33 = vector.shape_cast %32 : vector<128x1x8xf32> to vector<128x8xf32>
    %34 = arith.maximumf %31, %33 : vector<128x8xf32>
    %35 = vector.shape_cast %34 : vector<128x8xf32> to vector<8x2x8x8xf32>
    %36 = vector.extract_strided_slice %35 {offsets = [0, 0, 0, 0], sizes = [8, 1, 8, 8], strides = [1, 1, 1, 1]} : vector<8x2x8x8xf32> to vector<8x1x8x8xf32>
    %37 = vector.shape_cast %36 : vector<8x1x8x8xf32> to vector<8x8x8xf32>
    %38 = vector.extract_strided_slice %35 {offsets = [0, 1, 0, 0], sizes = [8, 1, 8, 8], strides = [1, 1, 1, 1]} : vector<8x2x8x8xf32> to vector<8x1x8x8xf32>
    %39 = vector.shape_cast %38 : vector<8x1x8x8xf32> to vector<8x8x8xf32>
    %40 = arith.maximumf %37, %39 : vector<8x8x8xf32>
    %c0_50 = arith.constant 0 : index
    %c0_51 = arith.constant 0 : index
    %41 = vector.load %arg4[%c0_50, %c0_51] : memref<128x8xbf16, #tpu.memory_space<vmem>>, vector<128x8xbf16>
    %c0_52 = arith.constant 0 : index
    %c0_53 = arith.constant 0 : index
    %42 = vector.load %arg5[%c0_52, %c0_53] : memref<1x8xf32, #tpu.memory_space<vmem>>, vector<1x8xf32>
    %cst_54 = arith.constant 0.000000e+00 : f32
    %43 = vector.broadcast %cst_54 : f32 to vector<1x10x8xf32>
    %cst_55 = arith.constant 0.000000e+00 : f32
    %44 = vector.broadcast %cst_55 : f32 to vector<10x1x8xf32>
    %c0_56 = arith.constant 0 : index
    %c0_57 = arith.constant 0 : index
    %c0_58 = arith.constant 0 : index
    %45 = vector.load %arg12[%c0_56, %c0_57, %c0_58] : memref<10x10x8xf32, #tpu.memory_space<vmem>>, vector<1x10x8xf32>
    tpu.vector_store %arg12[%c0_56, %c0_57, %c0_58], %43 {strides = array<i32>} : memref<10x10x8xf32, #tpu.memory_space<vmem>>, vector<1x10x8xf32>,
    %c9 = arith.constant 9 : index
    %c0_59 = arith.constant 0 : index
    %c0_60 = arith.constant 0 : index
    %46 = vector.load %arg12[%c9, %c0_59, %c0_60] : memref<10x10x8xf32, #tpu.memory_space<vmem>>, vector<1x10x8xf32>
    tpu.vector_store %arg12[%c9, %c0_59, %c0_60], %43 {strides = array<i32>} : memref<10x10x8xf32, #tpu.memory_space<vmem>>, vector<1x10x8xf32>,
    %c0_61 = arith.constant 0 : index
    %c0_62 = arith.constant 0 : index
    %c0_63 = arith.constant 0 : index
    %47 = vector.load %arg12[%c0_61, %c0_62, %c0_63] : memref<10x10x8xf32, #tpu.memory_space<vmem>>, vector<10x1x8xf32>
    tpu.vector_store %arg12[%c0_61, %c0_62, %c0_63], %44 {strides = array<i32>} : memref<10x10x8xf32, #tpu.memory_space<vmem>>, vector<10x1x8xf32>,
    %c0_64 = arith.constant 0 : index
    %c9_65 = arith.constant 9 : index
    %c0_66 = arith.constant 0 : index
    %48 = vector.load %arg12[%c0_64, %c9_65, %c0_66] : memref<10x10x8xf32, #tpu.memory_space<vmem>>, vector<10x1x8xf32>
    tpu.vector_store %arg12[%c0_64, %c9_65, %c0_66], %44 {strides = array<i32>} : memref<10x10x8xf32, #tpu.memory_space<vmem>>, vector<10x1x8xf32>,
    %c1_67 = arith.constant 1 : index
    %c1_68 = arith.constant 1 : index
    %c0_69 = arith.constant 0 : index
    %49 = vector.load %arg12[%c1_67, %c1_68, %c0_69] : memref<10x10x8xf32, #tpu.memory_space<vmem>>, vector<8x8x8xf32>
    tpu.vector_store %arg12[%c1_67, %c1_68, %c0_69], %40 {strides = array<i32>} : memref<10x10x8xf32, #tpu.memory_space<vmem>>, vector<8x8x8xf32>,
    %c0_70 = arith.constant 0 : index
    %c0_71 = arith.constant 0 : index
    %c0_72 = arith.constant 0 : index
    %50 = vector.load %arg12[%c0_70, %c0_71, %c0_72] : memref<10x10x8xf32, #tpu.memory_space<vmem>>, vector<8x8x8xf32>
    %c0_73 = arith.constant 0 : index
    %c1_74 = arith.constant 1 : index
    %c0_75 = arith.constant 0 : index
    %51 = vector.load %arg12[%c0_73, %c1_74, %c0_75] : memref<10x10x8xf32, #tpu.memory_space<vmem>>, vector<8x8x8xf32>
    %c0_76 = arith.constant 0 : index
    %c2_77 = arith.constant 2 : index
    %c0_78 = arith.constant 0 : index
    %52 = vector.load %arg12[%c0_76, %c2_77, %c0_78] : memref<10x10x8xf32, #tpu.memory_space<vmem>>, vector<8x8x8xf32>
    %c1_79 = arith.constant 1 : index
    %c0_80 = arith.constant 0 : index
    %c0_81 = arith.constant 0 : index
    %53 = vector.load %arg12[%c1_79, %c0_80, %c0_81] : memref<10x10x8xf32, #tpu.memory_space<vmem>>, vector<8x8x8xf32>
    %c1_82 = arith.constant 1 : index
    %c1_83 = arith.constant 1 : index
    %c0_84 = arith.constant 0 : index
    %54 = vector.load %arg12[%c1_82, %c1_83, %c0_84] : memref<10x10x8xf32, #tpu.memory_space<vmem>>, vector<8x8x8xf32>
    %c1_85 = arith.constant 1 : index
    %c2_86 = arith.constant 2 : index
    %c0_87 = arith.constant 0 : index
    %55 = vector.load %arg12[%c1_85, %c2_86, %c0_87] : memref<10x10x8xf32, #tpu.memory_space<vmem>>, vector<8x8x8xf32>
    %c2_88 = arith.constant 2 : index
    %c0_89 = arith.constant 0 : index
    %c0_90 = arith.constant 0 : index
    %56 = vector.load %arg12[%c2_88, %c0_89, %c0_90] : memref<10x10x8xf32, #tpu.memory_space<vmem>>, vector<8x8x8xf32>
    %c2_91 = arith.constant 2 : index
    %c1_92 = arith.constant 1 : index
    %c0_93 = arith.constant 0 : index
    %57 = vector.load %arg12[%c2_91, %c1_92, %c0_93] : memref<10x10x8xf32, #tpu.memory_space<vmem>>, vector<8x8x8xf32>
    %c2_94 = arith.constant 2 : index
    %c2_95 = arith.constant 2 : index
    %c0_96 = arith.constant 0 : index
    %58 = vector.load %arg12[%c2_94, %c2_95, %c0_96] : memref<10x10x8xf32, #tpu.memory_space<vmem>>, vector<8x8x8xf32>
    %cst_97 = arith.constant 0.000000e+00 : f32
    %59 = vector.broadcast %cst_97 : f32 to vector<8x8x56xf32>
    %60 = tpu.concatenate %50, %51, %52, %53, %54, %55, %56, %57, %58, %59 in 2 : vector<8x8x8xf32>, vector<8x8x8xf32>, vector<8x8x8xf32>, vector<8x8x8xf32>, vector<8x8x8xf32>, vector<8x8x8xf32>, vector<8x8x8xf32>, vector<8x8x8xf32>, vector<8x8x8xf32>, vector<8x8x56xf32> -> vector<8x8x128xf32>
    %61 = vector.shape_cast %60 : vector<8x8x128xf32> to vector<64x128xf32>
    %62 = arith.truncf %61 : vector<64x128xf32> to vector<64x128xbf16>
    %cst_98 = arith.constant dense<0.000000e+00> : vector<64x8xf32>
    %63 = tpu.matmul %62, %41, %cst_98 {dimension_numbers = #tpu.dot_dimension_numbers<[1], [0], [0], [1], [0, 0, 1, 1], [], []>} : vector<64x128xbf16>, vector<128x8xbf16>, vector<64x8xf32> -> vector<64x8xf32>
    %64 = vector.broadcast %42 : vector<1x8xf32> to vector<64x8xf32>
    %65 = arith.addf %63, %64 : vector<64x8xf32>
    %cst_99 = arith.constant 0.000000e+00 : f32
    %66 = vector.broadcast %cst_99 : f32 to vector<64x8xf32>
    %67 = arith.maximumf %65, %66 : vector<64x8xf32>
    %68 = vector.shape_cast %67 : vector<64x8xf32> to vector<32x2x8xf32>
    %69 = vector.extract_strided_slice %68 {offsets = [0, 0, 0], sizes = [32, 1, 8], strides = [1, 1, 1]} : vector<32x2x8xf32> to vector<32x1x8xf32>
    %70 = vector.shape_cast %69 : vector<32x1x8xf32> to vector<32x8xf32>
    %71 = vector.extract_strided_slice %68 {offsets = [0, 1, 0], sizes = [32, 1, 8], strides = [1, 1, 1]} : vector<32x2x8xf32> to vector<32x1x8xf32>
    %72 = vector.shape_cast %71 : vector<32x1x8xf32> to vector<32x8xf32>
    %73 = arith.maximumf %70, %72 : vector<32x8xf32>
    %74 = vector.shape_cast %73 : vector<32x8xf32> to vector<4x2x4x8xf32>
    %75 = vector.extract_strided_slice %74 {offsets = [0, 0, 0, 0], sizes = [4, 1, 4, 8], strides = [1, 1, 1, 1]} : vector<4x2x4x8xf32> to vector<4x1x4x8xf32>
    %76 = vector.shape_cast %75 : vector<4x1x4x8xf32> to vector<4x4x8xf32>
    %77 = vector.extract_strided_slice %74 {offsets = [0, 1, 0, 0], sizes = [4, 1, 4, 8], strides = [1, 1, 1, 1]} : vector<4x2x4x8xf32> to vector<4x1x4x8xf32>
    %78 = vector.shape_cast %77 : vector<4x1x4x8xf32> to vector<4x4x8xf32>
    %79 = arith.maximumf %76, %78 : vector<4x4x8xf32>
    %c0_100 = arith.constant 0 : index
    %c0_101 = arith.constant 0 : index
    %80 = vector.load %arg6[%c0_100, %c0_101] : memref<128x8xbf16, #tpu.memory_space<vmem>>, vector<128x8xbf16>
    %c0_102 = arith.constant 0 : index
    %c0_103 = arith.constant 0 : index
    %81 = vector.load %arg7[%c0_102, %c0_103] : memref<1x8xf32, #tpu.memory_space<vmem>>, vector<1x8xf32>
    %cst_104 = arith.constant 0.000000e+00 : f32
    %82 = vector.broadcast %cst_104 : f32 to vector<1x6x8xf32>
    %cst_105 = arith.constant 0.000000e+00 : f32
    %83 = vector.broadcast %cst_105 : f32 to vector<6x1x8xf32>
    %c0_106 = arith.constant 0 : index
    %c0_107 = arith.constant 0 : index
    %c0_108 = arith.constant 0 : index
    %84 = vector.load %arg13[%c0_106, %c0_107, %c0_108] : memref<6x6x8xf32, #tpu.memory_space<vmem>>, vector<1x6x8xf32>
    tpu.vector_store %arg13[%c0_106, %c0_107, %c0_108], %82 {strides = array<i32>} : memref<6x6x8xf32, #tpu.memory_space<vmem>>, vector<1x6x8xf32>,
    %c5 = arith.constant 5 : index
    %c0_109 = arith.constant 0 : index
    %c0_110 = arith.constant 0 : index
    %85 = vector.load %arg13[%c5, %c0_109, %c0_110] : memref<6x6x8xf32, #tpu.memory_space<vmem>>, vector<1x6x8xf32>
    tpu.vector_store %arg13[%c5, %c0_109, %c0_110], %82 {strides = array<i32>} : memref<6x6x8xf32, #tpu.memory_space<vmem>>, vector<1x6x8xf32>,
    %c0_111 = arith.constant 0 : index
    %c0_112 = arith.constant 0 : index
    %c0_113 = arith.constant 0 : index
    %86 = vector.load %arg13[%c0_111, %c0_112, %c0_113] : memref<6x6x8xf32, #tpu.memory_space<vmem>>, vector<6x1x8xf32>
    tpu.vector_store %arg13[%c0_111, %c0_112, %c0_113], %83 {strides = array<i32>} : memref<6x6x8xf32, #tpu.memory_space<vmem>>, vector<6x1x8xf32>,
    %c0_114 = arith.constant 0 : index
    %c5_115 = arith.constant 5 : index
    %c0_116 = arith.constant 0 : index
    %87 = vector.load %arg13[%c0_114, %c5_115, %c0_116] : memref<6x6x8xf32, #tpu.memory_space<vmem>>, vector<6x1x8xf32>
    tpu.vector_store %arg13[%c0_114, %c5_115, %c0_116], %83 {strides = array<i32>} : memref<6x6x8xf32, #tpu.memory_space<vmem>>, vector<6x1x8xf32>,
    %c1_117 = arith.constant 1 : index
    %c1_118 = arith.constant 1 : index
    %c0_119 = arith.constant 0 : index
    %88 = vector.load %arg13[%c1_117, %c1_118, %c0_119] : memref<6x6x8xf32, #tpu.memory_space<vmem>>, vector<4x4x8xf32>
    tpu.vector_store %arg13[%c1_117, %c1_118, %c0_119], %79 {strides = array<i32>} : memref<6x6x8xf32, #tpu.memory_space<vmem>>, vector<4x4x8xf32>,
    %c0_120 = arith.constant 0 : index
    %c0_121 = arith.constant 0 : index
    %c0_122 = arith.constant 0 : index
    %89 = vector.load %arg13[%c0_120, %c0_121, %c0_122] : memref<6x6x8xf32, #tpu.memory_space<vmem>>, vector<4x4x8xf32>
    %c0_123 = arith.constant 0 : index
    %c1_124 = arith.constant 1 : index
    %c0_125 = arith.constant 0 : index
    %90 = vector.load %arg13[%c0_123, %c1_124, %c0_125] : memref<6x6x8xf32, #tpu.memory_space<vmem>>, vector<4x4x8xf32>
    %c0_126 = arith.constant 0 : index
    %c2_127 = arith.constant 2 : index
    %c0_128 = arith.constant 0 : index
    %91 = vector.load %arg13[%c0_126, %c2_127, %c0_128] : memref<6x6x8xf32, #tpu.memory_space<vmem>>, vector<4x4x8xf32>
    %c1_129 = arith.constant 1 : index
    %c0_130 = arith.constant 0 : index
    %c0_131 = arith.constant 0 : index
    %92 = vector.load %arg13[%c1_129, %c0_130, %c0_131] : memref<6x6x8xf32, #tpu.memory_space<vmem>>, vector<4x4x8xf32>
    %c1_132 = arith.constant 1 : index
    %c1_133 = arith.constant 1 : index
    %c0_134 = arith.constant 0 : index
    %93 = vector.load %arg13[%c1_132, %c1_133, %c0_134] : memref<6x6x8xf32, #tpu.memory_space<vmem>>, vector<4x4x8xf32>
    %c1_135 = arith.constant 1 : index
    %c2_136 = arith.constant 2 : index
    %c0_137 = arith.constant 0 : index
    %94 = vector.load %arg13[%c1_135, %c2_136, %c0_137] : memref<6x6x8xf32, #tpu.memory_space<vmem>>, vector<4x4x8xf32>
    %c2_138 = arith.constant 2 : index
    %c0_139 = arith.constant 0 : index
    %c0_140 = arith.constant 0 : index
    %95 = vector.load %arg13[%c2_138, %c0_139, %c0_140] : memref<6x6x8xf32, #tpu.memory_space<vmem>>, vector<4x4x8xf32>
    %c2_141 = arith.constant 2 : index
    %c1_142 = arith.constant 1 : index
    %c0_143 = arith.constant 0 : index
    %96 = vector.load %arg13[%c2_141, %c1_142, %c0_143] : memref<6x6x8xf32, #tpu.memory_space<vmem>>, vector<4x4x8xf32>
    %c2_144 = arith.constant 2 : index
    %c2_145 = arith.constant 2 : index
    %c0_146 = arith.constant 0 : index
    %97 = vector.load %arg13[%c2_144, %c2_145, %c0_146] : memref<6x6x8xf32, #tpu.memory_space<vmem>>, vector<4x4x8xf32>
    %cst_147 = arith.constant 0.000000e+00 : f32
    %98 = vector.broadcast %cst_147 : f32 to vector<4x4x56xf32>
    %99 = tpu.concatenate %89, %90, %91, %92, %93, %94, %95, %96, %97, %98 in 2 : vector<4x4x8xf32>, vector<4x4x8xf32>, vector<4x4x8xf32>, vector<4x4x8xf32>, vector<4x4x8xf32>, vector<4x4x8xf32>, vector<4x4x8xf32>, vector<4x4x8xf32>, vector<4x4x8xf32>, vector<4x4x56xf32> -> vector<4x4x128xf32>
    %100 = vector.shape_cast %99 : vector<4x4x128xf32> to vector<16x128xf32>
    %101 = arith.truncf %100 : vector<16x128xf32> to vector<16x128xbf16>
    %cst_148 = arith.constant dense<0.000000e+00> : vector<16x8xf32>
    %102 = tpu.matmul %101, %80, %cst_148 {dimension_numbers = #tpu.dot_dimension_numbers<[1], [0], [0], [1], [0, 0, 1, 1], [], []>} : vector<16x128xbf16>, vector<128x8xbf16>, vector<16x8xf32> -> vector<16x8xf32>
    %103 = vector.broadcast %81 : vector<1x8xf32> to vector<16x8xf32>
    %104 = arith.addf %102, %103 : vector<16x8xf32>
    %cst_149 = arith.constant 0.000000e+00 : f32
    %105 = vector.broadcast %cst_149 : f32 to vector<16x8xf32>
    %106 = arith.maximumf %104, %105 : vector<16x8xf32>
    %107 = vector.shape_cast %106 : vector<16x8xf32> to vector<8x2x8xf32>
    %108 = vector.extract_strided_slice %107 {offsets = [0, 0, 0], sizes = [8, 1, 8], strides = [1, 1, 1]} : vector<8x2x8xf32> to vector<8x1x8xf32>
    %109 = vector.shape_cast %108 : vector<8x1x8xf32> to vector<8x8xf32>
    %110 = vector.extract_strided_slice %107 {offsets = [0, 1, 0], sizes = [8, 1, 8], strides = [1, 1, 1]} : vector<8x2x8xf32> to vector<8x1x8xf32>
    %111 = vector.shape_cast %110 : vector<8x1x8xf32> to vector<8x8xf32>
    %112 = arith.maximumf %109, %111 : vector<8x8xf32>
    %113 = vector.shape_cast %112 : vector<8x8xf32> to vector<2x2x2x8xf32>
    %114 = vector.extract_strided_slice %113 {offsets = [0, 0, 0, 0], sizes = [2, 1, 2, 8], strides = [1, 1, 1, 1]} : vector<2x2x2x8xf32> to vector<2x1x2x8xf32>
    %115 = vector.shape_cast %114 : vector<2x1x2x8xf32> to vector<2x2x8xf32>
    %116 = vector.extract_strided_slice %113 {offsets = [0, 1, 0, 0], sizes = [2, 1, 2, 8], strides = [1, 1, 1, 1]} : vector<2x2x2x8xf32> to vector<2x1x2x8xf32>
    %117 = vector.shape_cast %116 : vector<2x1x2x8xf32> to vector<2x2x8xf32>
    %118 = arith.maximumf %115, %117 : vector<2x2x8xf32>
    %c0_150 = arith.constant 0 : index
    %c0_151 = arith.constant 0 : index
    %119 = vector.load %arg8[%c0_150, %c0_151] : memref<128x8xbf16, #tpu.memory_space<vmem>>, vector<128x8xbf16>
    %c0_152 = arith.constant 0 : index
    %c0_153 = arith.constant 0 : index
    %120 = vector.load %arg9[%c0_152, %c0_153] : memref<1x8xf32, #tpu.memory_space<vmem>>, vector<1x8xf32>
    %cst_154 = arith.constant 0.000000e+00 : f32
    %121 = vector.broadcast %cst_154 : f32 to vector<1x4x8xf32>
    %cst_155 = arith.constant 0.000000e+00 : f32
    %122 = vector.broadcast %cst_155 : f32 to vector<4x1x8xf32>
    %c0_156 = arith.constant 0 : index
    %c0_157 = arith.constant 0 : index
    %c0_158 = arith.constant 0 : index
    %123 = vector.load %arg14[%c0_156, %c0_157, %c0_158] : memref<4x4x8xf32, #tpu.memory_space<vmem>>, vector<1x4x8xf32>
    tpu.vector_store %arg14[%c0_156, %c0_157, %c0_158], %121 {strides = array<i32>} : memref<4x4x8xf32, #tpu.memory_space<vmem>>, vector<1x4x8xf32>,
    %c3 = arith.constant 3 : index
    %c0_159 = arith.constant 0 : index
    %c0_160 = arith.constant 0 : index
    %124 = vector.load %arg14[%c3, %c0_159, %c0_160] : memref<4x4x8xf32, #tpu.memory_space<vmem>>, vector<1x4x8xf32>
    tpu.vector_store %arg14[%c3, %c0_159, %c0_160], %121 {strides = array<i32>} : memref<4x4x8xf32, #tpu.memory_space<vmem>>, vector<1x4x8xf32>,
    %c0_161 = arith.constant 0 : index
    %c0_162 = arith.constant 0 : index
    %c0_163 = arith.constant 0 : index
    %125 = vector.load %arg14[%c0_161, %c0_162, %c0_163] : memref<4x4x8xf32, #tpu.memory_space<vmem>>, vector<4x1x8xf32>
    tpu.vector_store %arg14[%c0_161, %c0_162, %c0_163], %122 {strides = array<i32>} : memref<4x4x8xf32, #tpu.memory_space<vmem>>, vector<4x1x8xf32>,
    %c0_164 = arith.constant 0 : index
    %c3_165 = arith.constant 3 : index
    %c0_166 = arith.constant 0 : index
    %126 = vector.load %arg14[%c0_164, %c3_165, %c0_166] : memref<4x4x8xf32, #tpu.memory_space<vmem>>, vector<4x1x8xf32>
    tpu.vector_store %arg14[%c0_164, %c3_165, %c0_166], %122 {strides = array<i32>} : memref<4x4x8xf32, #tpu.memory_space<vmem>>, vector<4x1x8xf32>,
    %c1_167 = arith.constant 1 : index
    %c1_168 = arith.constant 1 : index
    %c0_169 = arith.constant 0 : index
    %127 = vector.load %arg14[%c1_167, %c1_168, %c0_169] : memref<4x4x8xf32, #tpu.memory_space<vmem>>, vector<2x2x8xf32>
    tpu.vector_store %arg14[%c1_167, %c1_168, %c0_169], %118 {strides = array<i32>} : memref<4x4x8xf32, #tpu.memory_space<vmem>>, vector<2x2x8xf32>,
    %c0_170 = arith.constant 0 : index
    %c0_171 = arith.constant 0 : index
    %c0_172 = arith.constant 0 : index
    %128 = vector.load %arg14[%c0_170, %c0_171, %c0_172] : memref<4x4x8xf32, #tpu.memory_space<vmem>>, vector<2x2x8xf32>
    %c0_173 = arith.constant 0 : index
    %c1_174 = arith.constant 1 : index
    %c0_175 = arith.constant 0 : index
    %129 = vector.load %arg14[%c0_173, %c1_174, %c0_175] : memref<4x4x8xf32, #tpu.memory_space<vmem>>, vector<2x2x8xf32>
    %c0_176 = arith.constant 0 : index
    %c2_177 = arith.constant 2 : index
    %c0_178 = arith.constant 0 : index
    %130 = vector.load %arg14[%c0_176, %c2_177, %c0_178] : memref<4x4x8xf32, #tpu.memory_space<vmem>>, vector<2x2x8xf32>
    %c1_179 = arith.constant 1 : index
    %c0_180 = arith.constant 0 : index
    %c0_181 = arith.constant 0 : index
    %131 = vector.load %arg14[%c1_179, %c0_180, %c0_181] : memref<4x4x8xf32, #tpu.memory_space<vmem>>, vector<2x2x8xf32>
    %c1_182 = arith.constant 1 : index
    %c1_183 = arith.constant 1 : index
    %c0_184 = arith.constant 0 : index
    %132 = vector.load %arg14[%c1_182, %c1_183, %c0_184] : memref<4x4x8xf32, #tpu.memory_space<vmem>>, vector<2x2x8xf32>
    %c1_185 = arith.constant 1 : index
    %c2_186 = arith.constant 2 : index
    %c0_187 = arith.constant 0 : index
    %133 = vector.load %arg14[%c1_185, %c2_186, %c0_187] : memref<4x4x8xf32, #tpu.memory_space<vmem>>, vector<2x2x8xf32>
    %c2_188 = arith.constant 2 : index
    %c0_189 = arith.constant 0 : index
    %c0_190 = arith.constant 0 : index
    %134 = vector.load %arg14[%c2_188, %c0_189, %c0_190] : memref<4x4x8xf32, #tpu.memory_space<vmem>>, vector<2x2x8xf32>
    %c2_191 = arith.constant 2 : index
    %c1_192 = arith.constant 1 : index
    %c0_193 = arith.constant 0 : index
    %135 = vector.load %arg14[%c2_191, %c1_192, %c0_193] : memref<4x4x8xf32, #tpu.memory_space<vmem>>, vector<2x2x8xf32>
    %c2_194 = arith.constant 2 : index
    %c2_195 = arith.constant 2 : index
    %c0_196 = arith.constant 0 : index
    %136 = vector.load %arg14[%c2_194, %c2_195, %c0_196] : memref<4x4x8xf32, #tpu.memory_space<vmem>>, vector<2x2x8xf32>
    %cst_197 = arith.constant 0.000000e+00 : f32
    %137 = vector.broadcast %cst_197 : f32 to vector<2x2x56xf32>
    %138 = tpu.concatenate %128, %129, %130, %131, %132, %133, %134, %135, %136, %137 in 2 : vector<2x2x8xf32>, vector<2x2x8xf32>, vector<2x2x8xf32>, vector<2x2x8xf32>, vector<2x2x8xf32>, vector<2x2x8xf32>, vector<2x2x8xf32>, vector<2x2x8xf32>, vector<2x2x8xf32>, vector<2x2x56xf32> -> vector<2x2x128xf32>
    %139 = vector.shape_cast %138 : vector<2x2x128xf32> to vector<4x128xf32>
    %140 = arith.truncf %139 : vector<4x128xf32> to vector<4x128xbf16>
    %cst_198 = arith.constant dense<0.000000e+00> : vector<4x8xf32>
    %141 = tpu.matmul %140, %119, %cst_198 {dimension_numbers = #tpu.dot_dimension_numbers<[1], [0], [0], [1], [0, 0, 1, 1], [], []>} : vector<4x128xbf16>, vector<128x8xbf16>, vector<4x8xf32> -> vector<4x8xf32>
    %142 = vector.broadcast %120 : vector<1x8xf32> to vector<4x8xf32>
    %143 = arith.addf %141, %142 : vector<4x8xf32>
    %cst_199 = arith.constant 0.000000e+00 : f32
    %144 = vector.broadcast %cst_199 : f32 to vector<4x8xf32>
    %145 = arith.maximumf %143, %144 : vector<4x8xf32>
    %146 = vector.shape_cast %145 : vector<4x8xf32> to vector<2x2x8xf32>
    %147 = tpu.transpose %146, [0, 2, 1] : vector<2x2x8xf32> -> vector<2x8x2xf32>
    %148 = vector.shape_cast %147 : vector<2x8x2xf32> to vector<16x2xf32>
    %c0_200 = arith.constant 0 : index
    %c0_201 = arith.constant 0 : index
    %c0_202 = arith.constant 0 : index
    %149 = vector.load %arg10[%c0_200, %c0_201, %c0_202] : memref<1x16x2xf32, #tpu.memory_space<vmem>>, vector<1x16x2xf32>
    %150 = vector.shape_cast %149 : vector<1x16x2xf32> to vector<16x2xf32>
    %151 = vector.shape_cast %148 : vector<16x2xf32> to vector<1x16x2xf32>
    tpu.vector_store %arg10[%c0_200, %c0_201, %c0_202], %151 {strides = array<i32>} : memref<1x16x2xf32, #tpu.memory_space<vmem>>, vector<1x16x2xf32>,
    return
  }
  func.func @transform_0(%arg0: i32) -> (i32, i32, i32, i32) {
    %c0_i32 = arith.constant 0 : i32
    %c0_i32_0 = arith.constant 0 : i32
    %c0_i32_1 = arith.constant 0 : i32
    %c0_i32_2 = arith.constant 0 : i32
    return %arg0, %c0_i32, %c0_i32_0, %c0_i32_1 : i32, i32, i32, i32
  }
  func.func @transform_1(%arg0: i32) -> (i32, i32) {
    %c0_i32 = arith.constant 0 : i32
    %c0_i32_0 = arith.constant 0 : i32
    %c0_i32_1 = arith.constant 0 : i32
    return %c0_i32, %c0_i32_0 : i32, i32
  }
  func.func @transform_2(%arg0: i32) -> (i32, i32) {
    %c0_i32 = arith.constant 0 : i32
    %c0_i32_0 = arith.constant 0 : i32
    %c0_i32_1 = arith.constant 0 : i32
    return %c0_i32, %c0_i32_0 : i32, i32
  }
  func.func @transform_3(%arg0: i32) -> (i32, i32) {
    %c0_i32 = arith.constant 0 : i32
    %c0_i32_0 = arith.constant 0 : i32
    %c0_i32_1 = arith.constant 0 : i32
    return %c0_i32, %c0_i32_0 : i32, i32
  }
  func.func @transform_4(%arg0: i32) -> (i32, i32) {
    %c0_i32 = arith.constant 0 : i32
    %c0_i32_0 = arith.constant 0 : i32
    %c0_i32_1 = arith.constant 0 : i32
    return %c0_i32, %c0_i32_0 : i32, i32
  }
  func.func @transform_5(%arg0: i32) -> (i32, i32) {
    %c0_i32 = arith.constant 0 : i32
    %c0_i32_0 = arith.constant 0 : i32
    %c0_i32_1 = arith.constant 0 : i32
    return %c0_i32, %c0_i32_0 : i32, i32
  }
  func.func @transform_6(%arg0: i32) -> (i32, i32) {
    %c0_i32 = arith.constant 0 : i32
    %c0_i32_0 = arith.constant 0 : i32
    %c0_i32_1 = arith.constant 0 : i32
    return %c0_i32, %c0_i32_0 : i32, i32
  }
  func.func @transform_7(%arg0: i32) -> (i32, i32) {
    %c0_i32 = arith.constant 0 : i32
    %c0_i32_0 = arith.constant 0 : i32
    %c0_i32_1 = arith.constant 0 : i32
    return %c0_i32, %c0_i32_0 : i32, i32
  }
  func.func @transform_8(%arg0: i32) -> (i32, i32) {
    %c0_i32 = arith.constant 0 : i32
    %c0_i32_0 = arith.constant 0 : i32
    %c0_i32_1 = arith.constant 0 : i32
    return %c0_i32, %c0_i32_0 : i32, i32
  }
  func.func @transform_9(%arg0: i32) -> (i32, i32, i32) {
    %c0_i32 = arith.constant 0 : i32
    %c0_i32_0 = arith.constant 0 : i32
    %c0_i32_1 = arith.constant 0 : i32
    return %arg0, %c0_i32, %c0_i32_0 : i32, i32, i32
  }
}

module attributes {stable_mosaic.version = 11 : i64} {
  func.func @kernel(%arg0: i32, %arg1: memref<1x4x8xf32, #tpu.memory_space<vmem>>, %arg2: memref<8x64xbf16, #tpu.memory_space<vmem>>, %arg3: memref<16x64xbf16, #tpu.memory_space<vmem>>, %arg4: memref<1x64xf32, #tpu.memory_space<vmem>>, %arg5: memref<8x64xbf16, #tpu.memory_space<vmem>>, %arg6: memref<16x64xbf16, #tpu.memory_space<vmem>>, %arg7: memref<1x64xf32, #tpu.memory_space<vmem>>, %arg8: memref<32x64xbf16, #tpu.memory_space<vmem>>, %arg9: memref<16x64xbf16, #tpu.memory_space<vmem>>, %arg10: memref<1x64xf32, #tpu.memory_space<vmem>>, %arg11: memref<32x64xbf16, #tpu.memory_space<vmem>>, %arg12: memref<16x64xbf16, #tpu.memory_space<vmem>>, %arg13: memref<1x64xf32, #tpu.memory_space<vmem>>, %arg14: memref<32x48xbf16, #tpu.memory_space<vmem>>, %arg15: memref<1x48xf32, #tpu.memory_space<vmem>>, %arg16: memref<32x128xbf16, #tpu.memory_space<vmem>>, %arg17: memref<1x128xf32, #tpu.memory_space<vmem>>, %arg18: memref<1x4x128xf32, #tpu.memory_space<vmem>>) attributes {dimension_semantics = [#tpu.dimension_semantics<parallel>], iteration_bounds = array<i64: 2>, scalar_prefetch = 0 : i64, scratch_operands = 0 : i64, tpu.core_type = #tpu.core_type<tc>, window_params = [{transform_indices = @transform_0, window_bounds = array<i64: 1, 4, 8>}, {pipeline_mode = #tpu.pipeline_mode<synchronous>, transform_indices = @transform_1, window_bounds = array<i64: 8, 64>}, {pipeline_mode = #tpu.pipeline_mode<synchronous>, transform_indices = @transform_2, window_bounds = array<i64: 16, 64>}, {pipeline_mode = #tpu.pipeline_mode<synchronous>, transform_indices = @transform_3, window_bounds = array<i64: 1, 64>}, {pipeline_mode = #tpu.pipeline_mode<synchronous>, transform_indices = @transform_4, window_bounds = array<i64: 8, 64>}, {pipeline_mode = #tpu.pipeline_mode<synchronous>, transform_indices = @transform_5, window_bounds = array<i64: 16, 64>}, {pipeline_mode = #tpu.pipeline_mode<synchronous>, transform_indices = @transform_6, window_bounds = array<i64: 1, 64>}, {pipeline_mode = #tpu.pipeline_mode<synchronous>, transform_indices = @transform_7, window_bounds = array<i64: 32, 64>}, {pipeline_mode = #tpu.pipeline_mode<synchronous>, transform_indices = @transform_8, window_bounds = array<i64: 16, 64>}, {pipeline_mode = #tpu.pipeline_mode<synchronous>, transform_indices = @transform_9, window_bounds = array<i64: 1, 64>}, {pipeline_mode = #tpu.pipeline_mode<synchronous>, transform_indices = @transform_10, window_bounds = array<i64: 32, 64>}, {pipeline_mode = #tpu.pipeline_mode<synchronous>, transform_indices = @transform_11, window_bounds = array<i64: 16, 64>}, {pipeline_mode = #tpu.pipeline_mode<synchronous>, transform_indices = @transform_12, window_bounds = array<i64: 1, 64>}, {pipeline_mode = #tpu.pipeline_mode<synchronous>, transform_indices = @transform_13, window_bounds = array<i64: 32, 48>}, {pipeline_mode = #tpu.pipeline_mode<synchronous>, transform_indices = @transform_14, window_bounds = array<i64: 1, 48>}, {pipeline_mode = #tpu.pipeline_mode<synchronous>, transform_indices = @transform_15, window_bounds = array<i64: 32, 128>}, {pipeline_mode = #tpu.pipeline_mode<synchronous>, transform_indices = @transform_16, window_bounds = array<i64: 1, 128>}, {transform_indices = @transform_17, window_bounds = array<i64: 1, 4, 128>}]} {
    %c0 = arith.constant 0 : index
    %c0_0 = arith.constant 0 : index
    %c0_1 = arith.constant 0 : index
    %0 = vector.load %arg1[%c0, %c0_0, %c0_1] : memref<1x4x8xf32, #tpu.memory_space<vmem>>, vector<1x4x8xf32>
    %c0_2 = arith.constant 0 : index
    %c0_3 = arith.constant 0 : index
    %1 = vector.load %arg2[%c0_2, %c0_3] : memref<8x64xbf16, #tpu.memory_space<vmem>>, vector<8x64xbf16>
    %c0_4 = arith.constant 0 : index
    %c0_5 = arith.constant 0 : index
    %2 = vector.load %arg3[%c0_4, %c0_5] : memref<16x64xbf16, #tpu.memory_space<vmem>>, vector<16x64xbf16>
    %c0_6 = arith.constant 0 : index
    %c0_7 = arith.constant 0 : index
    %3 = vector.load %arg4[%c0_6, %c0_7] : memref<1x64xf32, #tpu.memory_space<vmem>>, vector<1x64xf32>
    %4 = vector.shape_cast %0 : vector<1x4x8xf32> to vector<4x8xf32>
    %5 = arith.truncf %4 : vector<4x8xf32> to vector<4x8xbf16>
    %cst = arith.constant dense<0.000000e+00> : vector<4x64xf32>
    %6 = tpu.matmul %5, %1, %cst {dimension_numbers = #tpu.dot_dimension_numbers<[1], [0], [0], [1], [0, 0, 1, 1], [], []>} : vector<4x8xbf16>, vector<8x64xbf16>, vector<4x64xf32> -> vector<4x64xf32>
    %7 = vector.broadcast %3 : vector<1x64xf32> to vector<4x64xf32>
    %8 = arith.addf %6, %7 : vector<4x64xf32>
    %9 = vector.shape_cast %8 : vector<4x64xf32> to vector<1x4x64xf32>
    %cst_8 = arith.constant 0.000000e+00 : f32
    %10 = vector.broadcast %cst_8 : f32 to vector<1x16xf32>
    %cst_9 = arith.constant 0.000000e+00 : f32
    %11 = vector.broadcast %cst_9 : f32 to vector<1x16xf32>
    %12 = vector.extract_strided_slice %9 {offsets = [0, 0, 0], sizes = [1, 1, 64], strides = [1, 1, 1]} : vector<1x4x64xf32> to vector<1x1x64xf32>
    %13 = vector.shape_cast %12 : vector<1x1x64xf32> to vector<1x64xf32>
    %14 = arith.truncf %10 : vector<1x16xf32> to vector<1x16xbf16>
    %cst_10 = arith.constant dense<0.000000e+00> : vector<1x64xf32>
    %15 = tpu.matmul %14, %2, %cst_10 {dimension_numbers = #tpu.dot_dimension_numbers<[1], [0], [0], [1], [0, 0, 1, 1], [], []>} : vector<1x16xbf16>, vector<16x64xbf16>, vector<1x64xf32> -> vector<1x64xf32>
    %16 = arith.addf %13, %15 : vector<1x64xf32>
    %17 = vector.extract_strided_slice %16 {offsets = [0, 0], sizes = [1, 16], strides = [1, 1]} : vector<1x64xf32> to vector<1x16xf32>
    %18 = arith.negf %17 : vector<1x16xf32>
    %19 = math.exp %18 : vector<1x16xf32>
    %cst_11 = arith.constant 1.000000e+00 : f32
    %20 = vector.broadcast %cst_11 : f32 to vector<1x16xf32>
    %21 = arith.addf %20, %19 : vector<1x16xf32>
    %22 = arith.divf %20, %21 : vector<1x16xf32>
    %23 = vector.extract_strided_slice %16 {offsets = [0, 16], sizes = [1, 16], strides = [1, 1]} : vector<1x64xf32> to vector<1x16xf32>
    %24 = arith.negf %23 : vector<1x16xf32>
    %25 = math.exp %24 : vector<1x16xf32>
    %cst_12 = arith.constant 1.000000e+00 : f32
    %26 = vector.broadcast %cst_12 : f32 to vector<1x16xf32>
    %27 = arith.addf %26, %25 : vector<1x16xf32>
    %28 = arith.divf %26, %27 : vector<1x16xf32>
    %29 = vector.extract_strided_slice %16 {offsets = [0, 32], sizes = [1, 16], strides = [1, 1]} : vector<1x64xf32> to vector<1x16xf32>
    %30 = math.tanh %29 : vector<1x16xf32>
    %31 = vector.extract_strided_slice %16 {offsets = [0, 48], sizes = [1, 16], strides = [1, 1]} : vector<1x64xf32> to vector<1x16xf32>
    %32 = arith.negf %31 : vector<1x16xf32>
    %33 = math.exp %32 : vector<1x16xf32>
    %cst_13 = arith.constant 1.000000e+00 : f32
    %34 = vector.broadcast %cst_13 : f32 to vector<1x16xf32>
    %35 = arith.addf %34, %33 : vector<1x16xf32>
    %36 = arith.divf %34, %35 : vector<1x16xf32>
    %37 = arith.mulf %28, %11 : vector<1x16xf32>
    %38 = arith.mulf %22, %30 : vector<1x16xf32>
    %39 = arith.addf %37, %38 : vector<1x16xf32>
    %40 = math.tanh %39 : vector<1x16xf32>
    %41 = arith.mulf %36, %40 : vector<1x16xf32>
    %42 = vector.extract_strided_slice %9 {offsets = [0, 1, 0], sizes = [1, 1, 64], strides = [1, 1, 1]} : vector<1x4x64xf32> to vector<1x1x64xf32>
    %43 = vector.shape_cast %42 : vector<1x1x64xf32> to vector<1x64xf32>
    %44 = arith.truncf %41 : vector<1x16xf32> to vector<1x16xbf16>
    %cst_14 = arith.constant dense<0.000000e+00> : vector<1x64xf32>
    %45 = tpu.matmul %44, %2, %cst_14 {dimension_numbers = #tpu.dot_dimension_numbers<[1], [0], [0], [1], [0, 0, 1, 1], [], []>} : vector<1x16xbf16>, vector<16x64xbf16>, vector<1x64xf32> -> vector<1x64xf32>
    %46 = arith.addf %43, %45 : vector<1x64xf32>
    %47 = vector.extract_strided_slice %46 {offsets = [0, 0], sizes = [1, 16], strides = [1, 1]} : vector<1x64xf32> to vector<1x16xf32>
    %48 = arith.negf %47 : vector<1x16xf32>
    %49 = math.exp %48 : vector<1x16xf32>
    %cst_15 = arith.constant 1.000000e+00 : f32
    %50 = vector.broadcast %cst_15 : f32 to vector<1x16xf32>
    %51 = arith.addf %50, %49 : vector<1x16xf32>
    %52 = arith.divf %50, %51 : vector<1x16xf32>
    %53 = vector.extract_strided_slice %46 {offsets = [0, 16], sizes = [1, 16], strides = [1, 1]} : vector<1x64xf32> to vector<1x16xf32>
    %54 = arith.negf %53 : vector<1x16xf32>
    %55 = math.exp %54 : vector<1x16xf32>
    %cst_16 = arith.constant 1.000000e+00 : f32
    %56 = vector.broadcast %cst_16 : f32 to vector<1x16xf32>
    %57 = arith.addf %56, %55 : vector<1x16xf32>
    %58 = arith.divf %56, %57 : vector<1x16xf32>
    %59 = vector.extract_strided_slice %46 {offsets = [0, 32], sizes = [1, 16], strides = [1, 1]} : vector<1x64xf32> to vector<1x16xf32>
    %60 = math.tanh %59 : vector<1x16xf32>
    %61 = vector.extract_strided_slice %46 {offsets = [0, 48], sizes = [1, 16], strides = [1, 1]} : vector<1x64xf32> to vector<1x16xf32>
    %62 = arith.negf %61 : vector<1x16xf32>
    %63 = math.exp %62 : vector<1x16xf32>
    %cst_17 = arith.constant 1.000000e+00 : f32
    %64 = vector.broadcast %cst_17 : f32 to vector<1x16xf32>
    %65 = arith.addf %64, %63 : vector<1x16xf32>
    %66 = arith.divf %64, %65 : vector<1x16xf32>
    %67 = arith.mulf %58, %39 : vector<1x16xf32>
    %68 = arith.mulf %52, %60 : vector<1x16xf32>
    %69 = arith.addf %67, %68 : vector<1x16xf32>
    %70 = math.tanh %69 : vector<1x16xf32>
    %71 = arith.mulf %66, %70 : vector<1x16xf32>
    %72 = vector.extract_strided_slice %9 {offsets = [0, 2, 0], sizes = [1, 1, 64], strides = [1, 1, 1]} : vector<1x4x64xf32> to vector<1x1x64xf32>
    %73 = vector.shape_cast %72 : vector<1x1x64xf32> to vector<1x64xf32>
    %74 = arith.truncf %71 : vector<1x16xf32> to vector<1x16xbf16>
    %cst_18 = arith.constant dense<0.000000e+00> : vector<1x64xf32>
    %75 = tpu.matmul %74, %2, %cst_18 {dimension_numbers = #tpu.dot_dimension_numbers<[1], [0], [0], [1], [0, 0, 1, 1], [], []>} : vector<1x16xbf16>, vector<16x64xbf16>, vector<1x64xf32> -> vector<1x64xf32>
    %76 = arith.addf %73, %75 : vector<1x64xf32>
    %77 = vector.extract_strided_slice %76 {offsets = [0, 0], sizes = [1, 16], strides = [1, 1]} : vector<1x64xf32> to vector<1x16xf32>
    %78 = arith.negf %77 : vector<1x16xf32>
    %79 = math.exp %78 : vector<1x16xf32>
    %cst_19 = arith.constant 1.000000e+00 : f32
    %80 = vector.broadcast %cst_19 : f32 to vector<1x16xf32>
    %81 = arith.addf %80, %79 : vector<1x16xf32>
    %82 = arith.divf %80, %81 : vector<1x16xf32>
    %83 = vector.extract_strided_slice %76 {offsets = [0, 16], sizes = [1, 16], strides = [1, 1]} : vector<1x64xf32> to vector<1x16xf32>
    %84 = arith.negf %83 : vector<1x16xf32>
    %85 = math.exp %84 : vector<1x16xf32>
    %cst_20 = arith.constant 1.000000e+00 : f32
    %86 = vector.broadcast %cst_20 : f32 to vector<1x16xf32>
    %87 = arith.addf %86, %85 : vector<1x16xf32>
    %88 = arith.divf %86, %87 : vector<1x16xf32>
    %89 = vector.extract_strided_slice %76 {offsets = [0, 32], sizes = [1, 16], strides = [1, 1]} : vector<1x64xf32> to vector<1x16xf32>
    %90 = math.tanh %89 : vector<1x16xf32>
    %91 = vector.extract_strided_slice %76 {offsets = [0, 48], sizes = [1, 16], strides = [1, 1]} : vector<1x64xf32> to vector<1x16xf32>
    %92 = arith.negf %91 : vector<1x16xf32>
    %93 = math.exp %92 : vector<1x16xf32>
    %cst_21 = arith.constant 1.000000e+00 : f32
    %94 = vector.broadcast %cst_21 : f32 to vector<1x16xf32>
    %95 = arith.addf %94, %93 : vector<1x16xf32>
    %96 = arith.divf %94, %95 : vector<1x16xf32>
    %97 = arith.mulf %88, %69 : vector<1x16xf32>
    %98 = arith.mulf %82, %90 : vector<1x16xf32>
    %99 = arith.addf %97, %98 : vector<1x16xf32>
    %100 = math.tanh %99 : vector<1x16xf32>
    %101 = arith.mulf %96, %100 : vector<1x16xf32>
    %102 = vector.extract_strided_slice %9 {offsets = [0, 3, 0], sizes = [1, 1, 64], strides = [1, 1, 1]} : vector<1x4x64xf32> to vector<1x1x64xf32>
    %103 = vector.shape_cast %102 : vector<1x1x64xf32> to vector<1x64xf32>
    %104 = arith.truncf %101 : vector<1x16xf32> to vector<1x16xbf16>
    %cst_22 = arith.constant dense<0.000000e+00> : vector<1x64xf32>
    %105 = tpu.matmul %104, %2, %cst_22 {dimension_numbers = #tpu.dot_dimension_numbers<[1], [0], [0], [1], [0, 0, 1, 1], [], []>} : vector<1x16xbf16>, vector<16x64xbf16>, vector<1x64xf32> -> vector<1x64xf32>
    %106 = arith.addf %103, %105 : vector<1x64xf32>
    %107 = vector.extract_strided_slice %106 {offsets = [0, 0], sizes = [1, 16], strides = [1, 1]} : vector<1x64xf32> to vector<1x16xf32>
    %108 = arith.negf %107 : vector<1x16xf32>
    %109 = math.exp %108 : vector<1x16xf32>
    %cst_23 = arith.constant 1.000000e+00 : f32
    %110 = vector.broadcast %cst_23 : f32 to vector<1x16xf32>
    %111 = arith.addf %110, %109 : vector<1x16xf32>
    %112 = arith.divf %110, %111 : vector<1x16xf32>
    %113 = vector.extract_strided_slice %106 {offsets = [0, 16], sizes = [1, 16], strides = [1, 1]} : vector<1x64xf32> to vector<1x16xf32>
    %114 = arith.negf %113 : vector<1x16xf32>
    %115 = math.exp %114 : vector<1x16xf32>
    %cst_24 = arith.constant 1.000000e+00 : f32
    %116 = vector.broadcast %cst_24 : f32 to vector<1x16xf32>
    %117 = arith.addf %116, %115 : vector<1x16xf32>
    %118 = arith.divf %116, %117 : vector<1x16xf32>
    %119 = vector.extract_strided_slice %106 {offsets = [0, 32], sizes = [1, 16], strides = [1, 1]} : vector<1x64xf32> to vector<1x16xf32>
    %120 = math.tanh %119 : vector<1x16xf32>
    %121 = vector.extract_strided_slice %106 {offsets = [0, 48], sizes = [1, 16], strides = [1, 1]} : vector<1x64xf32> to vector<1x16xf32>
    %122 = arith.negf %121 : vector<1x16xf32>
    %123 = math.exp %122 : vector<1x16xf32>
    %cst_25 = arith.constant 1.000000e+00 : f32
    %124 = vector.broadcast %cst_25 : f32 to vector<1x16xf32>
    %125 = arith.addf %124, %123 : vector<1x16xf32>
    %126 = arith.divf %124, %125 : vector<1x16xf32>
    %127 = arith.mulf %118, %99 : vector<1x16xf32>
    %128 = arith.mulf %112, %120 : vector<1x16xf32>
    %129 = arith.addf %127, %128 : vector<1x16xf32>
    %130 = math.tanh %129 : vector<1x16xf32>
    %131 = arith.mulf %126, %130 : vector<1x16xf32>
    %132 = vector.shape_cast %41 : vector<1x16xf32> to vector<1x1x16xf32>
    %133 = vector.shape_cast %71 : vector<1x16xf32> to vector<1x1x16xf32>
    %134 = vector.shape_cast %101 : vector<1x16xf32> to vector<1x1x16xf32>
    %135 = vector.shape_cast %131 : vector<1x16xf32> to vector<1x1x16xf32>
    %136 = tpu.concatenate %132, %133, %134, %135 in 1 : vector<1x1x16xf32>, vector<1x1x16xf32>, vector<1x1x16xf32>, vector<1x1x16xf32> -> vector<1x4x16xf32>
    %c0_26 = arith.constant 0 : index
    %c0_27 = arith.constant 0 : index
    %137 = vector.load %arg5[%c0_26, %c0_27] : memref<8x64xbf16, #tpu.memory_space<vmem>>, vector<8x64xbf16>
    %c0_28 = arith.constant 0 : index
    %c0_29 = arith.constant 0 : index
    %138 = vector.load %arg6[%c0_28, %c0_29] : memref<16x64xbf16, #tpu.memory_space<vmem>>, vector<16x64xbf16>
    %c0_30 = arith.constant 0 : index
    %c0_31 = arith.constant 0 : index
    %139 = vector.load %arg7[%c0_30, %c0_31] : memref<1x64xf32, #tpu.memory_space<vmem>>, vector<1x64xf32>
    %140 = vector.shape_cast %0 : vector<1x4x8xf32> to vector<4x8xf32>
    %141 = arith.truncf %140 : vector<4x8xf32> to vector<4x8xbf16>
    %cst_32 = arith.constant dense<0.000000e+00> : vector<4x64xf32>
    %142 = tpu.matmul %141, %137, %cst_32 {dimension_numbers = #tpu.dot_dimension_numbers<[1], [0], [0], [1], [0, 0, 1, 1], [], []>} : vector<4x8xbf16>, vector<8x64xbf16>, vector<4x64xf32> -> vector<4x64xf32>
    %143 = vector.broadcast %139 : vector<1x64xf32> to vector<4x64xf32>
    %144 = arith.addf %142, %143 : vector<4x64xf32>
    %145 = vector.shape_cast %144 : vector<4x64xf32> to vector<1x4x64xf32>
    %cst_33 = arith.constant 0.000000e+00 : f32
    %146 = vector.broadcast %cst_33 : f32 to vector<1x16xf32>
    %cst_34 = arith.constant 0.000000e+00 : f32
    %147 = vector.broadcast %cst_34 : f32 to vector<1x16xf32>
    %148 = vector.extract_strided_slice %145 {offsets = [0, 3, 0], sizes = [1, 1, 64], strides = [1, 1, 1]} : vector<1x4x64xf32> to vector<1x1x64xf32>
    %149 = vector.shape_cast %148 : vector<1x1x64xf32> to vector<1x64xf32>
    %150 = arith.truncf %146 : vector<1x16xf32> to vector<1x16xbf16>
    %cst_35 = arith.constant dense<0.000000e+00> : vector<1x64xf32>
    %151 = tpu.matmul %150, %138, %cst_35 {dimension_numbers = #tpu.dot_dimension_numbers<[1], [0], [0], [1], [0, 0, 1, 1], [], []>} : vector<1x16xbf16>, vector<16x64xbf16>, vector<1x64xf32> -> vector<1x64xf32>
    %152 = arith.addf %149, %151 : vector<1x64xf32>
    %153 = vector.extract_strided_slice %152 {offsets = [0, 0], sizes = [1, 16], strides = [1, 1]} : vector<1x64xf32> to vector<1x16xf32>
    %154 = arith.negf %153 : vector<1x16xf32>
    %155 = math.exp %154 : vector<1x16xf32>
    %cst_36 = arith.constant 1.000000e+00 : f32
    %156 = vector.broadcast %cst_36 : f32 to vector<1x16xf32>
    %157 = arith.addf %156, %155 : vector<1x16xf32>
    %158 = arith.divf %156, %157 : vector<1x16xf32>
    %159 = vector.extract_strided_slice %152 {offsets = [0, 16], sizes = [1, 16], strides = [1, 1]} : vector<1x64xf32> to vector<1x16xf32>
    %160 = arith.negf %159 : vector<1x16xf32>
    %161 = math.exp %160 : vector<1x16xf32>
    %cst_37 = arith.constant 1.000000e+00 : f32
    %162 = vector.broadcast %cst_37 : f32 to vector<1x16xf32>
    %163 = arith.addf %162, %161 : vector<1x16xf32>
    %164 = arith.divf %162, %163 : vector<1x16xf32>
    %165 = vector.extract_strided_slice %152 {offsets = [0, 32], sizes = [1, 16], strides = [1, 1]} : vector<1x64xf32> to vector<1x16xf32>
    %166 = math.tanh %165 : vector<1x16xf32>
    %167 = vector.extract_strided_slice %152 {offsets = [0, 48], sizes = [1, 16], strides = [1, 1]} : vector<1x64xf32> to vector<1x16xf32>
    %168 = arith.negf %167 : vector<1x16xf32>
    %169 = math.exp %168 : vector<1x16xf32>
    %cst_38 = arith.constant 1.000000e+00 : f32
    %170 = vector.broadcast %cst_38 : f32 to vector<1x16xf32>
    %171 = arith.addf %170, %169 : vector<1x16xf32>
    %172 = arith.divf %170, %171 : vector<1x16xf32>
    %173 = arith.mulf %164, %147 : vector<1x16xf32>
    %174 = arith.mulf %158, %166 : vector<1x16xf32>
    %175 = arith.addf %173, %174 : vector<1x16xf32>
    %176 = math.tanh %175 : vector<1x16xf32>
    %177 = arith.mulf %172, %176 : vector<1x16xf32>
    %178 = vector.extract_strided_slice %145 {offsets = [0, 2, 0], sizes = [1, 1, 64], strides = [1, 1, 1]} : vector<1x4x64xf32> to vector<1x1x64xf32>
    %179 = vector.shape_cast %178 : vector<1x1x64xf32> to vector<1x64xf32>
    %180 = arith.truncf %177 : vector<1x16xf32> to vector<1x16xbf16>
    %cst_39 = arith.constant dense<0.000000e+00> : vector<1x64xf32>
    %181 = tpu.matmul %180, %138, %cst_39 {dimension_numbers = #tpu.dot_dimension_numbers<[1], [0], [0], [1], [0, 0, 1, 1], [], []>} : vector<1x16xbf16>, vector<16x64xbf16>, vector<1x64xf32> -> vector<1x64xf32>
    %182 = arith.addf %179, %181 : vector<1x64xf32>
    %183 = vector.extract_strided_slice %182 {offsets = [0, 0], sizes = [1, 16], strides = [1, 1]} : vector<1x64xf32> to vector<1x16xf32>
    %184 = arith.negf %183 : vector<1x16xf32>
    %185 = math.exp %184 : vector<1x16xf32>
    %cst_40 = arith.constant 1.000000e+00 : f32
    %186 = vector.broadcast %cst_40 : f32 to vector<1x16xf32>
    %187 = arith.addf %186, %185 : vector<1x16xf32>
    %188 = arith.divf %186, %187 : vector<1x16xf32>
    %189 = vector.extract_strided_slice %182 {offsets = [0, 16], sizes = [1, 16], strides = [1, 1]} : vector<1x64xf32> to vector<1x16xf32>
    %190 = arith.negf %189 : vector<1x16xf32>
    %191 = math.exp %190 : vector<1x16xf32>
    %cst_41 = arith.constant 1.000000e+00 : f32
    %192 = vector.broadcast %cst_41 : f32 to vector<1x16xf32>
    %193 = arith.addf %192, %191 : vector<1x16xf32>
    %194 = arith.divf %192, %193 : vector<1x16xf32>
    %195 = vector.extract_strided_slice %182 {offsets = [0, 32], sizes = [1, 16], strides = [1, 1]} : vector<1x64xf32> to vector<1x16xf32>
    %196 = math.tanh %195 : vector<1x16xf32>
    %197 = vector.extract_strided_slice %182 {offsets = [0, 48], sizes = [1, 16], strides = [1, 1]} : vector<1x64xf32> to vector<1x16xf32>
    %198 = arith.negf %197 : vector<1x16xf32>
    %199 = math.exp %198 : vector<1x16xf32>
    %cst_42 = arith.constant 1.000000e+00 : f32
    %200 = vector.broadcast %cst_42 : f32 to vector<1x16xf32>
    %201 = arith.addf %200, %199 : vector<1x16xf32>
    %202 = arith.divf %200, %201 : vector<1x16xf32>
    %203 = arith.mulf %194, %175 : vector<1x16xf32>
    %204 = arith.mulf %188, %196 : vector<1x16xf32>
    %205 = arith.addf %203, %204 : vector<1x16xf32>
    %206 = math.tanh %205 : vector<1x16xf32>
    %207 = arith.mulf %202, %206 : vector<1x16xf32>
    %208 = vector.extract_strided_slice %145 {offsets = [0, 1, 0], sizes = [1, 1, 64], strides = [1, 1, 1]} : vector<1x4x64xf32> to vector<1x1x64xf32>
    %209 = vector.shape_cast %208 : vector<1x1x64xf32> to vector<1x64xf32>
    %210 = arith.truncf %207 : vector<1x16xf32> to vector<1x16xbf16>
    %cst_43 = arith.constant dense<0.000000e+00> : vector<1x64xf32>
    %211 = tpu.matmul %210, %138, %cst_43 {dimension_numbers = #tpu.dot_dimension_numbers<[1], [0], [0], [1], [0, 0, 1, 1], [], []>} : vector<1x16xbf16>, vector<16x64xbf16>, vector<1x64xf32> -> vector<1x64xf32>
    %212 = arith.addf %209, %211 : vector<1x64xf32>
    %213 = vector.extract_strided_slice %212 {offsets = [0, 0], sizes = [1, 16], strides = [1, 1]} : vector<1x64xf32> to vector<1x16xf32>
    %214 = arith.negf %213 : vector<1x16xf32>
    %215 = math.exp %214 : vector<1x16xf32>
    %cst_44 = arith.constant 1.000000e+00 : f32
    %216 = vector.broadcast %cst_44 : f32 to vector<1x16xf32>
    %217 = arith.addf %216, %215 : vector<1x16xf32>
    %218 = arith.divf %216, %217 : vector<1x16xf32>
    %219 = vector.extract_strided_slice %212 {offsets = [0, 16], sizes = [1, 16], strides = [1, 1]} : vector<1x64xf32> to vector<1x16xf32>
    %220 = arith.negf %219 : vector<1x16xf32>
    %221 = math.exp %220 : vector<1x16xf32>
    %cst_45 = arith.constant 1.000000e+00 : f32
    %222 = vector.broadcast %cst_45 : f32 to vector<1x16xf32>
    %223 = arith.addf %222, %221 : vector<1x16xf32>
    %224 = arith.divf %222, %223 : vector<1x16xf32>
    %225 = vector.extract_strided_slice %212 {offsets = [0, 32], sizes = [1, 16], strides = [1, 1]} : vector<1x64xf32> to vector<1x16xf32>
    %226 = math.tanh %225 : vector<1x16xf32>
    %227 = vector.extract_strided_slice %212 {offsets = [0, 48], sizes = [1, 16], strides = [1, 1]} : vector<1x64xf32> to vector<1x16xf32>
    %228 = arith.negf %227 : vector<1x16xf32>
    %229 = math.exp %228 : vector<1x16xf32>
    %cst_46 = arith.constant 1.000000e+00 : f32
    %230 = vector.broadcast %cst_46 : f32 to vector<1x16xf32>
    %231 = arith.addf %230, %229 : vector<1x16xf32>
    %232 = arith.divf %230, %231 : vector<1x16xf32>
    %233 = arith.mulf %224, %205 : vector<1x16xf32>
    %234 = arith.mulf %218, %226 : vector<1x16xf32>
    %235 = arith.addf %233, %234 : vector<1x16xf32>
    %236 = math.tanh %235 : vector<1x16xf32>
    %237 = arith.mulf %232, %236 : vector<1x16xf32>
    %238 = vector.extract_strided_slice %145 {offsets = [0, 0, 0], sizes = [1, 1, 64], strides = [1, 1, 1]} : vector<1x4x64xf32> to vector<1x1x64xf32>
    %239 = vector.shape_cast %238 : vector<1x1x64xf32> to vector<1x64xf32>
    %240 = arith.truncf %237 : vector<1x16xf32> to vector<1x16xbf16>
    %cst_47 = arith.constant dense<0.000000e+00> : vector<1x64xf32>
    %241 = tpu.matmul %240, %138, %cst_47 {dimension_numbers = #tpu.dot_dimension_numbers<[1], [0], [0], [1], [0, 0, 1, 1], [], []>} : vector<1x16xbf16>, vector<16x64xbf16>, vector<1x64xf32> -> vector<1x64xf32>
    %242 = arith.addf %239, %241 : vector<1x64xf32>
    %243 = vector.extract_strided_slice %242 {offsets = [0, 0], sizes = [1, 16], strides = [1, 1]} : vector<1x64xf32> to vector<1x16xf32>
    %244 = arith.negf %243 : vector<1x16xf32>
    %245 = math.exp %244 : vector<1x16xf32>
    %cst_48 = arith.constant 1.000000e+00 : f32
    %246 = vector.broadcast %cst_48 : f32 to vector<1x16xf32>
    %247 = arith.addf %246, %245 : vector<1x16xf32>
    %248 = arith.divf %246, %247 : vector<1x16xf32>
    %249 = vector.extract_strided_slice %242 {offsets = [0, 16], sizes = [1, 16], strides = [1, 1]} : vector<1x64xf32> to vector<1x16xf32>
    %250 = arith.negf %249 : vector<1x16xf32>
    %251 = math.exp %250 : vector<1x16xf32>
    %cst_49 = arith.constant 1.000000e+00 : f32
    %252 = vector.broadcast %cst_49 : f32 to vector<1x16xf32>
    %253 = arith.addf %252, %251 : vector<1x16xf32>
    %254 = arith.divf %252, %253 : vector<1x16xf32>
    %255 = vector.extract_strided_slice %242 {offsets = [0, 32], sizes = [1, 16], strides = [1, 1]} : vector<1x64xf32> to vector<1x16xf32>
    %256 = math.tanh %255 : vector<1x16xf32>
    %257 = vector.extract_strided_slice %242 {offsets = [0, 48], sizes = [1, 16], strides = [1, 1]} : vector<1x64xf32> to vector<1x16xf32>
    %258 = arith.negf %257 : vector<1x16xf32>
    %259 = math.exp %258 : vector<1x16xf32>
    %cst_50 = arith.constant 1.000000e+00 : f32
    %260 = vector.broadcast %cst_50 : f32 to vector<1x16xf32>
    %261 = arith.addf %260, %259 : vector<1x16xf32>
    %262 = arith.divf %260, %261 : vector<1x16xf32>
    %263 = arith.mulf %254, %235 : vector<1x16xf32>
    %264 = arith.mulf %248, %256 : vector<1x16xf32>
    %265 = arith.addf %263, %264 : vector<1x16xf32>
    %266 = math.tanh %265 : vector<1x16xf32>
    %267 = arith.mulf %262, %266 : vector<1x16xf32>
    %268 = vector.shape_cast %267 : vector<1x16xf32> to vector<1x1x16xf32>
    %269 = vector.shape_cast %237 : vector<1x16xf32> to vector<1x1x16xf32>
    %270 = vector.shape_cast %207 : vector<1x16xf32> to vector<1x1x16xf32>
    %271 = vector.shape_cast %177 : vector<1x16xf32> to vector<1x1x16xf32>
    %272 = tpu.concatenate %268, %269, %270, %271 in 1 : vector<1x1x16xf32>, vector<1x1x16xf32>, vector<1x1x16xf32>, vector<1x1x16xf32> -> vector<1x4x16xf32>
    %273 = tpu.concatenate %136, %272 in 2 : vector<1x4x16xf32>, vector<1x4x16xf32> -> vector<1x4x32xf32>
    %c0_51 = arith.constant 0 : index
    %c0_52 = arith.constant 0 : index
    %274 = vector.load %arg8[%c0_51, %c0_52] : memref<32x64xbf16, #tpu.memory_space<vmem>>, vector<32x64xbf16>
    %c0_53 = arith.constant 0 : index
    %c0_54 = arith.constant 0 : index
    %275 = vector.load %arg9[%c0_53, %c0_54] : memref<16x64xbf16, #tpu.memory_space<vmem>>, vector<16x64xbf16>
    %c0_55 = arith.constant 0 : index
    %c0_56 = arith.constant 0 : index
    %276 = vector.load %arg10[%c0_55, %c0_56] : memref<1x64xf32, #tpu.memory_space<vmem>>, vector<1x64xf32>
    %277 = vector.shape_cast %273 : vector<1x4x32xf32> to vector<4x32xf32>
    %278 = arith.truncf %277 : vector<4x32xf32> to vector<4x32xbf16>
    %cst_57 = arith.constant dense<0.000000e+00> : vector<4x64xf32>
    %279 = tpu.matmul %278, %274, %cst_57 {dimension_numbers = #tpu.dot_dimension_numbers<[1], [0], [0], [1], [0, 0, 1, 1], [], []>} : vector<4x32xbf16>, vector<32x64xbf16>, vector<4x64xf32> -> vector<4x64xf32>
    %280 = vector.broadcast %276 : vector<1x64xf32> to vector<4x64xf32>
    %281 = arith.addf %279, %280 : vector<4x64xf32>
    %282 = vector.shape_cast %281 : vector<4x64xf32> to vector<1x4x64xf32>
    %cst_58 = arith.constant 0.000000e+00 : f32
    %283 = vector.broadcast %cst_58 : f32 to vector<1x16xf32>
    %cst_59 = arith.constant 0.000000e+00 : f32
    %284 = vector.broadcast %cst_59 : f32 to vector<1x16xf32>
    %285 = vector.extract_strided_slice %282 {offsets = [0, 0, 0], sizes = [1, 1, 64], strides = [1, 1, 1]} : vector<1x4x64xf32> to vector<1x1x64xf32>
    %286 = vector.shape_cast %285 : vector<1x1x64xf32> to vector<1x64xf32>
    %287 = arith.truncf %283 : vector<1x16xf32> to vector<1x16xbf16>
    %cst_60 = arith.constant dense<0.000000e+00> : vector<1x64xf32>
    %288 = tpu.matmul %287, %275, %cst_60 {dimension_numbers = #tpu.dot_dimension_numbers<[1], [0], [0], [1], [0, 0, 1, 1], [], []>} : vector<1x16xbf16>, vector<16x64xbf16>, vector<1x64xf32> -> vector<1x64xf32>
    %289 = arith.addf %286, %288 : vector<1x64xf32>
    %290 = vector.extract_strided_slice %289 {offsets = [0, 0], sizes = [1, 16], strides = [1, 1]} : vector<1x64xf32> to vector<1x16xf32>
    %291 = arith.negf %290 : vector<1x16xf32>
    %292 = math.exp %291 : vector<1x16xf32>
    %cst_61 = arith.constant 1.000000e+00 : f32
    %293 = vector.broadcast %cst_61 : f32 to vector<1x16xf32>
    %294 = arith.addf %293, %292 : vector<1x16xf32>
    %295 = arith.divf %293, %294 : vector<1x16xf32>
    %296 = vector.extract_strided_slice %289 {offsets = [0, 16], sizes = [1, 16], strides = [1, 1]} : vector<1x64xf32> to vector<1x16xf32>
    %297 = arith.negf %296 : vector<1x16xf32>
    %298 = math.exp %297 : vector<1x16xf32>
    %cst_62 = arith.constant 1.000000e+00 : f32
    %299 = vector.broadcast %cst_62 : f32 to vector<1x16xf32>
    %300 = arith.addf %299, %298 : vector<1x16xf32>
    %301 = arith.divf %299, %300 : vector<1x16xf32>
    %302 = vector.extract_strided_slice %289 {offsets = [0, 32], sizes = [1, 16], strides = [1, 1]} : vector<1x64xf32> to vector<1x16xf32>
    %303 = math.tanh %302 : vector<1x16xf32>
    %304 = vector.extract_strided_slice %289 {offsets = [0, 48], sizes = [1, 16], strides = [1, 1]} : vector<1x64xf32> to vector<1x16xf32>
    %305 = arith.negf %304 : vector<1x16xf32>
    %306 = math.exp %305 : vector<1x16xf32>
    %cst_63 = arith.constant 1.000000e+00 : f32
    %307 = vector.broadcast %cst_63 : f32 to vector<1x16xf32>
    %308 = arith.addf %307, %306 : vector<1x16xf32>
    %309 = arith.divf %307, %308 : vector<1x16xf32>
    %310 = arith.mulf %301, %284 : vector<1x16xf32>
    %311 = arith.mulf %295, %303 : vector<1x16xf32>
    %312 = arith.addf %310, %311 : vector<1x16xf32>
    %313 = math.tanh %312 : vector<1x16xf32>
    %314 = arith.mulf %309, %313 : vector<1x16xf32>
    %315 = vector.extract_strided_slice %282 {offsets = [0, 1, 0], sizes = [1, 1, 64], strides = [1, 1, 1]} : vector<1x4x64xf32> to vector<1x1x64xf32>
    %316 = vector.shape_cast %315 : vector<1x1x64xf32> to vector<1x64xf32>
    %317 = arith.truncf %314 : vector<1x16xf32> to vector<1x16xbf16>
    %cst_64 = arith.constant dense<0.000000e+00> : vector<1x64xf32>
    %318 = tpu.matmul %317, %275, %cst_64 {dimension_numbers = #tpu.dot_dimension_numbers<[1], [0], [0], [1], [0, 0, 1, 1], [], []>} : vector<1x16xbf16>, vector<16x64xbf16>, vector<1x64xf32> -> vector<1x64xf32>
    %319 = arith.addf %316, %318 : vector<1x64xf32>
    %320 = vector.extract_strided_slice %319 {offsets = [0, 0], sizes = [1, 16], strides = [1, 1]} : vector<1x64xf32> to vector<1x16xf32>
    %321 = arith.negf %320 : vector<1x16xf32>
    %322 = math.exp %321 : vector<1x16xf32>
    %cst_65 = arith.constant 1.000000e+00 : f32
    %323 = vector.broadcast %cst_65 : f32 to vector<1x16xf32>
    %324 = arith.addf %323, %322 : vector<1x16xf32>
    %325 = arith.divf %323, %324 : vector<1x16xf32>
    %326 = vector.extract_strided_slice %319 {offsets = [0, 16], sizes = [1, 16], strides = [1, 1]} : vector<1x64xf32> to vector<1x16xf32>
    %327 = arith.negf %326 : vector<1x16xf32>
    %328 = math.exp %327 : vector<1x16xf32>
    %cst_66 = arith.constant 1.000000e+00 : f32
    %329 = vector.broadcast %cst_66 : f32 to vector<1x16xf32>
    %330 = arith.addf %329, %328 : vector<1x16xf32>
    %331 = arith.divf %329, %330 : vector<1x16xf32>
    %332 = vector.extract_strided_slice %319 {offsets = [0, 32], sizes = [1, 16], strides = [1, 1]} : vector<1x64xf32> to vector<1x16xf32>
    %333 = math.tanh %332 : vector<1x16xf32>
    %334 = vector.extract_strided_slice %319 {offsets = [0, 48], sizes = [1, 16], strides = [1, 1]} : vector<1x64xf32> to vector<1x16xf32>
    %335 = arith.negf %334 : vector<1x16xf32>
    %336 = math.exp %335 : vector<1x16xf32>
    %cst_67 = arith.constant 1.000000e+00 : f32
    %337 = vector.broadcast %cst_67 : f32 to vector<1x16xf32>
    %338 = arith.addf %337, %336 : vector<1x16xf32>
    %339 = arith.divf %337, %338 : vector<1x16xf32>
    %340 = arith.mulf %331, %312 : vector<1x16xf32>
    %341 = arith.mulf %325, %333 : vector<1x16xf32>
    %342 = arith.addf %340, %341 : vector<1x16xf32>
    %343 = math.tanh %342 : vector<1x16xf32>
    %344 = arith.mulf %339, %343 : vector<1x16xf32>
    %345 = vector.extract_strided_slice %282 {offsets = [0, 2, 0], sizes = [1, 1, 64], strides = [1, 1, 1]} : vector<1x4x64xf32> to vector<1x1x64xf32>
    %346 = vector.shape_cast %345 : vector<1x1x64xf32> to vector<1x64xf32>
    %347 = arith.truncf %344 : vector<1x16xf32> to vector<1x16xbf16>
    %cst_68 = arith.constant dense<0.000000e+00> : vector<1x64xf32>
    %348 = tpu.matmul %347, %275, %cst_68 {dimension_numbers = #tpu.dot_dimension_numbers<[1], [0], [0], [1], [0, 0, 1, 1], [], []>} : vector<1x16xbf16>, vector<16x64xbf16>, vector<1x64xf32> -> vector<1x64xf32>
    %349 = arith.addf %346, %348 : vector<1x64xf32>
    %350 = vector.extract_strided_slice %349 {offsets = [0, 0], sizes = [1, 16], strides = [1, 1]} : vector<1x64xf32> to vector<1x16xf32>
    %351 = arith.negf %350 : vector<1x16xf32>
    %352 = math.exp %351 : vector<1x16xf32>
    %cst_69 = arith.constant 1.000000e+00 : f32
    %353 = vector.broadcast %cst_69 : f32 to vector<1x16xf32>
    %354 = arith.addf %353, %352 : vector<1x16xf32>
    %355 = arith.divf %353, %354 : vector<1x16xf32>
    %356 = vector.extract_strided_slice %349 {offsets = [0, 16], sizes = [1, 16], strides = [1, 1]} : vector<1x64xf32> to vector<1x16xf32>
    %357 = arith.negf %356 : vector<1x16xf32>
    %358 = math.exp %357 : vector<1x16xf32>
    %cst_70 = arith.constant 1.000000e+00 : f32
    %359 = vector.broadcast %cst_70 : f32 to vector<1x16xf32>
    %360 = arith.addf %359, %358 : vector<1x16xf32>
    %361 = arith.divf %359, %360 : vector<1x16xf32>
    %362 = vector.extract_strided_slice %349 {offsets = [0, 32], sizes = [1, 16], strides = [1, 1]} : vector<1x64xf32> to vector<1x16xf32>
    %363 = math.tanh %362 : vector<1x16xf32>
    %364 = vector.extract_strided_slice %349 {offsets = [0, 48], sizes = [1, 16], strides = [1, 1]} : vector<1x64xf32> to vector<1x16xf32>
    %365 = arith.negf %364 : vector<1x16xf32>
    %366 = math.exp %365 : vector<1x16xf32>
    %cst_71 = arith.constant 1.000000e+00 : f32
    %367 = vector.broadcast %cst_71 : f32 to vector<1x16xf32>
    %368 = arith.addf %367, %366 : vector<1x16xf32>
    %369 = arith.divf %367, %368 : vector<1x16xf32>
    %370 = arith.mulf %361, %342 : vector<1x16xf32>
    %371 = arith.mulf %355, %363 : vector<1x16xf32>
    %372 = arith.addf %370, %371 : vector<1x16xf32>
    %373 = math.tanh %372 : vector<1x16xf32>
    %374 = arith.mulf %369, %373 : vector<1x16xf32>
    %375 = vector.extract_strided_slice %282 {offsets = [0, 3, 0], sizes = [1, 1, 64], strides = [1, 1, 1]} : vector<1x4x64xf32> to vector<1x1x64xf32>
    %376 = vector.shape_cast %375 : vector<1x1x64xf32> to vector<1x64xf32>
    %377 = arith.truncf %374 : vector<1x16xf32> to vector<1x16xbf16>
    %cst_72 = arith.constant dense<0.000000e+00> : vector<1x64xf32>
    %378 = tpu.matmul %377, %275, %cst_72 {dimension_numbers = #tpu.dot_dimension_numbers<[1], [0], [0], [1], [0, 0, 1, 1], [], []>} : vector<1x16xbf16>, vector<16x64xbf16>, vector<1x64xf32> -> vector<1x64xf32>
    %379 = arith.addf %376, %378 : vector<1x64xf32>
    %380 = vector.extract_strided_slice %379 {offsets = [0, 0], sizes = [1, 16], strides = [1, 1]} : vector<1x64xf32> to vector<1x16xf32>
    %381 = arith.negf %380 : vector<1x16xf32>
    %382 = math.exp %381 : vector<1x16xf32>
    %cst_73 = arith.constant 1.000000e+00 : f32
    %383 = vector.broadcast %cst_73 : f32 to vector<1x16xf32>
    %384 = arith.addf %383, %382 : vector<1x16xf32>
    %385 = arith.divf %383, %384 : vector<1x16xf32>
    %386 = vector.extract_strided_slice %379 {offsets = [0, 16], sizes = [1, 16], strides = [1, 1]} : vector<1x64xf32> to vector<1x16xf32>
    %387 = arith.negf %386 : vector<1x16xf32>
    %388 = math.exp %387 : vector<1x16xf32>
    %cst_74 = arith.constant 1.000000e+00 : f32
    %389 = vector.broadcast %cst_74 : f32 to vector<1x16xf32>
    %390 = arith.addf %389, %388 : vector<1x16xf32>
    %391 = arith.divf %389, %390 : vector<1x16xf32>
    %392 = vector.extract_strided_slice %379 {offsets = [0, 32], sizes = [1, 16], strides = [1, 1]} : vector<1x64xf32> to vector<1x16xf32>
    %393 = math.tanh %392 : vector<1x16xf32>
    %394 = vector.extract_strided_slice %379 {offsets = [0, 48], sizes = [1, 16], strides = [1, 1]} : vector<1x64xf32> to vector<1x16xf32>
    %395 = arith.negf %394 : vector<1x16xf32>
    %396 = math.exp %395 : vector<1x16xf32>
    %cst_75 = arith.constant 1.000000e+00 : f32
    %397 = vector.broadcast %cst_75 : f32 to vector<1x16xf32>
    %398 = arith.addf %397, %396 : vector<1x16xf32>
    %399 = arith.divf %397, %398 : vector<1x16xf32>
    %400 = arith.mulf %391, %372 : vector<1x16xf32>
    %401 = arith.mulf %385, %393 : vector<1x16xf32>
    %402 = arith.addf %400, %401 : vector<1x16xf32>
    %403 = math.tanh %402 : vector<1x16xf32>
    %404 = arith.mulf %399, %403 : vector<1x16xf32>
    %405 = vector.shape_cast %314 : vector<1x16xf32> to vector<1x1x16xf32>
    %406 = vector.shape_cast %344 : vector<1x16xf32> to vector<1x1x16xf32>
    %407 = vector.shape_cast %374 : vector<1x16xf32> to vector<1x1x16xf32>
    %408 = vector.shape_cast %404 : vector<1x16xf32> to vector<1x1x16xf32>
    %409 = tpu.concatenate %405, %406, %407, %408 in 1 : vector<1x1x16xf32>, vector<1x1x16xf32>, vector<1x1x16xf32>, vector<1x1x16xf32> -> vector<1x4x16xf32>
    %c0_76 = arith.constant 0 : index
    %c0_77 = arith.constant 0 : index
    %410 = vector.load %arg11[%c0_76, %c0_77] : memref<32x64xbf16, #tpu.memory_space<vmem>>, vector<32x64xbf16>
    %c0_78 = arith.constant 0 : index
    %c0_79 = arith.constant 0 : index
    %411 = vector.load %arg12[%c0_78, %c0_79] : memref<16x64xbf16, #tpu.memory_space<vmem>>, vector<16x64xbf16>
    %c0_80 = arith.constant 0 : index
    %c0_81 = arith.constant 0 : index
    %412 = vector.load %arg13[%c0_80, %c0_81] : memref<1x64xf32, #tpu.memory_space<vmem>>, vector<1x64xf32>
    %413 = vector.shape_cast %273 : vector<1x4x32xf32> to vector<4x32xf32>
    %414 = arith.truncf %413 : vector<4x32xf32> to vector<4x32xbf16>
    %cst_82 = arith.constant dense<0.000000e+00> : vector<4x64xf32>
    %415 = tpu.matmul %414, %410, %cst_82 {dimension_numbers = #tpu.dot_dimension_numbers<[1], [0], [0], [1], [0, 0, 1, 1], [], []>} : vector<4x32xbf16>, vector<32x64xbf16>, vector<4x64xf32> -> vector<4x64xf32>
    %416 = vector.broadcast %412 : vector<1x64xf32> to vector<4x64xf32>
    %417 = arith.addf %415, %416 : vector<4x64xf32>
    %418 = vector.shape_cast %417 : vector<4x64xf32> to vector<1x4x64xf32>
    %cst_83 = arith.constant 0.000000e+00 : f32
    %419 = vector.broadcast %cst_83 : f32 to vector<1x16xf32>
    %cst_84 = arith.constant 0.000000e+00 : f32
    %420 = vector.broadcast %cst_84 : f32 to vector<1x16xf32>
    %421 = vector.extract_strided_slice %418 {offsets = [0, 3, 0], sizes = [1, 1, 64], strides = [1, 1, 1]} : vector<1x4x64xf32> to vector<1x1x64xf32>
    %422 = vector.shape_cast %421 : vector<1x1x64xf32> to vector<1x64xf32>
    %423 = arith.truncf %419 : vector<1x16xf32> to vector<1x16xbf16>
    %cst_85 = arith.constant dense<0.000000e+00> : vector<1x64xf32>
    %424 = tpu.matmul %423, %411, %cst_85 {dimension_numbers = #tpu.dot_dimension_numbers<[1], [0], [0], [1], [0, 0, 1, 1], [], []>} : vector<1x16xbf16>, vector<16x64xbf16>, vector<1x64xf32> -> vector<1x64xf32>
    %425 = arith.addf %422, %424 : vector<1x64xf32>
    %426 = vector.extract_strided_slice %425 {offsets = [0, 0], sizes = [1, 16], strides = [1, 1]} : vector<1x64xf32> to vector<1x16xf32>
    %427 = arith.negf %426 : vector<1x16xf32>
    %428 = math.exp %427 : vector<1x16xf32>
    %cst_86 = arith.constant 1.000000e+00 : f32
    %429 = vector.broadcast %cst_86 : f32 to vector<1x16xf32>
    %430 = arith.addf %429, %428 : vector<1x16xf32>
    %431 = arith.divf %429, %430 : vector<1x16xf32>
    %432 = vector.extract_strided_slice %425 {offsets = [0, 16], sizes = [1, 16], strides = [1, 1]} : vector<1x64xf32> to vector<1x16xf32>
    %433 = arith.negf %432 : vector<1x16xf32>
    %434 = math.exp %433 : vector<1x16xf32>
    %cst_87 = arith.constant 1.000000e+00 : f32
    %435 = vector.broadcast %cst_87 : f32 to vector<1x16xf32>
    %436 = arith.addf %435, %434 : vector<1x16xf32>
    %437 = arith.divf %435, %436 : vector<1x16xf32>
    %438 = vector.extract_strided_slice %425 {offsets = [0, 32], sizes = [1, 16], strides = [1, 1]} : vector<1x64xf32> to vector<1x16xf32>
    %439 = math.tanh %438 : vector<1x16xf32>
    %440 = vector.extract_strided_slice %425 {offsets = [0, 48], sizes = [1, 16], strides = [1, 1]} : vector<1x64xf32> to vector<1x16xf32>
    %441 = arith.negf %440 : vector<1x16xf32>
    %442 = math.exp %441 : vector<1x16xf32>
    %cst_88 = arith.constant 1.000000e+00 : f32
    %443 = vector.broadcast %cst_88 : f32 to vector<1x16xf32>
    %444 = arith.addf %443, %442 : vector<1x16xf32>
    %445 = arith.divf %443, %444 : vector<1x16xf32>
    %446 = arith.mulf %437, %420 : vector<1x16xf32>
    %447 = arith.mulf %431, %439 : vector<1x16xf32>
    %448 = arith.addf %446, %447 : vector<1x16xf32>
    %449 = math.tanh %448 : vector<1x16xf32>
    %450 = arith.mulf %445, %449 : vector<1x16xf32>
    %451 = vector.extract_strided_slice %418 {offsets = [0, 2, 0], sizes = [1, 1, 64], strides = [1, 1, 1]} : vector<1x4x64xf32> to vector<1x1x64xf32>
    %452 = vector.shape_cast %451 : vector<1x1x64xf32> to vector<1x64xf32>
    %453 = arith.truncf %450 : vector<1x16xf32> to vector<1x16xbf16>
    %cst_89 = arith.constant dense<0.000000e+00> : vector<1x64xf32>
    %454 = tpu.matmul %453, %411, %cst_89 {dimension_numbers = #tpu.dot_dimension_numbers<[1], [0], [0], [1], [0, 0, 1, 1], [], []>} : vector<1x16xbf16>, vector<16x64xbf16>, vector<1x64xf32> -> vector<1x64xf32>
    %455 = arith.addf %452, %454 : vector<1x64xf32>
    %456 = vector.extract_strided_slice %455 {offsets = [0, 0], sizes = [1, 16], strides = [1, 1]} : vector<1x64xf32> to vector<1x16xf32>
    %457 = arith.negf %456 : vector<1x16xf32>
    %458 = math.exp %457 : vector<1x16xf32>
    %cst_90 = arith.constant 1.000000e+00 : f32
    %459 = vector.broadcast %cst_90 : f32 to vector<1x16xf32>
    %460 = arith.addf %459, %458 : vector<1x16xf32>
    %461 = arith.divf %459, %460 : vector<1x16xf32>
    %462 = vector.extract_strided_slice %455 {offsets = [0, 16], sizes = [1, 16], strides = [1, 1]} : vector<1x64xf32> to vector<1x16xf32>
    %463 = arith.negf %462 : vector<1x16xf32>
    %464 = math.exp %463 : vector<1x16xf32>
    %cst_91 = arith.constant 1.000000e+00 : f32
    %465 = vector.broadcast %cst_91 : f32 to vector<1x16xf32>
    %466 = arith.addf %465, %464 : vector<1x16xf32>
    %467 = arith.divf %465, %466 : vector<1x16xf32>
    %468 = vector.extract_strided_slice %455 {offsets = [0, 32], sizes = [1, 16], strides = [1, 1]} : vector<1x64xf32> to vector<1x16xf32>
    %469 = math.tanh %468 : vector<1x16xf32>
    %470 = vector.extract_strided_slice %455 {offsets = [0, 48], sizes = [1, 16], strides = [1, 1]} : vector<1x64xf32> to vector<1x16xf32>
    %471 = arith.negf %470 : vector<1x16xf32>
    %472 = math.exp %471 : vector<1x16xf32>
    %cst_92 = arith.constant 1.000000e+00 : f32
    %473 = vector.broadcast %cst_92 : f32 to vector<1x16xf32>
    %474 = arith.addf %473, %472 : vector<1x16xf32>
    %475 = arith.divf %473, %474 : vector<1x16xf32>
    %476 = arith.mulf %467, %448 : vector<1x16xf32>
    %477 = arith.mulf %461, %469 : vector<1x16xf32>
    %478 = arith.addf %476, %477 : vector<1x16xf32>
    %479 = math.tanh %478 : vector<1x16xf32>
    %480 = arith.mulf %475, %479 : vector<1x16xf32>
    %481 = vector.extract_strided_slice %418 {offsets = [0, 1, 0], sizes = [1, 1, 64], strides = [1, 1, 1]} : vector<1x4x64xf32> to vector<1x1x64xf32>
    %482 = vector.shape_cast %481 : vector<1x1x64xf32> to vector<1x64xf32>
    %483 = arith.truncf %480 : vector<1x16xf32> to vector<1x16xbf16>
    %cst_93 = arith.constant dense<0.000000e+00> : vector<1x64xf32>
    %484 = tpu.matmul %483, %411, %cst_93 {dimension_numbers = #tpu.dot_dimension_numbers<[1], [0], [0], [1], [0, 0, 1, 1], [], []>} : vector<1x16xbf16>, vector<16x64xbf16>, vector<1x64xf32> -> vector<1x64xf32>
    %485 = arith.addf %482, %484 : vector<1x64xf32>
    %486 = vector.extract_strided_slice %485 {offsets = [0, 0], sizes = [1, 16], strides = [1, 1]} : vector<1x64xf32> to vector<1x16xf32>
    %487 = arith.negf %486 : vector<1x16xf32>
    %488 = math.exp %487 : vector<1x16xf32>
    %cst_94 = arith.constant 1.000000e+00 : f32
    %489 = vector.broadcast %cst_94 : f32 to vector<1x16xf32>
    %490 = arith.addf %489, %488 : vector<1x16xf32>
    %491 = arith.divf %489, %490 : vector<1x16xf32>
    %492 = vector.extract_strided_slice %485 {offsets = [0, 16], sizes = [1, 16], strides = [1, 1]} : vector<1x64xf32> to vector<1x16xf32>
    %493 = arith.negf %492 : vector<1x16xf32>
    %494 = math.exp %493 : vector<1x16xf32>
    %cst_95 = arith.constant 1.000000e+00 : f32
    %495 = vector.broadcast %cst_95 : f32 to vector<1x16xf32>
    %496 = arith.addf %495, %494 : vector<1x16xf32>
    %497 = arith.divf %495, %496 : vector<1x16xf32>
    %498 = vector.extract_strided_slice %485 {offsets = [0, 32], sizes = [1, 16], strides = [1, 1]} : vector<1x64xf32> to vector<1x16xf32>
    %499 = math.tanh %498 : vector<1x16xf32>
    %500 = vector.extract_strided_slice %485 {offsets = [0, 48], sizes = [1, 16], strides = [1, 1]} : vector<1x64xf32> to vector<1x16xf32>
    %501 = arith.negf %500 : vector<1x16xf32>
    %502 = math.exp %501 : vector<1x16xf32>
    %cst_96 = arith.constant 1.000000e+00 : f32
    %503 = vector.broadcast %cst_96 : f32 to vector<1x16xf32>
    %504 = arith.addf %503, %502 : vector<1x16xf32>
    %505 = arith.divf %503, %504 : vector<1x16xf32>
    %506 = arith.mulf %497, %478 : vector<1x16xf32>
    %507 = arith.mulf %491, %499 : vector<1x16xf32>
    %508 = arith.addf %506, %507 : vector<1x16xf32>
    %509 = math.tanh %508 : vector<1x16xf32>
    %510 = arith.mulf %505, %509 : vector<1x16xf32>
    %511 = vector.extract_strided_slice %418 {offsets = [0, 0, 0], sizes = [1, 1, 64], strides = [1, 1, 1]} : vector<1x4x64xf32> to vector<1x1x64xf32>
    %512 = vector.shape_cast %511 : vector<1x1x64xf32> to vector<1x64xf32>
    %513 = arith.truncf %510 : vector<1x16xf32> to vector<1x16xbf16>
    %cst_97 = arith.constant dense<0.000000e+00> : vector<1x64xf32>
    %514 = tpu.matmul %513, %411, %cst_97 {dimension_numbers = #tpu.dot_dimension_numbers<[1], [0], [0], [1], [0, 0, 1, 1], [], []>} : vector<1x16xbf16>, vector<16x64xbf16>, vector<1x64xf32> -> vector<1x64xf32>
    %515 = arith.addf %512, %514 : vector<1x64xf32>
    %516 = vector.extract_strided_slice %515 {offsets = [0, 0], sizes = [1, 16], strides = [1, 1]} : vector<1x64xf32> to vector<1x16xf32>
    %517 = arith.negf %516 : vector<1x16xf32>
    %518 = math.exp %517 : vector<1x16xf32>
    %cst_98 = arith.constant 1.000000e+00 : f32
    %519 = vector.broadcast %cst_98 : f32 to vector<1x16xf32>
    %520 = arith.addf %519, %518 : vector<1x16xf32>
    %521 = arith.divf %519, %520 : vector<1x16xf32>
    %522 = vector.extract_strided_slice %515 {offsets = [0, 16], sizes = [1, 16], strides = [1, 1]} : vector<1x64xf32> to vector<1x16xf32>
    %523 = arith.negf %522 : vector<1x16xf32>
    %524 = math.exp %523 : vector<1x16xf32>
    %cst_99 = arith.constant 1.000000e+00 : f32
    %525 = vector.broadcast %cst_99 : f32 to vector<1x16xf32>
    %526 = arith.addf %525, %524 : vector<1x16xf32>
    %527 = arith.divf %525, %526 : vector<1x16xf32>
    %528 = vector.extract_strided_slice %515 {offsets = [0, 32], sizes = [1, 16], strides = [1, 1]} : vector<1x64xf32> to vector<1x16xf32>
    %529 = math.tanh %528 : vector<1x16xf32>
    %530 = vector.extract_strided_slice %515 {offsets = [0, 48], sizes = [1, 16], strides = [1, 1]} : vector<1x64xf32> to vector<1x16xf32>
    %531 = arith.negf %530 : vector<1x16xf32>
    %532 = math.exp %531 : vector<1x16xf32>
    %cst_100 = arith.constant 1.000000e+00 : f32
    %533 = vector.broadcast %cst_100 : f32 to vector<1x16xf32>
    %534 = arith.addf %533, %532 : vector<1x16xf32>
    %535 = arith.divf %533, %534 : vector<1x16xf32>
    %536 = arith.mulf %527, %508 : vector<1x16xf32>
    %537 = arith.mulf %521, %529 : vector<1x16xf32>
    %538 = arith.addf %536, %537 : vector<1x16xf32>
    %539 = math.tanh %538 : vector<1x16xf32>
    %540 = arith.mulf %535, %539 : vector<1x16xf32>
    %541 = vector.shape_cast %540 : vector<1x16xf32> to vector<1x1x16xf32>
    %542 = vector.shape_cast %510 : vector<1x16xf32> to vector<1x1x16xf32>
    %543 = vector.shape_cast %480 : vector<1x16xf32> to vector<1x1x16xf32>
    %544 = vector.shape_cast %450 : vector<1x16xf32> to vector<1x1x16xf32>
    %545 = tpu.concatenate %541, %542, %543, %544 in 1 : vector<1x1x16xf32>, vector<1x1x16xf32>, vector<1x1x16xf32>, vector<1x1x16xf32> -> vector<1x4x16xf32>
    %546 = tpu.concatenate %409, %545 in 2 : vector<1x4x16xf32>, vector<1x4x16xf32> -> vector<1x4x32xf32>
    %547 = vector.shape_cast %546 : vector<1x4x32xf32> to vector<4x32xf32>
    %548 = arith.truncf %547 : vector<4x32xf32> to vector<4x32xbf16>
    %c0_101 = arith.constant 0 : index
    %c0_102 = arith.constant 0 : index
    %549 = vector.load %arg14[%c0_101, %c0_102] : memref<32x48xbf16, #tpu.memory_space<vmem>>, vector<32x48xbf16>
    %cst_103 = arith.constant dense<0.000000e+00> : vector<4x48xf32>
    %550 = tpu.matmul %548, %549, %cst_103 {dimension_numbers = #tpu.dot_dimension_numbers<[1], [0], [0], [1], [0, 0, 1, 1], [], []>} : vector<4x32xbf16>, vector<32x48xbf16>, vector<4x48xf32> -> vector<4x48xf32>
    %c0_104 = arith.constant 0 : index
    %c0_105 = arith.constant 0 : index
    %551 = vector.load %arg15[%c0_104, %c0_105] : memref<1x48xf32, #tpu.memory_space<vmem>>, vector<1x48xf32>
    %552 = vector.broadcast %551 : vector<1x48xf32> to vector<4x48xf32>
    %553 = arith.addf %550, %552 : vector<4x48xf32>
    %554 = vector.shape_cast %553 : vector<4x48xf32> to vector<1x4x48xf32>
    %555 = vector.extract_strided_slice %554 {offsets = [0, 0, 0], sizes = [1, 4, 8], strides = [1, 1, 1]} : vector<1x4x48xf32> to vector<1x4x8xf32>
    %556 = vector.extract_strided_slice %554 {offsets = [0, 0, 8], sizes = [1, 4, 8], strides = [1, 1, 1]} : vector<1x4x48xf32> to vector<1x4x8xf32>
    %557 = vector.extract_strided_slice %554 {offsets = [0, 0, 16], sizes = [1, 4, 32], strides = [1, 1, 1]} : vector<1x4x48xf32> to vector<1x4x32xf32>
    %558 = arith.truncf %555 : vector<1x4x8xf32> to vector<1x4x8xbf16>
    %559 = arith.truncf %556 : vector<1x4x8xf32> to vector<1x4x8xbf16>
    "tpu.trace_start"() <{level = 10 : i32, message = "bqd,bkd->bqk"}> : () -> ()
    %cst_106 = arith.constant dense<0.000000e+00> : vector<1x4x4xf32>
    %560 = tpu.matmul %558, %559, %cst_106 {dimension_numbers = #tpu.dot_dimension_numbers<[2], [2], [1], [1], [0, 0, 0, 1, 1, 1], [0], [0]>} : vector<1x4x8xbf16>, vector<1x4x8xbf16>, vector<1x4x4xf32> -> vector<1x4x4xf32>
    "tpu.trace_stop"() : () -> ()
    %cst_107 = arith.constant 0.353553385 : f32
    %561 = vector.broadcast %cst_107 : f32 to vector<1x4x4xf32>
    %562 = arith.mulf %560, %561 : vector<1x4x4xf32>
    %cst_108 = arith.constant dense<0xFF800000> : vector<1x4xf32>
    %563 = vector.multi_reduction <maximumf>, %562, %cst_108 [2] : vector<1x4x4xf32> to vector<1x4xf32>
    %564 = vector.shape_cast %563 : vector<1x4xf32> to vector<1x4x1xf32>
    %565 = vector.broadcast %564 : vector<1x4x1xf32> to vector<1x4x4xf32>
    %566 = arith.subf %562, %565 : vector<1x4x4xf32>
    %567 = math.exp %566 : vector<1x4x4xf32>
    %cst_109 = arith.constant dense<0.000000e+00> : vector<1x4xf32>
    %568 = vector.multi_reduction <add>, %567, %cst_109 [2] : vector<1x4x4xf32> to vector<1x4xf32>
    %569 = vector.shape_cast %568 : vector<1x4xf32> to vector<1x4x1xf32>
    %570 = tpu.reciprocal %569 {approx = true} : vector<1x4x1xf32> -> vector<1x4x1xf32>
    %571 = vector.broadcast %570 : vector<1x4x1xf32> to vector<1x4x4xf32>
    %572 = arith.mulf %567, %571 : vector<1x4x4xf32>
    %573 = arith.truncf %572 : vector<1x4x4xf32> to vector<1x4x4xbf16>
    %574 = arith.truncf %557 : vector<1x4x32xf32> to vector<1x4x32xbf16>
    "tpu.trace_start"() <{level = 10 : i32, message = "bqk,bkd->bqd"}> : () -> ()
    %cst_110 = arith.constant dense<0.000000e+00> : vector<1x4x32xf32>
    %575 = tpu.matmul %573, %574, %cst_110 {dimension_numbers = #tpu.dot_dimension_numbers<[2], [1], [1], [2], [0, 0, 0, 1, 1, 2], [0], [0]>} : vector<1x4x4xbf16>, vector<1x4x32xbf16>, vector<1x4x32xf32> -> vector<1x4x32xf32>
    "tpu.trace_stop"() : () -> ()
    %576 = vector.shape_cast %575 : vector<1x4x32xf32> to vector<4x32xf32>
    %577 = arith.truncf %576 : vector<4x32xf32> to vector<4x32xbf16>
    %c0_111 = arith.constant 0 : index
    %c0_112 = arith.constant 0 : index
    %578 = vector.load %arg16[%c0_111, %c0_112] : memref<32x128xbf16, #tpu.memory_space<vmem>>, vector<32x128xbf16>
    %cst_113 = arith.constant dense<0.000000e+00> : vector<4x128xf32>
    %579 = tpu.matmul %577, %578, %cst_113 {dimension_numbers = #tpu.dot_dimension_numbers<[1], [0], [0], [1], [0, 0, 1, 1], [], []>} : vector<4x32xbf16>, vector<32x128xbf16>, vector<4x128xf32> -> vector<4x128xf32>
    %c0_114 = arith.constant 0 : index
    %c0_115 = arith.constant 0 : index
    %580 = vector.load %arg17[%c0_114, %c0_115] : memref<1x128xf32, #tpu.memory_space<vmem>>, vector<1x128xf32>
    %581 = vector.broadcast %580 : vector<1x128xf32> to vector<4x128xf32>
    %582 = arith.addf %579, %581 : vector<4x128xf32>
    %583 = arith.negf %582 : vector<4x128xf32>
    %584 = math.exp %583 : vector<4x128xf32>
    %cst_116 = arith.constant 1.000000e+00 : f32
    %585 = vector.broadcast %cst_116 : f32 to vector<4x128xf32>
    %586 = arith.addf %585, %584 : vector<4x128xf32>
    %587 = arith.divf %585, %586 : vector<4x128xf32>
    %588 = vector.shape_cast %587 : vector<4x128xf32> to vector<1x4x128xf32>
    %c0_117 = arith.constant 0 : index
    %c0_118 = arith.constant 0 : index
    %c0_119 = arith.constant 0 : index
    %589 = vector.load %arg18[%c0_117, %c0_118, %c0_119] : memref<1x4x128xf32, #tpu.memory_space<vmem>>, vector<1x4x128xf32>
    tpu.vector_store %arg18[%c0_117, %c0_118, %c0_119], %588 {strides = array<i32>} : memref<1x4x128xf32, #tpu.memory_space<vmem>>, vector<1x4x128xf32>,
    return
  }
  func.func @transform_0(%arg0: i32) -> (i32, i32, i32) {
    %c0_i32 = arith.constant 0 : i32
    %c0_i32_0 = arith.constant 0 : i32
    %c0_i32_1 = arith.constant 0 : i32
    return %arg0, %c0_i32, %c0_i32_0 : i32, i32, i32
  }
  func.func @transform_1(%arg0: i32) -> (i32, i32) {
    %c0_i32 = arith.constant 0 : i32
    %c0_i32_0 = arith.constant 0 : i32
    %c0_i32_1 = arith.constant 0 : i32
    return %c0_i32, %c0_i32_0 : i32, i32
  }
  func.func @transform_2(%arg0: i32) -> (i32, i32) {
    %c0_i32 = arith.constant 0 : i32
    %c0_i32_0 = arith.constant 0 : i32
    %c0_i32_1 = arith.constant 0 : i32
    return %c0_i32, %c0_i32_0 : i32, i32
  }
  func.func @transform_3(%arg0: i32) -> (i32, i32) {
    %c0_i32 = arith.constant 0 : i32
    %c0_i32_0 = arith.constant 0 : i32
    %c0_i32_1 = arith.constant 0 : i32
    return %c0_i32, %c0_i32_0 : i32, i32
  }
  func.func @transform_4(%arg0: i32) -> (i32, i32) {
    %c0_i32 = arith.constant 0 : i32
    %c0_i32_0 = arith.constant 0 : i32
    %c0_i32_1 = arith.constant 0 : i32
    return %c0_i32, %c0_i32_0 : i32, i32
  }
  func.func @transform_5(%arg0: i32) -> (i32, i32) {
    %c0_i32 = arith.constant 0 : i32
    %c0_i32_0 = arith.constant 0 : i32
    %c0_i32_1 = arith.constant 0 : i32
    return %c0_i32, %c0_i32_0 : i32, i32
  }
  func.func @transform_6(%arg0: i32) -> (i32, i32) {
    %c0_i32 = arith.constant 0 : i32
    %c0_i32_0 = arith.constant 0 : i32
    %c0_i32_1 = arith.constant 0 : i32
    return %c0_i32, %c0_i32_0 : i32, i32
  }
  func.func @transform_7(%arg0: i32) -> (i32, i32) {
    %c0_i32 = arith.constant 0 : i32
    %c0_i32_0 = arith.constant 0 : i32
    %c0_i32_1 = arith.constant 0 : i32
    return %c0_i32, %c0_i32_0 : i32, i32
  }
  func.func @transform_8(%arg0: i32) -> (i32, i32) {
    %c0_i32 = arith.constant 0 : i32
    %c0_i32_0 = arith.constant 0 : i32
    %c0_i32_1 = arith.constant 0 : i32
    return %c0_i32, %c0_i32_0 : i32, i32
  }
  func.func @transform_9(%arg0: i32) -> (i32, i32) {
    %c0_i32 = arith.constant 0 : i32
    %c0_i32_0 = arith.constant 0 : i32
    %c0_i32_1 = arith.constant 0 : i32
    return %c0_i32, %c0_i32_0 : i32, i32
  }
  func.func @transform_10(%arg0: i32) -> (i32, i32) {
    %c0_i32 = arith.constant 0 : i32
    %c0_i32_0 = arith.constant 0 : i32
    %c0_i32_1 = arith.constant 0 : i32
    return %c0_i32, %c0_i32_0 : i32, i32
  }
  func.func @transform_11(%arg0: i32) -> (i32, i32) {
    %c0_i32 = arith.constant 0 : i32
    %c0_i32_0 = arith.constant 0 : i32
    %c0_i32_1 = arith.constant 0 : i32
    return %c0_i32, %c0_i32_0 : i32, i32
  }
  func.func @transform_12(%arg0: i32) -> (i32, i32) {
    %c0_i32 = arith.constant 0 : i32
    %c0_i32_0 = arith.constant 0 : i32
    %c0_i32_1 = arith.constant 0 : i32
    return %c0_i32, %c0_i32_0 : i32, i32
  }
  func.func @transform_13(%arg0: i32) -> (i32, i32) {
    %c0_i32 = arith.constant 0 : i32
    %c0_i32_0 = arith.constant 0 : i32
    %c0_i32_1 = arith.constant 0 : i32
    return %c0_i32, %c0_i32_0 : i32, i32
  }
  func.func @transform_14(%arg0: i32) -> (i32, i32) {
    %c0_i32 = arith.constant 0 : i32
    %c0_i32_0 = arith.constant 0 : i32
    %c0_i32_1 = arith.constant 0 : i32
    return %c0_i32, %c0_i32_0 : i32, i32
  }
  func.func @transform_15(%arg0: i32) -> (i32, i32) {
    %c0_i32 = arith.constant 0 : i32
    %c0_i32_0 = arith.constant 0 : i32
    %c0_i32_1 = arith.constant 0 : i32
    return %c0_i32, %c0_i32_0 : i32, i32
  }
  func.func @transform_16(%arg0: i32) -> (i32, i32) {
    %c0_i32 = arith.constant 0 : i32
    %c0_i32_0 = arith.constant 0 : i32
    %c0_i32_1 = arith.constant 0 : i32
    return %c0_i32, %c0_i32_0 : i32, i32
  }
  func.func @transform_17(%arg0: i32) -> (i32, i32, i32) {
    %c0_i32 = arith.constant 0 : i32
    %c0_i32_0 = arith.constant 0 : i32
    %c0_i32_1 = arith.constant 0 : i32
    return %arg0, %c0_i32, %c0_i32_0 : i32, i32, i32
  }
}

</mosaic_0001>

<bundles_post_ra>
// kernel: pitch_forward.3
= control target key start
LH: loop header
LB: loop body
LE: loop exit
PB: predicated region body
PF: predicated region fallthrough
CT: control target
= control target key end

     0   :  { %s3461_s0 = inlined_call_operand.vmem [shape: f32[2,4,8], index: 0, kind: input, shape index: {}]   ;;  %s3462_s1 = inlined_call_operand.vmem [shape: bf16[8,64], index: 1, kind: input, shape index: {}]   ;;  %s3463_s2 = inlined_call_operand.vmem [shape: bf16[16,64], index: 2, kind: input, shape index: {}]   ;;  %s3464_s3 = inlined_call_operand.vmem [shape: f32[1,64], index: 3, kind: input, shape index: {}]   ;;  %s3465_s4 = inlined_call_operand.vmem [shape: bf16[8,64], index: 4, kind: input, shape index: {}]   ;;  %s3466_s5 = inlined_call_operand.vmem [shape: bf16[16,64], index: 5, kind: input, shape index: {}]   ;;  %s3467_s6 = inlined_call_operand.vmem [shape: f32[1,64], index: 6, kind: input, shape index: {}]   ;;  %s3468_s7 = inlined_call_operand.vmem [shape: bf16[32,64], index: 7, kind: input, shape index: {}]   ;;  %s3469_s8 = inlined_call_operand.vmem [shape: bf16[16,64], index: 8, kind: input, shape index: {}]   ;;  %s3470_s9 = inlined_call_operand.vmem [shape: f32[1,64], index: 9, kind: input, shape index: {}]   ;;  %s3471_s10 = inlined_call_operand.vmem [shape: bf16[32,64], index: 10, kind: input, shape index: {}]   ;;  %s3472_s11 = inlined_call_operand.vmem [shape: bf16[16,64], index: 11, kind: input, shape index: {}]   ;;  %s3473_s12 = inlined_call_operand.vmem [shape: f32[1,64], index: 12, kind: input, shape index: {}]   ;;  %s3474_s13 = inlined_call_operand.vmem [shape: bf16[32,48], index: 13, kind: input, shape index: {}]   ;;  %s3475_s14 = inlined_call_operand.vmem [shape: f32[1,48], index: 14, kind: input, shape index: {}]   ;;  %s3476_s15 = inlined_call_operand.vmem [shape: bf16[32,128], index: 15, kind: input, shape index: {}]   ;;  %s3477_s16 = inlined_call_operand.vmem [shape: f32[1,128], index: 16, kind: input, shape index: {}]   ;;  %s3478_s17 = inlined_call_operand.hbm [shape: f32[2,4,128], index: 17, kind: output, shape index: {}]  }
   0x1   :  { %3485 = sst [smem:[#allocation5_spill]] %s3461_s0 }
   0x2   :  { %3486 = sst [smem:[#allocation6_spill]] %s3462_s1 }
   0x3   :  { %3487 = sst [smem:[#allocation7_spill]] %s3463_s2 }
   0x4   :  { %3488 = sst [smem:[#allocation8_spill]] %s3464_s3 }
   0x5   :  { %3489 = sst [smem:[#allocation9_spill]] %s3465_s4 }
   0x6   :  { %3490 = sst [smem:[#allocation10_spill]] %s3466_s5 }
   0x7   :  { %3491 = sst [smem:[#allocation11_spill]] %s3467_s6 }
   0x8   :  { %3492 = sst [smem:[#allocation12_spill]] %s3468_s7 }
   0x9   :  { %22 = vsyncpa [#allocation3], 0 }
   0xa   :  { %24 = vsyncpa [#allocation3 + $0x1], 0  ;;  %s3022_s24 = smov 0   ;;  %s3024_s25 = smov 0  }
   0xb   :  { %s3026_s26 = smov 0   ;;  %s3028_s27 = smov 0  }
   0xc LB: > { %s3043_s28 = sadd.s32 4294967295, %s2920_s27   ;;  %s2395_s29 = sadd.s32 4294967294, %s2920_s27   ;;  %s2920_s27 = sphi %s3028_s27, %s3509_s27   ;;  %s2916_s26 = sphi %s3026_s26, %s3508_s26   ;;  %s2912_s25 = sphi %s3024_s25, %s3507_s25   ;;  %s2908_s24 = sphi %s3022_s24, %s3506_s24  }
   0xd   : > { %s3047_s0 = sadd.s32 1, %s2920_s27   ;;  %s399_s30 = sadd.s32 1, %s2916_s26 }
   0xe   : > { %s396_s18 = ssub.s32 %s2920_s27, %s3047_s0  ;;  %p409_p0 = scmp.ne.s32.totalorder %s2916_s26, %s2912_s25 }
   0xf   : > { %p397_p1 = scmp.eq.s32.totalorder %s396_s18, 0  ;;  %p410_p2 = scmp.eq.s32.totalorder %s3043_s28, 1 }
  0x10   : > { %p415_p3 = scmp.ne.s32.totalorder %s2912_s25, %s2908_s24  ;;  %p416_p4 = scmp.eq.s32.totalorder %s2395_s29, 1 }
  0x11   : > { %s3058_s19 = scalar_select %p397_p1, %s2916_s26, %s399_s30  }
  0x12   : > { %p3060_p5 = por %p410_p2, %p409_p0  ;;  %p3064_p6 = por %p416_p4, %p415_p3 }
  0x13   : > { %p2398_p7 = scmp.ge.s32.totalorder %s2920_s27, 1  ;;  %p489_p8 = scmp.lt.s32.totalorder %s2920_s27, 3 }
  0x15   : > { %p490_p9 = pnand %p2398_p7, %p489_p8 }
  0x16   : > { %s3495_s2 = sld [smem:[#allocation7_spill]] (!%p490_p9)  ;;  %p540_p10 = scmp.lt.s32.totalorder (!%p490_p9), %s3043_s28, 1 }
  0x17   : > { %493 = sbr.rel (%p490_p9) target bundleno = 11045 (0x2b25), region = 88  ;;  %s3496_s30 = sld [smem:[#allocation6_spill]] (!%p490_p9) }
  0x18   : > { %s3497_s29 = sld [smem:[#allocation5_spill]] (!%p490_p9)  ;;  %s3483_s23 = smov (!%p490_p9), 16  }
  0x19   : > { %s3498_s3 = sld [smem:[#allocation8_spill]] (!%p490_p9)  ;;  %s3504_s22 = smov (!%p490_p9), 96  }
  0x1a   : > { %s3499_s4 = sld [smem:[#allocation9_spill]] (!%p490_p9) }
  0x1b   : > { %s3500_s5 = sld [smem:[#allocation10_spill]] (!%p490_p9) }
  0x1c   : > { %v3073_v0 = vld [vmem:[%s3495_s2] sm:$0xff]   ;;  %v2922_v1 = vmov 0.0   ;;  %vm561_vm0 = vcmask 1043456   ;;  %vm2923_vm1 = vmmov 0   ;;  %s541_s18 = scalar_select %p540_p10, %s3043_s28, 1  ;;  %v2924_v4 = vmov 0  }
  0x1d   : > { %2518 = vmatprep.subr.bf16.mxu1 %v2922_v1  ;;  %2512 = vmatprep.subr.bf16.mxu0 %v2922_v1  ;;  %v546_v2 = vld [vmem:[%s3496_s30] sm:$0xf]  ;;  %vm557_vm2 = vcmask 64512   ;;  %vm611_vm3 = vcmask 130048   ;;  %vm917_vm4 = vcmask 1040384   ;;  %vm919_vm5 = vcmask 1041408  }
  0x1e   : > { %2519 = vmatpush3.bf16.msra.mxu1 %v3073_v0  ;;  %2520 = vmatprep.mubr.msk.bf16.mxu1 %vm2923_vm1, %v2922_v1  ;;  %v563_v3 = vsel %vm561_vm0, %v546_v2, 0  ;;  %s2400_s21 = sshll.u32 %s541_s18, 2  ;;  %s3501_s6 = sld [smem:[#allocation11_spill]]  ;;  %vm921_vm6 = vcmask 1042432   ;;  %vm1325_vm7 = vcmask 261120   ;;  %vm2186_vm8 = vcmask 27648  }
  0x1f   : > { %2513 = vmatpush3.bf16.msra.mxu0 %v563_v3  ;;  %2514 = vmatprep.mubr.msk.bf16.mxu0 %vm2923_vm1, %v2922_v1  ;;  %s543_s30 = scalar_lea.vmem %s3497_s29, %s2400_s21  ;;  %v2401_v9 = vld [vmem:[%s3498_s3] ss:$0 sm:$0xff]  ;;  %s3479_s21 = smov 96   ;;  %vm2201_vm9 = vcmask 31744  }
  0x20   : > { %2524 = vmatprep.subr.bf16.mxu0 %v2922_v1  ;;  %2530 = vmatprep.subr.bf16.mxu1 %v2922_v1  ;;  %v545_v5 = vld [vmem:[%s543_s30] sm:$0xf]  ;;  %s2927_s29 = smov 32   ;;  %s3481_s30 = smov 80  }
  0x21   : > { %2521 = vmatmul.mubr.bf16.vlgmr.msra.gmra.mxu1 %v2924_v4  ;;  %v3098_v6 = vpack.c.bf16 %v545_v5, %v545_v5  ;;  %v923_v55 = vld [vmem:[%s3499_s4] sm:$0xf]  ;;  %s3502_s7 = sld [smem:[#allocation12_spill]]  ;;  %s3505_s2 = smov 16  }
  0x22   : > { %2531 = vmatpush3.bf16.msra.mxu1 %v3073_v0  ;;  %2532 = vmatprep.mubr.msk.bf16.mxu1 %vm2923_vm1, %v2922_v1  ;;  %v934_v56 = vsel %vm561_vm0, %v923_v55, 0 }
  0x23   : > { %2542 = vmatprep.subr.bf16.mxu1 %v2922_v1  ;;  %2515 = vmatmul.mubr.msk.bf16.vlgmr.msra.gmra.mxu0 %vm557_vm2, %v3098_v6 }
  0x24   : > { %2525 = vmatpush3.bf16.msra.mxu0 %v3073_v0  ;;  %2526 = vmatprep.mubr.msk.bf16.mxu0 %vm2923_vm1, %v2922_v1 }
  0x25   : > { %2536 = vmatprep.subr.bf16.mxu0 %v2922_v1 }
  0xe1   : > { %v649_v7 = vpop.f32.mrf.mxu1 }
  0xe3   : > { %v2522_v8 = vpop.f32.mrf.mxu1  ;;  %v599_v11 = vpop.f32.mrf.mxu0 }
  0xe4   : > { %v3109_v13 = vadd.f32 %v2401_v9, %v599_v11 }
  0xe5   : > { %v652_v10 = vpop.f32.mrf.mxu1  ;;  %v2516_v14 = vpop.f32.mrf.mxu0 }
  0xe6   : > { %v655_v15 = vadd.f32 %v649_v7, %v3109_v13 }
  0xe7   : > { %v2523_v12 = vpop.f32.mrf.mxu1  ;;  %v602_v16 = vpop.f32.mrf.mxu0 }
  0xe8   : > { %2724 = vtanh.f32 %v655_v15  ;;  %v2404_v19 = vmul.f32 -1.442695, %v655_v15  ;;  %v3152_v15 = vld [vmem:[%s3500_s5] sm:$0xff]  }
  0xe9   : > { %v2517_v17 = vpop.f32.mrf.mxu0 }
  0xea   : > { %2726 = vpow2.f32 %v2404_v19 }
  0xf5   : > { %v2725_v18 = vpop.eup %2724 }
  0xf6   : > { %665 = vrot.lane.b32.xlu0 %v2725_v18, %s3479_s21 }
  0xf7   : > { %v2727_v20 = vpop.eup %2726 }
  0xf8   : > { %v659_v21 = vadd.f32 1.0, %v2727_v20 }
  0xfa   : > { %2728 = vrcp.f32 %v659_v21 }
 0x107   : > { %v2729_v22 = vpop.eup %2728 }
 0x108   : > { %v663_v25 = vmul.f32 0.0, %v2729_v22 }
 0x168   : > { %v666_v23 = vpop.permute.xlu0 %665 }
 0x169   : > { %v668_v24 = vmul.f32 %v2729_v22, %v666_v23 }
 0x16b   : > { %670 = vrot.lane.b32.xlu0 %v668_v24, %s3483_s23 }
 0x1dd   : > { %v671_v26 = vpop.permute.xlu0 %670 }
 0x1de   : > { %v673_v27 = vadd.f32 %v671_v26, %v663_v25 }
 0x1e0   : > { %2730 = vtanh.f32 %v673_v27  ;;  %v739_v46 = vrot.slane %v673_v27, 7 }
 0x1ed   : > { %v2731_v28 = vpop.eup %2730 }
 0x1ee   : > { %676 = vrot.lane.b32.xlu1 %v2731_v28, %s2927_s29 }
 0x260   : > { %v677_v29 = vpop.permute.xlu1 %676 }
 0x261   : > { %v3115_v30 = vmul.f32 %v2729_v22, %v677_v29  ;;  %v2411_v29 = vld [vmem:[%s3501_s6] ss:$0 sm:$0xff]  ;;  %s2931_s6 = smov [#allocation2]  }
 0x263   : > { %v680_v31 = vpack.c.bf16 %v3115_v30, %v3115_v30 }
 0x265   : > { %682 = vrot.lane.b32.xlu1 %v680_v31, %s3481_s30 }
 0x2d7   : > { %v683_v32 = vpop.permute.xlu1 %682 }
 0x2d8   : > { %2527 = vmatmul.mubr.msk.bf16.vlgmr.msra.gmra.mxu0 %vm611_vm3, %v683_v32 }
 0x2d9   : > { %2537 = vmatpush3.bf16.msra.mxu0 %v3073_v0  ;;  %2538 = vmatprep.mubr.msk.bf16.mxu0 %vm2923_vm1, %v2922_v1 }
 0x2da   : > { %2548 = vmatprep.subr.bf16.mxu0 %v2922_v1 }
 0x398   : > { %v721_v33 = vpop.f32.mrf.mxu0 }
 0x399   : > { %v728_v34 = vrot.slane %v721_v33, 7 }
 0x39a   : > { %v2528_v35 = vpop.f32.mrf.mxu0 }
 0x39b   : > { %v730_v36 = vadd.f32 %v728_v34, %v3109_v13 }
 0x39c   : > { %v724_v37 = vpop.f32.mrf.mxu0 }
 0x39d   : > { %2732 = vtanh.f32 %v730_v36  ;;  %v2406_v40 = vmul.f32 -1.442695, %v730_v36 }
 0x39e   : > { %v2529_v38 = vpop.f32.mrf.mxu0 }
 0x39f   : > { %2734 = vpow2.f32 %v2406_v40 }
 0x3aa   : > { %v2733_v39 = vpop.eup %2732 }
 0x3ab   : > { %743 = vrot.lane.b32.xlu0 %v2733_v39, %s3479_s21 }
 0x3ac   : > { %v2735_v41 = vpop.eup %2734 }
 0x3ad   : > { %v734_v42 = vadd.f32 1.0, %v2735_v41 }
 0x3af   : > { %2736 = vrcp.f32 %v734_v42 }
 0x3bc   : > { %v2737_v43 = vpop.eup %2736 }
 0x3bd   : > { %v741_v47 = vmul.f32 %v2737_v43, %v739_v46 }
 0x41d   : > { %v744_v44 = vpop.permute.xlu0 %743 }
 0x41e   : > { %v746_v45 = vmul.f32 %v2737_v43, %v744_v44 }
 0x420   : > { %748 = vrot.lane.b32.xlu1 %v746_v45, %s3483_s23 }
 0x492   : > { %v749_v48 = vpop.permute.xlu1 %748 }
 0x493   : > { %v751_v49 = vadd.f32 %v749_v48, %v741_v47 }
 0x495   : > { %2738 = vtanh.f32 %v751_v49  ;;  %v819_v9 = vrot.slane %v751_v49, 7 }
 0x4a2   : > { %v2739_v50 = vpop.eup %2738 }
 0x4a3   : > { %754 = vrot.lane.b32.xlu0 %v2739_v50, %s2927_s29 }
 0x515   : > { %v755_v51 = vpop.permute.xlu0 %754 }
 0x516   : > { %v757_v52 = vmul.f32 %v2737_v43, %v755_v51 }
 0x518   : > { %v758_v53 = vpack.c.bf16 %v757_v52, %v757_v52  ;;  %v918_v18 = vsel %vm917_vm4, %v3115_v30, %v757_v52 }
 0x51a   : > { %v760_v54 = vshrl.u32 %v758_v53, 16 }
 0x51c   : > { %762 = vrot.lane.b32.xlu1 %v760_v54, %s3481_s30 }
 0x58e   : > { %v763_v57 = vpop.permute.xlu1 %762 }
 0x58f   : > { %2533 = vmatmul.mubr.msk.bf16.vlgmr.msra.gmra.mxu1 %vm611_vm3, %v763_v57 }
 0x590   : > { %2543 = vmatpush3.bf16.msra.mxu1 %v934_v56  ;;  %2544 = vmatprep.mubr.msk.bf16.mxu1 %vm2923_vm1, %v2922_v1 }
 0x591   : > { %2554 = vmatprep.subr.bf16.mxu1 %v2922_v1 }
 0x597   : > { %2545 = vmatmul.mubr.msk.bf16.vlgmr.msra.gmra.mxu1 %vm557_vm2, %v3098_v6 }
 0x598   : > { %2556 = vmatprep.mubr.msk.bf16.mxu1 %vm2923_vm1, %v2922_v1  ;;  %2555 = vmatpush3.bf16.msra.mxu1 %v3152_v15 }
 0x599   : > { %2566 = vmatprep.subr.bf16.mxu1 %v2922_v1 }
 0x64f   : > { %v801_v58 = vpop.f32.mrf.mxu1 }
 0x650   : > { %v808_v59 = vrot.slane %v801_v58, 6 }
 0x651   : > { %v2534_v60 = vpop.f32.mrf.mxu1 }
 0x652   : > { %v810_v61 = vadd.f32 %v808_v59, %v3109_v13 }
 0x653   : > { %v804_v62 = vpop.f32.mrf.mxu1 }
 0x654   : > { %2740 = vtanh.f32 %v810_v61  ;;  %v2408_v2 = vmul.f32 -1.442695, %v810_v61 }
 0x655   : > { %v2535_v63 = vpop.f32.mrf.mxu1 }
 0x656   : > { %2742 = vpow2.f32 %v2408_v2 }
 0x657   : > { %v970_v23 = vpop.f32.mrf.mxu1 }
 0x658   : > { %v3177_v32 = vadd.f32 %v2411_v29, %v970_v23 }
 0x659   : > { %v2546_v24 = vpop.f32.mrf.mxu1 }
 0x65b   : > { %v973_v25 = vpop.f32.mrf.mxu1 }
 0x65d   : > { %v2547_v26 = vpop.f32.mrf.mxu1 }
 0x661   : > { %v2741_v0 = vpop.eup %2740 }
 0x662   : > { %823 = vrot.lane.b32.xlu0 %v2741_v0, %s3479_s21 }
 0x663   : > { %v2743_v3 = vpop.eup %2742 }
 0x664   : > { %v814_v5 = vadd.f32 1.0, %v2743_v3 }
 0x666   : > { %2744 = vrcp.f32 %v814_v5 }
 0x673   : > { %v2745_v6 = vpop.eup %2744 }
 0x674   : > { %v821_v10 = vmul.f32 %v2745_v6, %v819_v9 }
 0x6d4   : > { %v824_v7 = vpop.permute.xlu0 %823 }
 0x6d5   : > { %v826_v8 = vmul.f32 %v2745_v6, %v824_v7 }
 0x6d7   : > { %828 = vrot.lane.b32.xlu1 %v826_v8, %s3483_s23 }
 0x749   : > { %v829_v11 = vpop.permute.xlu1 %828 }
 0x74a   : > { %v3145_v12 = vadd.f32 %v829_v11, %v821_v10 }
 0x74c   : > { %2746 = vtanh.f32 %v3145_v12 }
 0x759   : > { %v2747_v14 = vpop.eup %2746 }
 0x75a   : > { %834 = vrot.lane.b32.xlu0 %v2747_v14, %s2927_s29 }
 0x7cc   : > { %v835_v16 = vpop.permute.xlu0 %834 }
 0x7cd   : > { %v837_v17 = vmul.f32 %v2745_v6, %v835_v16 }
 0x7cf   : > { %v838_v19 = vpack.c.bf16 %v837_v17, %v837_v17  ;;  %v3159_v20 = vsel %vm919_vm5, %v918_v18, %v837_v17 }
 0x7d1   : > { %v840_v21 = vrot.slane %v838_v19, 1 }
 0x7d3   : > { %841 = vrot.lane.b32.xlu1 %v840_v21, %s3481_s30 }
 0x845   : > { %v842_v22 = vpop.permute.xlu1 %841 }
 0x846   : > { %2539 = vmatmul.mubr.msk.bf16.vlgmr.msra.gmra.mxu0 %vm611_vm3, %v842_v22 }
 0x847   : > { %2549 = vmatpush3.bf16.msra.mxu0 %v3152_v15  ;;  %2550 = vmatprep.mubr.msk.bf16.mxu0 %vm2923_vm1, %v2922_v1 }
 0x848   : > { %2560 = vmatprep.subr.bf16.mxu0 %v2922_v1 }
 0x84e   : > { %2551 = vmatmul.mubr.bf16.vlgmr.msra.gmra.mxu0 %v2924_v4 }
 0x84f   : > { %2561 = vmatpush3.bf16.msra.mxu0 %v3152_v15  ;;  %2562 = vmatprep.mubr.msk.bf16.mxu0 %vm2923_vm1, %v2922_v1 }
 0x850   : > { %2572 = vmatprep.subr.bf16.mxu0 %v2922_v1 }
 0x906   : > { %v3172_v27 = vpop.f32.mrf.mxu0 }
 0x908   : > { %v2540_v28 = vpop.f32.mrf.mxu0 }
 0x90a   : > { %v883_v30 = vpop.f32.mrf.mxu0 }
 0x90c   : > { %v2541_v31 = vpop.f32.mrf.mxu0 }
 0x90e   : > { %v1016_v33 = vpop.f32.mrf.mxu0 }
 0x90f   : > { %v1023_v34 = vrot.slane %v1016_v33, 5 }
 0x910   : > { %v2552_v35 = vpop.f32.mrf.mxu0 }
 0x911   : > { %v1025_v36 = vadd.f32 %v1023_v34, %v3177_v32 }
 0x912   : > { %v1019_v37 = vpop.f32.mrf.mxu0 }
 0x913   : > { %2748 = vtanh.f32 %v1025_v36  ;;  %v2414_v40 = vmul.f32 -1.442695, %v1025_v36 }
 0x914   : > { %v2553_v38 = vpop.f32.mrf.mxu0 }
 0x915   : > { %2750 = vpow2.f32 %v2414_v40  ;;  %v887_v40 = vrot.slane %v3172_v27, 5 }
 0x920   : > { %v2749_v39 = vpop.eup %2748 }
 0x921   : > { %1035 = vrot.lane.b32.xlu0 %v2749_v39, %s3479_s21 }
 0x922   : > { %v2751_v41 = vpop.eup %2750 }
 0x923   : > { %v1029_v42 = vadd.f32 1.0, %v2751_v41  ;;  %v889_v41 = vadd.f32 %v887_v40, %v3109_v13 }
 0x925   : > { %2752 = vrcp.f32 %v1029_v42 }
 0x932   : > { %v2753_v43 = vpop.eup %2752 }
 0x933   : > { %v1033_v46 = vmul.f32 0.0, %v2753_v43 }
 0x993   : > { %v1036_v44 = vpop.permute.xlu0 %1035 }
 0x994   : > { %v1038_v45 = vmul.f32 %v2753_v43, %v1036_v44 }
 0x996   : > { %1040 = vrot.lane.b32.xlu1 %v1038_v45, %s3483_s23 }
 0xa08   : > { %v1041_v47 = vpop.permute.xlu1 %1040 }
 0xa09   : > { %v1043_v48 = vadd.f32 %v1041_v47, %v1033_v46  ;;  %v2410_v47 = vmul.f32 -1.442695, %v889_v41 }
 0xa0b   : > { %2754 = vtanh.f32 %v1043_v48  ;;  %v1112_v7 = vrot.slane %v1043_v48, 1 }
 0xa18   : > { %v2755_v49 = vpop.eup %2754 }
 0xa19   : > { %1046 = vrot.lane.b32.xlu0 %v2755_v49, %s2927_s29 }
 0xa8b   : > { %v1047_v50 = vpop.permute.xlu0 %1046 }
 0xa8c   : > { %v3183_v51 = vmul.f32 %v2753_v43, %v1047_v50 }
 0xa8e   : > { %v1050_v52 = vpack.c.bf16 %v3183_v51, %v3183_v51 }
 0xa90   : > { %v1052_v53 = vshrl.u32 %v1050_v52, 16 }
 0xa92   : > { %v1054_v54 = vrot.slane %v1052_v53, 1  ;;  %v898_v53 = vrot.slane %v3145_v12, 7 }
 0xa94   : > { %1055 = vrot.lane.b32.xlu1 %v1054_v54, %s3481_s30 }
 0xb06   : > { %v1056_v55 = vpop.permute.xlu1 %1055 }
 0xb07   : > { %2557 = vmatmul.mubr.msk.bf16.vlgmr.msra.gmra.mxu1 %vm611_vm3, %v1056_v55 }
 0xb08   : > { %2567 = vmatpush3.bf16.msra.mxu1 %v3152_v15  ;;  %2568 = vmatprep.mubr.msk.bf16.mxu1 %vm2923_vm1, %v2922_v1 }
 0xb09   : > { %2580 = vmatprep.subr.bf16.mxu1 %v2922_v1 }
 0xbc7   : > { %v1094_v56 = vpop.f32.mrf.mxu1 }
 0xbc8   : > { %v1101_v57 = vrot.slane %v1094_v56, 6 }
 0xbc9   : > { %v2558_v58 = vpop.f32.mrf.mxu1 }
 0xbca   : > { %v1103_v59 = vadd.f32 %v1101_v57, %v3177_v32 }
 0xbcb   : > { %v1097_v60 = vpop.f32.mrf.mxu1 }
 0xbcc   : > { %2756 = vtanh.f32 %v1103_v59  ;;  %v2416_v63 = vmul.f32 -1.442695, %v1103_v59 }
 0xbcd   : > { %v2559_v61 = vpop.f32.mrf.mxu1 }
 0xbce   : > { %2758 = vpow2.f32 %v2416_v63 }
 0xbd9   : > { %v2757_v62 = vpop.eup %2756 }
 0xbda   : > { %1116 = vrot.lane.b32.xlu0 %v2757_v62, %s3479_s21 }
 0xbdb   : > { %v2759_v0 = vpop.eup %2758 }
 0xbdc   : > { %v1107_v2 = vadd.f32 1.0, %v2759_v0 }
 0xbde   : > { %2760 = vrcp.f32 %v1107_v2 }
 0xbeb   : > { %v2761_v3 = vpop.eup %2760 }
 0xbec   : > { %v1114_v8 = vmul.f32 %v2761_v3, %v1112_v7 }
 0xc4c   : > { %v1117_v5 = vpop.permute.xlu0 %1116 }
 0xc4d   : > { %v1119_v6 = vmul.f32 %v2761_v3, %v1117_v5 }
 0xc4f   : > { %1121 = vrot.lane.b32.xlu1 %v1119_v6, %s3483_s23 }
 0xcc1   : > { %v1122_v9 = vpop.permute.xlu1 %1121 }
 0xcc2   : > { %v1124_v10 = vadd.f32 %v1122_v9, %v1114_v8 }
 0xcc4   : > { %2762 = vtanh.f32 %v1124_v10  ;;  %v1191_v35 = vrot.slane %v1124_v10, 1  ;;  %v2714_v10 = vld [vmem:[%s3502_s7 + $0x8] sm:$0xff]  }
 0xcd1   : > { %v2763_v11 = vpop.eup %2762 }
 0xcd2   : > { %1127 = vrot.lane.b32.xlu0 %v2763_v11, %s2927_s29  ;;  %v3232_v11 = vld [vmem:[%s3469_s8] sm:$0xff]  }
 0xd44   : > { %v1128_v14 = vpop.permute.xlu0 %1127 }
 0xd45   : > { %v3197_v15 = vmul.f32 %v2761_v3, %v1128_v14 }
 0xd47   : > { %v1131_v16 = vpack.c.bf16 %v3197_v15, %v3197_v15 }
 0xd49   : > { %v1133_v17 = vrot.slane %v1131_v16, 1 }
 0xd4b   : > { %1134 = vrot.lane.b32.xlu1 %v1133_v17, %s3481_s30 }
 0xdbd   : > { %v1135_v18 = vpop.permute.xlu1 %1134 }
 0xdbe   : > { %2563 = vmatmul.mubr.msk.bf16.vlgmr.msra.gmra.mxu0 %vm611_vm3, %v1135_v18 }
 0xdbf   : > { %2576 = vmatprep.mubr.msk.bf16.mxu0 %vm2923_vm1, %v2922_v1  ;;  %2573 = vmatpush3.bf16.msra.mxu0 %v2714_v10 }
 0xdc0   : > { %2574 = vmatprep.subr.bf16.mxu0 %v2922_v1 }
 0xe7e   : > { %v1173_v19 = vpop.f32.mrf.mxu0 }
 0xe7f   : > { %v1180_v21 = vrot.slane %v1173_v19, 7  ;;  %v2716_v19 = vld [vmem:[%s3502_s7] sm:$0xff]   ;;  %s2864_s7 = sshll.u32 %s2931_s6, 4  ;;  %s2865_s7 = int_to_ptr.vmem [resolvable:$false] %s2864_s7 }
 0xe80   : > { %v2564_v22 = vpop.f32.mrf.mxu0  ;;  %2575 = vmatpush3.bf16.msra.mxu0 %v2716_v19 }
 0xe81   : > { %v1182_v23 = vadd.f32 %v1180_v21, %v3177_v32  ;;  %2586 = vmatprep.subr.bf16.mxu0 %v2922_v1 }
 0xe82   : > { %v1176_v24 = vpop.f32.mrf.mxu0 }
 0xe83   : > { %2764 = vtanh.f32 %v1182_v23  ;;  %v2418_v28 = vmul.f32 -1.442695, %v1182_v23 }
 0xe84   : > { %v2565_v25 = vpop.f32.mrf.mxu0 }
 0xe85   : > { %2766 = vpow2.f32 %v2418_v28 }
 0xe90   : > { %v2765_v26 = vpop.eup %2764 }
 0xe91   : > { %1195 = vrot.lane.b32.xlu0 %v2765_v26, %s3479_s21 }
 0xe92   : > { %v2767_v29 = vpop.eup %2766 }
 0xe93   : > { %v1186_v30 = vadd.f32 1.0, %v2767_v29 }
 0xe95   : > { %2768 = vrcp.f32 %v1186_v30 }
 0xea2   : > { %v2769_v31 = vpop.eup %2768 }
 0xea3   : > { %v1193_v36 = vmul.f32 %v2769_v31, %v1191_v35 }
 0xf03   : > { %v1196_v33 = vpop.permute.xlu0 %1195 }
 0xf04   : > { %v1198_v34 = vmul.f32 %v2769_v31, %v1196_v33 }
 0xf06   : > { %1200 = vrot.lane.b32.xlu1 %v1198_v34, %s3483_s23 }
 0xf78   : > { %v1201_v37 = vpop.permute.xlu1 %1200 }
 0xf79   : > { %v1203_v38 = vadd.f32 %v1201_v37, %v1193_v36 }
 0xf7b   : > { %2770 = vtanh.f32 %v1203_v38  ;;  %v1268_v7 = vrot.slane %v1203_v38, 1 }
 0xf7c   : > { %2772 = vtanh.f32 %v889_v41 }
 0xf7d   : > { %2774 = vpow2.f32 %v2410_v47 }
 0xf88   : > { %v2771_v39 = vpop.eup %2770 }
 0xf89   : > { %1206 = vrot.lane.b32.xlu0 %v2771_v39, %s2927_s29  ;;  %v2773_v46 = vpop.eup %2772 }
 0xf8a   : > { %v2775_v48 = vpop.eup %2774 }
 0xf8b   : > { %v893_v49 = vadd.f32 1.0, %v2775_v48 }
 0xf8d   : > { %2776 = vrcp.f32 %v893_v49 }
 0xf9a   : > { %v2777_v13 = vpop.eup %2776 }
 0xf9b   : > { %v900_v54 = vmul.f32 %v2777_v13, %v898_v53 }
 0xffb   : > { %v1207_v42 = vpop.permute.xlu0 %1206 }
 0xffc   : > { %v3211_v43 = vmul.f32 %v2769_v31, %v1207_v42 }
 0xffe   : > { %v1210_v44 = vpack.c.bf16 %v3211_v43, %v3211_v43 }
0x1000   : > { %v1212_v45 = vshrl.u32 %v1210_v44, 16 }
0x1002   : > { %1214 = vrot.lane.b32.xlu1 %v1212_v45, %s3481_s30  ;;  %s2930_s30 = smov 112  }
0x1006   : > { %902 = vrot.lane.b32.xlu1 %v2773_v46, %s3479_s21 }
0x1074   : > { %v1215_v27 = vpop.permute.xlu1 %1214 }
0x1075   : > { %2569 = vmatmul.mubr.msk.bf16.vlgmr.msra.gmra.mxu1 %vm611_vm3, %v1215_v27 }
0x1076   : > { %2582 = vmatprep.mubr.msk.bf16.mxu1 %vm2923_vm1, %v2922_v1  ;;  %2581 = vmatpush3.bf16.msra.mxu1 %v3232_v11 }
0x1077   : > { %2592 = vmatprep.subr.bf16.mxu1 %v2922_v1 }
0x1078   : > { %v903_v50 = vpop.permute.xlu1 %902 }
0x1079   : > { %v905_v52 = vmul.f32 %v2777_v13, %v903_v50 }
0x107b   : > { %907 = vrot.lane.b32.xlu1 %v905_v52, %s3483_s23 }
0x107d   : > { %2583 = vmatmul.mubr.bf16.vlgmr.msra.gmra.mxu1 %v2924_v4 }
0x107e   : > { %2593 = vmatpush3.bf16.msra.mxu1 %v3232_v11  ;;  %2594 = vmatprep.mubr.msk.bf16.mxu1 %vm2923_vm1, %v2922_v1 }
0x107f   : > { %2604 = vmatprep.subr.bf16.mxu1 %v2922_v1 }
0x10ed   : > { %v908_v55 = vpop.permute.xlu1 %907 }
0x10ee   : > { %v910_v56 = vadd.f32 %v908_v55, %v900_v54 }
0x10f0   : > { %2778 = vtanh.f32 %v910_v56 }
0x10fd   : > { %v2779_v57 = vpop.eup %2778 }
0x10fe   : > { %913 = vrot.lane.b32.xlu1 %v2779_v57, %s2927_s29 }
0x1135   : > { %v1253_v58 = vpop.f32.mrf.mxu1 }
0x1136   : > { %v1259_v59 = vadd.f32 %v1253_v58, %v3177_v32 }
0x1137   : > { %v2570_v60 = vpop.f32.mrf.mxu1 }
0x1138   : > { %2780 = vtanh.f32 %v1259_v59  ;;  %v2420_v0 = vmul.f32 -1.442695, %v1259_v59 }
0x1139   : > { %v1256_v61 = vpop.f32.mrf.mxu1 }
0x113a   : > { %2782 = vpow2.f32 %v2420_v0 }
0x113b   : > { %v2571_v62 = vpop.f32.mrf.mxu1 }
0x113d   : > { %v1409_v25 = vpop.f32.mrf.mxu1 }
0x113f   : > { %v2584_v26 = vpop.f32.mrf.mxu1 }
0x1141   : > { %v1412_v28 = vpop.f32.mrf.mxu1 }
0x1143   : > { %v2585_v29 = vpop.f32.mrf.mxu1 }
0x1145   : > { %v2781_v63 = vpop.eup %2780 }
0x1146   : > { %1272 = vrot.lane.b32.xlu0 %v2781_v63, %s3479_s21  ;;  %s3503_s21 = smov 80  }
0x1147   : > { %v2783_v12 = vpop.eup %2782 }
0x1148   : > { %v1263_v2 = vadd.f32 1.0, %v2783_v12 }
0x114a   : > { %2784 = vrcp.f32 %v1263_v2 }
0x1157   : > { %v2785_v3 = vpop.eup %2784 }
0x1158   : > { %v1270_v8 = vmul.f32 %v2785_v3, %v1268_v7 }
0x1170   : > { %v914_v14 = vpop.permute.xlu1 %913 }
0x1171   : > { %v916_v17 = vmul.f32 %v2777_v13, %v914_v14  ;;  %v2717_v14 = vld [vmem:[%s3471_s10 + $0x8] sm:$0xff]  }
0x1173   : > { %v922_v18 = vsel %vm921_vm6, %v3159_v20, %v916_v17  ;;  %v2718_v17 = vld [vmem:[%s3471_s10] sm:$0xff]  }
0x11b8   : > { %v1273_v5 = vpop.permute.xlu0 %1272 }
0x11b9   : > { %v1275_v6 = vmul.f32 %v2785_v3, %v1273_v5 }
0x11bb   : > { %1277 = vrot.lane.b32.xlu0 %v1275_v6, %s3483_s23 }
0x122d   : > { %v1278_v32 = vpop.permute.xlu0 %1277 }
0x122e   : > { %v1280_v9 = vadd.f32 %v1278_v32, %v1270_v8 }
0x1230   : > { %2786 = vtanh.f32 %v1280_v9 }
0x123d   : > { %v2787_v16 = vpop.eup %2786 }
0x123e   : > { %1283 = vrot.lane.b32.xlu0 %v2787_v16, %s2927_s29 }
0x1242   : > { %1291 = vrot.lane.b32.xlu0 %v922_v18, %s3503_s21 }
0x12b0   : > { %v1284_v21 = vpop.permute.xlu0 %1283 }
0x12b1   : > { %v1286_v22 = vmul.f32 %v2785_v3, %v1284_v21 }
0x12b3   : > { %v1287_v23 = vsel %vm917_vm4, %v1286_v22, %v3211_v43 }
0x12b4   : > { %v1288_v24 = vsel %vm919_vm5, %v1287_v23, %v3197_v15  ;;  %v1292_v30 = vpop.permute.xlu0 %1291 }
0x12b5   : > { %v1289_v20 = vsel %vm921_vm6, %v1288_v24, %v3183_v51  ;;  %v2421_v51 = vld [vmem:[%s3470_s9] ss:$0 sm:$0xff] }
0x12b6   : > { %1295 = vrot.lane.b32.xlu1 %v1289_v20, %s3504_s22 }
0x1328   : > { %v1296_v31 = vpop.permute.xlu1 %1295 }
0x1329   : > { %v1298_v33 = vsel %vm611_vm3, %v1292_v30, %v1296_v31 }
0x132a   : > { %v3258_v34 = vpack.c.bf16 %v1298_v33, %v1298_v33 }
0x132c   : > { %2577 = vmatmul.mubr.msk.bf16.vlgmr.msra.gmra.mxu0 %vm1325_vm7, %v3258_v34 }
0x132d   : > { %2587 = vmatpush3.bf16.msra.mxu0 %v3232_v11  ;;  %2588 = vmatprep.mubr.msk.bf16.mxu0 %vm2923_vm1, %v2922_v1 }
0x132e   : > { %2598 = vmatprep.subr.bf16.mxu0 %v2922_v1 }
0x13ec   : > { %v1363_v15 = vpop.f32.mrf.mxu0 }
0x13ed   : > { %v3269_v35 = vadd.f32 %v2421_v51, %v1363_v15 }
0x13ee   : > { %v2578_v36 = vpop.f32.mrf.mxu0 }
0x13ef   : > { %v1415_v37 = vadd.f32 %v1409_v25, %v3269_v35 }
0x13f0   : > { %v1366_v38 = vpop.f32.mrf.mxu0 }
0x13f1   : > { %2788 = vtanh.f32 %v1415_v37  ;;  %v2426_v41 = vmul.f32 -1.442695, %v1415_v37 }
0x13f2   : > { %v2579_v39 = vpop.f32.mrf.mxu0 }
0x13f3   : > { %2790 = vpow2.f32 %v2426_v41  ;;  %v2719_v41 = vld [vmem:[%s3472_s11] sm:$0xff]  }
0x13fe   : > { %v2789_v40 = vpop.eup %2788 }
0x13ff   : > { %1425 = vrot.lane.b32.xlu0 %v2789_v40, %s3504_s22 }
0x1400   : > { %v2791_v42 = vpop.eup %2790 }
0x1401   : > { %v1419_v43 = vadd.f32 1.0, %v2791_v42 }
0x1403   : > { %2792 = vrcp.f32 %v1419_v43 }
0x1410   : > { %v2793_v44 = vpop.eup %2792 }
0x1411   : > { %v1423_v47 = vmul.f32 0.0, %v2793_v44 }
0x1471   : > { %v1426_v45 = vpop.permute.xlu0 %1425 }
0x1472   : > { %v1428_v46 = vmul.f32 %v2793_v44, %v1426_v45 }
0x1474   : > { %1430 = vrot.lane.b32.xlu1 %v1428_v46, %s3483_s23 }
0x14e6   : > { %v1431_v48 = vpop.permute.xlu1 %1430 }
0x14e7   : > { %v1433_v49 = vadd.f32 %v1431_v48, %v1423_v47 }
0x14e9   : > { %2794 = vtanh.f32 %v1433_v49  ;;  %v1499_v3 = vrot.slane %v1433_v49, 7 }
0x14f6   : > { %v2795_v27 = vpop.eup %2794 }
0x14f7   : > { %1436 = vrot.lane.b32.xlu0 %v2795_v27, %s2927_s29 }
0x1569   : > { %v1437_v13 = vpop.permute.xlu0 %1436 }
0x156a   : > { %v3275_v50 = vmul.f32 %v2793_v44, %v1437_v13 }
0x156c   : > { %v1440_v52 = vpack.c.bf16 %v3275_v50, %v3275_v50 }
0x156e   : > { %1442 = vrot.lane.b32.xlu1 %v1440_v52, %s3503_s21 }
0x15e0   : > { %v1443_v53 = vpop.permute.xlu1 %1442 }
0x15e1   : > { %2589 = vmatmul.mubr.msk.bf16.vlgmr.msra.gmra.mxu0 %vm611_vm3, %v1443_v53 }
0x15e2   : > { %2599 = vmatpush3.bf16.msra.mxu0 %v3232_v11  ;;  %2600 = vmatprep.mubr.msk.bf16.mxu0 %vm2923_vm1, %v2922_v1 }
0x15e3   : > { %2612 = vmatprep.subr.bf16.mxu0 %v2922_v1 }
0x16a1   : > { %v1481_v54 = vpop.f32.mrf.mxu0 }
0x16a2   : > { %v1488_v55 = vrot.slane %v1481_v54, 7 }
0x16a3   : > { %v2590_v56 = vpop.f32.mrf.mxu0 }
0x16a4   : > { %v1490_v57 = vadd.f32 %v1488_v55, %v3269_v35 }
0x16a5   : > { %v1484_v58 = vpop.f32.mrf.mxu0 }
0x16a6   : > { %2796 = vtanh.f32 %v1490_v57  ;;  %v2428_v61 = vmul.f32 -1.442695, %v1490_v57 }
0x16a7   : > { %v2591_v59 = vpop.f32.mrf.mxu0 }
0x16a8   : > { %2798 = vpow2.f32 %v2428_v61 }
0x16b3   : > { %v2797_v60 = vpop.eup %2796 }
0x16b4   : > { %1503 = vrot.lane.b32.xlu0 %v2797_v60, %s3504_s22 }
0x16b5   : > { %v2799_v62 = vpop.eup %2798 }
0x16b6   : > { %v1494_v63 = vadd.f32 1.0, %v2799_v62 }
0x16b8   : > { %2800 = vrcp.f32 %v1494_v63 }
0x16c5   : > { %v2801_v0 = vpop.eup %2800 }
0x16c6   : > { %v1501_v5 = vmul.f32 %v2801_v0, %v1499_v3 }
0x1726   : > { %v1504_v12 = vpop.permute.xlu0 %1503 }
0x1727   : > { %v1506_v2 = vmul.f32 %v2801_v0, %v1504_v12 }
0x1729   : > { %1508 = vrot.lane.b32.xlu1 %v1506_v2, %s3483_s23 }
0x179b   : > { %v1509_v6 = vpop.permute.xlu1 %1508 }
0x179c   : > { %v1511_v7 = vadd.f32 %v1509_v6, %v1501_v5 }
0x179e   : > { %2802 = vtanh.f32 %v1511_v7  ;;  %v1579_v36 = vrot.slane %v1511_v7, 7 }
0x17ab   : > { %v2803_v8 = vpop.eup %2802 }
0x17ac   : > { %1514 = vrot.lane.b32.xlu0 %v2803_v8, %s2927_s29 }
0x181e   : > { %v1515_v32 = vpop.permute.xlu0 %1514 }
0x181f   : > { %v1517_v9 = vmul.f32 %v2801_v0, %v1515_v32 }
0x1821   : > { %v1518_v10 = vpack.c.bf16 %v1517_v9, %v1517_v9  ;;  %v1677_v44 = vsel %vm917_vm4, %v3275_v50, %v1517_v9  ;;  %v2433_v50 = vld [vmem:[%s3473_s12] ss:$0 sm:$0xff] }
0x1823   : > { %v1520_v11 = vshrl.u32 %v1518_v10, 16 }
0x1825   : > { %1522 = vrot.lane.b32.xlu1 %v1520_v11, %s3503_s21 }
0x1897   : > { %v1523_v16 = vpop.permute.xlu1 %1522 }
0x1898   : > { %2595 = vmatmul.mubr.msk.bf16.vlgmr.msra.gmra.mxu1 %vm611_vm3, %v1523_v16 }
0x1899   : > { %2605 = vmatpush3.bf16.msra.mxu1 %v2717_v14  ;;  %2608 = vmatprep.mubr.msk.bf16.mxu1 %vm2923_vm1, %v2922_v1 }
0x189a   : > { %2606 = vmatprep.subr.bf16.mxu1 %v2922_v1 }
0x189d   : > { %2607 = vmatpush3.bf16.msra.mxu1 %v2718_v17 }
0x189e   : > { %2618 = vmatprep.subr.bf16.mxu1 %v2922_v1 }
0x18a0   : > { %2609 = vmatmul.mubr.msk.bf16.vlgmr.msra.gmra.mxu1 %vm1325_vm7, %v3258_v34 }
0x18a1   : > { %2620 = vmatprep.mubr.msk.bf16.mxu1 %vm2923_vm1, %v2922_v1  ;;  %2619 = vmatpush3.bf16.msra.mxu1 %v2719_v41 }
0x18a2   : > { %2630 = vmatprep.subr.bf16.mxu1 %v2922_v1 }
0x1958   : > { %v1561_v18 = vpop.f32.mrf.mxu1 }
0x1959   : > { %v1568_v19 = vrot.slane %v1561_v18, 6 }
0x195a   : > { %v2596_v21 = vpop.f32.mrf.mxu1 }
0x195b   : > { %v1570_v22 = vadd.f32 %v1568_v19, %v3269_v35 }
0x195c   : > { %v1564_v23 = vpop.f32.mrf.mxu1 }
0x195d   : > { %2804 = vtanh.f32 %v1570_v22  ;;  %v2430_v30 = vmul.f32 -1.442695, %v1570_v22 }
0x195e   : > { %v2597_v24 = vpop.f32.mrf.mxu1 }
0x195f   : > { %2806 = vpow2.f32 %v2430_v30 }
0x1960   : > { %v1739_v20 = vpop.f32.mrf.mxu1 }
0x1961   : > { %v3335_v54 = vadd.f32 %v2433_v50, %v1739_v20 }
0x1962   : > { %v2610_v25 = vpop.f32.mrf.mxu1 }
0x1964   : > { %v1742_v26 = vpop.f32.mrf.mxu1 }
0x1966   : > { %v2611_v28 = vpop.f32.mrf.mxu1 }
0x196a   : > { %v2805_v29 = vpop.eup %2804 }
0x196b   : > { %1583 = vrot.lane.b32.xlu0 %v2805_v29, %s3504_s22 }
0x196c   : > { %v2807_v31 = vpop.eup %2806 }
0x196d   : > { %v1574_v33 = vadd.f32 1.0, %v2807_v31 }
0x196f   : > { %2808 = vrcp.f32 %v1574_v33 }
0x197c   : > { %v2809_v34 = vpop.eup %2808 }
0x197d   : > { %v1581_v37 = vmul.f32 %v2809_v34, %v1579_v36 }
0x19dd   : > { %v1584_v51 = vpop.permute.xlu0 %1583 }
0x19de   : > { %v1586_v15 = vmul.f32 %v2809_v34, %v1584_v51 }
0x19e0   : > { %1588 = vrot.lane.b32.xlu1 %v1586_v15, %s3505_s2 }
0x1a52   : > { %v1589_v38 = vpop.permute.xlu1 %1588 }
0x1a53   : > { %v3308_v39 = vadd.f32 %v1589_v38, %v1581_v37 }
0x1a55   : > { %2810 = vtanh.f32 %v3308_v39 }
0x1a62   : > { %v2811_v40 = vpop.eup %2810 }
0x1a63   : > { %1594 = vrot.lane.b32.xlu0 %v2811_v40, %s2927_s29 }
0x1ad5   : > { %v1595_v42 = vpop.permute.xlu0 %1594 }
0x1ad6   : > { %v1597_v43 = vmul.f32 %v2809_v34, %v1595_v42 }
0x1ad8   : > { %v1598_v45 = vpack.c.bf16 %v1597_v43, %v1597_v43  ;;  %v3319_v46 = vsel %vm919_vm5, %v1677_v44, %v1597_v43 }
0x1ada   : > { %v1600_v47 = vrot.slane %v1598_v45, 1 }
0x1adc   : > { %1601 = vrot.lane.b32.xlu1 %v1600_v47, %s3503_s21 }
0x1b4e   : > { %v1602_v48 = vpop.permute.xlu1 %1601 }
0x1b4f   : > { %2601 = vmatmul.mubr.msk.bf16.vlgmr.msra.gmra.mxu0 %vm611_vm3, %v1602_v48 }
0x1b50   : > { %2613 = vmatpush3.bf16.msra.mxu0 %v2719_v41  ;;  %2614 = vmatprep.mubr.msk.bf16.mxu0 %vm2923_vm1, %v2922_v1 }
0x1b51   : > { %2624 = vmatprep.subr.bf16.mxu0 %v2922_v1 }
0x1b57   : > { %2615 = vmatmul.mubr.bf16.vlgmr.msra.gmra.mxu0 %v2924_v4 }
0x1b58   : > { %2625 = vmatpush3.bf16.msra.mxu0 %v2719_v41  ;;  %2626 = vmatprep.mubr.msk.bf16.mxu0 %vm2923_vm1, %v2922_v1 }
0x1b59   : > { %2636 = vmatprep.subr.bf16.mxu0 %v2922_v1 }
0x1c0f   : > { %v3330_v49 = vpop.f32.mrf.mxu0 }
0x1c11   : > { %v2602_v27 = vpop.f32.mrf.mxu0 }
0x1c13   : > { %v1643_v13 = vpop.f32.mrf.mxu0 }
0x1c15   : > { %v2603_v52 = vpop.f32.mrf.mxu0 }
0x1c17   : > { %v1785_v53 = vpop.f32.mrf.mxu0 }
0x1c18   : > { %v1792_v55 = vrot.slane %v1785_v53, 5 }
0x1c19   : > { %v2616_v4 = vpop.f32.mrf.mxu0 }
0x1c1a   : > { %v1794_v56 = vadd.f32 %v1792_v55, %v3335_v54 }
0x1c1b   : > { %v1788_v57 = vpop.f32.mrf.mxu0 }
0x1c1c   : > { %2812 = vtanh.f32 %v1794_v56  ;;  %v2438_v60 = vmul.f32 -1.442695, %v1794_v56 }
0x1c1d   : > { %v2617_v58 = vpop.f32.mrf.mxu0 }
0x1c1e   : > { %2814 = vpow2.f32 %v2438_v60 }
0x1c29   : > { %v2813_v59 = vpop.eup %2812 }
0x1c2a   : > { %1804 = vrot.lane.b32.xlu0 %v2813_v59, %s3504_s22  ;;  %v1647_v59 = vrot.slane %v3330_v49, 5 }
0x1c2b   : > { %v2815_v61 = vpop.eup %2814 }
0x1c2c   : > { %v1798_v62 = vadd.f32 1.0, %v2815_v61  ;;  %v1649_v60 = vadd.f32 %v1647_v59, %v3269_v35 }
0x1c2e   : > { %2816 = vrcp.f32 %v1798_v62 }
0x1c3b   : > { %v2817_v63 = vpop.eup %2816 }
0x1c3c   : > { %v1802_v2 = vmul.f32 0.0, %v2817_v63 }
0x1c9c   : > { %v1805_v0 = vpop.permute.xlu0 %1804 }
0x1c9d   : > { %v1807_v12 = vmul.f32 %v2817_v63, %v1805_v0 }
0x1c9f   : > { %1809 = vrot.lane.b32.xlu1 %v1807_v12, %s3505_s2 }
0x1d11   : > { %v1810_v3 = vpop.permute.xlu1 %1809 }
0x1d12   : > { %v1812_v5 = vadd.f32 %v1810_v3, %v1802_v2  ;;  %v2432_v2 = vmul.f32 -1.442695, %v1649_v60 }
0x1d14   : > { %2818 = vtanh.f32 %v1812_v5  ;;  %v1881_v29 = vrot.slane %v1812_v5, 1 }
0x1d21   : > { %v2819_v6 = vpop.eup %2818 }
0x1d22   : > { %1815 = vrot.lane.b32.xlu0 %v2819_v6, %s2927_s29 }
0x1d94   : > { %v1816_v7 = vpop.permute.xlu0 %1815 }
0x1d95   : > { %v3341_v8 = vmul.f32 %v2817_v63, %v1816_v7 }
0x1d97   : > { %v1819_v32 = vpack.c.bf16 %v3341_v8, %v3341_v8 }
0x1d99   : > { %v1821_v9 = vshrl.u32 %v1819_v32, 16  ;;  %v1658_v32 = vrot.slane %v3308_v39, 7 }
0x1d9b   : > { %v1823_v10 = vrot.slane %v1821_v9, 1 }
0x1d9d   : > { %1824 = vrot.lane.b32.xlu1 %v1823_v10, %s3503_s21 }
0x1e0f   : > { %v1825_v11 = vpop.permute.xlu1 %1824 }
0x1e10   : > { %2621 = vmatmul.mubr.msk.bf16.vlgmr.msra.gmra.mxu1 %vm611_vm3, %v1825_v11 }
0x1e11   : > { %2631 = vmatpush3.bf16.msra.mxu1 %v2719_v41  ;;  %2632 = vmatprep.mubr.msk.bf16.mxu1 %vm2923_vm1, %v2922_v1 }
0x1e12   : > { %2644 = vmatprep.subr.bf16.mxu1 %v2922_v1 }
0x1ed0   : > { %v1863_v14 = vpop.f32.mrf.mxu1 }
0x1ed1   : > { %v1870_v16 = vrot.slane %v1863_v14, 6 }
0x1ed2   : > { %v2622_v17 = vpop.f32.mrf.mxu1 }
0x1ed3   : > { %v1872_v18 = vadd.f32 %v1870_v16, %v3335_v54 }
0x1ed4   : > { %v1866_v19 = vpop.f32.mrf.mxu1 }
0x1ed5   : > { %2820 = vtanh.f32 %v1872_v18  ;;  %v2440_v23 = vmul.f32 -1.442695, %v1872_v18 }
0x1ed6   : > { %v2623_v21 = vpop.f32.mrf.mxu1 }
0x1ed7   : > { %2822 = vpow2.f32 %v2440_v23 }
0x1ee2   : > { %v2821_v22 = vpop.eup %2820 }
0x1ee3   : > { %1885 = vrot.lane.b32.xlu0 %v2821_v22, %s3504_s22 }
0x1ee4   : > { %v2823_v24 = vpop.eup %2822 }
0x1ee5   : > { %v1876_v20 = vadd.f32 1.0, %v2823_v24 }
0x1ee7   : > { %2824 = vrcp.f32 %v1876_v20 }
0x1ef4   : > { %v2825_v25 = vpop.eup %2824 }
0x1ef5   : > { %v1883_v30 = vmul.f32 %v2825_v25, %v1881_v29 }
0x1f55   : > { %v1886_v26 = vpop.permute.xlu0 %1885 }
0x1f56   : > { %v1888_v28 = vmul.f32 %v2825_v25, %v1886_v26 }
0x1f58   : > { %1890 = vrot.lane.b32.xlu1 %v1888_v28, %s3505_s2 }
0x1fca   : > { %v1891_v31 = vpop.permute.xlu1 %1890 }
0x1fcb   : > { %v1893_v33 = vadd.f32 %v1891_v31, %v1883_v30  ;;  %v2720_v31 = vld [vmem:[%s3474_s13 + $0x8] sm:$0xff]  }
0x1fcd   : > { %2826 = vtanh.f32 %v1893_v33  ;;  %v1960_v55 = vrot.slane %v1893_v33, 1 }
0x1fda   : > { %v2827_v34 = vpop.eup %2826 }
0x1fdb   : > { %1896 = vrot.lane.b32.xlu0 %v2827_v34, %s2927_s29 }
0x204d   : > { %v1897_v51 = vpop.permute.xlu0 %1896 }
0x204e   : > { %v3354_v15 = vmul.f32 %v2825_v25, %v1897_v51 }
0x2050   : > { %v1900_v36 = vpack.c.bf16 %v3354_v15, %v3354_v15 }
0x2052   : > { %v1902_v37 = vrot.slane %v1900_v36, 1 }
0x2054   : > { %1903 = vrot.lane.b32.xlu1 %v1902_v37, %s3503_s21  ;;  %v2721_v37 = vld [vmem:[%s3474_s13] sm:$0xff]  }
0x20c6   : > { %v1904_v38 = vpop.permute.xlu1 %1903 }
0x20c7   : > { %2627 = vmatmul.mubr.msk.bf16.vlgmr.msra.gmra.mxu0 %vm611_vm3, %v1904_v38 }
0x20c8   : > { %2640 = vmatprep.mubr.msk.bf16.mxu0 %vm2923_vm1, %v2922_v1  ;;  %2637 = vmatpush3.bf16.msra.mxu0 %v2720_v31 }
0x20c9   : > { %2638 = vmatprep.subr.bf16.mxu0 %v2922_v1 }
0x20cc   : > { %2639 = vmatpush3.bf16.msra.mxu0 %v2721_v37 }
0x20cd   : > { %2650 = vmatprep.subr.bf16.mxu0 %v2922_v1 }
0x2187   : > { %v1942_v40 = vpop.f32.mrf.mxu0 }
0x2188   : > { %v1949_v41 = vrot.slane %v1942_v40, 7 }
0x2189   : > { %v2628_v42 = vpop.f32.mrf.mxu0 }
0x218a   : > { %v1951_v43 = vadd.f32 %v1949_v41, %v3335_v54 }
0x218b   : > { %v1945_v44 = vpop.f32.mrf.mxu0 }
0x218c   : > { %2828 = vtanh.f32 %v1951_v43  ;;  %v2442_v48 = vmul.f32 -1.442695, %v1951_v43 }
0x218d   : > { %v2629_v45 = vpop.f32.mrf.mxu0 }
0x218e   : > { %2830 = vpow2.f32 %v2442_v48  ;;  %v2445_v48 = vld [vmem:[%s3475_s14] ss:$0 sm:$0xff] }
0x2199   : > { %v2829_v47 = vpop.eup %2828 }
0x219a   : > { %1964 = vrot.lane.b32.xlu0 %v2829_v47, %s3504_s22 }
0x219b   : > { %v2831_v27 = vpop.eup %2830 }
0x219c   : > { %v1955_v13 = vadd.f32 1.0, %v2831_v27 }
0x219e   : > { %2832 = vrcp.f32 %v1955_v13 }
0x21ab   : > { %v2833_v50 = vpop.eup %2832 }
0x21ac   : > { %v1962_v4 = vmul.f32 %v2833_v50, %v1960_v55 }
0x220c   : > { %v1965_v52 = vpop.permute.xlu0 %1964 }
0x220d   : > { %v1967_v53 = vmul.f32 %v2833_v50, %v1965_v52 }
0x220f   : > { %1969 = vrot.lane.b32.xlu1 %v1967_v53, %s3505_s2 }
0x2281   : > { %v1970_v56 = vpop.permute.xlu1 %1969 }
0x2282   : > { %v1972_v57 = vadd.f32 %v1970_v56, %v1962_v4 }
0x2284   : > { %2834 = vtanh.f32 %v1972_v57  ;;  %v2037_v28 = vrot.slane %v1972_v57, 1 }
0x2285   : > { %2836 = vtanh.f32 %v1649_v60 }
0x2286   : > { %2838 = vpow2.f32 %v2432_v2  ;;  %v2722_v2 = vld [vmem:[%s3476_s15 + $0x8] sm:$0xff]  }
0x2291   : > { %v2835_v58 = vpop.eup %2834 }
0x2292   : > { %1975 = vrot.lane.b32.xlu0 %v2835_v58, %s2927_s29  ;;  %v2837_v12 = vpop.eup %2836 }
0x2293   : > { %v2839_v3 = vpop.eup %2838 }
0x2294   : > { %v1653_v5 = vadd.f32 1.0, %v2839_v3 }
0x2296   : > { %2840 = vrcp.f32 %v1653_v5 }
0x22a3   : > { %v2841_v35 = vpop.eup %2840 }
0x22a4   : > { %v1660_v9 = vmul.f32 %v2841_v35, %v1658_v32  ;;  %v2723_v32 = vld [vmem:[%s3476_s15] sm:$0xff]  }
0x2304   : > { %v1976_v61 = vpop.permute.xlu0 %1975 }
0x2305   : > { %v1978_v62 = vmul.f32 %v2833_v50, %v1976_v61 }
0x2307   : > { %v1979_v63 = vpack.c.bf16 %v1978_v62, %v1978_v62 }
0x2309   : > { %v1981_v0 = vshrl.u32 %v1979_v63, 16 }
0x230b   : > { %1983 = vrot.lane.b32.xlu1 %v1981_v0, %s3503_s21 }
0x230f   : > { %1662 = vrot.lane.b32.xlu1 %v2837_v12, %s3504_s22 }
0x237d   : > { %v1984_v6 = vpop.permute.xlu1 %1983 }
0x237e   : > { %2633 = vmatmul.mubr.msk.bf16.vlgmr.msra.gmra.mxu1 %vm611_vm3, %v1984_v6 }
0x237f   : > { %2646 = vmatprep.mubr.msk.bf16.mxu1 %vm2923_vm1, %v2922_v1 }
0x2381   : > { %v1663_v49 = vpop.permute.xlu1 %1662 }
0x2382   : > { %v1665_v7 = vmul.f32 %v2841_v35, %v1663_v49 }
0x2384   : > { %1667 = vrot.lane.b32.xlu1 %v1665_v7, %s3505_s2 }
0x23f6   : > { %v1668_v10 = vpop.permute.xlu1 %1667 }
0x23f7   : > { %v1670_v11 = vadd.f32 %v1668_v10, %v1660_v9 }
0x23f9   : > { %2842 = vtanh.f32 %v1670_v11 }
0x2406   : > { %v2843_v14 = vpop.eup %2842 }
0x2407   : > { %1673 = vrot.lane.b32.xlu1 %v2843_v14, %s2927_s29 }
0x243e   : > { %v2022_v16 = vpop.f32.mrf.mxu1 }
0x243f   : > { %v2028_v17 = vadd.f32 %v2022_v16, %v3335_v54  ;;  %v2451_v16 = vld [vmem:[%s3477_s16] ss:$0 sm:$0xff] }
0x2440   : > { %v2634_v18 = vpop.f32.mrf.mxu1 }
0x2441   : > { %2844 = vtanh.f32 %v2028_v17  ;;  %v2444_v23 = vmul.f32 -1.442695, %v2028_v17 }
0x2442   : > { %v2025_v19 = vpop.f32.mrf.mxu1 }
0x2443   : > { %2846 = vpow2.f32 %v2444_v23 }
0x2444   : > { %v2635_v21 = vpop.f32.mrf.mxu1 }
0x244e   : > { %v2845_v22 = vpop.eup %2844 }
0x244f   : > { %2041 = vrot.lane.b32.xlu0 %v2845_v22, %s3504_s22 }
0x2450   : > { %v2847_v39 = vpop.eup %2846 }
0x2451   : > { %v2032_v24 = vadd.f32 1.0, %v2847_v39 }
0x2453   : > { %2848 = vrcp.f32 %v2032_v24 }
0x2460   : > { %v2849_v20 = vpop.eup %2848 }
0x2461   : > { %v2039_v29 = vmul.f32 %v2849_v20, %v2037_v28 }
0x2479   : > { %v1674_v33 = vpop.permute.xlu1 %1673 }
0x247a   : > { %v1676_v51 = vmul.f32 %v2841_v35, %v1674_v33 }
0x247c   : > { %v1679_v36 = vsel %vm921_vm6, %v3319_v46, %v1676_v51 }
0x24c1   : > { %v2042_v25 = vpop.permute.xlu0 %2041 }
0x24c2   : > { %v2044_v26 = vmul.f32 %v2849_v20, %v2042_v25 }
0x24c4   : > { %2046 = vrot.lane.b32.xlu0 %v2044_v26, %s3505_s2  ;;  %s2457_s2 = sshll.u32 %s3043_s28, 6  ;;  %s2866_s28 = scalar_lea.vmem %s2865_s7, 128 }
0x2536   : > { %v2047_v54 = vpop.permute.xlu0 %2046 }
0x2537   : > { %v2049_v30 = vadd.f32 %v2047_v54, %v2039_v29 }
0x2539   : > { %2850 = vtanh.f32 %v2049_v30 }
0x2546   : > { %v2851_v34 = vpop.eup %2850 }
0x2547   : > { %2052 = vrot.lane.b32.xlu0 %v2851_v34, %s2927_s29 }
0x254b   : > { %2060 = vrot.lane.b32.xlu0 %v1679_v36, %s3503_s21  ;;  %s3426_s21 = scalar_lea.hbm %s3478_s17, %s2457_s2 }
0x25b9   : > { %v2053_v38 = vpop.permute.xlu0 %2052 }
0x25ba   : > { %v2055_v40 = vmul.f32 %v2849_v20, %v2053_v38 }
0x25bc   : > { %v2056_v41 = vsel %vm917_vm4, %v2055_v40, %v1978_v62 }
0x25bd   : > { %v2057_v42 = vsel %vm919_vm5, %v2056_v41, %v3354_v15  ;;  %v2061_v46 = vpop.permute.xlu0 %2060 }
0x25be   : > { %v2058_v43 = vsel %vm921_vm6, %v2057_v42, %v3341_v8 }
0x25bf   : > { %2064 = vrot.lane.b32.xlu1 %v2058_v43, %s3504_s22  ;;  %s2929_s22 = smov 120  }
0x2631   : > { %v2065_v44 = vpop.permute.xlu1 %2064 }
0x2632   : > { %v2067_v45 = vsel %vm611_vm3, %v2061_v46, %v2065_v44 }
0x2633   : > { %v2068_v47 = vpack.c.bf16 %v2067_v45, %v2067_v45 }
0x2635   : > { %2641 = vmatmul.mubr.msk.bf16.vlgmr.msra.gmra.mxu0 %vm1325_vm7, %v2068_v47 }
0x2636   : > { %2652 = vmatprep.mubr.msk.bf16.mxu0 %vm2923_vm1, %v2922_v1 }
0x26f5   : > { %v2129_v15 = vpop.f32.mrf.mxu0 }
0x26f6   : > { %v2130_v27 = vadd.f32 %v2445_v48, %v2129_v15 }
0x26f7   : > { %v2642_v13 = vpop.f32.mrf.mxu0 }
0x26f8   : > { %v2135_v8 = vpack.c.bf16 %v2130_v27, %v2130_v27 }
0x26f9   : > { %v2132_v50 = vpop.f32.mrf.mxu0 }
0x26fa   : > { %2137 = vrot.lane.b32.xlu0 %v2135_v8, %s2929_s22 }
0x26fb   : > { %v2643_v52 = vpop.f32.mrf.mxu0 }
0x276c   : > { %v2138_v53 = vpop.permute.xlu0 %2137 }
0x276d   : > { %v2143_v55 = vsel %vm557_vm2, %v2138_v53, 0 }
0x276e   : > { %2645 = vmatpush3.bf16.xpose.msra.mxu1 %v2143_v55 }
0x276f   : > { %2656 = vmatprep.subr.bf16.mxu1 %v2922_v1 }
0x2775   : > { %2647 = vmatmul.mubr.msk.bf16.vlgmr.msra.gmra.mxu1 %vm557_vm2, %v2135_v8 }
0x2776   : > { %2660 = vmatprep.mubr.msk.bf16.mxu1 %vm2923_vm1, %v2922_v1  ;;  %2657 = vmatpush3.bf16.msra.mxu1 %v2722_v2 }
0x2777   : > { %2658 = vmatprep.subr.bf16.mxu1 %v2922_v1 }
0x277a   : > { %2659 = vmatpush3.bf16.msra.mxu1 %v2723_v32 }
0x2835   : > { %v2179_v4 = vpop.f32.mrf.mxu1 }
0x2836   : > { %v2185_v56 = vmul.f32 0.35355338, %v2179_v4 }
0x2837   : > { %v2648_v57 = vpop.f32.mrf.mxu1 }
0x2838   : > { %v2187_v58 = vsel %vm2186_vm8, %v2185_v56, -inf }
0x2839   : > { %2188 = vmax.xlane.f32.xlu1 %v2187_v58  ;;  %v2182_v59 = vpop.f32.mrf.mxu1 }
0x283b   : > { %v2649_v60 = vpop.f32.mrf.mxu1 }
0x28c2   : > { %v2189_v61 = vpop.xlane.xlu1 %2188 }
0x28c3   : > { %v2190_v62 = vsub.f32 %v2185_v56, %v2189_v61 }
0x28c5   : > { %v2191_v63 = vmul.f32 1.442695, %v2190_v62 }
0x28c7   : > { %2852 = vpow2.f32 %v2191_v63 }
0x28d4   : > { %v2853_v0 = vpop.eup %2852 }
0x28d5   : > { %v2193_v12 = vsel %vm2186_vm8, %v2853_v0, 0.0 }
0x28d6   : > { %2194 = vadd.xlane.f32.xlu0 %v2193_v12 }
0x28ec   : > { %2199 = vrot.lane.b32.xlu0 %v2135_v8, %s2930_s30  ;;  %s537_s30 = sand.u32 1, %s2912_s25  }
0x28ed   : > { %s2399_s18 = sshll.u32 %s537_s30, 2  ;;  %s2323_s22 = scalar_lea.sflag [#allocation3], %s537_s30 }
0x28ee   : > { %s539_s23 = scalar_lea.vmem [#allocation2], %s2399_s18 }
0x28ef   : > { %s2336_s29 = sshll.u32 %s539_s23, 4  ;;  %s2337_s29 = int_to_ptr.vmem [resolvable:$true] %s2336_s29 }
0x28f0   : > { %s2860_s5 = scalar_lea.vmem %s2337_s29, 64  ;;  %p2867_p0 = scmp.lt.s32.totalorder %s2337_s29, %s2865_s7 }
0x28f1   : > { %p2861_p11 = scmp.ne.s32.totalorder %s2337_s29, %s2860_s5  ;;  %p2868_p1 = scmp.lt.s32.totalorder %s2866_s28, %s2860_s5 }
0x28f3   : > { %p2862_p12 = pnand %p2861_p11, %p3060_p5  ;;  %p2869_p2 = por %p2868_p1, %p2867_p0 }
0x28f5   : > { %p2863_p13 = pneg %p2862_p12 }
0x28f7   : > { %p2870_p3 = pnand %p2869_p2, %p2863_p13 }
0x295f   : > { %v2195_v3 = vpop.xlane.xlu0 %2194 }
0x2960   : > { %2854 = vrcp.f32 %v2195_v3 }
0x2963   : > { %v2200_v5 = vpop.permute.xlu0 %2199 }
0x2964   : > { %v2206_v6 = vsel %vm919_vm5, %v2200_v5, 0 }
0x2965   : > { %2651 = vmatpush3.bf16.msra.mxu0 %v2206_v6 }
0x296d   : > { %v2855_v35 = vpop.eup %2854 }
0x296e   : > { %v2197_v49 = vmul.f32 %v2855_v35, %v2853_v0 }
0x2970   : > { %v2198_v7 = vpack.c.bf16 %v2197_v49, %v2197_v49 }
0x2972   : > { %2653 = vmatmul.mubr.msk.bf16.vlgmr.msra.gmra.mxu0 %vm2201_vm9, %v2198_v7 }
0x2a32   : > { %v2242_v9 = vpop.f32.mrf.mxu0 }
0x2a33   : > { %v2248_v10 = vpack.c.bf16 %v2242_v9, %v2242_v9 }
0x2a34   : > { %v2654_v1 = vpop.f32.mrf.mxu0 }
0x2a35   : > { %2661 = vmatmul.mubr.msk.bf16.vlgmr.msra.gmra.mxu1 %vm1325_vm7, %v2248_v10 }
0x2a36   : > { %v2245_v11 = vpop.f32.mrf.mxu0 }
0x2a38   : > { %v2655_v14 = vpop.f32.mrf.mxu0 }
0x2af5   : > { %v2309_v17 = vpop.f32.mrf.mxu1 }
0x2af6   : > { %v2310_v18 = vadd.f32 %v2451_v16, %v2309_v17 }
0x2af7   : > { %v2662_v19 = vpop.f32.mrf.mxu1 }
0x2af8   : > { %v2455_v21 = vmul.f32 -1.442695, %v2310_v18 }
0x2af9   : > { %v2312_v22 = vpop.f32.mrf.mxu1 }
0x2afa   : > { %2856 = vpow2.f32 %v2455_v21 }
0x2afb   : > { %v2663_v23 = vpop.f32.mrf.mxu1 }
0x2b07   : > { %v2857_v39 = vpop.eup %2856 }
0x2b08   : > { %v2318_v24 = vadd.f32 1.0, %v2857_v39 }
0x2b0a   : > { %2858 = vrcp.f32 %v2318_v24 }
0x2b17   : > { %v2859_v20 = vpop.eup %2858 }
0x2b18   : > { %2321 = vst [vmem:[%s539_s23] sm:$0xf] %v2859_v20 }
0x2b19   : > { %2873 = shalt.err (!%p2870_p3)
}
0x2b1a   : > { %s2874_s3 = scalar_lea.hbm %s3426_s21, 64  ;;  %s2878_s6 = scalar_lea.hbm %s3478_s17, 128 }
0x2b1b   : > { %p2875_p4 = scmp.ne.s32.totalorder %s3426_s21, %s2874_s3  ;;  %p2879_p9 = scmp.lt.s32.totalorder %s3426_s21, %s3478_s17 }
0x2b1c   : > { %p2880_p10 = scmp.lt.s32.totalorder %s2878_s6, %s2874_s3 }
0x2b1d   : > { %p2876_p7 = pnand %p2875_p4, %p3060_p5 }
0x2b1e   : > { %p2881_p11 = por %p2880_p10, %p2879_p9 }
0x2b1f   : > { %p2877_p8 = pneg %p2876_p7 }
0x2b21   : > { %p2882_p12 = pnand %p2881_p11, %p2877_p8 }
0x2b23   : > { %2885 = shalt.err (!%p2882_p12)
}
0x2b24   : > { %2664 = dma.vmem_to_hbm [thread:$0]  (%p3060_p5), %s2337_s29, 64, %s3426_s21, %s2323_s22  }
0x2b25 PF: > { %p2670_p13 = scmp.ge.s32.totalorder %s2920_s27, 2  ;;  %s2348_s5 = sand.u32 1, %s2908_s24  }
0x2b26   : > { %s2349_s7 = scalar_lea.sflag [#allocation3], %s2348_s5 }
0x2b27   : > { %p2667_p0 = pnand %p2670_p13, %p3064_p6 }
0x2b29   : > { %p2668_p1 = pneg %p2667_p0 }
0x2b2b   : > { %2903 = dma.done.wait (%p2668_p1), %s2349_s7, 64  }
0x2b2c   : > { %2905 = vsyncadd (%p2668_p1), %s2349_s7, 4294967232  ;;  %p27_p2 = scmp.ge.s32.totalorder %s3047_s0, 4   ;;  %s3506_s24 = smov %s2912_s25 }
0x2b2d   : > { %s3507_s25 = smov %s2916_s26  ;;  %s3508_s26 = smov %s3058_s19 }
0x2b2e   : > { %s3509_s27 = smov %s3047_s0  ;;  %29 = sbr.rel (!%p27_p2) target bundleno = 12 (0xc), region = 123 }
0x2b33   :  { %2354 = vsyncpa [#allocation3], 1 }
0x2b34   :  { %2356 = vsyncpa [#allocation3 + $0x1], 1 }

// kernel: pitch_forward.2
= control target key start
LH: loop header
LB: loop body
LE: loop exit
PB: predicated region body
PF: predicated region fallthrough
CT: control target
= control target key end

     0   :  { %s7221_s30 = smov 0   ;;  %s9049_s0 = inlined_call_operand.vmem [shape: f32[2,16,16,1], index: 0, kind: input, shape index: {}]   ;;  %s9050_s1 = inlined_call_operand.vmem [shape: bf16[128,8], index: 1, kind: input, shape index: {}]   ;;  %s9051_s2 = inlined_call_operand.vmem [shape: f32[1,8], index: 2, kind: input, shape index: {}]   ;;  %s9052_s3 = inlined_call_operand.vmem [shape: bf16[128,8], index: 3, kind: input, shape index: {}]   ;;  %s9053_s4 = inlined_call_operand.vmem [shape: f32[1,8], index: 4, kind: input, shape index: {}]   ;;  %s9054_s5 = inlined_call_operand.vmem [shape: bf16[128,8], index: 5, kind: input, shape index: {}]   ;;  %s9055_s6 = inlined_call_operand.vmem [shape: f32[1,8], index: 6, kind: input, shape index: {}]   ;;  %s9056_s7 = inlined_call_operand.vmem [shape: bf16[128,8], index: 7, kind: input, shape index: {}]   ;;  %s9057_s8 = inlined_call_operand.vmem [shape: f32[1,8], index: 8, kind: input, shape index: {}]   ;;  %s9058_s9 = inlined_call_operand.vmem [shape: f32[2,16,2], index: 9, kind: output, shape index: {}]  }
   0x1 LB: > { %s5835_s10 = sadd.s32 4294967295, %s7151_s30   ;;  %p5839_p0 = scmp.ge.s32.totalorder %s7151_s30, 1  ;;  %s7151_s30 = sphi %s7221_s30, %s19_s30  }
   0x2   : > { %p287_p1 = scmp.lt.s32.totalorder %s7151_s30, 3 }
   0x4   : > { %p288_p2 = pnand %p5839_p0, %p287_p1 }
   0x5   : > { %p323_p3 = scmp.lt.s32.totalorder (!%p288_p2), %s5835_s10, 1  ;;  %s7154_s17 = smov (!%p288_p2), 1  }
   0x6   : > { %291 = sbr.rel (%p288_p2) target bundleno = 1868 (0x74c), region = 56  ;;  %s7155_s18 = smov (!%p288_p2), 2  }
   0x7   : > { %s7156_s19 = smov (!%p288_p2), 3   ;;  %s7157_s20 = smov (!%p288_p2), 4  }
   0x8   : > { %s7158_s21 = smov (!%p288_p2), 5   ;;  %s7159_s26 = smov (!%p288_p2), 6  }
   0x9   : > { %s7160_s29 = smov (!%p288_p2), 7   ;;  %s7161_s13 = smov (!%p288_p2), 8  }
   0xa   : > { %s7168_s27 = smov (!%p288_p2), 56   ;;  %s7169_s28 = smov (!%p288_p2), 64  }
   0xb   : > { %vm383_vm0 = vcmask 7168   ;;  %vm386_vm1 = vcmask 1024   ;;  %vm392_vm2 = vcmask 0   ;;  %v7153_v0 = vmov 0.0   ;;  %s9094_s10 = smov (!%p323_p3, %s5835_s10), 1  ;;  %v7104_v1 = vld [vmem:[%s9050_s1 + $0x38] sm:$0xff]  }
   0xc   : > { %384 = vst.msk [vmem:[#allocation2] sm:$0xff] %vm383_vm0, %v7153_v0  ;;  %385 = vst.msk [vmem:[#allocation2 + $0x8] sm:$0xff] %vm383_vm0, %v7153_v0  ;;  %s6110_s11 = sshll.u32 %s9094_s10, 8  ;;  %6166 = vmatprep.subr.bf16.mxu0 %v7104_v1  ;;  %vm2005_vm3 = vcmask 64512   ;;  %v7105_v49 = vld [vmem:[%s9050_s1 + $0x30] sm:$0xff]   ;;  %v7106_v50 = vld [vmem:[%s9050_s1 + $0x28] sm:$0xff]  }
   0xd   : > { %387 = vst.msk [vmem:[#allocation2 + $0x10] sm:$0x3] %vm386_vm1, %v7153_v0  ;;  %391 = vst.msk [vmem:[#allocation2 + $0x1a8] sm:$0x3] %vm386_vm1, %v7153_v0  ;;  %s7324_s16 = scalar_lea.vmem %s9049_s0, %s6110_s11  ;;  %6167 = vmatpush3.bf16.msra.mxu0 %v7104_v1  ;;  %v7107_v54 = vld [vmem:[%s9050_s1 + $0x20] sm:$0xff]   ;;  %v7108_v58 = vld [vmem:[%s9050_s1 + $0x18] sm:$0xff]  }
   0xe   : > { %389 = vst.msk [vmem:[#allocation2 + $0x198] sm:$0xff] %vm383_vm0, %v7153_v0  ;;  %390 = vst.msk [vmem:[#allocation2 + $0x1a0] sm:$0xff] %vm383_vm0, %v7153_v0  ;;  %v334_v2 = vld [vmem:[%s7324_s16] sm:$0xff]  ;;  %v335_v3 = vld [vmem:[%s7324_s16 + $0x8] sm:$0xff]  ;;  %6168 = vmatprep.subr.bf16.mxu0 %v7105_v49  ;;  %vm9059_vm4 = vcmask 15360   ;;  %vm1840_vm5 = vcmask 23552  }
   0xf   : > { %394 = vst.msk [vmem:[#allocation2 + $0x18] sm:$0x1] %vm392_vm2, %v7153_v0  ;;  %395 = vst.msk [vmem:[#allocation2 + $0x30] sm:$0x1] %vm392_vm2, %v7153_v0  ;;  %v336_v4 = vld [vmem:[%s7324_s16 + $0x10] sm:$0xff]  ;;  %v337_v10 = vld [vmem:[%s7324_s16 + $0x18] sm:$0xff] }
  0x10   : > { %396 = vst.msk [vmem:[#allocation2 + $0x48] sm:$0x1] %vm392_vm2, %v7153_v0  ;;  %397 = vst.msk [vmem:[#allocation2 + $0x60] sm:$0x1] %vm392_vm2, %v7153_v0  ;;  %v338_v11 = vld [vmem:[%s7324_s16 + $0x20] sm:$0xff]  ;;  %v339_v13 = vld [vmem:[%s7324_s16 + $0x28] sm:$0xff] }
  0x11   : > { %398 = vst.msk [vmem:[#allocation2 + $0x78] sm:$0x1] %vm392_vm2, %v7153_v0  ;;  %399 = vst.msk [vmem:[#allocation2 + $0x90] sm:$0x1] %vm392_vm2, %v7153_v0  ;;  %v340_v14 = vld [vmem:[%s7324_s16 + $0x30] sm:$0xff]  ;;  %v341_v15 = vld [vmem:[%s7324_s16 + $0x38] sm:$0xff]  ;;  %6169 = vmatpush3.bf16.msra.mxu0 %v7105_v49 }
  0x12   : > { %400 = vst.msk [vmem:[#allocation2 + $0xa8] sm:$0x1] %vm392_vm2, %v7153_v0  ;;  %401 = vst.msk [vmem:[#allocation2 + $0xc0] sm:$0x1] %vm392_vm2, %v7153_v0  ;;  %v342_v16 = vld [vmem:[%s7324_s16 + $0x40] sm:$0xff]  ;;  %v343_v17 = vld [vmem:[%s7324_s16 + $0x48] sm:$0xff]  ;;  %6170 = vmatprep.subr.bf16.mxu0 %v7106_v50 }
  0x13   : > { %402 = vst.msk [vmem:[#allocation2 + $0xd8] sm:$0x1] %vm392_vm2, %v7153_v0  ;;  %403 = vst.msk [vmem:[#allocation2 + $0xf0] sm:$0x1] %vm392_vm2, %v7153_v0  ;;  %v526_v5 = vld [vmem:[#allocation2 + $0x2] sm:$0xff]  ;;  %v344_v18 = vld [vmem:[%s7324_s16 + $0x50] sm:$0xff] }
  0x14   : > { %404 = vst.msk [vmem:[#allocation2 + $0x108] sm:$0x1] %vm392_vm2, %v7153_v0  ;;  %405 = vst.msk [vmem:[#allocation2 + $0x120] sm:$0x1] %vm392_vm2, %v7153_v0  ;;  %v494_v6 = vld [vmem:[#allocation2 + $0x1] sm:$0xff]  ;;  %v495_v7 = vld [vmem:[#allocation2 + $0x9] sm:$0xff] }
  0x15   : > { %406 = vst.msk [vmem:[#allocation2 + $0x138] sm:$0x1] %vm392_vm2, %v7153_v0  ;;  %407 = vst.msk [vmem:[#allocation2 + $0x150] sm:$0x1] %vm392_vm2, %v7153_v0  ;;  %v6304_v9 = vpack.i.bf16 %v495_v7, %v494_v6  ;;  %v345_v19 = vld [vmem:[%s7324_s16 + $0x58] sm:$0xff]  ;;  %v346_v20 = vld [vmem:[%s7324_s16 + $0x60] sm:$0xff]  ;;  %6171 = vmatpush3.bf16.msra.mxu0 %v7106_v50 }
  0x16   : > { %408 = vst.msk [vmem:[#allocation2 + $0x168] sm:$0x1] %vm392_vm2, %v7153_v0  ;;  %409 = vst.msk [vmem:[#allocation2 + $0x180] sm:$0x1] %vm392_vm2, %v7153_v0  ;;  %v347_v21 = vld [vmem:[%s7324_s16 + $0x68] sm:$0xff]  ;;  %v348_v22 = vld [vmem:[%s7324_s16 + $0x70] sm:$0xff]  ;;  %6172 = vmatprep.subr.bf16.mxu0 %v7107_v54 }
  0x17   : > { %412 = vst.msk [vmem:[#allocation2 + $0x29] sm:$0x1] %vm392_vm2, %v7153_v0  ;;  %413 = vst.msk [vmem:[#allocation2 + $0x41] sm:$0x1] %vm392_vm2, %v7153_v0  ;;  %6305 = vrot.lane.b32.xlu0 %v6304_v9, %s7154_s17  ;;  %v349_v23 = vld [vmem:[%s7324_s16 + $0x78] sm:$0xff]  ;;  %v350_v24 = vld [vmem:[%s7324_s16 + $0x80] sm:$0xff] }
  0x18   : > { %414 = vst.msk [vmem:[#allocation2 + $0x59] sm:$0x1] %vm392_vm2, %v7153_v0  ;;  %415 = vst.msk [vmem:[#allocation2 + $0x71] sm:$0x1] %vm392_vm2, %v7153_v0  ;;  %v351_v25 = vld [vmem:[%s7324_s16 + $0x88] sm:$0xff]  ;;  %v352_v52 = vld [vmem:[%s7324_s16 + $0x90] sm:$0xff] }
  0x19   : > { %416 = vst.msk [vmem:[#allocation2 + $0x89] sm:$0x1] %vm392_vm2, %v7153_v0  ;;  %417 = vst.msk [vmem:[#allocation2 + $0xa1] sm:$0x1] %vm392_vm2, %v7153_v0  ;;  %v353_v53 = vld [vmem:[%s7324_s16 + $0x98] sm:$0xff]  ;;  %v354_v55 = vld [vmem:[%s7324_s16 + $0xa0] sm:$0xff]  ;;  %6173 = vmatpush3.bf16.msra.mxu0 %v7107_v54 }
  0x1a   : > { %418 = vst.msk [vmem:[#allocation2 + $0xb9] sm:$0x1] %vm392_vm2, %v7153_v0  ;;  %419 = vst.msk [vmem:[#allocation2 + $0xd1] sm:$0x1] %vm392_vm2, %v7153_v0  ;;  %v355_v59 = vld [vmem:[%s7324_s16 + $0xa8] sm:$0xff]  ;;  %v7109_v61 = vld [vmem:[%s9050_s1 + $0x10] sm:$0xff]   ;;  %6174 = vmatprep.subr.bf16.mxu0 %v7108_v58 }
  0x1b   : > { %420 = vst.msk [vmem:[#allocation2 + $0xe9] sm:$0x1] %vm392_vm2, %v7153_v0  ;;  %421 = vst.msk [vmem:[#allocation2 + $0x101] sm:$0x1] %vm392_vm2, %v7153_v0  ;;  %v356_v62 = vld [vmem:[%s7324_s16 + $0xb0] sm:$0xff]  ;;  %v357_v63 = vld [vmem:[%s7324_s16 + $0xb8] sm:$0xff] }
  0x1c   : > { %422 = vst.msk [vmem:[#allocation2 + $0x119] sm:$0x1] %vm392_vm2, %v7153_v0  ;;  %423 = vst.msk [vmem:[#allocation2 + $0x131] sm:$0x1] %vm392_vm2, %v7153_v0  ;;  %v7111_v7 = vld [vmem:[%s9050_s1] sm:$0xff]   ;;  %vm1873_vm6 = vcmask 31744  }
  0x1d   : > { %424 = vst.msk [vmem:[#allocation2 + $0x149] sm:$0x1] %vm392_vm2, %v7153_v0  ;;  %425 = vst.msk [vmem:[#allocation2 + $0x161] sm:$0x1] %vm392_vm2, %v7153_v0  ;;  %6175 = vmatpush3.bf16.msra.mxu0 %v7108_v58  ;;  %vm1906_vm7 = vcmask 39936   ;;  %vm1939_vm8 = vcmask 48128  }
  0x1e   : > { %426 = vst.msk [vmem:[#allocation2 + $0x179] sm:$0x1] %vm392_vm2, %v7153_v0  ;;  %427 = vst.msk [vmem:[#allocation2 + $0x191] sm:$0x1] %vm392_vm2, %v7153_v0  ;;  %6176 = vmatprep.subr.bf16.mxu0 %v7109_v61  ;;  %vm1972_vm9 = vcmask 56320   ;;  %vm2038_vm10 = vcmask 72704  }
  0x1f   : > { %411 = vst.msk [vmem:[#allocation2 + $0x11] sm:$0x1] %vm392_vm2, %v7153_v0  ;;  %428 = vst.msk [vmem:[#allocation2 + $0x1a9] sm:$0x1] %vm392_vm2, %v7153_v0  ;;  %vm9060_vm12 = vcmask 58368   ;;  %vm9061_vm13 = vcmask 57344  }
  0x20   : > { %393 = vst.msk [vmem:[#allocation2] sm:$0x1] %vm392_vm2, %v7153_v0  ;;  %410 = vst.msk [vmem:[#allocation2 + $0x198] sm:$0x1] %vm392_vm2, %v7153_v0  ;;  %vm3978_vm14 = vcmask 1041409   ;;  %vm9062_vm15 = vcmask 1042434  }
  0x21   : > { %430 = vst.msk [vmem:[#allocation2 + $0x19] sm:$0xff] %vm383_vm0, %v334_v2  ;;  %431 = vst.msk [vmem:[#allocation2 + $0x21] sm:$0xff] %vm383_vm0, %v335_v3  ;;  %v7110_v3 = vld [vmem:[%s9050_s1 + $0x8] sm:$0xff]   ;;  %6177 = vmatpush3.bf16.msra.mxu0 %v7109_v61  ;;  %vm3984_vm1 = vcmask 1044484   ;;  %vm3986_vm2 = vcmask 1045509  }
  0x22   : > { %432 = vst.msk [vmem:[#allocation2 + $0x31] sm:$0xff] %vm383_vm0, %v336_v4  ;;  %433 = vst.msk [vmem:[#allocation2 + $0x39] sm:$0xff] %vm383_vm0, %v337_v10  ;;  %6178 = vmatprep.subr.bf16.mxu0 %v7110_v3 }
  0x23   : > { %434 = vst.msk [vmem:[#allocation2 + $0x49] sm:$0xff] %vm383_vm0, %v338_v11  ;;  %435 = vst.msk [vmem:[#allocation2 + $0x51] sm:$0xff] %vm383_vm0, %v339_v13  ;;  %v358_v11 = vld [vmem:[%s7324_s16 + $0xc0] sm:$0xff] }
  0x24   : > { %436 = vst.msk [vmem:[#allocation2 + $0x61] sm:$0xff] %vm383_vm0, %v340_v14  ;;  %437 = vst.msk [vmem:[#allocation2 + $0x69] sm:$0xff] %vm383_vm0, %v341_v15  ;;  %v359_v14 = vld [vmem:[%s7324_s16 + $0xc8] sm:$0xff] }
  0x25   : > { %438 = vst.msk [vmem:[#allocation2 + $0x79] sm:$0xff] %vm383_vm0, %v342_v16  ;;  %439 = vst.msk [vmem:[#allocation2 + $0x81] sm:$0xff] %vm383_vm0, %v343_v17  ;;  %6179 = vmatpush3.bf16.msra.mxu0 %v7110_v3 }
  0x26   : > { %v527_v8 = vld [vmem:[#allocation2 + $0xa] sm:$0xff]  ;;  %440 = vst.msk [vmem:[#allocation2 + $0x91] sm:$0xff] %vm383_vm0, %v344_v18  ;;  %441 = vst.msk [vmem:[#allocation2 + $0x99] sm:$0xff] %vm383_vm0, %v345_v19  ;;  %6180 = vmatprep.subr.bf16.mxu0 %v7111_v7 }
  0x27   : > { %v6309_v12 = vpack.i.bf16 %v527_v8, %v526_v5  ;;  %442 = vst.msk [vmem:[#allocation2 + $0xa9] sm:$0xff] %vm383_vm0, %v346_v20  ;;  %443 = vst.msk [vmem:[#allocation2 + $0xb1] sm:$0xff] %vm383_vm0, %v347_v21 }
  0x28   : > { %444 = vst.msk [vmem:[#allocation2 + $0xc1] sm:$0xff] %vm383_vm0, %v348_v22  ;;  %445 = vst.msk [vmem:[#allocation2 + $0xc9] sm:$0xff] %vm383_vm0, %v349_v23  ;;  %v528_v26 = vld [vmem:[#allocation2 + $0x1a] sm:$0xff]  ;;  %v529_v27 = vld [vmem:[#allocation2 + $0x22] sm:$0xff] }
  0x29   : > { %6310 = vrot.lane.b32.xlu1 %v6309_v12, %s7155_s18  ;;  %v496_v28 = vld [vmem:[#allocation2 + $0x19] sm:$0xff]  ;;  %446 = vst.msk [vmem:[#allocation2 + $0xd9] sm:$0xff] %vm383_vm0, %v350_v24  ;;  %447 = vst.msk [vmem:[#allocation2 + $0xe1] sm:$0xff] %vm383_vm0, %v351_v25  ;;  %v6319_v29 = vpack.i.bf16 %v529_v27, %v528_v26  ;;  %v497_v30 = vld [vmem:[#allocation2 + $0x21] sm:$0xff]  ;;  %6181 = vmatpush3.bf16.msra.mxu0 %v7111_v7 }
  0x2a   : > { %v7364_v31 = vld [vmem:[#allocation2 + $0x30] sm:$0xff]  ;;  %v7366_v32 = vld [vmem:[#allocation2 + $0x18] sm:$0xff]  ;;  %v6314_v33 = vpack.i.bf16 %v497_v30, %v496_v28  ;;  %v7370_v35 = vld [vmem:[#allocation2 + $0x20] sm:$0xff]  ;;  %3631 = vst.msk [vmem:[#allocation3] sm:$0xff] %vm2005_vm3, %v7153_v0  ;;  %6258 = vmatprep.subr.bf16.mxu0 %v7153_v0 }
  0x2b   : > { %v7368_v34 = vld [vmem:[#allocation2 + $0x38] sm:$0xff]  ;;  %v6324_v37 = vpack.i.bf16 %v7370_v35, %v7366_v32  ;;  %v7382_v44 = vld [vmem:[#allocation2 + $0x48] sm:$0xff]  ;;  %v7384_v45 = vld [vmem:[#allocation2 + $0x50] sm:$0xff]  ;;  %3635 = vst.msk [vmem:[#allocation3 + $0x90] sm:$0xff] %vm2005_vm3, %v7153_v0 }
  0x2c   : > { %v6329_v36 = vpack.i.bf16 %v7368_v34, %v7364_v31  ;;  %6315 = vrot.lane.b32.xlu0 %v6314_v33, %s7154_s17  ;;  %v592_v38 = vld [vmem:[#allocation2 + $0x31] sm:$0xff]  ;;  %v593_v39 = vld [vmem:[#allocation2 + $0x39] sm:$0xff]  ;;  %v7389_v46 = vpack.i.bf16 %v7384_v45, %v7382_v44  ;;  %v689_v47 = vld [vmem:[#allocation2 + $0x49] sm:$0xff]  ;;  %448 = vst.msk [vmem:[#allocation2 + $0xf1] sm:$0xff] %vm383_vm0, %v352_v52 }
  0x2d   : > { %6320 = vrot.lane.b32.xlu1 %v6319_v29, %s7155_s18  ;;  %v6339_v40 = vpack.i.bf16 %v593_v39, %v592_v38  ;;  %v624_v41 = vld [vmem:[#allocation2 + $0x32] sm:$0xff]  ;;  %v625_v42 = vld [vmem:[#allocation2 + $0x3a] sm:$0xff]  ;;  %449 = vst.msk [vmem:[#allocation2 + $0xf9] sm:$0xff] %vm383_vm0, %v353_v53  ;;  %v721_v56 = vld [vmem:[#allocation2 + $0x4a] sm:$0xff] }
  0x2e   : > { %v6349_v43 = vpack.i.bf16 %v625_v42, %v624_v41  ;;  %v690_v48 = vld [vmem:[#allocation2 + $0x51] sm:$0xff]  ;;  %450 = vst.msk [vmem:[#allocation2 + $0x109] sm:$0xff] %vm383_vm0, %v354_v55  ;;  %451 = vst.msk [vmem:[#allocation2 + $0x111] sm:$0xff] %vm383_vm0, %v355_v59  ;;  %v564_v1 = vld [vmem:[#allocation2 + $0x60] sm:$0xff] }
  0x2f   : > { %v7404_v51 = vpack.i.bf16 %v690_v48, %v689_v47  ;;  %v722_v57 = vld [vmem:[#allocation2 + $0x52] sm:$0xff]  ;;  %452 = vst.msk [vmem:[#allocation2 + $0x121] sm:$0xff] %vm383_vm0, %v356_v62  ;;  %453 = vst.msk [vmem:[#allocation2 + $0x129] sm:$0xff] %vm383_vm0, %v357_v63  ;;  %v565_v2 = vld [vmem:[#allocation2 + $0x68] sm:$0xff] }
  0x30   : > { %6325 = vrot.lane.b32.xlu0 %v6324_v37, %s7156_s19  ;;  %v6384_v60 = vpack.i.bf16 %v722_v57, %v721_v56  ;;  %v596_v4 = vld [vmem:[#allocation2 + $0x61] sm:$0xff]  ;;  %v597_v5 = vld [vmem:[#allocation2 + $0x69] sm:$0xff]  ;;  %v6409_v6 = vpack.i.bf16 %v565_v2, %v564_v1  ;;  %v7448_v12 = vld [vmem:[#allocation2 + $0x78] sm:$0xff]  ;;  %454 = vst.msk [vmem:[#allocation2 + $0x139] sm:$0xff] %vm383_vm0, %v358_v11 }
  0x31   : > { %6330 = vrot.lane.b32.xlu1 %v6329_v36, %s7156_s19  ;;  %v628_v8 = vld [vmem:[#allocation2 + $0x62] sm:$0xff]  ;;  %v629_v9 = vld [vmem:[#allocation2 + $0x6a] sm:$0xff]  ;;  %v6419_v10 = vpack.i.bf16 %v597_v5, %v596_v4  ;;  %455 = vst.msk [vmem:[#allocation2 + $0x141] sm:$0xff] %vm383_vm0, %v359_v14  ;;  %v693_v17 = vld [vmem:[#allocation2 + $0x79] sm:$0xff] }
  0x32   : > { %v7450_v13 = vld [vmem:[#allocation2 + $0x80] sm:$0xff]  ;;  %v6429_v15 = vpack.i.bf16 %v629_v9, %v628_v8  ;;  %v360_v23 = vld [vmem:[%s7324_s16 + $0xd0] sm:$0xff]  ;;  %v361_v24 = vld [vmem:[%s7324_s16 + $0xd8] sm:$0xff]  ;;  %3633 = vst.msk [vmem:[#allocation3 + $0x8] sm:$0x3] %vm9060_vm12, %v7153_v0 }
  0x33   : > { %v6439_v16 = vpack.i.bf16 %v7450_v13, %v7448_v12  ;;  %v694_v18 = vld [vmem:[#allocation2 + $0x81] sm:$0xff]  ;;  %456 = vst.msk [vmem:[#allocation2 + $0x151] sm:$0xff] %vm383_vm0, %v360_v23  ;;  %457 = vst.msk [vmem:[#allocation2 + $0x159] sm:$0xff] %vm383_vm0, %v361_v24  ;;  %v568_v25 = vld [vmem:[#allocation2 + $0x90] sm:$0xff] }
  0x34   : > { %6335 = vrot.lane.b32.xlu0 %v6314_v33, %s7157_s20  ;;  %v6449_v19 = vpack.i.bf16 %v694_v18, %v693_v17  ;;  %v725_v20 = vld [vmem:[#allocation2 + $0x7a] sm:$0xff]  ;;  %v726_v21 = vld [vmem:[#allocation2 + $0x82] sm:$0xff]  ;;  %v600_v28 = vld [vmem:[#allocation2 + $0x91] sm:$0xff]  ;;  %3636 = vst.msk [vmem:[#allocation3 + $0x98] sm:$0x3] %vm9060_vm12, %v7153_v0  ;;  %vm4449_vm12 = vcmask 523264  }
  0x35   : > { %6340 = vrot.lane.b32.xlu1 %v6339_v40, %s7157_s20  ;;  %v6464_v22 = vpack.i.bf16 %v726_v21, %v725_v20  ;;  %v569_v26 = vld [vmem:[#allocation2 + $0x98] sm:$0xff]  ;;  %v362_v37 = vld [vmem:[%s7324_s16 + $0xe0] sm:$0xff]  ;;  %v363_v38 = vld [vmem:[%s7324_s16 + $0xe8] sm:$0xff]  ;;  %3648 = vst.msk [vmem:[#allocation3 + $0x9] sm:$0x1] %vm9061_vm13, %v7153_v0 }
  0x36   : > { %v6489_v27 = vpack.i.bf16 %v569_v26, %v568_v25  ;;  %v632_v33 = vld [vmem:[#allocation2 + $0x92] sm:$0xff]  ;;  %458 = vst.msk [vmem:[#allocation2 + $0x169] sm:$0xff] %vm383_vm0, %v362_v37  ;;  %459 = vst.msk [vmem:[#allocation2 + $0x171] sm:$0xff] %vm383_vm0, %v363_v38  ;;  %v729_v48 = vld [vmem:[#allocation2 + $0xaa] sm:$0xff] }
  0x37   : > { %v666_v41 = vld [vmem:[#allocation2 + $0xb0] sm:$0xff]  ;;  %v365_v52 = vld [vmem:[%s7324_s16 + $0xf8] sm:$0xff]  ;;  %v572_v53 = vld [vmem:[#allocation2 + $0xc0] sm:$0xff]  ;;  %3649 = vst.msk [vmem:[#allocation3 + $0x19] sm:$0x1] %vm9061_vm13, %v7153_v0 }
  0x38   : > { %6345 = vrot.lane.b32.xlu0 %v6319_v29, %s7158_s21  ;;  %v601_v29 = vld [vmem:[#allocation2 + $0x99] sm:$0xff]  ;;  %461 = vst.msk [vmem:[#allocation2 + $0x189] sm:$0xff] %vm383_vm0, %v365_v52  ;;  %v573_v54 = vld [vmem:[#allocation2 + $0xc8] sm:$0xff]  ;;  %v576_v18 = vld [vmem:[#allocation2 + $0xf0] sm:$0xff] }
  0x39   : > { %6350 = vrot.lane.b32.xlu1 %v6349_v43, %s7158_s21  ;;  %v6499_v30 = vpack.i.bf16 %v601_v29, %v600_v28  ;;  %v730_v49 = vld [vmem:[#allocation2 + $0xb2] sm:$0xff]  ;;  %v6569_v55 = vpack.i.bf16 %v573_v54, %v572_v53  ;;  %v604_v56 = vld [vmem:[#allocation2 + $0xc1] sm:$0xff]  ;;  %v605_v57 = vld [vmem:[#allocation2 + $0xc9] sm:$0xff]  ;;  %3638 = vst.msk [vmem:[#allocation3] sm:$0x1] %vm9061_vm13, %v7153_v0 }
  0x3a   : > { %v6544_v50 = vpack.i.bf16 %v730_v49, %v729_v48  ;;  %v6579_v58 = vpack.i.bf16 %v605_v57, %v604_v56  ;;  %v636_v59 = vld [vmem:[#allocation2 + $0xc2] sm:$0xff]  ;;  %v669_v62 = vld [vmem:[#allocation2 + $0xd8] sm:$0xff]  ;;  %vm7616_vm11 = vmpackc.low %vm2038_vm10, %vm2038_vm10  ;;  %3639 = vst.msk [vmem:[#allocation3 + $0x10] sm:$0x1] %vm9061_vm13, %v7153_v0  ;;  %vm4422_vm10 = vcmask 326656  }
  0x3b   : > { %v670_v63 = vld [vmem:[#allocation2 + $0xe0] sm:$0xff]  ;;  %v463_v23 = vld [vmem:[#allocation2 + $0x8] sm:$0xff]  ;;  %v640_v37 = vld [vmem:[#allocation2 + $0xf2] sm:$0xff]  ;;  %3640 = vst.msk [vmem:[#allocation3 + $0x20] sm:$0x1] %vm9061_vm13, %v7153_v0 }
  0x3c   : > { %6355 = vrot.lane.b32.xlu0 %v6329_v36, %s7159_s26  ;;  %v633_v36 = vld [vmem:[#allocation2 + $0x9a] sm:$0xff]  ;;  %v7508_v2 = vpack.i.bf16 %v670_v63, %v669_v62  ;;  %v734_v11 = vld [vmem:[#allocation2 + $0xe2] sm:$0xff]  ;;  %3641 = vst.msk [vmem:[#allocation3 + $0x30] sm:$0x1] %vm9061_vm13, %v7153_v0  ;;  %3642 = vst.msk [vmem:[#allocation3 + $0x40] sm:$0x1] %vm9061_vm13, %v7153_v0 }
  0x3d   : > { %6360 = vrot.lane.b32.xlu1 %v7389_v46, %s7159_s26  ;;  %v6509_v39 = vpack.i.bf16 %v633_v36, %v632_v33  ;;  %v701_v4 = vld [vmem:[#allocation2 + $0xd9] sm:$0xff]  ;;  %v702_v5 = vld [vmem:[#allocation2 + $0xe1] sm:$0xff]  ;;  %v608_v33 = vld [vmem:[#allocation2 + $0xf1] sm:$0xff]  ;;  %3643 = vst.msk [vmem:[#allocation3 + $0x50] sm:$0x1] %vm9061_vm13, %v7153_v0 }
  0x3e   : > { %v462_v24 = vld [vmem:[#allocation2] sm:$0xff]  ;;  %3644 = vst.msk [vmem:[#allocation3 + $0x60] sm:$0x1] %vm9061_vm13, %v7153_v0  ;;  %3645 = vst.msk [vmem:[#allocation3 + $0x70] sm:$0x1] %vm9061_vm13, %v7153_v0 }
  0x3f   : > { %v609_v36 = vld [vmem:[#allocation2 + $0xf9] sm:$0xff]  ;;  %3646 = vst.msk [vmem:[#allocation3 + $0x80] sm:$0x1] %vm9061_vm13, %v7153_v0  ;;  %3647 = vst.msk [vmem:[#allocation3 + $0x90] sm:$0x1] %vm9061_vm13, %v7153_v0 }
  0x40   : > { %6365 = vrot.lane.b32.xlu0 %v6339_v40, %s7160_s29  ;;  %3650 = vst.msk [vmem:[#allocation3 + $0x29] sm:$0x1] %vm9061_vm13, %v7153_v0  ;;  %3651 = vst.msk [vmem:[#allocation3 + $0x39] sm:$0x1] %vm9061_vm13, %v7153_v0 }
  0x41   : > { %6370 = vrot.lane.b32.xlu1 %v7404_v51, %s7160_s29  ;;  %3652 = vst.msk [vmem:[#allocation3 + $0x49] sm:$0x1] %vm9061_vm13, %v7153_v0  ;;  %3653 = vst.msk [vmem:[#allocation3 + $0x59] sm:$0x1] %vm9061_vm13, %v7153_v0 }
  0x42   : > { %3654 = vst.msk [vmem:[#allocation3 + $0x69] sm:$0x1] %vm9061_vm13, %v7153_v0  ;;  %3655 = vst.msk [vmem:[#allocation3 + $0x79] sm:$0x1] %vm9061_vm13, %v7153_v0 }
  0x43   : > { %3656 = vst.msk [vmem:[#allocation3 + $0x89] sm:$0x1] %vm9061_vm13, %v7153_v0  ;;  %3657 = vst.msk [vmem:[#allocation3 + $0x99] sm:$0x1] %vm9061_vm13, %v7153_v0 }
  0x44   : > { %6375 = vrot.lane.b32.xlu0 %v6349_v43, %s7161_s13  ;;  %4940 = vst.msk [vmem:[#allocation4 + $0x8] sm:$0x1] %vm9061_vm13, %v7153_v0  ;;  %4941 = vst.msk [vmem:[#allocation4 + $0x10] sm:$0x1] %vm9061_vm13, %v7153_v0 }
  0x45   : > { %6380 = vrot.lane.b32.xlu1 %v6339_v40, %s7154_s17  ;;  %v665_v40 = vld [vmem:[#allocation2 + $0xa8] sm:$0xff]  ;;  %4942 = vst.msk [vmem:[#allocation4 + $0x18] sm:$0x1] %vm9061_vm13, %v7153_v0  ;;  %4943 = vst.msk [vmem:[#allocation4 + $0x20] sm:$0x1] %vm9061_vm13, %v7153_v0 }
  0x46   : > { %v6519_v42 = vpack.i.bf16 %v666_v41, %v665_v40  ;;  %4946 = vst.msk [vmem:[#allocation4 + $0xd] sm:$0x1] %vm9061_vm13, %v7153_v0  ;;  %4947 = vst.msk [vmem:[#allocation4 + $0x15] sm:$0x1] %vm9061_vm13, %v7153_v0 }
  0x47   : > { %4948 = vst.msk [vmem:[#allocation4 + $0x1d] sm:$0x1] %vm9061_vm13, %v7153_v0  ;;  %4949 = vst.msk [vmem:[#allocation4 + $0x25] sm:$0x1] %vm9061_vm13, %v7153_v0 }
  0x48   : > { %6385 = vrot.lane.b32.xlu0 %v6384_v60, %s7161_s13  ;;  %5461 = vst.msk [vmem:[#allocation5 + $0x4] sm:$0x1] %vm9061_vm13, %v7153_v0  ;;  %5462 = vst.msk [vmem:[#allocation5 + $0x8] sm:$0x1] %vm9061_vm13, %v7153_v0 }
  0x49   : > { %6390 = vrot.lane.b32.xlu1 %v7404_v51, %s7154_s17  ;;  %5465 = vst.msk [vmem:[#allocation5 + $0x7] sm:$0x1] %vm9061_vm13, %v7153_v0  ;;  %5466 = vst.msk [vmem:[#allocation5 + $0xb] sm:$0x1] %vm9061_vm13, %v7153_v0  ;;  %vm9063_vm13 = vcmask 588800  }
  0x4c   : > { %6395 = vrot.lane.b32.xlu0 %v6349_v43, %s7155_s18  ;;  %v697_v43 = vld [vmem:[#allocation2 + $0xa9] sm:$0xff] }
  0x4d   : > { %6400 = vrot.lane.b32.xlu1 %v6384_v60, %s7155_s18 }
  0x50   : > { %6405 = vrot.lane.b32.xlu0 %v7389_v46, %s7156_s19  ;;  %v698_v46 = vld [vmem:[#allocation2 + $0xb1] sm:$0xff] }
  0x51   : > { %6410 = vrot.lane.b32.xlu1 %v6409_v6, %s7156_s19  ;;  %v6529_v47 = vpack.i.bf16 %v698_v46, %v697_v43  ;;  %v641_v43 = vld [vmem:[#allocation2 + $0xfa] sm:$0xff]  ;;  %v673_v46 = vld [vmem:[#allocation2 + $0x108] sm:$0xff] }
  0x54   : > { %6415 = vrot.lane.b32.xlu0 %v7404_v51, %s7157_s20  ;;  %v364_v51 = vld [vmem:[%s7324_s16 + $0xf0] sm:$0xff] }
  0x55   : > { %6420 = vrot.lane.b32.xlu1 %v6419_v10, %s7157_s20  ;;  %460 = vst.msk [vmem:[#allocation2 + $0x181] sm:$0xff] %vm383_vm0, %v364_v51 }
  0x58   : > { %6425 = vrot.lane.b32.xlu0 %v6384_v60, %s7158_s21  ;;  %v637_v60 = vld [vmem:[#allocation2 + $0xca] sm:$0xff] }
  0x59   : > { %6430 = vrot.lane.b32.xlu1 %v6429_v15, %s7158_s21  ;;  %v6589_v61 = vpack.i.bf16 %v637_v60, %v636_v59 }
  0x5c   : > { %6435 = vrot.lane.b32.xlu0 %v6409_v6, %s7159_s26  ;;  %v7513_v6 = vpack.i.bf16 %v702_v5, %v701_v4 }
  0x5d   : > { %6440 = vrot.lane.b32.xlu1 %v6439_v16, %s7159_s26 }
  0x60   : > { %6445 = vrot.lane.b32.xlu0 %v6419_v10, %s7160_s29 }
  0x61   : > { %6450 = vrot.lane.b32.xlu1 %v6449_v19, %s7160_s29 }
  0x64   : > { %6455 = vrot.lane.b32.xlu0 %v6429_v15, %s7161_s13 }
  0x65   : > { %6460 = vrot.lane.b32.xlu1 %v6419_v10, %s7154_s17  ;;  %v733_v10 = vld [vmem:[#allocation2 + $0xda] sm:$0xff] }
  0x68   : > { %6465 = vrot.lane.b32.xlu0 %v6464_v22, %s7161_s13 }
  0x69   : > { %6470 = vrot.lane.b32.xlu1 %v6449_v19, %s7154_s17 }
  0x6c   : > { %6475 = vrot.lane.b32.xlu0 %v6429_v15, %s7155_s18  ;;  %v7527_v15 = vpack.i.bf16 %v734_v11, %v733_v10 }
  0x6d   : > { %6480 = vrot.lane.b32.xlu1 %v6464_v22, %s7155_s18 }
  0x70   : > { %6485 = vrot.lane.b32.xlu0 %v6439_v16, %s7156_s19 }
  0x71   : > { %6490 = vrot.lane.b32.xlu1 %v6489_v27, %s7156_s19 }
  0x74   : > { %6495 = vrot.lane.b32.xlu0 %v6449_v19, %s7157_s20  ;;  %v577_v19 = vld [vmem:[#allocation2 + $0xf8] sm:$0xff] }
  0x75   : > { %6500 = vrot.lane.b32.xlu1 %v6499_v30, %s7157_s20  ;;  %v7543_v28 = vpack.i.bf16 %v577_v19, %v576_v18 }
  0x78   : > { %6505 = vrot.lane.b32.xlu0 %v6464_v22, %s7158_s21 }
  0x79   : > { %6510 = vrot.lane.b32.xlu1 %v6509_v39, %s7158_s21 }
  0x7c   : > { %6515 = vrot.lane.b32.xlu0 %v6489_v27, %s7159_s26 }
  0x7d   : > { %6520 = vrot.lane.b32.xlu1 %v6519_v42, %s7159_s26 }
  0x80   : > { %6525 = vrot.lane.b32.xlu0 %v6499_v30, %s7160_s29 }
  0x81   : > { %6530 = vrot.lane.b32.xlu1 %v6529_v47, %s7160_s29 }
  0x84   : > { %6535 = vrot.lane.b32.xlu0 %v6509_v39, %s7161_s13 }
  0x85   : > { %6540 = vrot.lane.b32.xlu1 %v6499_v30, %s7154_s17 }
  0x88   : > { %6545 = vrot.lane.b32.xlu0 %v6544_v50, %s7161_s13 }
  0x89   : > { %6550 = vrot.lane.b32.xlu1 %v6529_v47, %s7154_s17  ;;  %v6306_v3 = vpop.permute.xlu0 %6305 }
  0x8a   : > { %v6308_v20 = vunpack.i.h.bf16 %v6306_v3  ;;  %v6307_v21 = vunpack.i.l.bf16 %v6306_v3 }
  0x8c   : > { %6555 = vrot.lane.b32.xlu0 %v6509_v39, %s7155_s18  ;;  %v1776_v38 = vsel %vm383_vm0, %v463_v23, %v6308_v20  ;;  %v1775_v39 = vsel %vm383_vm0, %v462_v24, %v6307_v21 }
  0x8d   : > { %6560 = vrot.lane.b32.xlu1 %v6544_v50, %s7155_s18 }
  0x90   : > { %6565 = vrot.lane.b32.xlu0 %v6519_v42, %s7156_s19 }
  0x91   : > { %6570 = vrot.lane.b32.xlu1 %v6569_v55, %s7156_s19 }
  0x94   : > { %6575 = vrot.lane.b32.xlu0 %v6529_v47, %s7157_s20  ;;  %v674_v47 = vld [vmem:[#allocation2 + $0x110] sm:$0xff] }
  0x95   : > { %6580 = vrot.lane.b32.xlu1 %v6579_v58, %s7157_s20  ;;  %v7572_v57 = vpack.i.bf16 %v674_v47, %v673_v46 }
  0x98   : > { %6585 = vrot.lane.b32.xlu0 %v6544_v50, %s7158_s21 }
  0x99   : > { %6590 = vrot.lane.b32.xlu1 %v6589_v61, %s7158_s21 }
  0x9b   : > { %v7506_v1 = vpop.permute.xlu1 %6310 }
  0x9c   : > { %6595 = vrot.lane.b32.xlu0 %v6569_v55, %s7159_s26  ;;  %v6313_v29 = vunpack.i.h.bf16 %v7506_v1  ;;  %v6312_v30 = vunpack.i.l.bf16 %v7506_v1  ;;  %v7564_v55 = vpack.i.bf16 %v609_v36, %v608_v33  ;;  %v705_v33 = vld [vmem:[#allocation2 + $0x109] sm:$0xff]  ;;  %v706_v36 = vld [vmem:[#allocation2 + $0x111] sm:$0xff] }
  0x9d   : > { %6600 = vrot.lane.b32.xlu1 %v7508_v2, %s7159_s26 }
  0x9e   : > { %v6316_v8 = vpop.permute.xlu0 %6315  ;;  %v1809_v56 = vsel %vm9059_vm4, %v1776_v38, %v6313_v29 }
  0x9f   : > { %v7516_v7 = vpop.permute.xlu1 %6320  ;;  %v6318_v25 = vunpack.i.h.bf16 %v6316_v8  ;;  %v6317_v26 = vunpack.i.l.bf16 %v6316_v8 }
  0xa0   : > { %6605 = vrot.lane.b32.xlu0 %v6579_v58, %s7160_s29  ;;  %v6323_v40 = vunpack.i.h.bf16 %v7516_v7  ;;  %v6322_v41 = vunpack.i.l.bf16 %v7516_v7 }
  0xa1   : > { %6610 = vrot.lane.b32.xlu1 %v7513_v6, %s7160_s29  ;;  %v1777_v48 = vsel %vm383_vm0, %v7366_v32, %v6317_v26  ;;  %v1778_v49 = vsel %vm383_vm0, %v7370_v35, %v6318_v25  ;;  %v1808_v32 = vsel %vm9059_vm4, %v1775_v39, %v6312_v30  ;;  %v7570_v35 = vpack.i.bf16 %v641_v43, %v640_v37 }
  0xa2   : > { %v7523_v14 = vpop.permute.xlu0 %6325  ;;  %v1811_v59 = vsel %vm9059_vm4, %v1778_v49, %v6323_v40 }
  0xa3   : > { %v7521_v9 = vpop.permute.xlu1 %6330  ;;  %v6328_v53 = vunpack.i.h.bf16 %v7523_v14  ;;  %v6327_v54 = vunpack.i.l.bf16 %v7523_v14 }
  0xa4   : > { %6615 = vrot.lane.b32.xlu0 %v6589_v61, %s7161_s13  ;;  %v6333_v50 = vunpack.i.h.bf16 %v7521_v9  ;;  %v6332_v51 = vunpack.i.l.bf16 %v7521_v9 }
  0xa5   : > { %6620 = vrot.lane.b32.xlu1 %v6579_v58, %s7154_s17  ;;  %v1810_v58 = vsel %vm9059_vm4, %v1777_v48, %v6322_v41  ;;  %v1842_v5 = vsel %vm1840_vm5, %v1809_v56, %v6328_v53  ;;  %v1841_v7 = vsel %vm1840_vm5, %v1808_v32, %v6327_v54 }
  0xa6   : > { %v7531_v17 = vpop.permute.xlu0 %6335  ;;  %v1843_v63 = vsel %vm1840_vm5, %v1810_v58, %v6332_v51  ;;  %v1844_v1 = vsel %vm1840_vm5, %v1811_v59, %v6333_v50 }
  0xa7   : > { %v7529_v16 = vpop.permute.xlu1 %6340  ;;  %v6338_v60 = vunpack.i.h.bf16 %v7531_v17 }
  0xa8   : > { %6625 = vrot.lane.b32.xlu0 %v7527_v15, %s7161_s13  ;;  %v6343_v10 = vunpack.i.h.bf16 %v7529_v16  ;;  %v6342_v11 = vunpack.i.l.bf16 %v7529_v16 }
  0xa9   : > { %6630 = vrot.lane.b32.xlu1 %v7513_v6, %s7154_s17  ;;  %v1875_v19 = vsel %vm1873_vm6, %v1842_v5, %v6338_v60 }
  0xaa   : > { %v7539_v27 = vpop.permute.xlu0 %6345  ;;  %v1876_v41 = vsel %vm1873_vm6, %v1843_v63, %v6342_v11 }
  0xab   : > { %v7537_v22 = vpop.permute.xlu1 %6350  ;;  %v6348_v3 = vunpack.i.h.bf16 %v7539_v27 }
  0xac   : > { %6635 = vrot.lane.b32.xlu0 %v6589_v61, %s7155_s18  ;;  %v6337_v61 = vunpack.i.l.bf16 %v7531_v17  ;;  %v6353_v20 = vunpack.i.h.bf16 %v7537_v22  ;;  %v6352_v21 = vunpack.i.l.bf16 %v7537_v22 }
  0xad   : > { %6640 = vrot.lane.b32.xlu1 %v7527_v15, %s7155_s18  ;;  %v1908_v25 = vsel %vm1906_vm7, %v1875_v19, %v6348_v3  ;;  %v737_v3 = vld [vmem:[#allocation2 + $0x10a] sm:$0xff] }
  0xae   : > { %v6356_v52 = vpop.permute.xlu0 %6355  ;;  %v1874_v18 = vsel %vm1873_vm6, %v1841_v7, %v6337_v61 }
  0xaf   : > { %v7552_v42 = vpop.permute.xlu1 %6360  ;;  %v6358_v8 = vunpack.i.h.bf16 %v6356_v52  ;;  %v6357_v9 = vunpack.i.l.bf16 %v6356_v52  ;;  %v7622_v52 = vpack.i.bf16 %v706_v36, %v705_v33 }
  0xb0   : > { %6645 = vrot.lane.b32.xlu0 %v7508_v2, %s7156_s19  ;;  %v6347_v2 = vunpack.i.l.bf16 %v7539_v27  ;;  %v6363_v16 = vunpack.i.h.bf16 %v7552_v42  ;;  %v6362_v26 = vunpack.i.l.bf16 %v7552_v42  ;;  %v1877_v42 = vsel %vm1873_vm6, %v1844_v1, %v6343_v10  ;;  %v581_v10 = vld [vmem:[#allocation2 + $0x128] sm:$0xff] }
  0xb1   : > { %6650 = vrot.lane.b32.xlu1 %v7543_v28, %s7156_s19  ;;  %v1941_v22 = vsel %vm1939_vm8, %v1908_v25, %v6358_v8  ;;  %v1910_v49 = vsel %vm1906_vm7, %v1877_v42, %v6353_v20  ;;  %v677_v25 = vld [vmem:[#allocation2 + $0x138] sm:$0xff] }
  0xb2   : > { %v6366_v4 = vpop.permute.xlu0 %6365  ;;  %v1907_v24 = vsel %vm1906_vm7, %v1874_v18, %v6347_v2  ;;  %v1943_v54 = vsel %vm1939_vm8, %v1910_v49, %v6363_v16  ;;  %v738_v2 = vld [vmem:[#allocation2 + $0x112] sm:$0xff]  ;;  %v644_v18 = vld [vmem:[#allocation2 + $0x122] sm:$0xff] }
  0xb3   : > { %v6371_v62 = vpop.permute.xlu1 %6370  ;;  %v6368_v14 = vunpack.i.h.bf16 %v6366_v4  ;;  %v6367_v17 = vunpack.i.l.bf16 %v6366_v4  ;;  %v1940_v30 = vsel %vm1939_vm8, %v1907_v24, %v6357_v9  ;;  %v7646_v5 = vpack.i.bf16 %v738_v2, %v737_v3  ;;  %v580_v9 = vld [vmem:[#allocation2 + $0x120] sm:$0xff]  ;;  %v645_v24 = vld [vmem:[#allocation2 + $0x12a] sm:$0xff] }
  0xb4   : > { %6655 = vrot.lane.b32.xlu0 %v7513_v6, %s7157_s20  ;;  %v6373_v37 = vunpack.i.h.bf16 %v6371_v62  ;;  %v6372_v38 = vunpack.i.l.bf16 %v6371_v62  ;;  %v678_v16 = vld [vmem:[#allocation2 + $0x140] sm:$0xff] }
  0xb5   : > { %6660 = vrot.lane.b32.xlu1 %v7564_v55, %s7157_s20  ;;  %v1973_v39 = vsel %vm1972_vm9, %v1940_v30, %v6367_v17  ;;  %v1974_v40 = vsel %vm1972_vm9, %v1941_v22, %v6368_v14  ;;  %v612_v14 = vld [vmem:[#allocation2 + $0x121] sm:$0xff]  ;;  %v613_v17 = vld [vmem:[#allocation2 + $0x129] sm:$0xff] }
  0xb6   : > { %v6376_v27 = vpop.permute.xlu0 %6375  ;;  %v1976_v59 = vsel %vm1972_vm9, %v1943_v54, %v6373_v37  ;;  %v7672_v36 = vpack.i.bf16 %v613_v17, %v612_v14 }
  0xb7   : > { %v7594_v23 = vpop.permute.xlu1 %6380  ;;  %v6378_v6 = vunpack.i.h.bf16 %v6376_v27  ;;  %v6377_v29 = vunpack.i.l.bf16 %v6376_v27 }
  0xb8   : > { %6665 = vrot.lane.b32.xlu0 %v7527_v15, %s7158_s21  ;;  %v1909_v15 = vsel %vm1906_vm7, %v1876_v41, %v6352_v21  ;;  %v7664_v21 = vpack.i.bf16 %v581_v10, %v580_v9  ;;  %v6382_v27 = vunpack.i.l.bf16 %v7594_v23  ;;  %v7676_v41 = vpack.i.bf16 %v678_v16, %v677_v25 }
  0xb9   : > { %6670 = vrot.lane.b32.xlu1 %v7570_v35, %s7158_s21  ;;  %v2006_v46 = vsel %vm2005_vm3, %v1973_v39, %v6377_v29  ;;  %v2007_v47 = vsel %vm2005_vm3, %v1974_v40, %v6378_v6  ;;  %v1942_v53 = vsel %vm1939_vm8, %v1909_v15, %v6362_v26  ;;  %v6383_v26 = vunpack.i.h.bf16 %v7594_v23 }
  0xba   : > { %v6386_v50 = vpop.permute.xlu0 %6385  ;;  %v5854_v51 = vpack.c.bf16 %v2007_v47, %v2006_v46  ;;  %v1975_v58 = vsel %vm1972_vm9, %v1942_v53, %v6372_v38  ;;  %v7674_v40 = vpack.i.bf16 %v645_v24, %v644_v18  ;;  %v1779_v47 = vsel %vm383_vm0, %v7364_v31, %v6382_v27 }
  0xbb   : > { %v7610_v43 = vpop.permute.xlu1 %6390  ;;  %v6388_v32 = vunpack.i.h.bf16 %v6386_v50  ;;  %v6387_v56 = vunpack.i.l.bf16 %v6386_v50  ;;  %v1780_v46 = vsel %vm383_vm0, %v7368_v34, %v6383_v26 }
  0xbc   : > { %6675 = vrot.lane.b32.xlu0 %v7543_v28, %s7159_s26  ;;  %6182 = vmatprep.mubr.msk.bf16.mxu0 %vm7616_vm11, %v5854_v51  ;;  %v6393_v19 = vunpack.i.h.bf16 %v7610_v43  ;;  %v6392_v20 = vunpack.i.l.bf16 %v7610_v43 }
  0xbd   : > { %6680 = vrot.lane.b32.xlu1 %v7572_v57, %s7159_s26  ;;  %v2008_v60 = vsel %vm2005_vm3, %v1975_v58, %v6387_v56  ;;  %v2009_v61 = vsel %vm2005_vm3, %v1976_v59, %v6388_v32 }
  0xbe   : > { %v6396_v63 = vpop.permute.xlu0 %6395  ;;  %v5857_v1 = vpack.c.bf16 %v2009_v61, %v2008_v60  ;;  %v1782_v23 = vsel %vm383_vm0, %v7384_v45, %v6393_v19  ;;  %v1781_v42 = vsel %vm383_vm0, %v7382_v44, %v6392_v20  ;;  %v710_v20 = vld [vmem:[#allocation2 + $0x141] sm:$0xff] }
  0xbf   : > { %v6401_v62 = vpop.permute.xlu1 %6400  ;;  %v6398_v30 = vunpack.i.h.bf16 %v6396_v63  ;;  %v6397_v22 = vunpack.i.l.bf16 %v6396_v63 }
  0xc0   : > { %6685 = vrot.lane.b32.xlu0 %v7564_v55, %s7160_s29  ;;  %6183 = vmatmul.mubr.msk.bf16.vlgmr.msra.gmra.mxu0 %vm7616_vm11, %v5857_v1  ;;  %v6403_v6 = vunpack.i.h.bf16 %v6401_v62  ;;  %v6402_v29 = vunpack.i.l.bf16 %v6401_v62 }
  0xc1   : > { %6690 = vrot.lane.b32.xlu1 %v7622_v52, %s7160_s29  ;;  %v1813_v44 = vsel %vm9059_vm4, %v1780_v46, %v6398_v30  ;;  %v1812_v45 = vsel %vm9059_vm4, %v1779_v47, %v6397_v22 }
  0xc2   : > { %v6406_v4 = vpop.permute.xlu0 %6405  ;;  %v1814_v15 = vsel %vm9059_vm4, %v1781_v42, %v6402_v29  ;;  %v1815_v49 = vsel %vm9059_vm4, %v1782_v23, %v6403_v6 }
  0xc3   : > { %v6411_v28 = vpop.permute.xlu1 %6410  ;;  %v6407_v43 = vunpack.i.l.bf16 %v6406_v4 }
  0xc4   : > { %6695 = vrot.lane.b32.xlu0 %v7570_v35, %s7161_s13  ;;  %v6413_v37 = vunpack.i.h.bf16 %v6411_v28  ;;  %v6412_v38 = vunpack.i.l.bf16 %v6411_v28 }
  0xc5   : > { %6700 = vrot.lane.b32.xlu1 %v7564_v55, %s7154_s17 }
  0xc6   : > { %v7650_v8 = vpop.permute.xlu0 %6415  ;;  %v1847_v34 = vsel %vm1840_vm5, %v1814_v15, %v6412_v38  ;;  %v1848_v31 = vsel %vm1840_vm5, %v1815_v49, %v6413_v37 }
  0xc7   : > { %v7648_v7 = vpop.permute.xlu1 %6420  ;;  %v6418_v50 = vunpack.i.h.bf16 %v7650_v8  ;;  %v6417_v51 = vunpack.i.l.bf16 %v7650_v8 }
  0xc8   : > { %6705 = vrot.lane.b32.xlu0 %v7646_v5, %s7161_s13  ;;  %v6423_v61 = vunpack.i.h.bf16 %v7648_v7  ;;  %v6422_v62 = vunpack.i.l.bf16 %v7648_v7 }
  0xc9   : > { %6710 = vrot.lane.b32.xlu1 %v7622_v52, %s7154_s17 }
  0xca   : > { %v7658_v55 = vpop.permute.xlu0 %6425  ;;  %v1880_v27 = vsel %vm1873_vm6, %v1847_v34, %v6422_v62  ;;  %v1881_v6 = vsel %vm1873_vm6, %v1848_v31, %v6423_v61  ;;  %v648_v61 = vld [vmem:[#allocation2 + $0x152] sm:$0xff] }
  0xcb   : > { %v7656_v11 = vpop.permute.xlu1 %6430  ;;  %v6428_v54 = vunpack.i.h.bf16 %v7658_v55  ;;  %v6427_v32 = vunpack.i.l.bf16 %v7658_v55 }
  0xcc   : > { %6715 = vrot.lane.b32.xlu0 %v7570_v35, %s7155_s18  ;;  %v6408_v35 = vunpack.i.h.bf16 %v6406_v4  ;;  %v6433_v2 = vunpack.i.h.bf16 %v7656_v11  ;;  %v6432_v4 = vunpack.i.l.bf16 %v7656_v11  ;;  %v709_v11 = vld [vmem:[#allocation2 + $0x139] sm:$0xff] }
  0xcd   : > { %6720 = vrot.lane.b32.xlu1 %v7646_v5, %s7155_s18  ;;  %v7734_v23 = vpack.i.bf16 %v710_v20, %v709_v11 }
  0xce   : > { %v6436_v39 = vpop.permute.xlu0 %6435  ;;  %v1846_v58 = vsel %vm1840_vm5, %v1813_v44, %v6408_v35  ;;  %v1914_v37 = vsel %vm1906_vm7, %v1881_v6, %v6433_v2  ;;  %v682_v2 = vld [vmem:[#allocation2 + $0x170] sm:$0xff] }
  0xcf   : > { %v7670_v33 = vpop.permute.xlu1 %6440  ;;  %v6438_v59 = vunpack.i.h.bf16 %v6436_v39  ;;  %v6437_v60 = vunpack.i.l.bf16 %v6436_v39  ;;  %v1879_v3 = vsel %vm1873_vm6, %v1846_v58, %v6418_v50 }
  0xd0   : > { %6725 = vrot.lane.b32.xlu0 %v7572_v57, %s7156_s19  ;;  %v1845_v57 = vsel %vm1840_vm5, %v1812_v45, %v6407_v43  ;;  %v1912_v10 = vsel %vm1906_vm7, %v1879_v3, %v6428_v54  ;;  %v6443_v7 = vunpack.i.h.bf16 %v7670_v33  ;;  %v6442_v55 = vunpack.i.l.bf16 %v7670_v33  ;;  %v681_v3 = vld [vmem:[#allocation2 + $0x168] sm:$0xff] }
  0xd1   : > { %6730 = vrot.lane.b32.xlu1 %v7664_v21, %s7156_s19  ;;  %v1878_v28 = vsel %vm1873_vm6, %v1845_v57, %v6417_v51  ;;  %v1945_v17 = vsel %vm1939_vm8, %v1912_v10, %v6438_v59  ;;  %v1913_v33 = vsel %vm1906_vm7, %v1880_v27, %v6432_v4  ;;  %v741_v51 = vld [vmem:[#allocation2 + $0x13a] sm:$0xff]  ;;  %v616_v59 = vld [vmem:[#allocation2 + $0x151] sm:$0xff] }
  0xd2   : > { %v6446_v56 = vpop.permute.xlu0 %6445  ;;  %v1911_v9 = vsel %vm1906_vm7, %v1878_v28, %v6427_v32  ;;  %v1947_v42 = vsel %vm1939_vm8, %v1914_v37, %v6443_v7  ;;  %v585_v57 = vld [vmem:[#allocation2 + $0x158] sm:$0xff] }
  0xd3   : > { %v6451_v53 = vpop.permute.xlu1 %6450  ;;  %v6448_v63 = vunpack.i.h.bf16 %v6446_v56  ;;  %v6447_v1 = vunpack.i.l.bf16 %v6446_v56  ;;  %v584_v56 = vld [vmem:[#allocation2 + $0x150] sm:$0xff]  ;;  %v649_v28 = vld [vmem:[#allocation2 + $0x15a] sm:$0xff] }
  0xd4   : > { %6735 = vrot.lane.b32.xlu0 %v7622_v52, %s7157_s20  ;;  %v1944_v52 = vsel %vm1939_vm8, %v1911_v9, %v6437_v60  ;;  %v6453_v24 = vunpack.i.h.bf16 %v6451_v53  ;;  %v6452_v25 = vunpack.i.l.bf16 %v6451_v53  ;;  %v742_v53 = vld [vmem:[#allocation2 + $0x142] sm:$0xff]  ;;  %v617_v60 = vld [vmem:[#allocation2 + $0x159] sm:$0xff] }
  0xd5   : > { %6740 = vrot.lane.b32.xlu1 %v7672_v36, %s7157_s20  ;;  %v1977_v16 = vsel %vm1972_vm9, %v1944_v52, %v6447_v1  ;;  %v1978_v26 = vsel %vm1972_vm9, %v1945_v17, %v6448_v63  ;;  %v7758_v31 = vpack.i.bf16 %v742_v53, %v741_v51  ;;  %v7776_v1 = vpack.i.bf16 %v585_v57, %v584_v56 }
  0xd6   : > { %v6456_v14 = vpop.permute.xlu0 %6455  ;;  %v1980_v47 = vsel %vm1972_vm9, %v1947_v42, %v6453_v24 }
  0xd7   : > { %v7712_v8 = vpop.permute.xlu1 %6460  ;;  %v6458_v18 = vunpack.i.h.bf16 %v6456_v14  ;;  %v6457_v19 = vunpack.i.l.bf16 %v6456_v14  ;;  %v471_v14 = vld [vmem:[#allocation2 + $0x68] sm:$0xff] }
  0xd8   : > { %6745 = vrot.lane.b32.xlu0 %v7646_v5, %s7158_s21  ;;  %v1946_v5 = vsel %vm1939_vm8, %v1913_v33, %v6442_v55  ;;  %v6463_v4 = vunpack.i.h.bf16 %v7712_v8  ;;  %v6462_v9 = vunpack.i.l.bf16 %v7712_v8  ;;  %v470_v55 = vld [vmem:[#allocation2 + $0x60] sm:$0xff] }
  0xd9   : > { %6750 = vrot.lane.b32.xlu1 %v7674_v40, %s7158_s21  ;;  %v2010_v29 = vsel %vm2005_vm3, %v1977_v16, %v6457_v19  ;;  %v2011_v30 = vsel %vm2005_vm3, %v1978_v26, %v6458_v18  ;;  %v1979_v46 = vsel %vm1972_vm9, %v1946_v5, %v6452_v25  ;;  %v7784_v19 = vpack.i.bf16 %v617_v60, %v616_v59 }
  0xda   : > { %v6466_v38 = vpop.permute.xlu0 %6465  ;;  %v5860_v39 = vpack.c.bf16 %v2011_v30, %v2010_v29  ;;  %v7786_v25 = vpack.i.bf16 %v649_v28, %v648_v61  ;;  %v7788_v16 = vpack.i.bf16 %v682_v2, %v681_v3  ;;  %v1784_v6 = vsel %vm383_vm0, %v471_v14, %v6463_v4 }
  0xdb   : > { %v7730_v22 = vpop.permute.xlu1 %6470  ;;  %v6468_v35 = vunpack.i.h.bf16 %v6466_v38  ;;  %v6467_v43 = vunpack.i.l.bf16 %v6466_v38  ;;  %v1783_v29 = vsel %vm383_vm0, %v470_v55, %v6462_v9 }
  0xdc   : > { %6755 = vrot.lane.b32.xlu0 %v7664_v21, %s7159_s26  ;;  %6186 = vmatprep.mubr.msk.bf16.mxu0 %vm7616_vm11, %v5860_v39  ;;  %v6473_v62 = vunpack.i.h.bf16 %v7730_v22  ;;  %v6472_v63 = vunpack.i.l.bf16 %v7730_v22 }
  0xdd   : > { %6760 = vrot.lane.b32.xlu1 %v7676_v41, %s7159_s26  ;;  %v2013_v15 = vsel %vm2005_vm3, %v1980_v47, %v6468_v35  ;;  %v2012_v49 = vsel %vm2005_vm3, %v1979_v46, %v6467_v43 }
  0xde   : > { %v6476_v45 = vpop.permute.xlu0 %6475  ;;  %v5863_v50 = vpack.c.bf16 %v2013_v15, %v2012_v49  ;;  %v1786_v8 = vsel %vm383_vm0, %v7450_v13, %v6473_v62 }
  0xdf   : > { %v6481_v44 = vpop.permute.xlu1 %6480  ;;  %v6478_v52 = vunpack.i.h.bf16 %v6476_v45  ;;  %v6477_v17 = vunpack.i.l.bf16 %v6476_v45 }
  0xe0   : > { %6765 = vrot.lane.b32.xlu0 %v7672_v36, %s7160_s29  ;;  %6187 = vmatmul.mubr.msk.bf16.gmra.mxu0 %vm7616_vm11, %v5863_v50  ;;  %v6483_v10 = vunpack.i.h.bf16 %v6481_v44  ;;  %v6482_v7 = vunpack.i.l.bf16 %v6481_v44 }
  0xe1   : > { %6770 = vrot.lane.b32.xlu1 %v7734_v23, %s7160_s29  ;;  %v1817_v13 = vsel %vm9059_vm4, %v1784_v6, %v6478_v52 }
  0xe2   : > { %v6486_v34 = vpop.permute.xlu0 %6485  ;;  %v1819_v22 = vsel %vm9059_vm4, %v1786_v8, %v6483_v10 }
  0xe3   : > { %v6491_v21 = vpop.permute.xlu1 %6490  ;;  %v6488_v26 = vunpack.i.h.bf16 %v6486_v34  ;;  %v6487_v27 = vunpack.i.l.bf16 %v6486_v34 }
  0xe4   : > { %6775 = vrot.lane.b32.xlu0 %v7674_v40, %s7161_s13  ;;  %v6493_v11 = vunpack.i.h.bf16 %v6491_v21  ;;  %v6492_v20 = vunpack.i.l.bf16 %v6491_v21 }
  0xe5   : > { %6780 = vrot.lane.b32.xlu1 %v7672_v36, %s7154_s17  ;;  %v1850_v46 = vsel %vm1840_vm5, %v1817_v13, %v6488_v26 }
  0xe6   : > { %v7762_v32 = vpop.permute.xlu0 %6495  ;;  %v1852_v5 = vsel %vm1840_vm5, %v1819_v22, %v6493_v11 }
  0xe7   : > { %v7760_v54 = vpop.permute.xlu1 %6500  ;;  %v6498_v33 = vunpack.i.h.bf16 %v7762_v32  ;;  %v6497_v37 = vunpack.i.l.bf16 %v7762_v32 }
  0xe8   : > { %6785 = vrot.lane.b32.xlu0 %v7758_v31, %s7161_s13  ;;  %v6503_v49 = vunpack.i.h.bf16 %v7760_v54  ;;  %v6502_v44 = vunpack.i.l.bf16 %v7760_v54 }
  0xe9   : > { %6790 = vrot.lane.b32.xlu1 %v7734_v23, %s7154_s17  ;;  %v1883_v51 = vsel %vm1873_vm6, %v1850_v46, %v6498_v33  ;;  %v746_v33 = vld [vmem:[#allocation2 + $0x172] sm:$0xff]  ;;  %v621_v46 = vld [vmem:[#allocation2 + $0x189] sm:$0xff] }
  0xea   : > { %v7770_v36 = vpop.permute.xlu0 %6505  ;;  %v1885_v10 = vsel %vm1873_vm6, %v1852_v5, %v6503_v49 }
  0xeb   : > { %v7768_v58 = vpop.permute.xlu1 %6510  ;;  %v6508_v42 = vunpack.i.h.bf16 %v7770_v36  ;;  %v6507_v35 = vunpack.i.l.bf16 %v7770_v36 }
  0xec   : > { %6795 = vrot.lane.b32.xlu0 %v7674_v40, %s7155_s18  ;;  %v1785_v40 = vsel %vm383_vm0, %v7448_v12, %v6472_v63  ;;  %v1816_v12 = vsel %vm9059_vm4, %v1783_v29, %v6477_v17  ;;  %v6513_v53 = vunpack.i.h.bf16 %v7768_v58  ;;  %v6512_v34 = vunpack.i.l.bf16 %v7768_v58  ;;  %v713_v58 = vld [vmem:[#allocation2 + $0x169] sm:$0xff]  ;;  %v714_v63 = vld [vmem:[#allocation2 + $0x171] sm:$0xff] }
  0xed   : > { %6800 = vrot.lane.b32.xlu1 %v7758_v31, %s7155_s18  ;;  %v1818_v30 = vsel %vm9059_vm4, %v1785_v40, %v6482_v7  ;;  %v1916_v57 = vsel %vm1906_vm7, %v1883_v51, %v6508_v42  ;;  %v588_v42 = vld [vmem:[#allocation2 + $0x180] sm:$0xff] }
  0xee   : > { %v6516_v24 = vpop.permute.xlu0 %6515  ;;  %v1851_v39 = vsel %vm1840_vm5, %v1818_v30, %v6492_v20  ;;  %v1918_v17 = vsel %vm1906_vm7, %v1885_v10, %v6513_v53  ;;  %v7844_v20 = vpack.i.bf16 %v714_v63, %v713_v58 }
  0xef   : > { %v7782_v18 = vpop.permute.xlu1 %6520  ;;  %v6518_v47 = vunpack.i.h.bf16 %v6516_v24  ;;  %v6517_v15 = vunpack.i.l.bf16 %v6516_v24  ;;  %v1884_v9 = vsel %vm1873_vm6, %v1851_v39, %v6502_v44 }
  0xf0   : > { %6805 = vrot.lane.b32.xlu0 %v7676_v41, %s7156_s19  ;;  %v1849_v41 = vsel %vm1840_vm5, %v1816_v12, %v6487_v27  ;;  %v6523_v54 = vunpack.i.h.bf16 %v7782_v18  ;;  %v6522_v36 = vunpack.i.l.bf16 %v7782_v18  ;;  %v1917_v52 = vsel %vm1906_vm7, %v1884_v9, %v6512_v34  ;;  %v745_v12 = vld [vmem:[#allocation2 + $0x16a] sm:$0xff] }
  0xf1   : > { %6810 = vrot.lane.b32.xlu1 %v7776_v1, %s7156_s19  ;;  %v1882_v21 = vsel %vm1873_vm6, %v1849_v41, %v6497_v37  ;;  %v1949_v60 = vsel %vm1939_vm8, %v1916_v57, %v6518_v47  ;;  %v620_v41 = vld [vmem:[#allocation2 + $0x181] sm:$0xff] }
  0xf2   : > { %v6526_v43 = vpop.permute.xlu0 %6525  ;;  %v1915_v56 = vsel %vm1906_vm7, %v1882_v21, %v6507_v35  ;;  %v1951_v24 = vsel %vm1939_vm8, %v1918_v17, %v6523_v54  ;;  %v589_v35 = vld [vmem:[#allocation2 + $0x188] sm:$0xff]  ;;  %v7892_v21 = vld [vmem:[#allocation2 + $0x1a0] sm:$0xff] }
  0xf3   : > { %v6531_v38 = vpop.permute.xlu1 %6530  ;;  %v6528_v45 = vunpack.i.h.bf16 %v6526_v43  ;;  %v6527_v50 = vunpack.i.l.bf16 %v6526_v43  ;;  %v652_v47 = vld [vmem:[#allocation2 + $0x182] sm:$0xff]  ;;  %v7888_v44 = vpack.i.bf16 %v589_v35, %v588_v42 }
  0xf4   : > { %6815 = vrot.lane.b32.xlu0 %v7734_v23, %s7157_s20  ;;  %v1948_v23 = vsel %vm1939_vm8, %v1915_v56, %v6517_v15  ;;  %v6533_v28 = vunpack.i.h.bf16 %v6531_v38  ;;  %v6532_v3 = vunpack.i.l.bf16 %v6531_v38  ;;  %v7870_v38 = vpack.i.bf16 %v746_v33, %v745_v12  ;;  %v476_v34 = vld [vmem:[#allocation2 + $0xa8] sm:$0xff]  ;;  %v477_v56 = vld [vmem:[#allocation2 + $0xb0] sm:$0xff] }
  0xf5   : > { %6820 = vrot.lane.b32.xlu1 %v7784_v19, %s7157_s20  ;;  %v1981_v2 = vsel %vm1972_vm9, %v1948_v23, %v6527_v50  ;;  %v1982_v4 = vsel %vm1972_vm9, %v1949_v60, %v6528_v45  ;;  %v653_v45 = vld [vmem:[#allocation2 + $0x18a] sm:$0xff]  ;;  %v7890_v50 = vld [vmem:[#allocation2 + $0x198] sm:$0xff] }
  0xf6   : > { %v6536_v59 = vpop.permute.xlu0 %6535  ;;  %v1984_v27 = vsel %vm1972_vm9, %v1951_v24, %v6533_v28 }
  0xf7   : > { %v7822_v32 = vpop.permute.xlu1 %6540  ;;  %v6538_v61 = vunpack.i.h.bf16 %v6536_v59  ;;  %v6537_v62 = vunpack.i.l.bf16 %v6536_v59  ;;  %v475_v59 = vld [vmem:[#allocation2 + $0x98] sm:$0xff] }
  0xf8   : > { %6825 = vrot.lane.b32.xlu0 %v7758_v31, %s7158_s21  ;;  %v1950_v31 = vsel %vm1939_vm8, %v1917_v52, %v6522_v36  ;;  %v6543_v51 = vunpack.i.h.bf16 %v7822_v32  ;;  %v6542_v53 = vunpack.i.l.bf16 %v7822_v32  ;;  %v474_v36 = vld [vmem:[#allocation2 + $0x90] sm:$0xff]  ;;  %v6919_v32 = vpack.i.bf16 %v7892_v21, %v7890_v50 }
  0xf9   : > { %6830 = vrot.lane.b32.xlu1 %v7786_v25, %s7158_s21  ;;  %v2014_v7 = vsel %vm2005_vm3, %v1981_v2, %v6537_v62  ;;  %v2015_v55 = vsel %vm2005_vm3, %v1982_v4, %v6538_v61  ;;  %v1983_v26 = vsel %vm1972_vm9, %v1950_v31, %v6532_v3  ;;  %v7900_v62 = vpack.i.bf16 %v621_v46, %v620_v41 }
  0xfa   : > { %v6546_v18 = vpop.permute.xlu0 %6545  ;;  %v5866_v11 = vpack.c.bf16 %v2015_v55, %v2014_v7  ;;  %v7902_v3 = vpack.i.bf16 %v653_v45, %v652_v47  ;;  %v1788_v10 = vsel %vm383_vm0, %v475_v59, %v6543_v51  ;;  %v1787_v7 = vsel %vm383_vm0, %v474_v36, %v6542_v53  ;;  %v718_v51 = vld [vmem:[#allocation2 + $0x1a1] sm:$0xff] }
  0xfb   : > { %v7840_v14 = vpop.permute.xlu1 %6550  ;;  %v6548_v8 = vunpack.i.h.bf16 %v6546_v18  ;;  %v6547_v40 = vunpack.i.l.bf16 %v6546_v18 }
  0xfc   : > { %6835 = vrot.lane.b32.xlu0 %v7776_v1, %s7159_s26  ;;  %6190 = vmatprep.mubr.msk.bf16.mxu0 %vm7616_vm11, %v5866_v11  ;;  %v6553_v15 = vunpack.i.h.bf16 %v7840_v14  ;;  %v6552_v49 = vunpack.i.l.bf16 %v7840_v14 }
  0xfd   : > { %6840 = vrot.lane.b32.xlu1 %v7788_v16, %s7159_s26  ;;  %v2017_v6 = vsel %vm2005_vm3, %v1984_v27, %v6548_v8  ;;  %v2016_v29 = vsel %vm2005_vm3, %v1983_v26, %v6547_v40 }
  0xfe   : > { %v6556_v22 = vpop.permute.xlu0 %6555  ;;  %v5869_v13 = vpack.c.bf16 %v2017_v6, %v2016_v29  ;;  %v1790_v2 = vsel %vm383_vm0, %v477_v56, %v6553_v15 }
  0xff   : > { %v6561_v30 = vpop.permute.xlu1 %6560  ;;  %v6558_v23 = vunpack.i.h.bf16 %v6556_v22  ;;  %v6557_v60 = vunpack.i.l.bf16 %v6556_v22 }
 0x100   : > { %6845 = vrot.lane.b32.xlu0 %v7784_v19, %s7160_s29  ;;  %6191 = vmatmul.mubr.msk.bf16.gmra.mxu0 %vm7616_vm11, %v5869_v13  ;;  %v6563_v57 = vunpack.i.h.bf16 %v6561_v30  ;;  %v6562_v54 = vunpack.i.l.bf16 %v6561_v30 }
 0x101   : > { %6850 = vrot.lane.b32.xlu1 %v7844_v20, %s7160_s29  ;;  %v1821_v52 = vsel %vm9059_vm4, %v1788_v10, %v6558_v23  ;;  %v1820_v17 = vsel %vm9059_vm4, %v1787_v7, %v6557_v60 }
 0x102   : > { %v7864_v37 = vpop.permute.xlu0 %6565  ;;  %v1823_v14 = vsel %vm9059_vm4, %v1790_v2, %v6563_v57 }
 0x103   : > { %v6571_v1 = vpop.permute.xlu1 %6570  ;;  %v6568_v4 = vunpack.i.h.bf16 %v7864_v37  ;;  %v6567_v9 = vunpack.i.l.bf16 %v7864_v37 }
 0x104   : > { %6855 = vrot.lane.b32.xlu0 %v7786_v25, %s7161_s13  ;;  %v6573_v58 = vunpack.i.h.bf16 %v6571_v1  ;;  %v6572_v63 = vunpack.i.l.bf16 %v6571_v1 }
 0x105   : > { %6860 = vrot.lane.b32.xlu1 %v7784_v19, %s7154_s17  ;;  %v1854_v6 = vsel %vm1840_vm5, %v1821_v52, %v6568_v4 }
 0x106   : > { %v7874_v5 = vpop.permute.xlu0 %6575  ;;  %v1856_v8 = vsel %vm1840_vm5, %v1823_v14, %v6573_v58  ;;  %v750_v14 = vld [vmem:[#allocation2 + $0x1a2] sm:$0xff] }
 0x107   : > { %v7872_v39 = vpop.permute.xlu1 %6580  ;;  %v6578_v18 = vunpack.i.h.bf16 %v7874_v5  ;;  %v6577_v11 = vunpack.i.l.bf16 %v7874_v5 }
 0x108   : > { %6865 = vrot.lane.b32.xlu0 %v7870_v38, %s7161_s13  ;;  %v6583_v22 = vunpack.i.h.bf16 %v7872_v39  ;;  %v6582_v13 = vunpack.i.l.bf16 %v7872_v39 }
 0x109   : > { %6870 = vrot.lane.b32.xlu1 %v7844_v20, %s7154_s17  ;;  %v1887_v37 = vsel %vm1873_vm6, %v1854_v6, %v6578_v18  ;;  %v481_v6 = vld [vmem:[#allocation2 + $0xe0] sm:$0xff] }
 0x10a   : > { %v7882_v19 = vpop.permute.xlu0 %6585  ;;  %v1889_v36 = vsel %vm1873_vm6, %v1856_v8, %v6583_v22  ;;  %v478_v22 = vld [vmem:[#allocation2 + $0xc0] sm:$0xff] }
 0x10b   : > { %v7880_v43 = vpop.permute.xlu1 %6590  ;;  %v6588_v40 = vunpack.i.h.bf16 %v7882_v19  ;;  %v6587_v26 = vunpack.i.l.bf16 %v7882_v19 }
 0x10c   : > { %6875 = vrot.lane.b32.xlu0 %v7786_v25, %s7155_s18  ;;  %v1789_v25 = vsel %vm383_vm0, %v476_v34, %v6552_v49  ;;  %v6593_v5 = vunpack.i.h.bf16 %v7880_v43  ;;  %v6592_v42 = vunpack.i.l.bf16 %v7880_v43  ;;  %v717_v43 = vld [vmem:[#allocation2 + $0x199] sm:$0xff] }
 0x10d   : > { %6880 = vrot.lane.b32.xlu1 %v7870_v38, %s7155_s18  ;;  %v1822_v55 = vsel %vm9059_vm4, %v1789_v25, %v6562_v54  ;;  %v1920_v41 = vsel %vm1906_vm7, %v1887_v37, %v6588_v40  ;;  %v6929_v2 = vpack.i.bf16 %v718_v51, %v717_v43  ;;  %s7163_s18 = smov 16  }
 0x10e   : > { %v6596_v28 = vpop.permute.xlu0 %6595  ;;  %v1855_v24 = vsel %vm1840_vm5, %v1822_v55, %v6572_v63  ;;  %v1922_v58 = vsel %vm1906_vm7, %v1889_v36, %v6593_v5  ;;  %v749_v55 = vld [vmem:[#allocation2 + $0x19a] sm:$0xff] }
 0x10f   : > { %v7898_v61 = vpop.permute.xlu1 %6600  ;;  %v6598_v29 = vunpack.i.h.bf16 %v6596_v28  ;;  %v6597_v30 = vunpack.i.l.bf16 %v6596_v28  ;;  %v1888_v54 = vsel %vm1873_vm6, %v1855_v24, %v6582_v13  ;;  %v479_v13 = vld [vmem:[#allocation2 + $0xc8] sm:$0xff] }
 0x110   : > { %6885 = vrot.lane.b32.xlu0 %v7788_v16, %s7156_s19  ;;  %v1853_v16 = vsel %vm1840_vm5, %v1820_v17, %v6567_v9  ;;  %v6603_v39 = vunpack.i.h.bf16 %v7898_v61  ;;  %v6602_v46 = vunpack.i.l.bf16 %v7898_v61  ;;  %v1921_v61 = vsel %vm1906_vm7, %v1888_v54, %v6592_v42 }
 0x111   : > { %6890 = vrot.lane.b32.xlu1 %v7888_v44, %s7156_s19  ;;  %v1886_v33 = vsel %vm1873_vm6, %v1853_v16, %v6577_v11  ;;  %v1953_v15 = vsel %vm1939_vm8, %v1920_v41, %v6598_v29  ;;  %v480_v16 = vld [vmem:[#allocation2 + $0xd8] sm:$0xff]  ;;  %s7164_s19 = smov 24  }
 0x112   : > { %v6606_v27 = vpop.permute.xlu0 %6605  ;;  %v1919_v19 = vsel %vm1906_vm7, %v1886_v33, %v6587_v26  ;;  %v1954_v25 = vsel %vm1939_vm8, %v1921_v61, %v6602_v46 }
 0x113   : > { %v6611_v31 = vpop.permute.xlu1 %6610  ;;  %v6608_v1 = vunpack.i.h.bf16 %v6606_v27  ;;  %v6607_v12 = vunpack.i.l.bf16 %v6606_v27 }
 0x114   : > { %6895 = vrot.lane.b32.xlu0 %v7844_v20, %s7157_s20  ;;  %v1952_v20 = vsel %vm1939_vm8, %v1919_v19, %v6597_v30  ;;  %v6613_v53 = vunpack.i.h.bf16 %v6611_v31  ;;  %v6612_v34 = vunpack.i.l.bf16 %v6611_v31 }
 0x115   : > { %6900 = vrot.lane.b32.xlu1 %v7900_v62, %s7157_s20  ;;  %v1985_v56 = vsel %vm1972_vm9, %v1952_v20, %v6607_v12  ;;  %v1986_v57 = vsel %vm1972_vm9, %v1953_v15, %v6608_v1  ;;  %s7165_s20 = smov 32  }
 0x116   : > { %v6616_v47 = vpop.permute.xlu0 %6615  ;;  %v1987_v10 = vsel %vm1972_vm9, %v1954_v25, %v6612_v34 }
 0x117   : > { %v7938_v35 = vpop.permute.xlu1 %6620  ;;  %v6618_v49 = vunpack.i.h.bf16 %v6616_v47  ;;  %v6617_v45 = vunpack.i.l.bf16 %v6616_v47 }
 0x118   : > { %6905 = vrot.lane.b32.xlu0 %v7870_v38, %s7158_s21  ;;  %v1955_v38 = vsel %vm1939_vm8, %v1922_v58, %v6603_v39  ;;  %v6623_v26 = vunpack.i.h.bf16 %v7938_v35  ;;  %v6622_v27 = vunpack.i.l.bf16 %v7938_v35 }
 0x119   : > { %6910 = vrot.lane.b32.xlu1 %v7902_v3, %s7158_s21  ;;  %v2018_v59 = vsel %vm2005_vm3, %v1985_v56, %v6617_v45  ;;  %v2019_v23 = vsel %vm2005_vm3, %v1986_v57, %v6618_v49  ;;  %v1988_v7 = vsel %vm1972_vm9, %v1955_v38, %v6613_v53  ;;  %s7166_s21 = smov 40  }
 0x11a   : > { %v6626_v63 = vpop.permute.xlu0 %6625  ;;  %v5872_v28 = vpack.c.bf16 %v2019_v23, %v2018_v59  ;;  %v1792_v46 = vsel %vm383_vm0, %v479_v13, %v6623_v26  ;;  %v1791_v47 = vsel %vm383_vm0, %v478_v22, %v6622_v27 }
 0x11b   : > { %v7956_v60 = vpop.permute.xlu1 %6630  ;;  %v6628_v4 = vunpack.i.h.bf16 %v6626_v63  ;;  %v6627_v9 = vunpack.i.l.bf16 %v6626_v63 }
 0x11c   : > { %6915 = vrot.lane.b32.xlu0 %v7888_v44, %s7159_s26  ;;  %6194 = vmatprep.mubr.msk.bf16.mxu0 %vm7616_vm11, %v5872_v28  ;;  %v6633_v8 = vunpack.i.h.bf16 %v7956_v60  ;;  %v6632_v40 = vunpack.i.l.bf16 %v7956_v60 }
 0x11d   : > { %6920 = vrot.lane.b32.xlu1 %v6919_v32, %s7159_s26  ;;  %v2021_v52 = vsel %vm2005_vm3, %v1988_v7, %v6628_v4  ;;  %v2020_v17 = vsel %vm2005_vm3, %v1987_v10, %v6627_v9  ;;  %v6939_v32 = vpack.i.bf16 %v750_v14, %v749_v55  ;;  %s7167_s26 = smov 48  }
 0x11e   : > { %v7976_v50 = vpop.permute.xlu0 %6635  ;;  %v5875_v21 = vpack.c.bf16 %v2021_v52, %v2020_v17  ;;  %v1794_v35 = vsel %vm383_vm0, %v481_v6, %v6633_v8  ;;  %v1793_v19 = vsel %vm383_vm0, %v480_v16, %v6632_v40 }
 0x11f   : > { %v7974_v18 = vpop.permute.xlu1 %6640  ;;  %v6638_v1 = vunpack.i.h.bf16 %v7976_v50  ;;  %v6637_v12 = vunpack.i.l.bf16 %v7976_v50 }
 0x120   : > { %6925 = vrot.lane.b32.xlu0 %v7900_v62, %s7160_s29  ;;  %6195 = vmatmul.mubr.msk.bf16.gmra.mxu0 %vm7616_vm11, %v5875_v21  ;;  %v6643_v29 = vunpack.i.h.bf16 %v7974_v18  ;;  %v6642_v30 = vunpack.i.l.bf16 %v7974_v18 }
 0x121   : > { %6930 = vrot.lane.b32.xlu1 %v6929_v2, %s7160_s29  ;;  %v1825_v49 = vsel %vm9059_vm4, %v1792_v46, %v6638_v1  ;;  %v1824_v45 = vsel %vm9059_vm4, %v1791_v47, %v6637_v12 }
 0x122   : > { %v7985_v11 = vpop.permute.xlu0 %6645  ;;  %v1826_v20 = vsel %vm9059_vm4, %v1793_v19, %v6642_v30  ;;  %v1827_v15 = vsel %vm9059_vm4, %v1794_v35, %v6643_v29 }
 0x123   : > { %v7983_v44 = vpop.permute.xlu1 %6650  ;;  %v6648_v41 = vunpack.i.h.bf16 %v7985_v11  ;;  %v6647_v39 = vunpack.i.l.bf16 %v7985_v11 }
 0x124   : > { %6935 = vrot.lane.b32.xlu0 %v7902_v3, %s7161_s13  ;;  %v6653_v37 = vunpack.i.h.bf16 %v7983_v44  ;;  %v6652_v5 = vunpack.i.l.bf16 %v7983_v44 }
 0x125   : > { %6940 = vrot.lane.b32.xlu1 %v6939_v32, %s7161_s13  ;;  %v1857_v59 = vsel %vm1840_vm5, %v1824_v45, %v6647_v39  ;;  %v1858_v23 = vsel %vm1840_vm5, %v1825_v49, %v6648_v41 }
 0x126   : > { %v7996_v62 = vpop.permute.xlu0 %6655  ;;  %v1859_v34 = vsel %vm1840_vm5, %v1826_v20, %v6652_v5  ;;  %v1860_v56 = vsel %vm1840_vm5, %v1827_v15, %v6653_v37 }
 0x127   : > { %v7990_v31 = vpop.permute.xlu1 %6660  ;;  %v6658_v43 = vunpack.i.h.bf16 %v7996_v62  ;;  %v6657_v51 = vunpack.i.l.bf16 %v7996_v62 }
 0x128   : > { %v6663_v58 = vunpack.i.h.bf16 %v7990_v31  ;;  %v6662_v63 = vunpack.i.l.bf16 %v7990_v31 }
 0x129   : > { %v1890_v25 = vsel %vm1873_vm6, %v1857_v59, %v6657_v51  ;;  %v1891_v38 = vsel %vm1873_vm6, %v1858_v23, %v6658_v43 }
 0x12a   : > { %v6666_v3 = vpop.permute.xlu0 %6665 }
 0x12b   : > { %v7998_v24 = vpop.permute.xlu1 %6670  ;;  %v6668_v57 = vunpack.i.h.bf16 %v6666_v3  ;;  %v6667_v54 = vunpack.i.l.bf16 %v6666_v3  ;;  %v1893_v3 = vsel %vm1873_vm6, %v1860_v56, %v6663_v58 }
 0x12c   : > { %v6673_v4 = vunpack.i.h.bf16 %v7998_v24  ;;  %v6672_v9 = vunpack.i.l.bf16 %v7998_v24  ;;  %v1892_v24 = vsel %vm1873_vm6, %v1859_v34, %v6662_v63  ;;  %v485_v34 = vld [vmem:[#allocation2 + $0x110] sm:$0xff] }
 0x12d   : > { %v1923_v7 = vsel %vm1906_vm7, %v1890_v25, %v6667_v54  ;;  %v1924_v55 = vsel %vm1906_vm7, %v1891_v38, %v6668_v57  ;;  %v482_v54 = vld [vmem:[#allocation2 + $0xf0] sm:$0xff] }
 0x12e   : > { %v6676_v42 = vpop.permute.xlu0 %6675  ;;  %v1925_v27 = vsel %vm1906_vm7, %v1892_v24, %v6672_v9  ;;  %v1926_v16 = vsel %vm1906_vm7, %v1893_v3, %v6673_v4 }
 0x12f   : > { %v6681_v33 = vpop.permute.xlu1 %6680  ;;  %v6678_v60 = vunpack.i.h.bf16 %v6676_v42  ;;  %v6677_v61 = vunpack.i.l.bf16 %v6676_v42 }
 0x130   : > { %v6683_v14 = vunpack.i.h.bf16 %v6681_v33  ;;  %v6682_v52 = vunpack.i.l.bf16 %v6681_v33 }
 0x131   : > { %v1956_v18 = vsel %vm1939_vm8, %v1923_v7, %v6677_v61  ;;  %v1957_v50 = vsel %vm1939_vm8, %v1924_v55, %v6678_v60 }
 0x132   : > { %v6686_v36 = vpop.permute.xlu0 %6685  ;;  %v1958_v30 = vsel %vm1939_vm8, %v1925_v27, %v6682_v52  ;;  %v1959_v22 = vsel %vm1939_vm8, %v1926_v16, %v6683_v14 }
 0x133   : > { %v6691_v53 = vpop.permute.xlu1 %6690  ;;  %v6688_v28 = vunpack.i.h.bf16 %v6686_v36  ;;  %v6687_v2 = vunpack.i.l.bf16 %v6686_v36  ;;  %v483_v36 = vld [vmem:[#allocation2 + $0xf8] sm:$0xff] }
 0x134   : > { %v6693_v44 = vunpack.i.h.bf16 %v6691_v53  ;;  %v6692_v11 = vunpack.i.l.bf16 %v6691_v53  ;;  %v484_v53 = vld [vmem:[#allocation2 + $0x108] sm:$0xff] }
 0x135   : > { %v1989_v31 = vsel %vm1972_vm9, %v1956_v18, %v6687_v2  ;;  %v1990_v62 = vsel %vm1972_vm9, %v1957_v50, %v6688_v28 }
 0x136   : > { %v6696_v17 = vpop.permute.xlu0 %6695  ;;  %v1991_v12 = vsel %vm1972_vm9, %v1958_v30, %v6692_v11  ;;  %v1992_v33 = vsel %vm1972_vm9, %v1959_v22, %v6693_v44 }
 0x137   : > { %v8096_v10 = vpop.permute.xlu1 %6700  ;;  %v6698_v21 = vunpack.i.h.bf16 %v6696_v17  ;;  %v6697_v32 = vunpack.i.l.bf16 %v6696_v17 }
 0x138   : > { %v6703_v43 = vunpack.i.h.bf16 %v8096_v10  ;;  %v6702_v51 = vunpack.i.l.bf16 %v8096_v10 }
 0x139   : > { %v2022_v8 = vsel %vm2005_vm3, %v1989_v31, %v6697_v32  ;;  %v2023_v40 = vsel %vm2005_vm3, %v1990_v62, %v6698_v21 }
 0x13a   : > { %v6706_v6 = vpop.permute.xlu0 %6705  ;;  %v5878_v29 = vpack.c.bf16 %v2023_v40, %v2022_v8  ;;  %v1796_v4 = vsel %vm383_vm0, %v483_v36, %v6703_v43  ;;  %v1795_v9 = vsel %vm383_vm0, %v482_v54, %v6702_v51 }
 0x13b   : > { %v6711_v26 = vpop.permute.xlu1 %6710  ;;  %v6708_v13 = vunpack.i.h.bf16 %v6706_v6  ;;  %v6707_v1 = vunpack.i.l.bf16 %v6706_v6 }
 0x13c   : > { %6198 = vmatprep.mubr.msk.bf16.mxu0 %vm7616_vm11, %v5878_v29  ;;  %v6713_v49 = vunpack.i.h.bf16 %v6711_v26  ;;  %v6712_v45 = vunpack.i.l.bf16 %v6711_v26 }
 0x13d   : > { %v2025_v37 = vsel %vm2005_vm3, %v1992_v33, %v6708_v13  ;;  %v2024_v5 = vsel %vm2005_vm3, %v1991_v12, %v6707_v1 }
 0x13e   : > { %v6716_v35 = vpop.permute.xlu0 %6715  ;;  %v5881_v19 = vpack.c.bf16 %v2025_v37, %v2024_v5  ;;  %v1798_v28 = vsel %vm383_vm0, %v485_v34, %v6713_v49  ;;  %v1797_v2 = vsel %vm383_vm0, %v484_v53, %v6712_v45 }
 0x13f   : > { %v6721_v42 = vpop.permute.xlu1 %6720  ;;  %v6718_v59 = vunpack.i.h.bf16 %v6716_v35  ;;  %v6717_v23 = vunpack.i.l.bf16 %v6716_v35 }
 0x140   : > { %6199 = vmatmul.mubr.msk.bf16.gmra.mxu0 %vm7616_vm11, %v5881_v19  ;;  %v6723_v56 = vunpack.i.h.bf16 %v6721_v42  ;;  %v6722_v57 = vunpack.i.l.bf16 %v6721_v42 }
 0x141   : > { %v1829_v55 = vsel %vm9059_vm4, %v1796_v4, %v6718_v59  ;;  %v1828_v14 = vsel %vm9059_vm4, %v1795_v9, %v6717_v23 }
 0x142   : > { %v6726_v39 = vpop.permute.xlu0 %6725  ;;  %v1830_v10 = vsel %vm9059_vm4, %v1797_v2, %v6722_v57  ;;  %v1831_v7 = vsel %vm9059_vm4, %v1798_v28, %v6723_v56 }
 0x143   : > { %v6731_v41 = vpop.permute.xlu1 %6730  ;;  %v6728_v25 = vunpack.i.h.bf16 %v6726_v39  ;;  %v6727_v38 = vunpack.i.l.bf16 %v6726_v39 }
 0x144   : > { %v6733_v61 = vunpack.i.h.bf16 %v6731_v41  ;;  %v6732_v58 = vunpack.i.l.bf16 %v6731_v41 }
 0x145   : > { %v1861_v31 = vsel %vm1840_vm5, %v1828_v14, %v6727_v38  ;;  %v1862_v62 = vsel %vm1840_vm5, %v1829_v55, %v6728_v25  ;;  %v7162_v55 = vmov 1983009808  }
 0x146   : > { %v6736_v47 = vpop.permute.xlu0 %6735  ;;  %v1863_v50 = vsel %vm1840_vm5, %v1830_v10, %v6732_v58  ;;  %v1864_v21 = vsel %vm1840_vm5, %v1831_v7, %v6733_v61  ;;  %v8172_v14 = vunpack.c.l.s4 %v7162_v55 }
 0x147   : > { %v8120_v46 = vpop.permute.xlu1 %6740  ;;  %v6738_v52 = vunpack.i.h.bf16 %v6736_v47  ;;  %v6737_v17 = vunpack.i.l.bf16 %v6736_v47 }
 0x148   : > { %v6743_v8 = vunpack.i.h.bf16 %v8120_v46  ;;  %v6742_v40 = vunpack.i.l.bf16 %v8120_v46 }
 0x149   : > { %v1894_v16 = vsel %vm1873_vm6, %v1861_v31, %v6737_v17  ;;  %v1895_v6 = vsel %vm1873_vm6, %v1862_v62, %v6738_v52 }
 0x14a   : > { %v6746_v15 = vpop.permute.xlu0 %6745 }
 0x14b   : > { %v8122_v20 = vpop.permute.xlu1 %6750  ;;  %v6748_v32 = vunpack.i.h.bf16 %v6746_v15  ;;  %v6747_v44 = vunpack.i.l.bf16 %v6746_v15  ;;  %v1897_v15 = vsel %vm1873_vm6, %v1864_v21, %v6743_v8 }
 0x14c   : > { %v6753_v29 = vunpack.i.h.bf16 %v8122_v20  ;;  %v6752_v30 = vunpack.i.l.bf16 %v8122_v20  ;;  %v1896_v20 = vsel %vm1873_vm6, %v1863_v50, %v6742_v40 }
 0x14d   : > { %v1927_v13 = vsel %vm1906_vm7, %v1894_v16, %v6747_v44  ;;  %v1928_v1 = vsel %vm1906_vm7, %v1895_v6, %v6748_v32  ;;  %v486_v44 = vld [vmem:[#allocation2 + $0x120] sm:$0xff] }
 0x14e   : > { %v6756_v63 = vpop.permute.xlu0 %6755  ;;  %v1929_v51 = vsel %vm1906_vm7, %v1896_v20, %v6752_v30  ;;  %v1930_v53 = vsel %vm1906_vm7, %v1897_v15, %v6753_v29  ;;  %v7136_v16 = vld [vmem:[#allocation2 + $0x140] sm:$0xff]  ;;  %v7137_v29 = vld [vmem:[#allocation2 + $0x138] sm:$0xff] }
 0x14f   : > { %v6761_v60 = vpop.permute.xlu1 %6760  ;;  %v6758_v24 = vunpack.i.h.bf16 %v6756_v63  ;;  %v6757_v3 = vunpack.i.l.bf16 %v6756_v63 }
 0x150   : > { %v6763_v12 = vunpack.i.h.bf16 %v6761_v60  ;;  %v6762_v33 = vunpack.i.l.bf16 %v6761_v60 }
 0x151   : > { %v1960_v5 = vsel %vm1939_vm8, %v1927_v13, %v6757_v3  ;;  %v1961_v42 = vsel %vm1939_vm8, %v1928_v1, %v6758_v24 }
 0x152   : > { %v6766_v11 = vpop.permute.xlu0 %6765  ;;  %v1962_v57 = vsel %vm1939_vm8, %v1929_v51, %v6762_v33  ;;  %v1963_v54 = vsel %vm1939_vm8, %v1930_v53, %v6763_v12 }
 0x153   : > { %v6771_v18 = vpop.permute.xlu1 %6770  ;;  %v6768_v26 = vunpack.i.h.bf16 %v6766_v11  ;;  %v6767_v27 = vunpack.i.l.bf16 %v6766_v11  ;;  %v487_v11 = vld [vmem:[#allocation2 + $0x128] sm:$0xff] }
 0x154   : > { %v6773_v41 = vunpack.i.h.bf16 %v6771_v18  ;;  %v6772_v39 = vunpack.i.l.bf16 %v6771_v18 }
 0x155   : > { %v1993_v46 = vsel %vm1972_vm9, %v1960_v5, %v6767_v27  ;;  %v1994_v47 = vsel %vm1972_vm9, %v1961_v42, %v6768_v26  ;;  %v2369_v26 = vunpack.c.0.s8 %v8172_v14  ;;  %v2370_v27 = vlaneseq  ;;  %v7141_v14 = vld [vmem:[#allocation2 + $0x168] sm:$0xff] }
 0x156   : > { %v6776_v37 = vpop.permute.xlu0 %6775  ;;  %v1995_v23 = vsel %vm1972_vm9, %v1962_v57, %v6772_v39  ;;  %v1996_v60 = vsel %vm1972_vm9, %v1963_v54, %v6773_v41 }
 0x157   : > { %v8144_v22 = vpop.permute.xlu1 %6780  ;;  %v6778_v35 = vunpack.i.h.bf16 %v6776_v37  ;;  %v6777_v19 = vunpack.i.l.bf16 %v6776_v37 }
 0x158   : > { %v6783_v18 = vunpack.i.h.bf16 %v8144_v22  ;;  %v6782_v50 = vunpack.i.l.bf16 %v8144_v22 }
 0x159   : > { %v2026_v49 = vsel %vm2005_vm3, %v1993_v46, %v6777_v19  ;;  %v2027_v45 = vsel %vm2005_vm3, %v1994_v47, %v6778_v35 }
 0x15a   : > { %v6786_v34 = vpop.permute.xlu0 %6785  ;;  %v5884_v56 = vpack.c.bf16 %v2027_v45, %v2026_v49  ;;  %v1800_v1 = vsel %vm383_vm0, %v487_v11, %v6783_v18  ;;  %v1799_v12 = vsel %vm383_vm0, %v486_v44, %v6782_v50 }
 0x15b   : > { %v6791_v43 = vpop.permute.xlu1 %6790  ;;  %v6788_v36 = vunpack.i.h.bf16 %v6786_v34  ;;  %v6787_v59 = vunpack.i.l.bf16 %v6786_v34 }
 0x15c   : > { %6202 = vmatprep.mubr.msk.bf16.mxu0 %vm7616_vm11, %v5884_v56  ;;  %v6793_v52 = vunpack.i.h.bf16 %v6791_v43  ;;  %v6792_v17 = vunpack.i.l.bf16 %v6791_v43 }
 0x15d   : > { %v2029_v61 = vsel %vm2005_vm3, %v1996_v60, %v6788_v36  ;;  %v2028_v58 = vsel %vm2005_vm3, %v1995_v23, %v6787_v59 }
 0x15e   : > { %v6796_v28 = vpop.permute.xlu0 %6795  ;;  %v5887_v2 = vpack.c.bf16 %v2029_v61, %v2028_v58  ;;  %v1802_v6 = vsel %vm383_vm0, %v7136_v16, %v6793_v52  ;;  %v1801_v30 = vsel %vm383_vm0, %v7137_v29, %v6792_v17 }
 0x15f   : > { %v6801_v63 = vpop.permute.xlu1 %6800  ;;  %v6798_v31 = vunpack.i.h.bf16 %v6796_v28  ;;  %v6797_v62 = vunpack.i.l.bf16 %v6796_v28 }
 0x160   : > { %6203 = vmatmul.mubr.msk.bf16.gmra.mxu0 %vm7616_vm11, %v5887_v2  ;;  %v6803_v21 = vunpack.i.h.bf16 %v6801_v63  ;;  %v6802_v32 = vunpack.i.l.bf16 %v6801_v63 }
 0x161   : > { %v1833_v5 = vsel %vm9059_vm4, %v1800_v1, %v6798_v31  ;;  %v1832_v42 = vsel %vm9059_vm4, %v1799_v12, %v6797_v62 }
 0x162   : > { %v6806_v38 = vpop.permute.xlu0 %6805  ;;  %v1834_v33 = vsel %vm9059_vm4, %v1801_v30, %v6802_v32  ;;  %v1835_v37 = vsel %vm9059_vm4, %v1802_v6, %v6803_v21 }
 0x163   : > { %v6811_v25 = vpop.permute.xlu1 %6810  ;;  %v6808_v22 = vunpack.i.h.bf16 %v6806_v38  ;;  %v6807_v13 = vunpack.i.l.bf16 %v6806_v38 }
 0x164   : > { %v6813_v3 = vunpack.i.h.bf16 %v6811_v25  ;;  %v6812_v8 = vunpack.i.l.bf16 %v6811_v25 }
 0x165   : > { %v1865_v49 = vsel %vm1840_vm5, %v1832_v42, %v6807_v13  ;;  %v1866_v45 = vsel %vm1840_vm5, %v1833_v5, %v6808_v22 }
 0x166   : > { %v6816_v9 = vpop.permute.xlu0 %6815  ;;  %v1867_v39 = vsel %vm1840_vm5, %v1834_v33, %v6812_v8  ;;  %v1868_v46 = vsel %vm1840_vm5, %v1835_v37, %v6813_v3 }
 0x167   : > { %v8168_v4 = vpop.permute.xlu1 %6820  ;;  %v6818_v35 = vunpack.i.h.bf16 %v6816_v9  ;;  %v6817_v19 = vunpack.i.l.bf16 %v6816_v9 }
 0x168   : > { %v6823_v53 = vunpack.i.h.bf16 %v8168_v4  ;;  %v6822_v34 = vunpack.i.l.bf16 %v8168_v4 }
 0x169   : > { %v1898_v54 = vsel %vm1873_vm6, %v1865_v49, %v6817_v19  ;;  %v1899_v36 = vsel %vm1873_vm6, %v1866_v45, %v6818_v35  ;;  %v8222_v19 = vld [vmem:[%s9051_s2] ss:$0 sm:$0xff]  ;;  %v7139_v45 = vld [vmem:[#allocation2 + $0x150] sm:$0xff] }
 0x16a   : > { %v6826_v7 = vpop.permute.xlu0 %6825  ;;  %v1900_v17 = vsel %vm1873_vm6, %v1867_v39, %v6822_v34  ;;  %v1901_v18 = vsel %vm1873_vm6, %v1868_v46, %v6823_v53  ;;  %v7138_v39 = vld [vmem:[#allocation2 + $0x158] sm:$0xff] }
 0x16b   : > { %v8170_v10 = vpop.permute.xlu1 %6830  ;;  %v6828_v47 = vunpack.i.h.bf16 %v6826_v7  ;;  %v6827_v20 = vunpack.i.l.bf16 %v6826_v7 }
 0x16c   : > { %v6833_v59 = vunpack.i.h.bf16 %v8170_v10  ;;  %v6832_v23 = vunpack.i.l.bf16 %v8170_v10 }
 0x16d   : > { %v1931_v61 = vsel %vm1906_vm7, %v1898_v54, %v6827_v20  ;;  %v1932_v58 = vsel %vm1906_vm7, %v1899_v36, %v6828_v47 }
 0x16e   : > { %v6836_v40 = vpop.permute.xlu0 %6835  ;;  %v1933_v44 = vsel %vm1906_vm7, %v1900_v17, %v6832_v23  ;;  %v1934_v11 = vsel %vm1906_vm7, %v1901_v18, %v6833_v59 }
 0x16f   : > { %v8176_v24 = vpop.permute.xlu1 %6840  ;;  %v6838_v43 = vunpack.i.h.bf16 %v6836_v40  ;;  %v6837_v51 = vunpack.i.l.bf16 %v6836_v40 }
 0x170   : > { %v6843_v63 = vunpack.i.h.bf16 %v8176_v24  ;;  %v6842_v28 = vunpack.i.l.bf16 %v8176_v24  ;;  %v2371_v24 = vshrl.u32 %v2370_v27, 7 }
 0x171   : > { %v1964_v25 = vsel %vm1939_vm8, %v1931_v61, %v6837_v51  ;;  %v1965_v38 = vsel %vm1939_vm8, %v1932_v58, %v6838_v43  ;;  %v7140_v51 = vld [vmem:[#allocation2 + $0x170] sm:$0xff] }
 0x172   : > { %v6846_v15 = vpop.permute.xlu0 %6845  ;;  %v1966_v3 = vsel %vm1939_vm8, %v1933_v44, %v6842_v28  ;;  %v1967_v8 = vsel %vm1939_vm8, %v1934_v11, %v6843_v63  ;;  %v8231_v49 = vsub.s32 0, %v2371_v24 }
 0x173   : > { %v6851_v41 = vpop.permute.xlu1 %6850  ;;  %v6848_v56 = vunpack.i.h.bf16 %v6846_v15  ;;  %v6847_v57 = vunpack.i.l.bf16 %v6846_v15 }
 0x174   : > { %v6853_v7 = vunpack.i.h.bf16 %v6851_v41  ;;  %v6852_v55 = vunpack.i.l.bf16 %v6851_v41  ;;  %v8226_v41 = vsub.s32 %v2369_v26, %v2371_v24 }
 0x175   : > { %v1997_v10 = vsel %vm1972_vm9, %v1964_v25, %v6847_v57  ;;  %v1998_v52 = vsel %vm1972_vm9, %v1965_v38, %v6848_v56 }
 0x176   : > { %v6856_v2 = vpop.permute.xlu0 %6855  ;;  %v1999_v6 = vsel %vm1972_vm9, %v1966_v3, %v6852_v55  ;;  %v2000_v29 = vsel %vm1972_vm9, %v1967_v8, %v6853_v7 }
 0x177   : > { %v6861_v60 = vpop.permute.xlu1 %6860  ;;  %v6858_v4 = vunpack.i.h.bf16 %v6856_v2  ;;  %v6857_v9 = vunpack.i.l.bf16 %v6856_v2 }
 0x178   : > { %v6863_v30 = vunpack.i.h.bf16 %v6861_v60  ;;  %v6862_v22 = vunpack.i.l.bf16 %v6861_v60 }
 0x179   : > { %v2030_v50 = vsel %vm2005_vm3, %v1997_v10, %v6857_v9  ;;  %v2031_v21 = vsel %vm2005_vm3, %v1998_v52, %v6858_v4 }
 0x17a   : > { %v6866_v31 = vpop.permute.xlu0 %6865  ;;  %v5890_v62 = vpack.c.bf16 %v2031_v21, %v2030_v50  ;;  %v1804_v46 = vsel %vm383_vm0, %v7138_v39, %v6863_v30  ;;  %v1803_v43 = vsel %vm383_vm0, %v7139_v45, %v6862_v22 }
 0x17b   : > { %v6871_v32 = vpop.permute.xlu1 %6870  ;;  %v6868_v40 = vunpack.i.h.bf16 %v6866_v31  ;;  %v6867_v16 = vunpack.i.l.bf16 %v6866_v31 }
 0x17c   : > { %6206 = vmatprep.mubr.msk.bf16.mxu0 %vm7616_vm11, %v5890_v62  ;;  %v6873_v13 = vunpack.i.h.bf16 %v6871_v32  ;;  %v6872_v1 = vunpack.i.l.bf16 %v6871_v32 }
 0x17d   : > { %v2033_v12 = vsel %vm2005_vm3, %v2000_v29, %v6868_v40  ;;  %v2032_v27 = vsel %vm2005_vm3, %v1999_v6, %v6867_v16 }
 0x17e   : > { %v5893_v37 = vpack.c.bf16 %v2033_v12, %v2032_v27  ;;  %v6876_v35 = vpop.permute.xlu0 %6875  ;;  %v1806_v53 = vsel %vm383_vm0, %v7140_v51, %v6873_v13  ;;  %v1805_v26 = vsel %vm383_vm0, %v7141_v14, %v6872_v1  ;;  %vm9064_vm0 = vcmask 1043459  }
 0x17f   : > { %v6881_v33 = vpop.permute.xlu1 %6880  ;;  %v6878_v47 = vunpack.i.h.bf16 %v6876_v35  ;;  %v6877_v20 = vunpack.i.l.bf16 %v6876_v35 }
 0x180   : > { %v6883_v5 = vunpack.i.h.bf16 %v6881_v33  ;;  %v6882_v42 = vunpack.i.l.bf16 %v6881_v33  ;;  %v6184_v15 = vpop.f32.mrf.mxu0  ;;  %6207 = vmatmul.mubr.msk.bf16.gmra.mxu0 %vm7616_vm11, %v5893_v37 }
 0x181   : > { %v2184_v34 = vadd.f32 %v6184_v15, %v8222_v19  ;;  %v1837_v2 = vsel %vm9059_vm4, %v1804_v46, %v6878_v47  ;;  %v1836_v25 = vsel %vm9059_vm4, %v1803_v43, %v6877_v20 }
 0x182   : > { %v1838_v57 = vsel %vm9059_vm4, %v1805_v26, %v6882_v42  ;;  %v1839_v54 = vsel %vm9059_vm4, %v1806_v53, %v6883_v5  ;;  %v6886_v23 = vpop.permute.xlu0 %6885  ;;  %v2175_v60 = vpop.f32.mrf.mxu0  ;;  %vm4440_vm4 = vcmask 457728  }
 0x183   : > { %v6891_v56 = vpop.permute.xlu1 %6890  ;;  %v2304_v61 = vmax.f32 %v2184_v34, 0.0  ;;  %v6888_v58 = vunpack.i.h.bf16 %v6886_v23  ;;  %v6887_v63 = vunpack.i.l.bf16 %v6886_v23  ;;  %v2176_v28 = vadd.f32 %v8222_v19, %v2175_v60 }
 0x184   : > { %v6893_v36 = vunpack.i.h.bf16 %v6891_v56  ;;  %v6892_v59 = vunpack.i.l.bf16 %v6891_v56  ;;  %v6185_v9 = vpop.f32.mrf.mxu0 }
 0x185   : > { %v2400_v7 = vcombine.high %v2304_v61, %v2304_v61  ;;  %v2407_v55 = vrot.slane %v2304_v61, %v8226_v41  ;;  %v8248_v10 = vsel %vm1840_vm5, %v1836_v25, %v6887_v63  ;;  %v8251_v52 = vsel %vm1840_vm5, %v1837_v2, %v6888_v58 }
 0x186   : > { %v1871_v38 = vsel %vm1840_vm5, %v1838_v57, %v6892_v59  ;;  %v8244_v4 = vsel %vm1840_vm5, %v1839_v54, %v6893_v36  ;;  %v2302_v18 = vmax.f32 %v2176_v28, 0.0  ;;  %v2187_v50 = vadd.f32 %v6185_v9, %v8222_v19  ;;  %v8254_v44 = vpop.permute.xlu0 %6895  ;;  %v2178_v28 = vpop.f32.mrf.mxu0 }
 0x187   : > { %v6901_v17 = vpop.permute.xlu1 %6900  ;;  %v2414_v11 = vrot.slane %v2400_v7, %v8226_v41  ;;  %v2415_v31 = vcombine.high %v2407_v55, %v2407_v55  ;;  %v5909_v62 = vrot.slane %v2407_v55, 9  ;;  %v6898_v24 = vunpack.i.h.bf16 %v8254_v44 }
 0x188   : > { %v6903_v21 = vunpack.i.h.bf16 %v6901_v17  ;;  %v6902_v32 = vunpack.i.l.bf16 %v6901_v17  ;;  %v2366_v3 = vcombine.high %v2302_v18, %v2302_v18  ;;  %v2373_v8 = vrot.slane %v2302_v18, %v8226_v41 }
 0x189   : > { %v2305_v40 = vmax.f32 %v2187_v50, 0.0  ;;  %v2416_v6 = vcombine.high %v2414_v11, %v2414_v11  ;;  %v5910_v29 = vrot.slane %v2415_v31, 9  ;;  %v5911_v30 = vrot.slane %v2414_v11, 9 }
 0x18a   : > { %v8260_v16 = vsel %vm1873_vm6, %v1871_v38, %v6902_v32  ;;  %v3430_v22 = vmax.f32 %v2407_v55, %v5909_v62  ;;  %v2380_v1 = vrot.slane %v2366_v3, %v8226_v41  ;;  %v2381_v12 = vcombine.high %v2373_v8, %v2373_v8  ;;  %v6906_v39 = vpop.permute.xlu0 %6905 }
 0x18b   : > { %v6911_v13 = vpop.permute.xlu1 %6910  ;;  %v5901_v27 = vrot.slane %v2373_v8, 9  ;;  %v2417_v33 = vcombine.high %v2305_v40, %v2305_v40  ;;  %v5912_v37 = vrot.slane %v2416_v6, 9  ;;  %v3431_v5 = vmax.f32 %v2415_v31, %v5910_v29 }
 0x18c   : > { %v3432_v42 = vmax.f32 %v2414_v11, %v5911_v30  ;;  %v2424_v35 = vrot.slane %v2305_v40, %v8226_v41  ;;  %v2382_v46 = vcombine.high %v2380_v1, %v2380_v1  ;;  %v5902_v47 = vrot.slane %v2381_v12, 9 }
 0x18d   : > { %v5903_v20 = vrot.slane %v2380_v1, 9  ;;  %v3422_v15 = vmax.f32 %v2373_v8, %v5901_v27  ;;  %v3433_v45 = vmax.f32 %v2416_v6, %v5912_v37  ;;  %v2431_v43 = vrot.slane %v2417_v33, %v8226_v41 }
 0x18e   : > { %v2432_v51 = vcombine.high %v2424_v35, %v2424_v35  ;;  %v5913_v53 = vrot.slane %v2424_v35, 9  ;;  %v5904_v14 = vrot.slane %v2382_v46, 9  ;;  %v3423_v26 = vmax.f32 %v2381_v12, %v5902_v47  ;;  %v6916_v7 = vpop.permute.xlu0 %6915 }
 0x18f   : > { %v3424_v34 = vmax.f32 %v2380_v1, %v5903_v20  ;;  %v3550_v56 = vmax.f32 %v3422_v15, %v3430_v22  ;;  %v2433_v57 = vcombine.high %v2431_v43, %v2431_v43  ;;  %v5915_v36 = vrot.slane %v2431_v43, 9  ;;  %v6921_v23 = vpop.permute.xlu1 %6920 }
 0x190   : > { %v5914_v54 = vrot.slane %v2432_v51, 9  ;;  %v8265_v59 = vmax.f32 %v2424_v35, %v5913_v53  ;;  %v3425_v60 = vmax.f32 %v2382_v46, %v5904_v14  ;;  %v3551_v61 = vmax.f32 %v3423_v26, %v3431_v5 }
 0x191   : > { %v3552_v58 = vmax.f32 %v3424_v34, %v3432_v42  ;;  %v3725_v63 = vrot.slane %v3550_v56, %v8231_v49  ;;  %v5916_v2 = vrot.slane %v2433_v57, 9  ;;  %v8270_v38 = vmax.f32 %v2431_v43, %v5915_v36 }
 0x192   : > { %v8268_v25 = vmax.f32 %v2432_v51, %v5914_v54  ;;  %v1905_v9 = vsel %vm1873_vm6, %v8244_v4, %v6903_v21  ;;  %v3553_v55 = vmax.f32 %v3425_v60, %v3433_v45  ;;  %v3729_v17 = vrot.slane %v3551_v61, %v8231_v49  ;;  %v6926_v33 = vpop.permute.xlu0 %6925 }
 0x193   : > { %v3733_v18 = vrot.slane %v3552_v58, %v8231_v49  ;;  %v6897_v50 = vunpack.i.l.bf16 %v8254_v44  ;;  %v8277_v32 = vmax.f32 %v2433_v57, %v5916_v2  ;;  %v1903_v11 = vsel %vm1873_vm6, %v8251_v52, %v6898_v24  ;;  %v6931_v30 = vpop.permute.xlu1 %6930 }
 0x194   : > { %v2179_v31 = vadd.f32 %v8222_v19, %v2178_v28  ;;  %v6913_v62 = vunpack.i.h.bf16 %v6911_v13  ;;  %v3737_v3 = vrot.slane %v3553_v55, %v8231_v49  ;;  %v3979_v4 = vsel %vm3978_vm14, %v3729_v17, %v3725_v63 }
 0x195   : > { %v1902_v21 = vsel %vm1873_vm6, %v8248_v10, %v6897_v50  ;;  %v6912_v8 = vunpack.i.l.bf16 %v6911_v13  ;;  %v3981_v40 = vsel %vm9062_vm15, %v3733_v18, %v3979_v4  ;;  %v6908_v29 = vunpack.i.h.bf16 %v6906_v39 }
 0x196   : > { %v2303_v6 = vmax.f32 %v2179_v31, 0.0  ;;  %v1938_v44 = vsel %vm1906_vm7, %v1905_v9, %v6913_v62  ;;  %v3983_v52 = vsel %vm9064_vm0, %v3737_v3, %v3981_v40  ;;  %v6907_v22 = vunpack.i.l.bf16 %v6906_v39  ;;  %v6936_v63 = vpop.permute.xlu0 %6935 }
 0x197   : > { %v1937_v24 = vsel %vm1906_vm7, %v8260_v16, %v6912_v8  ;;  %v6923_v1 = vunpack.i.h.bf16 %v6921_v23  ;;  %v1936_v10 = vsel %vm1906_vm7, %v1903_v11, %v6908_v29  ;;  %v6922_v13 = vunpack.i.l.bf16 %v6921_v23  ;;  %v6941_v34 = vpop.permute.xlu1 %6940 }
 0x198   : > { %v2383_v12 = vcombine.high %v2303_v6, %v2303_v6  ;;  %v2390_v27 = vrot.slane %v2303_v6, %v8226_v41  ;;  %v1935_v37 = vsel %vm1906_vm7, %v1902_v21, %v6907_v22  ;;  %v6918_v42 = vunpack.i.h.bf16 %v6916_v7 }
 0x199   : > { %v1971_v5 = vsel %vm1939_vm8, %v1938_v44, %v6923_v1  ;;  %v6917_v35 = vunpack.i.l.bf16 %v6916_v7  ;;  %vm3988_vm5 = vcmask 1046534   ;;  %v1970_v39 = vsel %vm1939_vm8, %v1937_v24, %v6922_v13 }
 0x19a   : > { %v2397_v46 = vrot.slane %v2383_v12, %v8226_v41  ;;  %v2398_v47 = vcombine.high %v2390_v27, %v2390_v27  ;;  %v5905_v16 = vrot.slane %v2390_v27, 9  ;;  %vm3990_vm6 = vcmask 1047559  }
 0x19b   : > { %v1968_v20 = vsel %vm1939_vm8, %v1935_v37, %v6917_v35  ;;  %v1969_v15 = vsel %vm1939_vm8, %v1936_v10, %v6918_v42  ;;  %v6933_v45 = vunpack.i.h.bf16 %v6931_v30  ;;  %v6932_v43 = vunpack.i.l.bf16 %v6931_v30 }
 0x19c   : > { %v2399_v51 = vcombine.high %v2397_v46, %v2397_v46  ;;  %v5906_v53 = vrot.slane %v2398_v47, 9  ;;  %v5907_v14 = vrot.slane %v2397_v46, 9  ;;  %v3426_v26 = vmax.f32 %v2390_v27, %v5905_v16 }
 0x19d   : > { %v2003_v56 = vsel %vm1972_vm9, %v1970_v39, %v6932_v43  ;;  %v2004_v57 = vsel %vm1972_vm9, %v1971_v5, %v6933_v45  ;;  %v6928_v54 = vunpack.i.h.bf16 %v6926_v33  ;;  %v6927_v36 = vunpack.i.l.bf16 %v6926_v33 }
 0x19e   : > { %v5908_v23 = vrot.slane %v2399_v51, 9  ;;  %v3427_v60 = vmax.f32 %v2398_v47, %v5906_v53  ;;  %v3428_v61 = vmax.f32 %v2397_v46, %v5907_v14  ;;  %v3554_v58 = vmax.f32 %v3426_v26, %v8265_v59 }
 0x19f   : > { %v2001_v28 = vsel %vm1972_vm9, %v1968_v20, %v6927_v36  ;;  %v2002_v2 = vsel %vm1972_vm9, %v1969_v15, %v6928_v54  ;;  %v6943_v9 = vunpack.i.h.bf16 %v6941_v34  ;;  %v6942_v7 = vunpack.i.l.bf16 %v6941_v34 }
 0x1a0   : > { %v3429_v55 = vmax.f32 %v2399_v51, %v5908_v23  ;;  %v3555_v17 = vmax.f32 %v3427_v60, %v8268_v25  ;;  %v3556_v18 = vmax.f32 %v3428_v61, %v8270_v38  ;;  %v3741_v50 = vrot.slane %v3554_v58, %v8231_v49  ;;  %v6188_v3 = vpop.f32.mrf.mxu0 }
 0x1a1   : > { %v2036_v11 = vsel %vm2005_vm3, %v2003_v56, %v6942_v7  ;;  %v2037_v31 = vsel %vm2005_vm3, %v2004_v57, %v6943_v9  ;;  %v6938_v62 = vunpack.i.h.bf16 %v6936_v63  ;;  %v6937_v59 = vunpack.i.l.bf16 %v6936_v63 }
 0x1a2   : > { %v3557_v4 = vmax.f32 %v3429_v55, %v8277_v32  ;;  %v3745_v21 = vrot.slane %v3555_v17, %v8231_v49  ;;  %v3749_v8 = vrot.slane %v3556_v18, %v8231_v49  ;;  %v3985_v40 = vsel %vm3984_vm1, %v3741_v50, %v3983_v52  ;;  %v2191_v29 = vpop.f32.mrf.mxu0 }
 0x1a3   : > { %v5899_v25 = vpack.c.bf16 %v2037_v31, %v2036_v11  ;;  %v2034_v38 = vsel %vm2005_vm3, %v2001_v28, %v6937_v59  ;;  %v2035_v6 = vsel %vm2005_vm3, %v2002_v2, %v6938_v62  ;;  %v2200_v44 = vadd.f32 %v6188_v3, %v8222_v19  ;;  %v4066_v2 = vld [vmem:[#allocation3 + $0x1] sm:$0xff] }
 0x1a4   : > { %v3753_v30 = vrot.slane %v3557_v4, %v8231_v49  ;;  %v3987_v24 = vsel %vm3986_vm2, %v3745_v21, %v3985_v40  ;;  %v5896_v22 = vpack.c.bf16 %v2035_v6, %v2034_v38  ;;  %v2192_v32 = vadd.f32 %v8222_v19, %v2191_v29  ;;  %v6189_v27 = vpop.f32.mrf.mxu0  ;;  %v4074_v21 = vld [vmem:[#allocation3 + $0x2] sm:$0xff] }
 0x1a5   : > { %v3989_v1 = vsel %vm3988_vm5, %v3749_v8, %v3987_v24  ;;  %v2308_v12 = vmax.f32 %v2200_v44, 0.0  ;;  %v2203_v13 = vadd.f32 %v6189_v27, %v8222_v19  ;;  %vm4395_vm7 = vcmask 130048  }
 0x1a6   : > { %v3991_v52 = vsel %vm3990_vm6, %v3753_v30, %v3989_v1  ;;  %6210 = vmatprep.mubr.msk.bf16.mxu0 %vm7616_vm11, %v5896_v22  ;;  %v2306_v10 = vmax.f32 %v2192_v32, 0.0  ;;  %v2194_v56 = vpop.f32.mrf.mxu0  ;;  %vm4404_vm8 = vcmask 195584   ;;  %vm4413_vm9 = vcmask 261120  }
 0x1a7   : > { %4050 = vst.msk [vmem:[#allocation3 + $0x11] sm:$0xff] %vm2005_vm3, %v3991_v52  ;;  %6211 = vmatmul.mubr.msk.bf16.gmra.mxu0 %vm7616_vm11, %v5899_v25  ;;  %v2468_v33 = vcombine.high %v2308_v12, %v2308_v12  ;;  %v2475_v37 = vrot.slane %v2308_v12, %v8226_v41  ;;  %v2309_v35 = vmax.f32 %v2203_v13, 0.0  ;;  %v2195_v7 = vadd.f32 %v8222_v19, %v2194_v56 }
 0x1a8   : > { %v2434_v5 = vcombine.high %v2306_v10, %v2306_v10  ;;  %v2441_v42 = vrot.slane %v2306_v10, %v8226_v41  ;;  %vm4431_vm11 = vcmask 392192  }
 0x1a9   : > { %v2482_v46 = vrot.slane %v2468_v33, %v8226_v41  ;;  %v2483_v47 = vcombine.high %v2475_v37, %v2475_v37  ;;  %v5925_v16 = vrot.slane %v2475_v37, 9  ;;  %v2485_v48 = vcombine.high %v2309_v35, %v2309_v35 }
 0x1aa   : > { %v2448_v39 = vrot.slane %v2434_v5, %v8226_v41  ;;  %v2449_v20 = vcombine.high %v2441_v42, %v2441_v42  ;;  %v5917_v15 = vrot.slane %v2441_v42, 9  ;;  %v2492_v63 = vrot.slane %v2309_v35, %v8226_v41 }
 0x1ab   : > { %v2484_v45 = vcombine.high %v2482_v46, %v2482_v46  ;;  %v5926_v43 = vrot.slane %v2483_v47, 9  ;;  %v5927_v51 = vrot.slane %v2482_v46, 9  ;;  %v3446_v54 = vmax.f32 %v2475_v37, %v5925_v16 }
 0x1ac   : > { %v2450_v53 = vcombine.high %v2448_v39, %v2448_v39  ;;  %v5918_v14 = vrot.slane %v2449_v20, 9  ;;  %v5919_v26 = vrot.slane %v2448_v39, 9  ;;  %v3438_v34 = vmax.f32 %v2441_v42, %v5917_v15 }
 0x1ad   : > { %v5928_v57 = vrot.slane %v2484_v45, 9  ;;  %v3447_v36 = vmax.f32 %v2483_v47, %v5926_v43  ;;  %v3448_v23 = vmax.f32 %v2482_v46, %v5927_v51  ;;  %v2499_v50 = vrot.slane %v2485_v48, %v8226_v41 }
 0x1ae   : > { %v5920_v60 = vrot.slane %v2450_v53, 9  ;;  %v3439_v61 = vmax.f32 %v2449_v20, %v5918_v14  ;;  %v3440_v58 = vmax.f32 %v2448_v39, %v5919_v26  ;;  %v3558_v28 = vmax.f32 %v3438_v34, %v3446_v54  ;;  %v8332_v9 = vld [vmem:[#allocation3 + $0x11] sm:$0xff] }
 0x1af   : > { %v3449_v11 = vmax.f32 %v2484_v45, %v5928_v57  ;;  %v2500_v62 = vcombine.high %v2492_v63, %v2492_v63  ;;  %v6944_v59 = vpack.i.bf16 %v8332_v9, %v4066_v2  ;;  %v2307_v4 = vmax.f32 %v2195_v7, 0.0  ;;  %v8339_v8 = vld [vmem:[#allocation3 + $0x12] sm:$0xff] }
 0x1b0   : > { %v3441_v55 = vmax.f32 %v2450_v53, %v5920_v60  ;;  %v3559_v17 = vmax.f32 %v3439_v61, %v3447_v36  ;;  %v3560_v18 = vmax.f32 %v3440_v58, %v3448_v23  ;;  %v3757_v3 = vrot.slane %v3558_v28, %v8231_v49 }
 0x1b1   : > { %v2501_v38 = vcombine.high %v2499_v50, %v2499_v50  ;;  %v5929_v6 = vrot.slane %v2492_v63, 9  ;;  %6945 = vrot.lane.b32.xlu0 %v6944_v59, %s7161_s13  ;;  %v2451_v29 = vcombine.high %v2307_v4, %v2307_v4  ;;  %v2458_v30 = vrot.slane %v2307_v4, %v8226_v41 }
 0x1b2   : > { %v3761_v31 = vrot.slane %v3559_v17, %v8231_v49  ;;  %v3561_v40 = vmax.f32 %v3441_v55, %v3449_v11  ;;  %v3765_v25 = vrot.slane %v3560_v18, %v8231_v49  ;;  %v5930_v24 = vrot.slane %v2500_v62, 9 }
 0x1b3   : > { %v5931_v22 = vrot.slane %v2499_v50, 9  ;;  %v6949_v32 = vpack.i.bf16 %v8339_v8, %v4074_v21  ;;  %v2465_v1 = vrot.slane %v2451_v29, %v8226_v41  ;;  %v2466_v12 = vcombine.high %v2458_v30, %v2458_v30 }
 0x1b4   : > { %v3992_v44 = vsel %vm3978_vm14, %v3761_v31, %v3757_v3  ;;  %v5921_v27 = vrot.slane %v2458_v30, 9  ;;  %v3769_v52 = vrot.slane %v3561_v40, %v8231_v49  ;;  %v5932_v13 = vrot.slane %v2501_v38, 9 }
 0x1b5   : > { %v3993_v10 = vsel %vm9062_vm15, %v3765_v25, %v3992_v44  ;;  %v3450_v33 = vmax.f32 %v2492_v63, %v5929_v6  ;;  %6950 = vrot.lane.b32.xlu0 %v6949_v32, %s7163_s18  ;;  %v2467_v37 = vcombine.high %v2465_v1, %v2465_v1  ;;  %v5922_v5 = vrot.slane %v2466_v12, 9 }
 0x1b6   : > { %v5923_v42 = vrot.slane %v2465_v1, 9  ;;  %v3442_v35 = vmax.f32 %v2458_v30, %v5921_v27  ;;  %v3451_v46 = vmax.f32 %v2500_v62, %v5930_v24  ;;  %v3452_v47 = vmax.f32 %v2499_v50, %v5931_v22 }
 0x1b7   : > { %v5924_v16 = vrot.slane %v2467_v37, 9  ;;  %v3443_v39 = vmax.f32 %v2466_v12, %v5922_v5  ;;  %v3453_v45 = vmax.f32 %v2501_v38, %v5932_v13  ;;  %v3994_v43 = vsel %vm9064_vm0, %v3769_v52, %v3993_v10 }
 0x1b8   : > { %v3444_v20 = vmax.f32 %v2465_v1, %v5923_v42  ;;  %v3562_v15 = vmax.f32 %v3442_v35, %v3450_v33 }
 0x1b9   : > { %v3445_v51 = vmax.f32 %v2467_v37, %v5924_v16  ;;  %v3563_v48 = vmax.f32 %v3443_v39, %v3451_v46 }
 0x1ba   : > { %v3564_v53 = vmax.f32 %v3444_v20, %v3452_v47  ;;  %v3773_v14 = vrot.slane %v3562_v15, %v8231_v49  ;;  %v8372_v15 = vld [vmem:[#allocation3 + $0x10] sm:$0xff] }
 0x1bb   : > { %v3565_v26 = vmax.f32 %v3445_v51, %v3453_v45  ;;  %v3777_v34 = vrot.slane %v3563_v48, %v8231_v49 }
 0x1bc   : > { %v3781_v56 = vrot.slane %v3564_v53, %v8231_v49  ;;  %v3995_v57 = vsel %vm3984_vm1, %v3773_v14, %v3994_v43 }
 0x1bd   : > { %v3785_v54 = vrot.slane %v3565_v26, %v8231_v49  ;;  %v3996_v36 = vsel %vm3986_vm2, %v3777_v34, %v3995_v57 }
 0x1be   : > { %v3997_v60 = vsel %vm3988_vm5, %v3781_v56, %v3996_v36 }
 0x1bf   : > { %v3998_v58 = vsel %vm3990_vm6, %v3785_v54, %v3997_v60 }
 0x1c0   : > { %v6192_v23 = vpop.f32.mrf.mxu0  ;;  %4051 = vst.msk [vmem:[#allocation3 + $0x21] sm:$0xff] %vm2005_vm3, %v3998_v58 }
 0x1c1   : > { %v2216_v61 = vadd.f32 %v6192_v23, %v8222_v19 }
 0x1c2   : > { %v2207_v63 = vpop.f32.mrf.mxu0 }
 0x1c3   : > { %v2312_v28 = vmax.f32 %v2216_v61, 0.0  ;;  %v2208_v2 = vadd.f32 %v8222_v19, %v2207_v63 }
 0x1c4   : > { %v6193_v7 = vpop.f32.mrf.mxu0 }
 0x1c5   : > { %v2536_v55 = vcombine.high %v2312_v28, %v2312_v28  ;;  %v2543_v17 = vrot.slane %v2312_v28, %v8226_v41  ;;  %v2310_v18 = vmax.f32 %v2208_v2, 0.0  ;;  %v2219_v50 = vadd.f32 %v6193_v7, %v8222_v19 }
 0x1c6   : > { %v2210_v21 = vpop.f32.mrf.mxu0 }
 0x1c7   : > { %v2550_v11 = vrot.slane %v2536_v55, %v8226_v41  ;;  %v2551_v31 = vcombine.high %v2543_v17, %v2543_v17  ;;  %v5941_v62 = vrot.slane %v2543_v17, 9  ;;  %v2502_v59 = vcombine.high %v2310_v18, %v2310_v18  ;;  %v8369_v46 = vld [vmem:[#allocation3 + $0x20] sm:$0xff] }
 0x1c8   : > { %v2509_v3 = vrot.slane %v2310_v18, %v8226_v41  ;;  %v2313_v4 = vmax.f32 %v2219_v50, 0.0  ;;  %v2211_v22 = vadd.f32 %v8222_v19, %v2210_v21  ;;  %v6954_v51 = vpack.i.bf16 %v8369_v46, %v8372_v15  ;;  %v8378_v26 = vld [vmem:[#allocation3 + $0x21] sm:$0xff] }
 0x1c9   : > { %v2552_v40 = vcombine.high %v2550_v11, %v2550_v11  ;;  %v5942_v25 = vrot.slane %v2551_v31, 9  ;;  %v5943_v38 = vrot.slane %v2550_v11, 9  ;;  %v2516_v6 = vrot.slane %v2502_v59, %v8226_v41  ;;  %v8387_v55 = vld [vmem:[#allocation3 + $0x22] sm:$0xff] }
 0x1ca   : > { %v2517_v44 = vcombine.high %v2509_v3, %v2509_v3  ;;  %v5933_v29 = vrot.slane %v2509_v3, 9  ;;  %v3462_v30 = vmax.f32 %v2543_v17, %v5941_v62  ;;  %v2553_v24 = vcombine.high %v2313_v4, %v2313_v4  ;;  %6955 = vrot.lane.b32.xlu0 %v6954_v51, %s7164_s19 }
 0x1cb   : > { %v2518_v32 = vcombine.high %v2516_v6, %v2516_v6  ;;  %v5935_v12 = vrot.slane %v2516_v6, 9  ;;  %v5944_v52 = vrot.slane %v2552_v40, 9  ;;  %v3463_v10 = vmax.f32 %v2551_v31, %v5942_v25 }
 0x1cc   : > { %v5934_v1 = vrot.slane %v2517_v44, 9  ;;  %v3454_v27 = vmax.f32 %v2509_v3, %v5933_v29  ;;  %v3464_v13 = vmax.f32 %v2550_v11, %v5943_v38  ;;  %v2560_v33 = vrot.slane %v2313_v4, %v8226_v41 }
 0x1cd   : > { %v5936_v37 = vrot.slane %v2518_v32, 9  ;;  %v3456_v42 = vmax.f32 %v2516_v6, %v5935_v12  ;;  %v2567_v47 = vrot.slane %v2553_v24, %v8226_v41  ;;  %v3465_v45 = vmax.f32 %v2552_v40, %v5944_v52 }
 0x1ce   : > { %v3455_v5 = vmax.f32 %v2517_v44, %v5934_v1  ;;  %v3566_v35 = vmax.f32 %v3454_v27, %v3462_v30  ;;  %v2568_v43 = vcombine.high %v2560_v33, %v2560_v33  ;;  %v2311_v14 = vmax.f32 %v2211_v22, 0.0 }
 0x1cf   : > { %v3457_v16 = vmax.f32 %v2518_v32, %v5936_v37  ;;  %v3568_v20 = vmax.f32 %v3456_v42, %v3464_v13  ;;  %v2569_v57 = vcombine.high %v2567_v47, %v2567_v47  ;;  %v5945_v54 = vrot.slane %v2560_v33, 9 }
 0x1d0   : > { %v3567_v39 = vmax.f32 %v3455_v5, %v3463_v10  ;;  %v3789_v48 = vrot.slane %v3566_v35, %v8231_v49  ;;  %v2519_v23 = vcombine.high %v2311_v14, %v2311_v14  ;;  %v2526_v60 = vrot.slane %v2311_v14, %v8226_v41 }
 0x1d1   : > { %v3569_v34 = vmax.f32 %v3457_v16, %v3465_v45  ;;  %v3797_v56 = vrot.slane %v3568_v20, %v8231_v49  ;;  %v5946_v61 = vrot.slane %v2568_v43, 9  ;;  %v5947_v58 = vrot.slane %v2567_v47, 9 }
 0x1d2   : > { %v3793_v53 = vrot.slane %v3567_v39, %v8231_v49  ;;  %v6959_v63 = vpack.i.bf16 %v8378_v26, %v8332_v9  ;;  %v2533_v28 = vrot.slane %v2519_v23, %v8226_v41  ;;  %v2534_v2 = vcombine.high %v2526_v60, %v2526_v60 }
 0x1d3   : > { %v5937_v7 = vrot.slane %v2526_v60, 9  ;;  %v3801_v17 = vrot.slane %v3569_v34, %v8231_v49  ;;  %v5948_v50 = vrot.slane %v2569_v57, 9  ;;  %v3466_v11 = vmax.f32 %v2560_v33, %v5945_v54 }
 0x1d4   : > { %v3999_v36 = vsel %vm3978_vm14, %v3793_v53, %v3789_v48  ;;  %6960 = vrot.lane.b32.xlu0 %v6959_v63, %s7165_s20  ;;  %v2535_v31 = vcombine.high %v2533_v28, %v2533_v28  ;;  %v5938_v62 = vrot.slane %v2534_v2, 9  ;;  %v5939_v59 = vrot.slane %v2533_v28, 9 }
 0x1d5   : > { %v4000_v18 = vsel %vm9062_vm15, %v3797_v56, %v3999_v36  ;;  %v3458_v3 = vmax.f32 %v2526_v60, %v5937_v7  ;;  %v3467_v9 = vmax.f32 %v2568_v43, %v5946_v61  ;;  %v3468_v4 = vmax.f32 %v2567_v47, %v5947_v58 }
 0x1d6   : > { %v6964_v21 = vpack.i.bf16 %v8387_v55, %v8339_v8  ;;  %v5940_v40 = vrot.slane %v2535_v31, 9  ;;  %v3459_v25 = vmax.f32 %v2534_v2, %v5938_v62  ;;  %v3460_v38 = vmax.f32 %v2533_v28, %v5939_v59 }
 0x1d7   : > { %v3570_v6 = vmax.f32 %v3458_v3, %v3466_v11  ;;  %v3469_v44 = vmax.f32 %v2569_v57, %v5948_v50  ;;  %v4001_v29 = vsel %vm9064_vm0, %v3801_v17, %v4000_v18 }
 0x1d8   : > { %6965 = vrot.lane.b32.xlu0 %v6964_v21, %s7166_s21  ;;  %v3461_v30 = vmax.f32 %v2535_v31, %v5940_v40  ;;  %v3571_v24 = vmax.f32 %v3459_v25, %v3467_v9  ;;  %v3572_v22 = vmax.f32 %v3460_v38, %v3468_v4 }
 0x1d9   : > { %v3805_v32 = vrot.slane %v3570_v6, %v8231_v49 }
 0x1da   : > { %v3573_v1 = vmax.f32 %v3461_v30, %v3469_v44  ;;  %v3809_v12 = vrot.slane %v3571_v24, %v8231_v49  ;;  %v3813_v8 = vrot.slane %v3572_v22, %v8231_v49 }
 0x1db   : > { %v4002_v27 = vsel %vm3984_vm1, %v3805_v32, %v4001_v29 }
 0x1dc   : > { %v3817_v52 = vrot.slane %v3573_v1, %v8231_v49  ;;  %v4003_v10 = vsel %vm3986_vm2, %v3809_v12, %v4002_v27 }
 0x1dd   : > { %v4004_v33 = vsel %vm3988_vm5, %v3813_v8, %v4003_v10 }
 0x1de   : > { %v4005_v5 = vsel %vm3990_vm6, %v3817_v52, %v4004_v33 }
 0x1df   : > { %4052 = vst.msk [vmem:[#allocation3 + $0x31] sm:$0xff] %vm2005_vm3, %v4005_v5 }
 0x1e0   : > { %v6196_v13 = vpop.f32.mrf.mxu0 }
 0x1e1   : > { %v2232_v37 = vadd.f32 %v6196_v13, %v8222_v19 }
 0x1e2   : > { %v2223_v42 = vpop.f32.mrf.mxu0 }
 0x1e3   : > { %v2316_v35 = vmax.f32 %v2232_v37, 0.0  ;;  %v2224_v47 = vadd.f32 %v8222_v19, %v2223_v42 }
 0x1e4   : > { %v6197_v16 = vpop.f32.mrf.mxu0 }
 0x1e5   : > { %v2604_v39 = vcombine.high %v2316_v35, %v2316_v35  ;;  %v2611_v20 = vrot.slane %v2316_v35, %v8226_v41  ;;  %v2314_v45 = vmax.f32 %v2224_v47, 0.0  ;;  %v2235_v43 = vadd.f32 %v6197_v16, %v8222_v19 }
 0x1e6   : > { %v2226_v17 = vpop.f32.mrf.mxu0  ;;  %v8413_v4 = vld [vmem:[#allocation3 + $0x31] sm:$0xff] }
 0x1e7   : > { %v2618_v51 = vrot.slane %v2604_v39, %v8226_v41  ;;  %v2619_v48 = vcombine.high %v2611_v20, %v2611_v20  ;;  %v2570_v53 = vcombine.high %v2314_v45, %v2314_v45  ;;  %v2577_v14 = vrot.slane %v2314_v45, %v8226_v41  ;;  %v8415_v40 = vld [vmem:[#allocation3 + $0x30] sm:$0xff] }
 0x1e8   : > { %v2317_v34 = vmax.f32 %v2235_v43, 0.0  ;;  %v5957_v57 = vrot.slane %v2611_v20, 9  ;;  %v2227_v25 = vadd.f32 %v8222_v19, %v2226_v17  ;;  %v6969_v30 = vpack.i.bf16 %v8413_v4, %v8378_v26  ;;  %v8424_v12 = vld [vmem:[#allocation3 + $0x32] sm:$0xff] }
 0x1e9   : > { %v2620_v56 = vcombine.high %v2618_v51, %v2618_v51  ;;  %v5958_v54 = vrot.slane %v2619_v48, 9  ;;  %v5959_v36 = vrot.slane %v2618_v51, 9  ;;  %v2584_v23 = vrot.slane %v2570_v53, %v8226_v41 }
 0x1ea   : > { %v2585_v60 = vcombine.high %v2577_v14, %v2577_v14  ;;  %v5949_v61 = vrot.slane %v2577_v14, 9  ;;  %v2621_v58 = vcombine.high %v2317_v34, %v2317_v34  ;;  %v3478_v50 = vmax.f32 %v2611_v20, %v5957_v57  ;;  %6970 = vrot.lane.b32.xlu1 %v6969_v30, %s7161_s13 }
 0x1eb   : > { %v2586_v63 = vcombine.high %v2584_v23, %v2584_v23  ;;  %v5951_v2 = vrot.slane %v2584_v23, 9  ;;  %v5960_v18 = vrot.slane %v2620_v56, 9  ;;  %v3479_v11 = vmax.f32 %v2619_v48, %v5958_v54 }
 0x1ec   : > { %v5950_v28 = vrot.slane %v2585_v60, 9  ;;  %v3470_v7 = vmax.f32 %v2577_v14, %v5949_v61  ;;  %v3480_v31 = vmax.f32 %v2618_v51, %v5959_v36  ;;  %v2628_v9 = vrot.slane %v2317_v34, %v8226_v41 }
 0x1ed   : > { %v5952_v62 = vrot.slane %v2586_v63, 9  ;;  %v3472_v3 = vmax.f32 %v2584_v23, %v5951_v2  ;;  %v2635_v29 = vrot.slane %v2621_v58, %v8226_v41  ;;  %v3481_v24 = vmax.f32 %v2620_v56, %v5960_v18 }
 0x1ee   : > { %v3471_v59 = vmax.f32 %v2585_v60, %v5950_v28  ;;  %v3574_v21 = vmax.f32 %v3470_v7, %v3478_v50  ;;  %v2636_v32 = vcombine.high %v2628_v9, %v2628_v9  ;;  %v6979_v1 = vpack.i.bf16 %v8415_v40, %v8369_v46 }
 0x1ef   : > { %v3473_v38 = vmax.f32 %v2586_v63, %v5952_v62  ;;  %v3576_v44 = vmax.f32 %v3472_v3, %v3480_v31  ;;  %v2315_v27 = vmax.f32 %v2227_v25, 0.0  ;;  %v2637_v13 = vcombine.high %v2635_v29, %v2635_v29 }
 0x1f0   : > { %v3575_v6 = vmax.f32 %v3471_v59, %v3479_v11  ;;  %v3821_v8 = vrot.slane %v3574_v21, %v8231_v49  ;;  %v5961_v33 = vrot.slane %v2628_v9, 9  ;;  %6980 = vrot.lane.b32.xlu0 %v6979_v1, %s7167_s26  ;;  %v6974_v5 = vpack.i.bf16 %v8424_v12, %v8387_v55 }
 0x1f1   : > { %v3577_v52 = vmax.f32 %v3473_v38, %v3481_v24  ;;  %v3829_v10 = vrot.slane %v3576_v44, %v8231_v49  ;;  %v2587_v37 = vcombine.high %v2315_v27, %v2315_v27  ;;  %v2594_v46 = vrot.slane %v2315_v27, %v8226_v41 }
 0x1f2   : > { %v3825_v22 = vrot.slane %v3575_v6, %v8231_v49  ;;  %v5962_v42 = vrot.slane %v2636_v32, 9  ;;  %v5963_v35 = vrot.slane %v2635_v29, 9  ;;  %6975 = vrot.lane.b32.xlu1 %v6974_v5, %s7163_s18  ;;  %v5964_v43 = vrot.slane %v2637_v13, 9 }
 0x1f3   : > { %v2601_v47 = vrot.slane %v2587_v37, %v8226_v41  ;;  %v2602_v16 = vcombine.high %v2594_v46, %v2594_v46  ;;  %v5953_v39 = vrot.slane %v2594_v46, 9  ;;  %v3833_v20 = vrot.slane %v3577_v52, %v8231_v49 }
 0x1f4   : > { %v4006_v26 = vsel %vm3978_vm14, %v3825_v22, %v3821_v8  ;;  %v3482_v51 = vmax.f32 %v2628_v9, %v5961_v33  ;;  %6985 = vrot.lane.b32.xlu0 %v6969_v30, %s7168_s27  ;;  %v3483_v34 = vmax.f32 %v2636_v32, %v5962_v42  ;;  %v3484_v56 = vmax.f32 %v2635_v29, %v5963_v35 }
 0x1f5   : > { %v4007_v45 = vsel %vm9062_vm15, %v3829_v10, %v4006_v26  ;;  %v2603_v48 = vcombine.high %v2601_v47, %v2601_v47  ;;  %v5954_v53 = vrot.slane %v2602_v16, 9  ;;  %v5955_v55 = vrot.slane %v2601_v47, 9 }
 0x1f6   : > { %v3474_v14 = vmax.f32 %v2594_v46, %v5953_v39  ;;  %v3485_v60 = vmax.f32 %v2637_v13, %v5964_v43  ;;  %v4008_v61 = vsel %vm9064_vm0, %v3833_v20, %v4007_v45 }
 0x1f7   : > { %v5956_v57 = vrot.slane %v2603_v48, 9  ;;  %v3475_v54 = vmax.f32 %v2602_v16, %v5954_v53  ;;  %v3476_v36 = vmax.f32 %v2601_v47, %v5955_v55 }
 0x1f8   : > { %v3578_v23 = vmax.f32 %v3474_v14, %v3482_v51  ;;  %6990 = vrot.lane.b32.xlu0 %v6974_v5, %s7169_s28 }
 0x1f9   : > { %v3477_v58 = vmax.f32 %v2603_v48, %v5956_v57  ;;  %v3579_v63 = vmax.f32 %v3475_v54, %v3483_v34  ;;  %v3580_v28 = vmax.f32 %v3476_v36, %v3484_v56 }
 0x1fa   : > { %v3837_v2 = vrot.slane %v3578_v23, %v8231_v49 }
 0x1fb   : > { %v3581_v7 = vmax.f32 %v3477_v58, %v3485_v60  ;;  %v3841_v17 = vrot.slane %v3579_v63, %v8231_v49  ;;  %v3845_v18 = vrot.slane %v3580_v28, %v8231_v49  ;;  %v7112_v60 = vld [vmem:[%s9052_s3 + $0x38] sm:$0xff]  }
 0x1fc   : > { %v4009_v50 = vsel %vm3984_vm1, %v3837_v2, %v4008_v61  ;;  %6214 = vmatprep.subr.bf16.mxu1 %v7112_v60 }
 0x1fd   : > { %v3849_v31 = vrot.slane %v3581_v7, %v8231_v49  ;;  %v4010_v62 = vsel %vm3986_vm2, %v3841_v17, %v4009_v50  ;;  %6215 = vmatpush3.bf16.msra.mxu1 %v7112_v60  ;;  %v7117_v60 = vld [vmem:[%s9052_s3 + $0x10] sm:$0xff]  }
 0x1fe   : > { %v4011_v3 = vsel %vm3988_vm5, %v3845_v18, %v4010_v62  ;;  %v7113_v18 = vld [vmem:[%s9052_s3 + $0x30] sm:$0xff]  }
 0x1ff   : > { %v4012_v21 = vsel %vm3990_vm6, %v3849_v31, %v4011_v3  ;;  %6216 = vmatprep.subr.bf16.mxu1 %v7113_v18 }
 0x200   : > { %v6200_v11 = vpop.f32.mrf.mxu0  ;;  %4053 = vst.msk [vmem:[#allocation3 + $0x41] sm:$0xff] %vm2005_vm3, %v4012_v21 }
 0x201   : > { %v2248_v59 = vadd.f32 %v6200_v11, %v8222_v19  ;;  %6217 = vmatpush3.bf16.msra.mxu1 %v7113_v18 }
 0x202   : > { %v2239_v9 = vpop.f32.mrf.mxu0 }
 0x203   : > { %v2320_v25 = vmax.f32 %v2248_v59, 0.0  ;;  %v2240_v38 = vadd.f32 %v8222_v19, %v2239_v9 }
 0x204   : > { %v6201_v6 = vpop.f32.mrf.mxu0 }
 0x205   : > { %v2672_v44 = vcombine.high %v2320_v25, %v2320_v25  ;;  %v2679_v29 = vrot.slane %v2320_v25, %v8226_v41  ;;  %v2318_v30 = vmax.f32 %v2240_v38, 0.0  ;;  %v2251_v24 = vadd.f32 %v6201_v6, %v8222_v19 }
 0x206   : > { %v2242_v10 = vpop.f32.mrf.mxu0 }
 0x207   : > { %v2686_v22 = vrot.slane %v2672_v44, %v8226_v41  ;;  %v2687_v32 = vcombine.high %v2679_v29, %v2679_v29  ;;  %v5973_v1 = vrot.slane %v2679_v29, 9  ;;  %v2638_v8 = vcombine.high %v2318_v30, %v2318_v30  ;;  %v8459_v57 = vld [vmem:[#allocation3 + $0x40] sm:$0xff] }
 0x208   : > { %v2645_v27 = vrot.slane %v2318_v30, %v8226_v41  ;;  %v2321_v52 = vmax.f32 %v2251_v24, 0.0  ;;  %v2243_v47 = vadd.f32 %v8222_v19, %v2242_v10  ;;  %v6994_v63 = vpack.i.bf16 %v8459_v57, %v8415_v40  ;;  %v8469_v17 = vld [vmem:[#allocation3 + $0x41] sm:$0xff]  ;;  %v7114_v30 = vld [vmem:[%s9052_s3 + $0x28] sm:$0xff]  }
 0x209   : > { %v2688_v13 = vcombine.high %v2686_v22, %v2686_v22  ;;  %v5974_v33 = vrot.slane %v2687_v32, 9  ;;  %v5975_v26 = vrot.slane %v2686_v22, 9  ;;  %v2652_v37 = vrot.slane %v2638_v8, %v8226_v41  ;;  %6218 = vmatprep.subr.bf16.mxu1 %v7114_v30 }
 0x20a   : > { %v2653_v46 = vcombine.high %v2645_v27, %v2645_v27  ;;  %v5965_v5 = vrot.slane %v2645_v27, 9  ;;  %v3494_v42 = vmax.f32 %v2679_v29, %v5973_v1  ;;  %v2689_v35 = vcombine.high %v2321_v52, %v2321_v52  ;;  %6995 = vrot.lane.b32.xlu1 %v6994_v63, %s7164_s19  ;;  %v8481_v29 = vld [vmem:[#allocation3 + $0x42] sm:$0xff]  ;;  %6219 = vmatpush3.bf16.msra.mxu1 %v7114_v30 }
 0x20b   : > { %v2654_v16 = vcombine.high %v2652_v37, %v2652_v37  ;;  %v5967_v20 = vrot.slane %v2652_v37, 9  ;;  %v5976_v43 = vrot.slane %v2688_v13, 9  ;;  %v3495_v51 = vmax.f32 %v2687_v32, %v5974_v33 }
 0x20c   : > { %v5966_v39 = vrot.slane %v2653_v46, 9  ;;  %v3486_v45 = vmax.f32 %v2645_v27, %v5965_v5  ;;  %v3496_v48 = vmax.f32 %v2686_v22, %v5975_v26  ;;  %v2696_v53 = vrot.slane %v2321_v52, %v8226_v41 }
 0x20d   : > { %v5968_v55 = vrot.slane %v2654_v16, 9  ;;  %v3488_v34 = vmax.f32 %v2652_v37, %v5967_v20  ;;  %v2703_v54 = vrot.slane %v2689_v35, %v8226_v41  ;;  %v3497_v61 = vmax.f32 %v2688_v13, %v5976_v43 }
 0x20e   : > { %v3487_v14 = vmax.f32 %v2653_v46, %v5966_v39  ;;  %v3582_v56 = vmax.f32 %v3486_v45, %v3494_v42  ;;  %v2704_v58 = vcombine.high %v2696_v53, %v2696_v53  ;;  %v2319_v7 = vmax.f32 %v2243_v47, 0.0  ;;  %v7115_v42 = vld [vmem:[%s9052_s3 + $0x20] sm:$0xff]  }
 0x20f   : > { %v3489_v36 = vmax.f32 %v2654_v16, %v5968_v55  ;;  %v3584_v19 = vmax.f32 %v3488_v34, %v3496_v48  ;;  %v2705_v31 = vcombine.high %v2703_v54, %v2703_v54  ;;  %v5977_v62 = vrot.slane %v2696_v53, 9  ;;  %6220 = vmatprep.subr.bf16.mxu1 %v7115_v42 }
 0x210   : > { %v3583_v23 = vmax.f32 %v3487_v14, %v3495_v51  ;;  %v3853_v28 = vrot.slane %v3582_v56, %v8231_v49  ;;  %v2655_v59 = vcombine.high %v2319_v7, %v2319_v7  ;;  %v2662_v3 = vrot.slane %v2319_v7, %v8226_v41  ;;  %6221 = vmatpush3.bf16.msra.mxu1 %v7115_v42 }
 0x211   : > { %v3585_v50 = vmax.f32 %v3489_v36, %v3497_v61  ;;  %v3861_v11 = vrot.slane %v3584_v19, %v8231_v49  ;;  %v5978_v9 = vrot.slane %v2704_v58, 9  ;;  %v5979_v21 = vrot.slane %v2703_v54, 9 }
 0x212   : > { %v3857_v2 = vrot.slane %v3583_v23, %v8231_v49  ;;  %v6999_v25 = vpack.i.bf16 %v8469_v17, %v8413_v4  ;;  %v2669_v38 = vrot.slane %v2655_v59, %v8226_v41  ;;  %v2670_v6 = vcombine.high %v2662_v3, %v2662_v3 }
 0x213   : > { %v5969_v44 = vrot.slane %v2662_v3, 9  ;;  %v3865_v24 = vrot.slane %v3585_v50, %v8231_v49  ;;  %v5980_v32 = vrot.slane %v2705_v31, 9  ;;  %v3498_v1 = vmax.f32 %v2696_v53, %v5977_v62  ;;  %v7116_v53 = vld [vmem:[%s9052_s3 + $0x18] sm:$0xff]   ;;  %v7118_v50 = vld [vmem:[%s9052_s3 + $0x8] sm:$0xff]  }
 0x214   : > { %v4013_v40 = vsel %vm3978_vm14, %v3857_v2, %v3853_v28  ;;  %7000 = vrot.lane.b32.xlu1 %v6999_v25, %s7165_s20  ;;  %v2671_v4 = vcombine.high %v2669_v38, %v2669_v38  ;;  %v5970_v8 = vrot.slane %v2670_v6, 9  ;;  %v5971_v27 = vrot.slane %v2669_v38, 9  ;;  %6222 = vmatprep.subr.bf16.mxu1 %v7116_v53 }
 0x215   : > { %v4014_v22 = vsel %vm9062_vm15, %v3861_v11, %v4013_v40  ;;  %v3490_v52 = vmax.f32 %v2662_v3, %v5969_v44  ;;  %v3499_v10 = vmax.f32 %v2704_v58, %v5978_v9  ;;  %v3500_v13 = vmax.f32 %v2703_v54, %v5979_v21  ;;  %v8509_v54 = vld [vmem:[%s9051_s2] ss:$0 sm:$0xff]  ;;  %6223 = vmatpush3.bf16.msra.mxu1 %v7116_v53 }
 0x216   : > { %v7004_v33 = vpack.i.bf16 %v8481_v29, %v8424_v12  ;;  %v5972_v26 = vrot.slane %v2671_v4, 9  ;;  %v3491_v37 = vmax.f32 %v2670_v6, %v5970_v8  ;;  %v3492_v46 = vmax.f32 %v2669_v38, %v5971_v27  ;;  %6224 = vmatprep.subr.bf16.mxu1 %v7117_v60  ;;  %v7119_v44 = vld [vmem:[%s9052_s3] sm:$0xff]  }
 0x217   : > { %v3586_v5 = vmax.f32 %v3490_v52, %v3498_v1  ;;  %v3501_v35 = vmax.f32 %v2705_v31, %v5980_v32  ;;  %v4015_v47 = vsel %vm9064_vm0, %v3865_v24, %v4014_v22 }
 0x218   : > { %7005 = vrot.lane.b32.xlu1 %v7004_v33, %s7166_s21  ;;  %v3493_v16 = vmax.f32 %v2671_v4, %v5972_v26  ;;  %v3587_v39 = vmax.f32 %v3491_v37, %v3499_v10  ;;  %v3588_v20 = vmax.f32 %v3492_v46, %v3500_v13 }
 0x219   : > { %v3869_v45 = vrot.slane %v3586_v5, %v8231_v49  ;;  %6225 = vmatpush3.bf16.msra.mxu1 %v7117_v60 }
 0x21a   : > { %v3589_v12 = vmax.f32 %v3493_v16, %v3501_v35  ;;  %v3873_v43 = vrot.slane %v3587_v39, %v8231_v49  ;;  %v3877_v51 = vrot.slane %v3588_v20, %v8231_v49  ;;  %6226 = vmatprep.subr.bf16.mxu1 %v7118_v50 }
 0x21b   : > { %v4016_v48 = vsel %vm3984_vm1, %v3869_v45, %v4015_v47 }
 0x21c   : > { %v3881_v55 = vrot.slane %v3589_v12, %v8231_v49  ;;  %v4017_v14 = vsel %vm3986_vm2, %v3873_v43, %v4016_v48 }
 0x21d   : > { %v4018_v56 = vsel %vm3988_vm5, %v3877_v51, %v4017_v14  ;;  %6227 = vmatpush3.bf16.msra.mxu1 %v7118_v50 }
 0x21e   : > { %v4019_v23 = vsel %vm3990_vm6, %v3881_v55, %v4018_v56  ;;  %6228 = vmatprep.subr.bf16.mxu1 %v7119_v44 }
 0x21f   : > { %4054 = vst.msk [vmem:[#allocation3 + $0x51] sm:$0xff] %vm2005_vm3, %v4019_v23 }
 0x220   : > { %v6204_v34 = vpop.f32.mrf.mxu0 }
 0x221   : > { %v2264_v36 = vadd.f32 %v8509_v54, %v6204_v34  ;;  %6229 = vmatpush3.bf16.msra.mxu1 %v7119_v44 }
 0x222   : > { %v2255_v19 = vpop.f32.mrf.mxu0  ;;  %6238 = vmatprep.subr.bf16.mxu1 %v7153_v0 }
 0x223   : > { %v2324_v61 = vmax.f32 %v2264_v36, 0.0  ;;  %v2256_v58 = vadd.f32 %v8509_v54, %v2255_v19 }
 0x224   : > { %v6205_v63 = vpop.f32.mrf.mxu0 }
 0x225   : > { %v2740_v28 = vcombine.high %v2324_v61, %v2324_v61  ;;  %v2747_v2 = vrot.slane %v2324_v61, %v8226_v41  ;;  %v2322_v7 = vmax.f32 %v2256_v58, 0.0  ;;  %v2267_v18 = vadd.f32 %v8509_v54, %v6205_v63 }
 0x226   : > { %v8526_v6 = vld [vmem:[#allocation3 + $0x50] sm:$0xff]  ;;  %v2258_v16 = vpop.f32.mrf.mxu0 }
 0x227   : > { %v2755_v11 = vcombine.high %v2747_v2, %v2747_v2  ;;  %v2706_v31 = vcombine.high %v2322_v7, %v2322_v7  ;;  %v2754_v62 = vrot.slane %v2740_v28, %v8226_v41  ;;  %v2713_v40 = vrot.slane %v2322_v7, %v8226_v41  ;;  %v8531_v1 = vld [vmem:[#allocation3 + $0x52] sm:$0xff] }
 0x228   : > { %v2325_v21 = vmax.f32 %v2267_v18, 0.0  ;;  %v5989_v25 = vrot.slane %v2747_v2, 9  ;;  %v7009_v33 = vpack.i.bf16 %v8526_v6, %v8459_v57  ;;  %v7024_v46 = vpack.i.bf16 %v8531_v1, %v8481_v29  ;;  %v8541_v57 = vld [vmem:[#allocation3 + $0x51] sm:$0xff] }
 0x229   : > { %v5990_v59 = vrot.slane %v2755_v11, 9  ;;  %v2720_v3 = vrot.slane %v2706_v31, %v8226_v41  ;;  %v2721_v9 = vcombine.high %v2713_v40, %v2713_v40  ;;  %v5981_v38 = vrot.slane %v2713_v40, 9 }
 0x22a   : > { %v2756_v30 = vcombine.high %v2754_v62, %v2754_v62  ;;  %v5991_v24 = vrot.slane %v2754_v62, 9  ;;  %v2757_v13 = vcombine.high %v2325_v21, %v2325_v21  ;;  %v3510_v26 = vmax.f32 %v2747_v2, %v5989_v25  ;;  %7010 = vrot.lane.b32.xlu1 %v7009_v33, %s7167_s26  ;;  %7025 = vrot.lane.b32.xlu0 %v7024_v46, %s7169_s28 }
 0x22b   : > { %v2722_v22 = vcombine.high %v2720_v3, %v2720_v3  ;;  %v5982_v32 = vrot.slane %v2721_v9, 9  ;;  %v3511_v4 = vmax.f32 %v2755_v11, %v5990_v59  ;;  %v5983_v8 = vrot.slane %v2720_v3, 9 }
 0x22c   : > { %v3502_v27 = vmax.f32 %v2713_v40, %v5981_v38  ;;  %v5992_v5 = vrot.slane %v2756_v30, 9  ;;  %v3512_v42 = vmax.f32 %v2754_v62, %v5991_v24  ;;  %v2764_v47 = vrot.slane %v2325_v21, %v8226_v41 }
 0x22d   : > { %v5984_v52 = vrot.slane %v2722_v22, 9  ;;  %v3503_v10 = vmax.f32 %v2721_v9, %v5982_v32  ;;  %v3504_v37 = vmax.f32 %v2720_v3, %v5983_v8  ;;  %v2771_v29 = vrot.slane %v2757_v13, %v8226_v41 }
 0x22e   : > { %v3590_v39 = vmax.f32 %v3502_v27, %v3510_v26  ;;  %v2259_v43 = vadd.f32 %v8509_v54, %v2258_v16  ;;  %v3513_v51 = vmax.f32 %v2756_v30, %v5992_v5  ;;  %v2772_v48 = vcombine.high %v2764_v47, %v2764_v47  ;;  %7030 = vrot.lane.b32.xlu0 %v7024_v46, %s7163_s18 }
 0x22f   : > { %v3591_v35 = vmax.f32 %v3503_v10, %v3511_v4  ;;  %v3505_v20 = vmax.f32 %v2722_v22, %v5984_v52  ;;  %v3592_v45 = vmax.f32 %v3504_v37, %v3512_v42  ;;  %v7014_v53 = vpack.i.bf16 %v8541_v57, %v8469_v17 }
 0x230   : > { %v3885_v55 = vrot.slane %v3590_v39, %v8231_v49  ;;  %v2323_v14 = vmax.f32 %v2259_v43, 0.0  ;;  %v2773_v36 = vcombine.high %v2771_v29, %v2771_v29  ;;  %v5993_v23 = vrot.slane %v2764_v47, 9 }
 0x231   : > { %v3889_v12 = vrot.slane %v3591_v35, %v8231_v49  ;;  %v3593_v34 = vmax.f32 %v3505_v20, %v3513_v51  ;;  %v3893_v56 = vrot.slane %v3592_v45, %v8231_v49  ;;  %7015 = vrot.lane.b32.xlu1 %v7014_v53, %s7168_s27  ;;  %v5994_v58 = vrot.slane %v2772_v48, 9 }
 0x232   : > { %v2723_v60 = vcombine.high %v2323_v14, %v2323_v14  ;;  %v2730_v61 = vrot.slane %v2323_v14, %v8226_v41  ;;  %v5995_v63 = vrot.slane %v2771_v29, 9  ;;  %v5996_v50 = vrot.slane %v2773_v36, 9 }
 0x233   : > { %v4020_v19 = vsel %vm3978_vm14, %v3889_v12, %v3885_v55  ;;  %v3897_v7 = vrot.slane %v3593_v34, %v8231_v49  ;;  %v3514_v11 = vmax.f32 %v2764_v47, %v5993_v23  ;;  %v3515_v3 = vmax.f32 %v2772_v48, %v5994_v58 }
 0x234   : > { %v2737_v17 = vrot.slane %v2723_v60, %v8226_v41  ;;  %v2738_v28 = vcombine.high %v2730_v61, %v2730_v61  ;;  %v5985_v2 = vrot.slane %v2730_v61, 9  ;;  %v4021_v18 = vsel %vm9062_vm15, %v3893_v56, %v4020_v19 }
 0x235   : > { %7020 = vrot.lane.b32.xlu1 %v7014_v53, %s7161_s13  ;;  %v3516_v9 = vmax.f32 %v2771_v29, %v5995_v63  ;;  %v3517_v30 = vmax.f32 %v2773_v36, %v5996_v50  ;;  %v4022_v24 = vsel %vm9064_vm0, %v3897_v7, %v4021_v18  ;;  %v8575_v63 = vpop.permute.xlu0 %6945 }
 0x236   : > { %v2739_v31 = vcombine.high %v2737_v17, %v2737_v17  ;;  %v5986_v62 = vrot.slane %v2738_v28, 9  ;;  %v5987_v40 = vrot.slane %v2737_v17, 9  ;;  %v3506_v59 = vmax.f32 %v2730_v61, %v5985_v2 }
 0x238   : > { %v5988_v21 = vrot.slane %v2739_v31, 9  ;;  %v3507_v25 = vmax.f32 %v2738_v28, %v5986_v62  ;;  %v3508_v38 = vmax.f32 %v2737_v17, %v5987_v40  ;;  %v3594_v44 = vmax.f32 %v3506_v59, %v3514_v11 }
 0x23a   : > { %v3509_v22 = vmax.f32 %v2739_v31, %v5988_v21  ;;  %v3595_v32 = vmax.f32 %v3507_v25, %v3515_v3  ;;  %v3596_v4 = vmax.f32 %v3508_v38, %v3516_v9  ;;  %v3901_v8 = vrot.slane %v3594_v44, %v8231_v49 }
 0x23c   : > { %v3597_v52 = vmax.f32 %v3509_v22, %v3517_v30  ;;  %v3905_v10 = vrot.slane %v3595_v32, %v8231_v49  ;;  %v3909_v13 = vrot.slane %v3596_v4, %v8231_v49  ;;  %v4023_v33 = vsel %vm3984_vm1, %v3901_v8, %v4022_v24  ;;  %v8582_v22 = vpop.permute.xlu0 %6950 }
 0x23e   : > { %v3913_v46 = vrot.slane %v3597_v52, %v8231_v49  ;;  %v4024_v5 = vsel %vm3986_vm2, %v3905_v10, %v4023_v33 }
 0x23f   : > { %v4025_v35 = vsel %vm3988_vm5, %v3909_v13, %v4024_v5 }
 0x240   : > { %v6208_v27 = vpop.f32.mrf.mxu0  ;;  %v4026_v39 = vsel %vm3990_vm6, %v3913_v46, %v4025_v35  ;;  %v8592_v5 = vpop.permute.xlu0 %6955 }
 0x241   : > { %v2280_v26 = vadd.f32 %v8509_v54, %v6208_v27  ;;  %4055 = vst.msk [vmem:[#allocation3 + $0x61] sm:$0xff] %vm2005_vm3, %v4026_v39 }
 0x242   : > { %v2271_v37 = vpop.f32.mrf.mxu0 }
 0x243   : > { %v2272_v42 = vadd.f32 %v8509_v54, %v2271_v37  ;;  %v2328_v47 = vmax.f32 %v2280_v26, 0.0 }
 0x244   : > { %v6209_v16 = vpop.f32.mrf.mxu0 }
 0x245   : > { %v2326_v20 = vmax.f32 %v2272_v42, 0.0  ;;  %v2808_v45 = vcombine.high %v2328_v47, %v2328_v47  ;;  %v2815_v29 = vrot.slane %v2328_v47, %v8226_v41  ;;  %v2283_v51 = vadd.f32 %v8509_v54, %v6209_v16 }
 0x246   : > { %v2274_v17 = vpop.f32.mrf.mxu0 }
 0x247   : > { %v2774_v12 = vcombine.high %v2326_v20, %v2326_v20  ;;  %v2781_v43 = vrot.slane %v2326_v20, %v8226_v41  ;;  %v2822_v48 = vrot.slane %v2808_v45, %v8226_v41  ;;  %v2823_v53 = vcombine.high %v2815_v29, %v2815_v29 }
 0x248   : > { %v6005_v36 = vrot.slane %v2815_v29, 9  ;;  %v2329_v58 = vmax.f32 %v2283_v51, 0.0  ;;  %v8577_v3 = vld [vmem:[#allocation3 + $0x60] sm:$0xff]  ;;  %v2275_v9 = vadd.f32 %v8509_v54, %v2274_v17 }
 0x249   : > { %v2788_v55 = vrot.slane %v2774_v12, %v8226_v41  ;;  %v2789_v14 = vcombine.high %v2781_v43, %v2781_v43  ;;  %v5997_v34 = vrot.slane %v2781_v43, 9  ;;  %v2824_v56 = vcombine.high %v2822_v48, %v2822_v48  ;;  %v8587_v52 = vld [vmem:[#allocation3 + $0x61] sm:$0xff] }
 0x24a   : > { %v6006_v23 = vrot.slane %v2823_v53, 9  ;;  %v6007_v19 = vrot.slane %v2822_v48, 9  ;;  %v3526_v50 = vmax.f32 %v2815_v29, %v6005_v36  ;;  %v2825_v59 = vcombine.high %v2329_v58, %v2329_v58  ;;  %v8598_v39 = vld [vmem:[#allocation3 + $0x62] sm:$0xff] }
 0x24b   : > { %v2790_v60 = vcombine.high %v2788_v55, %v2788_v55  ;;  %v5998_v61 = vrot.slane %v2789_v14, 9  ;;  %v5999_v28 = vrot.slane %v2788_v55, 9  ;;  %v3518_v7 = vmax.f32 %v2781_v43, %v5997_v34 }
 0x24c   : > { %v6008_v18 = vrot.slane %v2824_v56, 9  ;;  %v3527_v11 = vmax.f32 %v2823_v53, %v6006_v23  ;;  %v3528_v62 = vmax.f32 %v2822_v48, %v6007_v19  ;;  %v2832_v44 = vrot.slane %v2329_v58, %v8226_v41 }
 0x24d   : > { %v6000_v2 = vrot.slane %v2790_v60, 9  ;;  %v3519_v31 = vmax.f32 %v2789_v14, %v5998_v61  ;;  %v3520_v40 = vmax.f32 %v2788_v55, %v5999_v28  ;;  %v3598_v25 = vmax.f32 %v3518_v7, %v3526_v50 }
 0x24e   : > { %v2839_v24 = vrot.slane %v2825_v59, %v8226_v41  ;;  %v3529_v32 = vmax.f32 %v2824_v56, %v6008_v18  ;;  %v7034_v8 = vpack.i.bf16 %v8577_v3, %v8526_v6  ;;  %v2840_v27 = vcombine.high %v2832_v44, %v2832_v44 }
 0x24f   : > { %v3521_v21 = vmax.f32 %v2790_v60, %v6000_v2  ;;  %v3599_v38 = vmax.f32 %v3519_v31, %v3527_v11  ;;  %v3600_v30 = vmax.f32 %v3520_v40, %v3528_v62  ;;  %v3917_v13 = vrot.slane %v3598_v25, %v8231_v49  ;;  %v6961_v60 = vpop.permute.xlu0 %6960 }
 0x250   : > { %7035 = vrot.lane.b32.xlu0 %v7034_v8, %s7164_s19  ;;  %v2327_v33 = vmax.f32 %v2275_v9, 0.0  ;;  %v2841_v37 = vcombine.high %v2839_v24, %v2839_v24  ;;  %v6009_v46 = vrot.slane %v2832_v44, 9  ;;  %v7039_v16 = vpack.i.bf16 %v8587_v52, %v8541_v57 }
 0x251   : > { %v3921_v4 = vrot.slane %v3599_v38, %v8231_v49  ;;  %v3601_v10 = vmax.f32 %v3521_v21, %v3529_v32  ;;  %v3925_v26 = vrot.slane %v3600_v30, %v8231_v49  ;;  %v6010_v20 = vrot.slane %v2840_v27, 9 }
 0x252   : > { %v2791_v35 = vcombine.high %v2327_v33, %v2327_v33  ;;  %v2798_v47 = vrot.slane %v2327_v33, %v8226_v41  ;;  %v6011_v45 = vrot.slane %v2839_v24, 9  ;;  %v6012_v53 = vrot.slane %v2841_v37, 9 }
 0x253   : > { %v4027_v42 = vsel %vm3978_vm14, %v3921_v4, %v3917_v13  ;;  %v3929_v29 = vrot.slane %v3601_v10, %v8231_v49  ;;  %v3530_v55 = vmax.f32 %v2832_v44, %v6009_v46  ;;  %v7044_v14 = vpack.i.bf16 %v8598_v39, %v8531_v1  ;;  %v6966_v21 = vpop.permute.xlu0 %6965  ;;  %v4058_v44 = vld [vmem:[#allocation3] sm:$0xff] }
 0x254   : > { %v2805_v12 = vrot.slane %v2791_v35, %v8226_v41  ;;  %v2806_v43 = vcombine.high %v2798_v47, %v2798_v47  ;;  %v6001_v51 = vrot.slane %v2798_v47, 9  ;;  %7040 = vrot.lane.b32.xlu0 %v7039_v16, %s7165_s20  ;;  %v4028_v48 = vsel %vm9062_vm15, %v3925_v26, %v4027_v42 }
 0x255   : > { %v3531_v23 = vmax.f32 %v2840_v27, %v6010_v20  ;;  %v3532_v19 = vmax.f32 %v2839_v24, %v6011_v45  ;;  %v3533_v2 = vmax.f32 %v2841_v37, %v6012_v53  ;;  %v4029_v7 = vsel %vm9064_vm0, %v3929_v29, %v4028_v48 }
 0x256   : > { %v2807_v57 = vcombine.high %v2805_v12, %v2805_v12  ;;  %v6002_v34 = vrot.slane %v2806_v43, 9  ;;  %v6003_v56 = vrot.slane %v2805_v12, 9  ;;  %v3522_v36 = vmax.f32 %v2798_v47, %v6001_v51 }
 0x257   : > { %v6947_v9 = vunpack.i.l.bf16 %v8575_v63  ;;  %v6948_v30 = vunpack.i.h.bf16 %v8575_v63  ;;  %v6953_v32 = vunpack.i.h.bf16 %v8582_v22  ;;  %v6952_v4 = vunpack.i.l.bf16 %v8582_v22 }
 0x258   : > { %v6004_v61 = vrot.slane %v2807_v57, 9  ;;  %v3523_v58 = vmax.f32 %v2806_v43, %v6002_v34  ;;  %v3524_v17 = vmax.f32 %v2805_v12, %v6003_v56  ;;  %v3602_v28 = vmax.f32 %v3522_v36, %v3530_v55  ;;  %7045 = vrot.lane.b32.xlu0 %v7044_v14, %s7166_s21 }
 0x259   : > { %v6958_v27 = vunpack.i.h.bf16 %v8592_v5  ;;  %v6957_v10 = vunpack.i.l.bf16 %v8592_v5  ;;  %v4387_v63 = vsel %vm2005_vm3, %v4058_v44, %v6947_v9  ;;  %v6963_v13 = vunpack.i.h.bf16 %v6961_v60 }
 0x25a   : > { %v3525_v18 = vmax.f32 %v2807_v57, %v6004_v61  ;;  %v3603_v50 = vmax.f32 %v3523_v58, %v3531_v23  ;;  %v3604_v11 = vmax.f32 %v3524_v17, %v3532_v19  ;;  %v3933_v1 = vrot.slane %v3602_v28, %v8231_v49 }
 0x25b   : > { %v6962_v33 = vunpack.i.l.bf16 %v6961_v60  ;;  %v4388_v22 = vsel %vm2005_vm3, %v8372_v15, %v6948_v30  ;;  %v6968_v46 = vunpack.i.h.bf16 %v6966_v21  ;;  %v6967_v42 = vunpack.i.l.bf16 %v6966_v21 }
 0x25c   : > { %v3605_v31 = vmax.f32 %v3525_v18, %v3533_v2  ;;  %v3937_v62 = vrot.slane %v3603_v50, %v8231_v49  ;;  %v3941_v40 = vrot.slane %v3604_v11, %v8231_v49  ;;  %v4030_v59 = vsel %vm3984_vm1, %v3933_v1, %v4029_v7 }
 0x25d   : > { %v4396_v5 = vsel %vm4395_vm7, %v4387_v63, %v6952_v4  ;;  %v4397_v47 = vsel %vm4395_vm7, %v4388_v22, %v6953_v32 }
 0x25e   : > { %v3945_v25 = vrot.slane %v3605_v31, %v8231_v49  ;;  %v4031_v38 = vsel %vm3986_vm2, %v3937_v62, %v4030_v59  ;;  %v4405_v29 = vsel %vm4404_vm8, %v4396_v5, %v6957_v10  ;;  %v4406_v12 = vsel %vm4404_vm8, %v4397_v47, %v6958_v27 }
 0x25f   : > { %v4032_v24 = vsel %vm3988_vm5, %v3941_v40, %v4031_v38  ;;  %v4414_v15 = vsel %vm4413_vm9, %v4405_v29, %v6962_v33  ;;  %v4415_v48 = vsel %vm4413_vm9, %v4406_v12, %v6963_v13 }
 0x260   : > { %v4033_v8 = vsel %vm3990_vm6, %v3945_v25, %v4032_v24  ;;  %v4423_v14 = vsel %vm4422_vm10, %v4414_v15, %v6967_v42  ;;  %v4424_v57 = vsel %vm4422_vm10, %v4415_v48, %v6968_v46 }
 0x261   : > { %4056 = vst.msk [vmem:[#allocation3 + $0x71] sm:$0xff] %vm2005_vm3, %v4033_v8 }
 0x262   : > { %v6981_v26 = vpop.permute.xlu0 %6980 }
 0x263   : > { %v6983_v16 = vunpack.i.h.bf16 %v6981_v26  ;;  %v6982_v20 = vunpack.i.l.bf16 %v6981_v26 }
 0x265   : > { %v8640_v36 = vsel %vm4431_vm11, %v4423_v14, %v6982_v20  ;;  %v8643_v23 = vsel %vm4431_vm11, %v4424_v57, %v6983_v16 }
 0x266   : > { %v8634_v53 = vpop.permute.xlu0 %6985 }
 0x267   : > { %v6212_v37 = vpop.f32.mrf.mxu0  ;;  %v6988_v17 = vunpack.i.h.bf16 %v8634_v53  ;;  %v6987_v9 = vunpack.i.l.bf16 %v8634_v53 }
 0x268   : > { %v2296_v35 = vadd.f32 %v8509_v54, %v6212_v37  ;;  %v8646_v58 = vld [vmem:[#allocation3 + $0x71] sm:$0xff] }
 0x269   : > { %v2287_v45 = vpop.f32.mrf.mxu0  ;;  %v8653_v1 = vpack.i.bf16 %v8646_v58, %v8587_v52  ;;  %v8662_v48 = vld [vmem:[#allocation3 + $0x70] sm:$0xff] }
 0x26a   : > { %v2332_v43 = vmax.f32 %v2296_v35, 0.0  ;;  %v2288_v51 = vadd.f32 %v8509_v54, %v2287_v45  ;;  %v6991_v33 = vpop.permute.xlu0 %6990 }
 0x26b   : > { %v6213_v55 = vpop.f32.mrf.mxu0  ;;  %7050 = vrot.lane.b32.xlu1 %v8653_v1, %s7161_s13  ;;  %v6993_v12 = vunpack.i.h.bf16 %v6991_v33 }
 0x26c   : > { %v2876_v34 = vcombine.high %v2332_v43, %v2332_v43  ;;  %v2883_v56 = vrot.slane %v2332_v43, %v8226_v41  ;;  %v2330_v19 = vmax.f32 %v2288_v51, 0.0  ;;  %v2299_v60 = vadd.f32 %v8509_v54, %v6213_v55 }
 0x26d   : > { %v2290_v61 = vpop.f32.mrf.mxu0  ;;  %v6992_v43 = vunpack.i.l.bf16 %v6991_v33 }
 0x26e   : > { %v2890_v28 = vrot.slane %v2876_v34, %v8226_v41  ;;  %v2891_v2 = vcombine.high %v2883_v56, %v2883_v56  ;;  %v6021_v7 = vrot.slane %v2883_v56, 9  ;;  %v2842_v18 = vcombine.high %v2330_v19, %v2330_v19 }
 0x26f   : > { %v2849_v50 = vrot.slane %v2330_v19, %v8226_v41  ;;  %v2333_v11 = vmax.f32 %v2299_v60, 0.0  ;;  %v2291_v59 = vadd.f32 %v8509_v54, %v2290_v61 }
 0x270   : > { %v2892_v31 = vcombine.high %v2890_v28, %v2890_v28  ;;  %v6022_v62 = vrot.slane %v2891_v2, 9  ;;  %v6023_v40 = vrot.slane %v2890_v28, 9  ;;  %v3542_v21 = vmax.f32 %v2883_v56, %v6021_v7 }
 0x271   : > { %v2856_v25 = vrot.slane %v2842_v18, %v8226_v41  ;;  %v2857_v38 = vcombine.high %v2849_v50, %v2849_v50  ;;  %v6013_v32 = vrot.slane %v2849_v50, 9  ;;  %v2893_v27 = vcombine.high %v2333_v11, %v2333_v11 }
 0x272   : > { %v6024_v44 = vrot.slane %v2892_v31, 9  ;;  %v3543_v30 = vmax.f32 %v2891_v2, %v6022_v62  ;;  %v3544_v24 = vmax.f32 %v2890_v28, %v6023_v40  ;;  %v2900_v63 = vrot.slane %v2333_v11, %v8226_v41  ;;  %v4081_v40 = vld [vmem:[#allocation3 + $0x72] sm:$0xff] }
 0x273   : > { %v2858_v52 = vcombine.high %v2856_v25, %v2856_v25  ;;  %v6014_v4 = vrot.slane %v2857_v38, 9  ;;  %v6015_v8 = vrot.slane %v2856_v25, 9  ;;  %v3534_v10 = vmax.f32 %v2849_v50, %v6013_v32 }
 0x274   : > { %v3545_v54 = vmax.f32 %v2892_v31, %v6024_v44  ;;  %v2331_v13 = vmax.f32 %v2291_v59, 0.0  ;;  %v2907_v46 = vrot.slane %v2893_v27, %v8226_v41  ;;  %v2908_v35 = vcombine.high %v2900_v63, %v2900_v63 }
 0x275   : > { %v6016_v26 = vrot.slane %v2858_v52, 9  ;;  %v3535_v37 = vmax.f32 %v2857_v38, %v6014_v4  ;;  %v3536_v22 = vmax.f32 %v2856_v25, %v6015_v8  ;;  %v3606_v42 = vmax.f32 %v3534_v10, %v3542_v21 }
 0x276   : > { %v6025_v5 = vrot.slane %v2900_v63, 9  ;;  %v2859_v47 = vcombine.high %v2331_v13, %v2331_v13  ;;  %v2909_v29 = vcombine.high %v2907_v46, %v2907_v46  ;;  %v6026_v51 = vrot.slane %v2908_v35, 9 }
 0x277   : > { %v3537_v16 = vmax.f32 %v2858_v52, %v6016_v26  ;;  %v3607_v20 = vmax.f32 %v3535_v37, %v3543_v30  ;;  %v3608_v45 = vmax.f32 %v3536_v22, %v3544_v24  ;;  %v6027_v15 = vrot.slane %v2907_v46, 9 }
 0x278   : > { %v3949_v14 = vrot.slane %v3606_v42, %v8231_v49  ;;  %v6028_v56 = vrot.slane %v2909_v29, 9  ;;  %v3546_v19 = vmax.f32 %v2900_v63, %v6025_v5  ;;  %v2866_v60 = vrot.slane %v2331_v13, %v8226_v41 }
 0x279   : > { %v3609_v55 = vmax.f32 %v3537_v16, %v3545_v54  ;;  %v3953_v57 = vrot.slane %v3607_v20, %v8231_v49  ;;  %v3957_v34 = vrot.slane %v3608_v45, %v8231_v49  ;;  %v2873_v61 = vrot.slane %v2859_v47, %v8226_v41 }
 0x27a   : > { %v3547_v2 = vmax.f32 %v2908_v35, %v6026_v51  ;;  %v3548_v7 = vmax.f32 %v2907_v46, %v6027_v15  ;;  %v7059_v18 = vpack.i.bf16 %v8662_v48, %v8577_v3  ;;  %v2874_v11 = vcombine.high %v2866_v60, %v2866_v60  ;;  %v6971_v35 = vpop.permute.xlu1 %6970  ;;  %v4114_v15 = vld [vmem:[#allocation3 + $0x90] sm:$0xff] }
 0x27b   : > { %v4034_v28 = vsel %vm3978_vm14, %v3953_v57, %v3949_v14  ;;  %v3961_v50 = vrot.slane %v3609_v55, %v8231_v49  ;;  %v2875_v31 = vcombine.high %v2873_v61, %v2873_v61  ;;  %v6017_v62 = vrot.slane %v2866_v60, 9  ;;  %v4122_v14 = vld [vmem:[#allocation3 + $0x91] sm:$0xff] }
 0x27c   : > { %v4035_v59 = vsel %vm9062_vm15, %v3957_v34, %v4034_v28  ;;  %v6019_v21 = vrot.slane %v2873_v61, 9  ;;  %7060 = vrot.lane.b32.xlu0 %v7059_v18, %s7167_s26  ;;  %v4441_v25 = vsel %vm4440_vm4, %v8640_v36, %v6987_v9  ;;  %v4442_v38 = vsel %vm4440_vm4, %v8643_v23, %v6988_v17  ;;  %vm8685_vm15 = vmpackc.low %vm9063_vm13, %vm9063_vm13 }
 0x27d   : > { %v6018_v44 = vrot.slane %v2874_v11, 9  ;;  %v6020_v30 = vrot.slane %v2875_v31, 9  ;;  %v3538_v24 = vmax.f32 %v2866_v60, %v6017_v62  ;;  %v4450_v32 = vsel %vm4449_vm12, %v4441_v25, %v6992_v43  ;;  %v4130_v60 = vld [vmem:[#allocation3 + $0x92] sm:$0xff] }
 0x27e   : > { %v3549_v52 = vmax.f32 %v2909_v29, %v6028_v56  ;;  %v3540_v4 = vmax.f32 %v2873_v61, %v6019_v21  ;;  %v4451_v8 = vsel %vm4449_vm12, %v4442_v38, %v6993_v12  ;;  %v7054_v53 = vpack.i.bf16 %v4081_v40, %v8598_v39  ;;  %v6976_v5 = vpop.permute.xlu1 %6975 }
 0x27f   : > { %v3539_v36 = vmax.f32 %v2874_v11, %v6018_v44  ;;  %v3541_v9 = vmax.f32 %v2875_v31, %v6020_v30  ;;  %v3610_v23 = vmax.f32 %v3538_v24, %v3546_v19  ;;  %v6039_v17 = vpack.c.bf16 %v4451_v8, %v4450_v32  ;;  %v7143_v31 = vld [vmem:[#allocation3 + $0x30] sm:$0xff] }
 0x280   : > { %v3612_v54 = vmax.f32 %v3540_v4, %v3548_v7  ;;  %v4036_v10 = vsel %vm9064_vm0, %v3961_v50, %v4035_v59  ;;  %7055 = vrot.lane.b32.xlu1 %v7054_v53, %s7163_s18  ;;  %7065 = vrot.lane.b32.xlu0 %v8653_v1, %s7168_s27  ;;  %v6973_v56 = vunpack.i.h.bf16 %v6971_v35  ;;  %v6972_v19 = vunpack.i.l.bf16 %v6971_v35 }
 0x281   : > { %v3611_v63 = vmax.f32 %v3539_v36, %v3547_v2  ;;  %v3613_v13 = vmax.f32 %v3541_v9, %v3549_v52  ;;  %v3965_v33 = vrot.slane %v3610_v23, %v8231_v49  ;;  %6230 = vmatprep.mubr.msk.bf16.mxu1 %vm8685_vm15, %v6039_v17  ;;  %v6978_v61 = vunpack.i.h.bf16 %v6976_v5 }
 0x282   : > { %v3973_v39 = vrot.slane %v3612_v54, %v8231_v49  ;;  %v6996_v45 = vpop.permute.xlu1 %6995  ;;  %v6977_v28 = vunpack.i.l.bf16 %v6976_v5  ;;  %v4390_v62 = vsel %vm2005_vm3, %v7143_v31, %v6973_v56  ;;  %vm4935_vm0 = vcmask 62464  }
 0x283   : > { %v3969_v26 = vrot.slane %v3611_v63, %v8231_v49  ;;  %v3977_v37 = vrot.slane %v3613_v13, %v8231_v49  ;;  %v4037_v22 = vsel %vm3984_vm1, %v3965_v33, %v4036_v10  ;;  %v6998_v2 = vunpack.i.h.bf16 %v6996_v45  ;;  %4938 = vst.msk [vmem:[#allocation4 + $0x28] sm:$0x3f] %vm4935_vm0, %v7153_v0  ;;  %4936 = vst.msk [vmem:[#allocation4] sm:$0x3f] %vm4935_vm0, %v7153_v0 }
 0x284   : > { %7070 = vrot.lane.b32.xlu0 %v7054_v53, %s7169_s28  ;;  %v6997_v7 = vunpack.i.l.bf16 %v6996_v45  ;;  %v4399_v44 = vsel %vm4395_vm7, %v4390_v62, %v6978_v61  ;;  %vm5048_vm1 = vcmask 60416   ;;  %vm9077_vm0 = vcmask 1043459  }
 0x285   : > { %v4038_v46 = vsel %vm3986_vm2, %v3969_v26, %v4037_v22  ;;  %v4408_v52 = vsel %vm4404_vm8, %v4399_v44, %v6998_v2  ;;  %5457 = vst.msk [vmem:[#allocation5] sm:$0xf] %vm5048_vm1, %v7153_v0  ;;  %5459 = vst.msk [vmem:[#allocation5 + $0xc] sm:$0xf] %vm5048_vm1, %v7153_v0  ;;  %vm9069_vm2 = vcmask 57344  }
 0x286   : > { %v4039_v1 = vsel %vm3988_vm5, %v3973_v39, %v4038_v46  ;;  %v7001_v43 = vpop.permute.xlu1 %7000  ;;  %5460 = vst.msk [vmem:[#allocation5] sm:$0x1] %vm9069_vm2, %v7153_v0  ;;  %vm9070_vm5 = vmmov %vm9069_vm2 }
 0x287   : > { %v4040_v42 = vsel %vm3990_vm6, %v3977_v37, %v4039_v1  ;;  %v7003_v18 = vunpack.i.h.bf16 %v7001_v43  ;;  %v7002_v50 = vunpack.i.l.bf16 %v7001_v43  ;;  %5463 = vst.msk [vmem:[#allocation5 + $0xc] sm:$0x1] %vm9070_vm5, %v7153_v0  ;;  %vm9071_vm6 = vmmov %vm9069_vm2 }
 0x288   : > { %4057 = vst.msk [vmem:[#allocation3 + $0x81] sm:$0xff] %vm2005_vm3, %v4040_v42  ;;  %vm9072_vm13 = vmmov %vm9069_vm2 }
 0x289   : > { %v4417_v53 = vsel %vm4413_vm9, %v4408_v52, %v7003_v18  ;;  %5464 = vst.msk [vmem:[#allocation5 + $0x3] sm:$0x1] %vm9071_vm6, %v7153_v0  ;;  %vm9073_vm5 = vmmov %vm9069_vm2 }
 0x28a   : > { %v7006_v57 = vpop.permute.xlu1 %7005  ;;  %5467 = vst.msk [vmem:[#allocation5 + $0xf] sm:$0x1] %vm9072_vm13, %v7153_v0  ;;  %vm9074_vm6 = vmmov %vm9069_vm2 }
 0x28b   : > { %v7008_v21 = vunpack.i.h.bf16 %v7006_v57  ;;  %v7007_v25 = vunpack.i.l.bf16 %v7006_v57  ;;  %4944 = vst.msk [vmem:[#allocation4 + $0x28] sm:$0x1] %vm9069_vm2, %v7153_v0  ;;  %vm9075_vm13 = vmmov %vm9069_vm2 }
 0x28c   : > { %4950 = vst.msk [vmem:[#allocation4 + $0x2d] sm:$0x1] %vm9073_vm5, %v7153_v0  ;;  %vm9079_vm5 = vmmov %vm9077_vm0 }
 0x28d   : > { %v4426_v23 = vsel %vm4422_vm10, %v4417_v53, %v7008_v21  ;;  %4939 = vst.msk [vmem:[#allocation4] sm:$0x1] %vm9074_vm6, %v7153_v0 }
 0x28e   : > { %4945 = vst.msk [vmem:[#allocation4 + $0x5] sm:$0x1] %vm9075_vm13, %v7153_v0  ;;  %vm9081_vm13 = vmmov %vm9077_vm0 }
 0x28f   : > { %v4089_v47 = vld [vmem:[#allocation3 + $0x80] sm:$0xff] }
 0x290   : > { %v7074_v16 = vpack.i.bf16 %v4089_v47, %v8662_v48  ;;  %v4097_v20 = vld [vmem:[#allocation3 + $0x81] sm:$0xff]  ;;  %v7089_v55 = vpack.i.bf16 %v4114_v15, %v4089_v47 }
 0x291   : > { %v7079_v29 = vpack.i.bf16 %v4097_v20, %v8646_v58  ;;  %v4105_v12 = vld [vmem:[#allocation3 + $0x82] sm:$0xff]  ;;  %v7094_v34 = vpack.i.bf16 %v4122_v14, %v4097_v20 }
 0x292   : > { %7075 = vrot.lane.b32.xlu1 %v7074_v16, %s7164_s19  ;;  %v7084_v51 = vpack.i.bf16 %v4105_v12, %v4081_v40  ;;  %v7099_v11 = vpack.i.bf16 %v4130_v60, %v4105_v12  ;;  %v7144_v40 = vld [vmem:[#allocation3 + $0x20] sm:$0xff] }
 0x293   : > { %v4389_v59 = vsel %vm2005_vm3, %v7144_v40, %v6972_v19 }
 0x294   : > { %v4398_v38 = vsel %vm4395_vm7, %v4389_v59, %v6977_v28 }
 0x295   : > { %v4407_v32 = vsel %vm4404_vm8, %v4398_v38, %v6997_v7 }
 0x296   : > { %7080 = vrot.lane.b32.xlu1 %v7079_v29, %s7165_s20  ;;  %v4416_v8 = vsel %vm4413_vm9, %v4407_v32, %v7002_v50  ;;  %v4062_v29 = vld [vmem:[#allocation3 + $0x40] sm:$0xff] }
 0x297   : > { %v4425_v9 = vsel %vm4422_vm10, %v4416_v8, %v7007_v25 }
 0x29a   : > { %7085 = vrot.lane.b32.xlu1 %v7084_v51, %s7166_s21 }
 0x29c   : > { %v7011_v58 = vpop.permute.xlu1 %7010  ;;  %v7026_v4 = vpop.permute.xlu0 %7025 }
 0x29d   : > { %v7013_v30 = vunpack.i.h.bf16 %v7011_v58  ;;  %v7012_v24 = vunpack.i.l.bf16 %v7011_v58  ;;  %v7028_v13 = vunpack.i.h.bf16 %v7026_v4  ;;  %v7027_v33 = vunpack.i.l.bf16 %v7026_v4 }
 0x29e   : > { %7090 = vrot.lane.b32.xlu1 %v7089_v55, %s7167_s26 }
 0x29f   : > { %v4434_v10 = vsel %vm4431_vm11, %v4425_v9, %v7012_v24  ;;  %v4435_v63 = vsel %vm4431_vm11, %v4426_v23, %v7013_v30 }
 0x2a0   : > { %v7031_v1 = vpop.permute.xlu0 %7030 }
 0x2a1   : > { %v7033_v55 = vunpack.i.h.bf16 %v7031_v1  ;;  %v7032_v14 = vunpack.i.l.bf16 %v7031_v1 }
 0x2a2   : > { %7095 = vrot.lane.b32.xlu1 %v7094_v34, %s7168_s27 }
 0x2a3   : > { %v7016_v36 = vpop.permute.xlu1 %7015 }
 0x2a4   : > { %v7018_v17 = vunpack.i.h.bf16 %v7016_v36  ;;  %v7017_v54 = vunpack.i.l.bf16 %v7016_v36 }
 0x2a6   : > { %7100 = vrot.lane.b32.xlu1 %v7099_v11, %s7169_s28  ;;  %v4443_v39 = vsel %vm4440_vm4, %v4434_v10, %v7017_v54  ;;  %v4444_v26 = vsel %vm4440_vm4, %v4435_v63, %v7018_v17 }
 0x2a7   : > { %v4452_v37 = vsel %vm4449_vm12, %v4443_v39, %v7027_v33  ;;  %v4453_v22 = vsel %vm4449_vm12, %v4444_v26, %v7028_v13  ;;  %v7021_v5 = vpop.permute.xlu1 %7020 }
 0x2a8   : > { %v6042_v46 = vpack.c.bf16 %v4453_v22, %v4452_v37  ;;  %v7023_v16 = vunpack.i.h.bf16 %v7021_v5  ;;  %v7022_v20 = vunpack.i.l.bf16 %v7021_v5 }
 0x2aa   : > { %6231 = vmatmul.mubr.msk.bf16.vlgmr.msra.gmra.mxu1 %vm8685_vm15, %v6042_v46  ;;  %v4392_v12 = vsel %vm2005_vm3, %v8526_v6, %v7023_v16  ;;  %v4391_v43 = vsel %vm2005_vm3, %v4062_v29, %v7022_v20 }
 0x2ab   : > { %v4400_v61 = vsel %vm4395_vm7, %v4391_v43, %v7032_v14  ;;  %v4401_v28 = vsel %vm4395_vm7, %v4392_v12, %v7033_v55 }
 0x2c2   : > { %v7036_v42 = vpop.permute.xlu0 %7035 }
 0x2c3   : > { %v7038_v51 = vunpack.i.h.bf16 %v7036_v42  ;;  %v7037_v15 = vunpack.i.l.bf16 %v7036_v42 }
 0x2c5   : > { %v4409_v7 = vsel %vm4404_vm8, %v4400_v61, %v7037_v15  ;;  %v4410_v6 = vsel %vm4404_vm8, %v4401_v28, %v7038_v51  ;;  %v5057_v51 = vld [vmem:[#allocation4 + $0x1] sm:$0xf]  ;;  %v5081_v15 = vld [vmem:[#allocation4 + $0x28] sm:$0xf] }
 0x2c6   : > { %v7041_v35 = vpop.permute.xlu0 %7040  ;;  %5094 = vrot.lane.b32.xlu0 %v5057_v51, %s7161_s13  ;;  %5180 = vrot.lane.b32.xlu1 %v5081_v15, %s7167_s26  ;;  %v5085_v28 = vld [vmem:[#allocation4 + $0x29] sm:$0xf] }
 0x2c7   : > { %v7043_v57 = vunpack.i.h.bf16 %v7041_v35  ;;  %v7042_v34 = vunpack.i.l.bf16 %v7041_v35 }
 0x2c9   : > { %v4418_v11 = vsel %vm4413_vm9, %v4409_v7, %v7042_v34  ;;  %v4419_v31 = vsel %vm4413_vm9, %v4410_v6, %v7043_v57  ;;  %v5061_v34 = vld [vmem:[#allocation4 + $0x2] sm:$0xf] }
 0x2ca   : > { %v7046_v47 = vpop.permute.xlu0 %7045  ;;  %5110 = vrot.lane.b32.xlu0 %v5061_v34, %s7163_s18  ;;  %5196 = vrot.lane.b32.xlu1 %v5085_v28, %s7168_s27 }
 0x2cb   : > { %v7048_v56 = vunpack.i.h.bf16 %v7046_v47  ;;  %v7047_v19 = vunpack.i.l.bf16 %v7046_v47 }
 0x2cd   : > { %v4427_v62 = vsel %vm4422_vm10, %v4418_v11, %v7047_v19  ;;  %v4428_v40 = vsel %vm4422_vm10, %v4419_v31, %v7048_v56 }
 0x2dd   : > { %v7051_v4 = vpop.permute.xlu1 %7050 }
 0x2de   : > { %v7053_v17 = vunpack.i.h.bf16 %v7051_v4  ;;  %v7052_v54 = vunpack.i.l.bf16 %v7051_v4 }
 0x2e0   : > { %v4394_v22 = vsel %vm2005_vm3, %v8662_v48, %v7053_v17  ;;  %v4393_v46 = vsel %vm2005_vm3, %v8577_v3, %v7052_v54 }
 0x2ee   : > { %v7061_v45 = vpop.permute.xlu0 %7060 }
 0x2ef   : > { %v7063_v58 = vunpack.i.h.bf16 %v7061_v45  ;;  %v7062_v2 = vunpack.i.l.bf16 %v7061_v45 }
 0x2f1   : > { %v4436_v21 = vsel %vm4431_vm11, %v4427_v62, %v7062_v2  ;;  %v4437_v25 = vsel %vm4431_vm11, %v4428_v40, %v7063_v58 }
 0x2f2   : > { %v7066_v60 = vpop.permute.xlu0 %7065  ;;  %v7056_v53 = vpop.permute.xlu1 %7055 }
 0x2f3   : > { %v7068_v18 = vunpack.i.h.bf16 %v7066_v60  ;;  %v7067_v50 = vunpack.i.l.bf16 %v7066_v60  ;;  %v7058_v63 = vunpack.i.h.bf16 %v7056_v53  ;;  %v7057_v13 = vunpack.i.l.bf16 %v7056_v53 }
 0x2f5   : > { %v4445_v30 = vsel %vm4440_vm4, %v4436_v21, %v7067_v50  ;;  %v4446_v24 = vsel %vm4440_vm4, %v4437_v25, %v7068_v18  ;;  %v4402_v5 = vsel %vm4395_vm7, %v4393_v46, %v7057_v13  ;;  %v4403_v47 = vsel %vm4395_vm7, %v4394_v22, %v7058_v63  ;;  %v8800_v50 = vld [vmem:[%s9053_s4] ss:$0 sm:$0xff] }
 0x2f6   : > { %v7071_v59 = vpop.permute.xlu0 %7070 }
 0x2f7   : > { %v7073_v38 = vunpack.i.h.bf16 %v7071_v59  ;;  %v7072_v44 = vunpack.i.l.bf16 %v7071_v59 }
 0x2f9   : > { %v4454_v32 = vsel %vm4449_vm12, %v4445_v30, %v7072_v44  ;;  %v4455_v52 = vsel %vm4449_vm12, %v4446_v24, %v7073_v38 }
 0x2fa   : > { %v6045_v8 = vpack.c.bf16 %v4455_v52, %v4454_v32 }
 0x2fc   : > { %6234 = vmatprep.mubr.msk.bf16.mxu1 %vm8685_vm15, %v6045_v8 }
 0x304   : > { %v7076_v36 = vpop.permute.xlu1 %7075 }
 0x305   : > { %v7078_v33 = vunpack.i.h.bf16 %v7076_v36  ;;  %v7077_v39 = vunpack.i.l.bf16 %v7076_v36 }
 0x307   : > { %v4411_v45 = vsel %vm4404_vm8, %v4402_v5, %v7077_v39  ;;  %v4412_v29 = vsel %vm4404_vm8, %v4403_v47, %v7078_v33 }
 0x308   : > { %v7081_v9 = vpop.permute.xlu1 %7080 }
 0x309   : > { %v7083_v26 = vunpack.i.h.bf16 %v7081_v9  ;;  %v7082_v37 = vunpack.i.l.bf16 %v7081_v9 }
 0x30b   : > { %v4420_v48 = vsel %vm4413_vm9, %v4411_v45, %v7082_v37  ;;  %v4421_v3 = vsel %vm4413_vm9, %v4412_v29, %v7083_v26 }
 0x30c   : > { %v7086_v23 = vpop.permute.xlu1 %7085 }
 0x30d   : > { %v7088_v1 = vunpack.i.h.bf16 %v7086_v23  ;;  %v7087_v42 = vunpack.i.l.bf16 %v7086_v23 }
 0x30f   : > { %v4429_v55 = vsel %vm4422_vm10, %v4420_v48, %v7087_v42  ;;  %v4430_v14 = vsel %vm4422_vm10, %v4421_v3, %v7088_v1 }
 0x310   : > { %v7091_v10 = vpop.permute.xlu1 %7090 }
 0x311   : > { %v7093_v16 = vunpack.i.h.bf16 %v7091_v10  ;;  %v7092_v20 = vunpack.i.l.bf16 %v7091_v10 }
 0x313   : > { %v4438_v56 = vsel %vm4431_vm11, %v4429_v55, %v7092_v20  ;;  %v4439_v19 = vsel %vm4431_vm11, %v4430_v14, %v7093_v16 }
 0x314   : > { %v7096_v35 = vpop.permute.xlu1 %7095 }
 0x315   : > { %v7098_v12 = vunpack.i.h.bf16 %v7096_v35  ;;  %v7097_v43 = vunpack.i.l.bf16 %v7096_v35 }
 0x317   : > { %v4447_v58 = vsel %vm4440_vm4, %v4438_v56, %v7097_v43  ;;  %v4448_v2 = vsel %vm4440_vm4, %v4439_v19, %v7098_v12 }
 0x318   : > { %v7101_v57 = vpop.permute.xlu1 %7100 }
 0x319   : > { %v7103_v60 = vunpack.i.h.bf16 %v7101_v57  ;;  %v7102_v61 = vunpack.i.l.bf16 %v7101_v57 }
 0x31b   : > { %v4456_v7 = vsel %vm4449_vm12, %v4447_v58, %v7102_v61  ;;  %v4457_v6 = vsel %vm4449_vm12, %v4448_v2, %v7103_v60 }
 0x31c   : > { %v6048_v18 = vpack.c.bf16 %v4457_v6, %v4456_v7 }
 0x31e   : > { %6235 = vmatmul.mubr.msk.bf16.gmra.mxu1 %vm8685_vm15, %v6048_v18  ;;  %vm9076_vm15 = vcmask 1042434  }
 0x31f   : > { %vm9078_vm2 = vmmov %vm9076_vm15 }
 0x320   : > { %vm9080_vm6 = vmmov %vm9078_vm2 }
 0x36a   : > { %v6232_v11 = vpop.f32.mrf.mxu1 }
 0x36b   : > { %v4568_v31 = vadd.f32 %v6232_v11, %v8800_v50 }
 0x36c   : > { %v4559_v62 = vpop.f32.mrf.mxu1 }
 0x36d   : > { %v4592_v40 = vmax.f32 %v4568_v31, 0.0  ;;  %v4560_v59 = vadd.f32 %v8800_v50, %v4559_v62 }
 0x36e   : > { %v6233_v21 = vpop.f32.mrf.mxu1 }
 0x36f   : > { %v4640_v25 = vcombine.high %v4592_v40, %v4592_v40  ;;  %v4647_v38 = vrot.slane %v4592_v40, %v8226_v41  ;;  %v4590_v44 = vmax.f32 %v4560_v59, 0.0  ;;  %v4571_v27 = vadd.f32 %v6233_v21, %v8800_v50 }
 0x370   : > { %v4562_v30 = vpop.f32.mrf.mxu1 }
 0x371   : > { %v4654_v24 = vrot.slane %v4640_v25, %v8226_v41  ;;  %v4655_v32 = vcombine.high %v4647_v38, %v4647_v38  ;;  %v4606_v52 = vcombine.high %v4590_v44, %v4590_v44  ;;  %v6058_v4 = vrot.slane %v4647_v38, 9 }
 0x372   : > { %v4613_v8 = vrot.slane %v4590_v44, %v8226_v41  ;;  %v4593_v53 = vmax.f32 %v4571_v27, 0.0  ;;  %v4563_v17 = vadd.f32 %v8800_v50, %v4562_v30 }
 0x373   : > { %v4656_v36 = vcombine.high %v4654_v24, %v4654_v24  ;;  %v6059_v9 = vrot.slane %v4655_v32, 9  ;;  %v6060_v23 = vrot.slane %v4654_v24, 9  ;;  %v4620_v54 = vrot.slane %v4606_v52, %v8226_v41 }
 0x374   : > { %v4621_v10 = vcombine.high %v4613_v8, %v4613_v8  ;;  %v6050_v63 = vrot.slane %v4613_v8, 9  ;;  %v4657_v13 = vcombine.high %v4593_v53, %v4593_v53  ;;  %v4664_v33 = vrot.slane %v4593_v53, %v8226_v41 }
 0x375   : > { %v6061_v39 = vrot.slane %v4656_v36, 9  ;;  %v4878_v26 = vmax.f32 %v4647_v38, %v6058_v4  ;;  %v4879_v37 = vmax.f32 %v4655_v32, %v6059_v9  ;;  %v4622_v22 = vcombine.high %v4620_v54, %v4620_v54 }
 0x376   : > { %v4880_v46 = vmax.f32 %v4654_v24, %v6060_v23  ;;  %v4671_v1 = vrot.slane %v4657_v13, %v8226_v41  ;;  %v4672_v42 = vcombine.high %v4664_v33, %v4664_v33  ;;  %v6062_v35 = vrot.slane %v4664_v33, 9 }
 0x377   : > { %v6051_v5 = vrot.slane %v4621_v10, 9  ;;  %v6052_v47 = vrot.slane %v4620_v54, 9  ;;  %v4870_v16 = vmax.f32 %v4613_v8, %v6050_v63  ;;  %v4591_v20 = vmax.f32 %v4563_v17, 0.0 }
 0x378   : > { %v4673_v45 = vcombine.high %v4671_v1, %v4671_v1  ;;  %v6063_v29 = vrot.slane %v4672_v42, 9  ;;  %v6064_v12 = vrot.slane %v4671_v1, 9  ;;  %v4882_v43 = vmax.f32 %v4664_v33, %v6062_v35 }
 0x379   : > { %v4881_v51 = vmax.f32 %v4656_v36, %v6061_v39  ;;  %v6053_v48 = vrot.slane %v4622_v22, 9  ;;  %v4623_v3 = vcombine.high %v4591_v20, %v4591_v20  ;;  %v4630_v15 = vrot.slane %v4591_v20, %v8226_v41 }
 0x37a   : > { %v6065_v55 = vrot.slane %v4673_v45, 9  ;;  %v4883_v14 = vmax.f32 %v4672_v42, %v6063_v29  ;;  %v4884_v57 = vmax.f32 %v4671_v1, %v6064_v12  ;;  %v4906_v34 = vmax.f32 %v4878_v26, %v4882_v43 }
 0x37b   : > { %v4871_v56 = vmax.f32 %v4621_v10, %v6051_v5  ;;  %v4637_v19 = vrot.slane %v4623_v3, %v8226_v41  ;;  %v4638_v60 = vcombine.high %v4630_v15, %v4630_v15  ;;  %v6054_v61 = vrot.slane %v4630_v15, 9 }
 0x37c   : > { %v4872_v28 = vmax.f32 %v4620_v54, %v6052_v47  ;;  %v4885_v58 = vmax.f32 %v4673_v45, %v6065_v55  ;;  %v4907_v2 = vmax.f32 %v4879_v37, %v4883_v14  ;;  %v4908_v7 = vmax.f32 %v4880_v46, %v4884_v57 }
 0x37d   : > { %v4639_v6 = vcombine.high %v4637_v19, %v4637_v19  ;;  %v6055_v18 = vrot.slane %v4638_v60, 9  ;;  %v6056_v11 = vrot.slane %v4637_v19, 9  ;;  %v4874_v31 = vmax.f32 %v4630_v15, %v6054_v61 }
 0x37e   : > { %v4909_v62 = vmax.f32 %v4881_v51, %v4885_v58  ;;  %v4986_v40 = vrot.slane %v4906_v34, %v8231_v49  ;;  %v4990_v59 = vrot.slane %v4907_v2, %v8231_v49  ;;  %v4994_v21 = vrot.slane %v4908_v7, %v8231_v49 }
 0x37f   : > { %v6057_v25 = vrot.slane %v4639_v6, 9  ;;  %v4875_v38 = vmax.f32 %v4638_v60, %v6055_v18  ;;  %v4876_v44 = vmax.f32 %v4637_v19, %v6056_v11  ;;  %v4902_v27 = vmax.f32 %v4870_v16, %v4874_v31 }
 0x380   : > { %v4873_v30 = vmax.f32 %v4622_v22, %v6053_v48  ;;  %v4998_v24 = vrot.slane %v4909_v62, %v8231_v49  ;;  %v5034_v32 = vsel %vm3978_vm14, %v4990_v59, %v4986_v40 }
 0x381   : > { %v5035_v52 = vsel %vm9076_vm15, %v4994_v21, %v5034_v32  ;;  %v4877_v4 = vmax.f32 %v4639_v6, %v6057_v25  ;;  %v4903_v8 = vmax.f32 %v4871_v56, %v4875_v38  ;;  %v4904_v53 = vmax.f32 %v4872_v28, %v4876_v44  ;;  %vm9082_vm15 = vmmov %vm9078_vm2 }
 0x382   : > { %v5036_v36 = vsel %vm9077_vm0, %v4998_v24, %v5035_v52  ;;  %v4970_v23 = vrot.slane %v4902_v27, %v8231_v49 }
 0x383   : > { %5050 = vst.msk [vmem:[#allocation4 + $0x11] sm:$0xf] %vm5048_vm1, %v5036_v36  ;;  %v4905_v9 = vmax.f32 %v4873_v30, %v4877_v4  ;;  %v4974_v17 = vrot.slane %v4903_v8, %v8231_v49  ;;  %v4978_v54 = vrot.slane %v4904_v53, %v8231_v49 }
 0x385   : > { %v4982_v10 = vrot.slane %v4905_v9, %v8231_v49  ;;  %v5031_v63 = vsel %vm3978_vm14, %v4974_v17, %v4970_v23 }
 0x386   : > { %v5032_v13 = vsel %vm9078_vm2, %v4978_v54, %v5031_v63  ;;  %vm9083_vm2 = vcmask 588800  }
 0x387   : > { %v5033_v33 = vsel %vm9079_vm5, %v4982_v10, %v5032_v13  ;;  %vm9084_vm5 = vmmov %vm9083_vm2 }
 0x388   : > { %5049 = vst.msk [vmem:[#allocation4 + $0x9] sm:$0xf] %vm5048_vm1, %v5033_v33 }
 0x38a   : > { %v5066_v39 = vld [vmem:[#allocation4 + $0x10] sm:$0xf] }
 0x38b   : > { %v5059_v26 = vld [vmem:[#allocation4 + $0x11] sm:$0xf]  ;;  %5128 = vrot.lane.b32.xlu1 %v5066_v39, %s7164_s19 }
 0x38c   : > { %5098 = vrot.lane.b32.xlu0 %v5059_v26, %s7161_s13  ;;  %v5070_v37 = vld [vmem:[#allocation4 + $0x11] sm:$0xf] }
 0x38d   : > { %v5063_v22 = vld [vmem:[#allocation4 + $0x12] sm:$0xf] }
 0x38e   : > { %v5074_v46 = vld [vmem:[#allocation4 + $0x12] sm:$0xf] }
 0x38f   : > { %5144 = vrot.lane.b32.xlu1 %v5070_v37, %s7165_s20  ;;  %v5078_v1 = vld [vmem:[#allocation4 + $0x10] sm:$0xf]  ;;  %v5058_v35 = vld [vmem:[#allocation4 + $0x9] sm:$0xf] }
 0x390   : > { %5114 = vrot.lane.b32.xlu0 %v5063_v22, %s7163_s18  ;;  %v5082_v42 = vld [vmem:[#allocation4 + $0x11] sm:$0xf]  ;;  %v5062_v47 = vld [vmem:[#allocation4 + $0xa] sm:$0xf] }
 0x391   : > { %v5086_v5 = vld [vmem:[#allocation4 + $0x12] sm:$0xf]  ;;  %v5065_v16 = vld [vmem:[#allocation4 + $0x8] sm:$0xf] }
 0x392   : > { %v5069_v20 = vld [vmem:[#allocation4 + $0x9] sm:$0xf] }
 0x393   : > { %5160 = vrot.lane.b32.xlu1 %v5074_v46, %s7166_s21  ;;  %v5073_v45 = vld [vmem:[#allocation4 + $0xa] sm:$0xf] }
 0x394   : > { %5174 = vrot.lane.b32.xlu0 %v5078_v1, %s7167_s26 }
 0x397   : > { %5096 = vrot.lane.b32.xlu1 %v5058_v35, %s7161_s13 }
 0x398   : > { %5190 = vrot.lane.b32.xlu0 %v5082_v42, %s7168_s27 }
 0x39b   : > { %5112 = vrot.lane.b32.xlu1 %v5062_v47, %s7163_s18 }
 0x39c   : > { %5206 = vrot.lane.b32.xlu0 %v5086_v5, %s7169_s28 }
 0x3a0   : > { %5126 = vrot.lane.b32.xlu0 %v5065_v16, %s7164_s19 }
 0x3a4   : > { %5142 = vrot.lane.b32.xlu0 %v5069_v20, %s7165_s20 }
 0x3a8   : > { %5158 = vrot.lane.b32.xlu0 %v5073_v45, %s7166_s21 }
 0x3de   : > { %v6236_v29 = vpop.f32.mrf.mxu1 }
 0x3df   : > { %v4584_v12 = vadd.f32 %v6236_v29, %v8800_v50 }
 0x3e0   : > { %v4575_v43 = vpop.f32.mrf.mxu1 }
 0x3e1   : > { %v4596_v51 = vmax.f32 %v4584_v12, 0.0  ;;  %v4576_v48 = vadd.f32 %v8800_v50, %v4575_v43 }
 0x3e2   : > { %v6237_v3 = vpop.f32.mrf.mxu1 }
 0x3e3   : > { %v4708_v15 = vcombine.high %v4596_v51, %v4596_v51  ;;  %v4715_v55 = vrot.slane %v4596_v51, %v8226_v41  ;;  %v4594_v14 = vmax.f32 %v4576_v48, 0.0  ;;  %v4587_v57 = vadd.f32 %v6237_v3, %v8800_v50 }
 0x3e4   : > { %v4578_v34 = vpop.f32.mrf.mxu1 }
 0x3e5   : > { %v4722_v56 = vrot.slane %v4708_v15, %v8226_v41  ;;  %v4723_v19 = vcombine.high %v4715_v55, %v4715_v55  ;;  %v4674_v60 = vcombine.high %v4594_v14, %v4594_v14  ;;  %v6074_v61 = vrot.slane %v4715_v55, 9 }
 0x3e6   : > { %v4681_v28 = vrot.slane %v4594_v14, %v8226_v41  ;;  %v4597_v58 = vmax.f32 %v4587_v57, 0.0  ;;  %v4579_v18 = vadd.f32 %v8800_v50, %v4578_v34 }
 0x3e7   : > { %v4724_v2 = vcombine.high %v4722_v56, %v4722_v56  ;;  %v6075_v7 = vrot.slane %v4723_v19, 9  ;;  %v6076_v6 = vrot.slane %v4722_v56, 9  ;;  %v4688_v11 = vrot.slane %v4674_v60, %v8226_v41 }
 0x3e8   : > { %v4689_v31 = vcombine.high %v4681_v28, %v4681_v28  ;;  %v6066_v62 = vrot.slane %v4681_v28, 9  ;;  %v4725_v40 = vcombine.high %v4597_v58, %v4597_v58  ;;  %v4732_v59 = vrot.slane %v4597_v58, %v8226_v41  ;;  %v7120_v58 = vld [vmem:[%s9054_s5 + $0x38] sm:$0xff]  }
 0x3e9   : > { %v6077_v21 = vrot.slane %v4724_v2, 9  ;;  %v4894_v25 = vmax.f32 %v4715_v55, %v6074_v61  ;;  %v4895_v38 = vmax.f32 %v4723_v19, %v6075_v7  ;;  %v4690_v44 = vcombine.high %v4688_v11, %v4688_v11  ;;  %6239 = vmatpush3.bf16.msra.mxu1 %v7120_v58 }
 0x3ea   : > { %v4896_v27 = vmax.f32 %v4722_v56, %v6076_v6  ;;  %v4739_v30 = vrot.slane %v4725_v40, %v8226_v41  ;;  %v4740_v24 = vcombine.high %v4732_v59, %v4732_v59  ;;  %v6078_v32 = vrot.slane %v4732_v59, 9  ;;  %6240 = vmatprep.subr.bf16.mxu1 %v7153_v0 }
 0x3eb   : > { %v6067_v52 = vrot.slane %v4689_v31, 9  ;;  %v6068_v4 = vrot.slane %v4688_v11, 9  ;;  %v4886_v8 = vmax.f32 %v4681_v28, %v6066_v62  ;;  %v4595_v50 = vmax.f32 %v4579_v18, 0.0 }
 0x3ec   : > { %v4741_v53 = vcombine.high %v4739_v30, %v4739_v30  ;;  %v6079_v36 = vrot.slane %v4740_v24, 9  ;;  %v6080_v9 = vrot.slane %v4739_v30, 9  ;;  %v4898_v23 = vmax.f32 %v4732_v59, %v6078_v32  ;;  %v7121_v59 = vld [vmem:[%s9054_s5 + $0x30] sm:$0xff]  }
 0x3ed   : > { %v4897_v17 = vmax.f32 %v4724_v2, %v6077_v21  ;;  %v6069_v54 = vrot.slane %v4690_v44, 9  ;;  %v4691_v10 = vcombine.high %v4595_v50, %v4595_v50  ;;  %v4698_v63 = vrot.slane %v4595_v50, %v8226_v41  ;;  %6241 = vmatpush3.bf16.msra.mxu1 %v7121_v59 }
 0x3ee   : > { %v6081_v13 = vrot.slane %v4741_v53, 9  ;;  %v4899_v33 = vmax.f32 %v4740_v24, %v6079_v36  ;;  %v4900_v39 = vmax.f32 %v4739_v30, %v6080_v9  ;;  %v4914_v26 = vmax.f32 %v4894_v25, %v4898_v23  ;;  %6242 = vmatprep.subr.bf16.mxu1 %v7153_v0  ;;  %v7126_v23 = vld [vmem:[%s9054_s5 + $0x8] sm:$0xff]  }
 0x3ef   : > { %v4887_v37 = vmax.f32 %v4689_v31, %v6067_v52  ;;  %v4705_v22 = vrot.slane %v4691_v10, %v8226_v41  ;;  %v4706_v46 = vcombine.high %v4698_v63, %v4698_v63  ;;  %v6070_v1 = vrot.slane %v4698_v63, 9  ;;  %v7123_v52 = vld [vmem:[%s9054_s5 + $0x20] sm:$0xff]  }
 0x3f0   : > { %v4888_v42 = vmax.f32 %v4688_v11, %v6068_v4  ;;  %v4901_v35 = vmax.f32 %v4741_v53, %v6081_v13  ;;  %v4915_v5 = vmax.f32 %v4895_v38, %v4899_v33  ;;  %v4916_v47 = vmax.f32 %v4896_v27, %v4900_v39  ;;  %v7124_v4 = vld [vmem:[%s9054_s5 + $0x18] sm:$0xff]   ;;  %v7125_v53 = vld [vmem:[%s9054_s5 + $0x10] sm:$0xff]   ;;  %v5095_v39 = vpop.permute.xlu0 %5094 }
 0x3f1   : > { %v4707_v16 = vcombine.high %v4705_v22, %v4705_v22  ;;  %v6071_v20 = vrot.slane %v4706_v46, 9  ;;  %v6072_v45 = vrot.slane %v4705_v22, 9  ;;  %v4890_v29 = vmax.f32 %v4698_v63, %v6070_v1  ;;  %v7127_v63 = vld [vmem:[%s9054_s5] sm:$0xff]   ;;  %v5089_v33 = vld [vmem:[#allocation4 + $0x2a] sm:$0xf] }
 0x3f2   : > { %v4917_v12 = vmax.f32 %v4897_v17, %v4901_v35  ;;  %v5018_v43 = vrot.slane %v4914_v26, %v8231_v49  ;;  %v5022_v51 = vrot.slane %v4915_v5, %v8231_v49  ;;  %v5026_v48 = vrot.slane %v4916_v47, %v8231_v49 }
 0x3f3   : > { %v6073_v3 = vrot.slane %v4707_v16, 9  ;;  %v4891_v15 = vmax.f32 %v4706_v46, %v6071_v20  ;;  %v4892_v55 = vmax.f32 %v4705_v22, %v6072_v45  ;;  %v4910_v14 = vmax.f32 %v4886_v8, %v4890_v29  ;;  %v5181_v22 = vpop.permute.xlu1 %5180 }
 0x3f4   : > { %v4889_v57 = vmax.f32 %v4690_v44, %v6069_v54  ;;  %v5030_v34 = vrot.slane %v4917_v12, %v8231_v49  ;;  %v5040_v56 = vsel %vm3978_vm14, %v5022_v51, %v5018_v43  ;;  %v7122_v44 = vld [vmem:[%s9054_s5 + $0x28] sm:$0xff]   ;;  %v5111_v26 = vpop.permute.xlu0 %5110 }
 0x3f5   : > { %v5041_v19 = vsel %vm9080_vm6, %v5026_v48, %v5040_v56  ;;  %v4893_v60 = vmax.f32 %v4707_v16, %v6073_v3  ;;  %v4911_v61 = vmax.f32 %v4887_v37, %v4891_v15  ;;  %v4912_v28 = vmax.f32 %v4888_v42, %v4892_v55  ;;  %6243 = vmatpush3.bf16.msra.mxu1 %v7122_v44  ;;  %vm9085_vm6 = vmmov %vm9083_vm2 }
 0x3f6   : > { %v5042_v2 = vsel %vm9081_vm13, %v5030_v34, %v5041_v19  ;;  %v5002_v6 = vrot.slane %v4910_v14, %v8231_v49  ;;  %6244 = vmatprep.subr.bf16.mxu1 %v7153_v0  ;;  %v5053_v34 = vld [vmem:[#allocation4] sm:$0xf]  ;;  %vm9086_vm13 = vmmov %vm9083_vm2 }
 0x3f7   : > { %5052 = vst.msk [vmem:[#allocation4 + $0x21] sm:$0xf] %vm5048_vm1, %v5042_v2  ;;  %v4913_v7 = vmax.f32 %v4889_v57, %v4893_v60  ;;  %v5006_v18 = vrot.slane %v4911_v61, %v8231_v49  ;;  %v5010_v11 = vrot.slane %v4912_v28, %v8231_v49  ;;  %v5197_v1 = vpop.permute.xlu1 %5196  ;;  %v5218_v60 = vsel %vm2005_vm3, %v5053_v34, %v5095_v39  ;;  %v5054_v61 = vld [vmem:[#allocation4 + $0x8] sm:$0xf]  ;;  %v6082_v34 = vld [vmem:[%s9055_s6] ss:$0 sm:$0xff] }
 0x3f9   : > { %v5014_v31 = vrot.slane %v4913_v7, %v8231_v49  ;;  %v5037_v62 = vsel %vm3978_vm14, %v5006_v18, %v5002_v6  ;;  %6245 = vmatpush3.bf16.msra.mxu1 %v7123_v52  ;;  %v5222_v6 = vsel %vm4395_vm7, %v5218_v60, %v5111_v26  ;;  %v5055_v18 = vld [vmem:[#allocation4 + $0x10] sm:$0xf] }
 0x3fa   : > { %v5038_v40 = vsel %vm9082_vm15, %v5010_v11, %v5037_v62  ;;  %6246 = vmatprep.subr.bf16.mxu1 %v7153_v0  ;;  %vm9087_vm15 = vcmask 58368  }
 0x3fb   : > { %v5039_v21 = vsel %vm9077_vm0, %v5014_v31, %v5038_v40  ;;  %vm9088_vm0 = vmmov %vm9087_vm15 }
 0x3fc   : > { %5051 = vst.msk [vmem:[#allocation4 + $0x19] sm:$0xf] %vm5048_vm1, %v5039_v21  ;;  %vm7170_vm1 = vmmov 0  }
 0x3fd   : > { %6247 = vmatpush3.bf16.msra.mxu1 %v7124_v4  ;;  %6254 = vmatprep.mubr.msk.bf16.mxu1 %vm7170_vm1, %v7153_v0  ;;  %v5129_v35 = vpop.permute.xlu1 %5128 }
 0x3fe   : > { %v5080_v25 = vld [vmem:[#allocation4 + $0x20] sm:$0xf]  ;;  %6248 = vmatprep.subr.bf16.mxu1 %v7153_v0  ;;  %6274 = vmatprep.mubr.msk.bf16.mxu0 %vm7170_vm1, %v7153_v0  ;;  %v5099_v37 = vpop.permute.xlu0 %5098 }
 0x3ff   : > { %v5068_v38 = vld [vmem:[#allocation4 + $0x20] sm:$0xf]  ;;  %5178 = vrot.lane.b32.xlu0 %v5080_v25, %s7167_s26  ;;  %v5220_v62 = vsel %vm2005_vm3, %v5055_v18, %v5099_v37 }
 0x400   : > { %5132 = vrot.lane.b32.xlu1 %v5068_v38, %s7164_s19  ;;  %v5084_v27 = vld [vmem:[#allocation4 + $0x21] sm:$0xf] }
 0x401   : > { %v5072_v30 = vld [vmem:[#allocation4 + $0x21] sm:$0xf]  ;;  %6249 = vmatpush3.bf16.msra.mxu1 %v7125_v53  ;;  %v5145_v47 = vpop.permute.xlu1 %5144 }
 0x402   : > { %v5076_v32 = vld [vmem:[#allocation4 + $0x22] sm:$0xf]  ;;  %6250 = vmatprep.subr.bf16.mxu1 %v7153_v0  ;;  %v5115_v46 = vpop.permute.xlu0 %5114 }
 0x403   : > { %5194 = vrot.lane.b32.xlu0 %v5084_v27, %s7168_s27  ;;  %v5067_v24 = vld [vmem:[#allocation4 + $0x18] sm:$0xf]  ;;  %v5088_v17 = vld [vmem:[#allocation4 + $0x22] sm:$0xf]  ;;  %v5224_v40 = vsel %vm4395_vm7, %v5220_v62, %v5115_v46 }
 0x404   : > { %5148 = vrot.lane.b32.xlu1 %v5072_v30, %s7165_s20  ;;  %v5071_v8 = vld [vmem:[#allocation4 + $0x19] sm:$0xf] }
 0x405   : > { %v5060_v50 = vld [vmem:[#allocation4 + $0x19] sm:$0xf]  ;;  %6251 = vmatpush3.bf16.msra.mxu1 %v7126_v23  ;;  %v5161_v20 = vpop.permute.xlu1 %5160 }
 0x406   : > { %v5075_v36 = vld [vmem:[#allocation4 + $0x1a] sm:$0xf]  ;;  %6252 = vmatprep.subr.bf16.mxu1 %v7153_v0  ;;  %v5175_v42 = vpop.permute.xlu0 %5174 }
 0x407   : > { %5130 = vrot.lane.b32.xlu0 %v5067_v24, %s7164_s19  ;;  %v5064_v9 = vld [vmem:[#allocation4 + $0x1a] sm:$0xf] }
 0x408   : > { %5164 = vrot.lane.b32.xlu1 %v5076_v32, %s7166_s21  ;;  %v5079_v54 = vld [vmem:[#allocation4 + $0x18] sm:$0xf] }
 0x409   : > { %v5083_v10 = vld [vmem:[#allocation4 + $0x19] sm:$0xf]  ;;  %6253 = vmatpush3.bf16.msra.mxu1 %v7127_v63  ;;  %v5097_v29 = vpop.permute.xlu1 %5096 }
 0x40a   : > { %v5087_v13 = vld [vmem:[#allocation4 + $0x1a] sm:$0xf]  ;;  %v5191_v5 = vpop.permute.xlu0 %5190  ;;  %v5219_v58 = vsel %vm2005_vm3, %v5054_v61, %v5097_v29 }
 0x40b   : > { %5146 = vrot.lane.b32.xlu0 %v5071_v8, %s7165_s20  ;;  %v5056_v28 = vld [vmem:[#allocation4 + $0x18] sm:$0xf] }
 0x40c   : > { %5100 = vrot.lane.b32.xlu1 %v5060_v50, %s7161_s13 }
 0x40d   : > { %v5113_v43 = vpop.permute.xlu1 %5112 }
 0x40e   : > { %v5207_v16 = vpop.permute.xlu0 %5206  ;;  %v5223_v11 = vsel %vm4395_vm7, %v5219_v58, %v5113_v43 }
 0x40f   : > { %5162 = vrot.lane.b32.xlu0 %v5075_v36, %s7166_s21  ;;  %v5227_v21 = vsel %vm4404_vm8, %v5223_v11, %v5129_v35 }
 0x410   : > { %5116 = vrot.lane.b32.xlu1 %v5064_v9, %s7163_s18  ;;  %v5231_v8 = vsel %vm4413_vm9, %v5227_v21, %v5145_v47 }
 0x411   : > { %v5235_v9 = vsel %vm4422_vm10, %v5231_v8, %v5161_v20 }
 0x412   : > { %v5127_v45 = vpop.permute.xlu0 %5126 }
 0x413   : > { %5210 = vrot.lane.b32.xlu0 %v5088_v17, %s7169_s28  ;;  %v5226_v25 = vsel %vm4404_vm8, %v5222_v6, %v5127_v45 }
 0x414   : > { %5176 = vrot.lane.b32.xlu1 %v5079_v54, %s7167_s26 }
 0x416   : > { %v5143_v12 = vpop.permute.xlu0 %5142 }
 0x417   : > { %v5230_v30 = vsel %vm4413_vm9, %v5226_v25, %v5143_v12 }
 0x418   : > { %5192 = vrot.lane.b32.xlu1 %v5083_v10, %s7168_s27 }
 0x41a   : > { %v5159_v51 = vpop.permute.xlu0 %5158 }
 0x41b   : > { %v5234_v32 = vsel %vm4422_vm10, %v5230_v30, %v5159_v51  ;;  %v5497_v51 = vld [vmem:[#allocation5 + $0x1] sm:$0x3] }
 0x41c   : > { %5208 = vrot.lane.b32.xlu1 %v5087_v13, %s7169_s28  ;;  %v5238_v53 = vsel %vm4431_vm11, %v5234_v32, %v5175_v42  ;;  %5516 = vrot.lane.b32.xlu0 %v5497_v51, %s7161_s13 }
 0x41d   : > { %v5242_v54 = vsel %vm4440_vm4, %v5238_v53, %v5191_v5 }
 0x41e   : > { %v5246_v46 = vsel %vm4449_vm12, %v5242_v54, %v5207_v16  ;;  %v5511_v16 = vld [vmem:[#allocation5 + $0xd] sm:$0x3] }
 0x41f   : > { %v5250_v45 = vsel %vm9085_vm6, %v5246_v46, 0.0  ;;  %v7133_v46 = vld [vmem:[%s9056_s7 + $0x10] sm:$0xff]  }
 0x420   : > { %5212 = vrot.lane.b32.xlu1 %v5089_v33, %s7169_s28 }
 0x471   : > { %v5179_v48 = vpop.permute.xlu0 %5178 }
 0x472   : > { %v5133_v3 = vpop.permute.xlu1 %5132 }
 0x475   : > { %v5195_v15 = vpop.permute.xlu0 %5194 }
 0x476   : > { %v5149_v55 = vpop.permute.xlu1 %5148 }
 0x479   : > { %v5131_v14 = vpop.permute.xlu0 %5130 }
 0x47a   : > { %v5165_v57 = vpop.permute.xlu1 %5164  ;;  %v5228_v38 = vsel %vm4404_vm8, %v5224_v40, %v5131_v14  ;;  %v7131_v14 = vld [vmem:[%s9056_s7 + $0x20] sm:$0xff]  }
 0x47d   : > { %v5147_v19 = vpop.permute.xlu0 %5146 }
 0x47e   : > { %v5101_v56 = vpop.permute.xlu1 %5100  ;;  %v5232_v24 = vsel %vm4413_vm9, %v5228_v38, %v5147_v19 }
 0x47f   : > { %v5221_v2 = vsel %vm2005_vm3, %v5056_v28, %v5101_v56 }
 0x481   : > { %v5163_v59 = vpop.permute.xlu0 %5162 }
 0x482   : > { %v5117_v7 = vpop.permute.xlu1 %5116  ;;  %v5236_v52 = vsel %vm4422_vm10, %v5232_v24, %v5163_v59 }
 0x483   : > { %v5225_v31 = vsel %vm4395_vm7, %v5221_v2, %v5117_v7  ;;  %v5240_v36 = vsel %vm4431_vm11, %v5236_v52, %v5179_v48  ;;  %v5509_v48 = vld [vmem:[#allocation5 + $0xc] sm:$0x3] }
 0x484   : > { %v5229_v44 = vsel %vm4404_vm8, %v5225_v31, %v5133_v3  ;;  %v5244_v10 = vsel %vm4440_vm4, %v5240_v36, %v5195_v15  ;;  %5558 = vrot.lane.b32.xlu1 %v5509_v48, %s7167_s26  ;;  %v7128_v3 = vld [vmem:[%s9056_s7 + $0x38] sm:$0xff]   ;;  %v7129_v15 = vld [vmem:[%s9056_s7 + $0x30] sm:$0xff]  }
 0x485   : > { %v5233_v4 = vsel %vm4413_vm9, %v5229_v44, %v5149_v55  ;;  %v5211_v63 = vpop.permute.xlu0 %5210  ;;  %6259 = vmatpush3.bf16.msra.mxu0 %v7128_v3  ;;  %v7130_v55 = vld [vmem:[%s9056_s7 + $0x28] sm:$0xff]  }
 0x486   : > { %v5177_v27 = vpop.permute.xlu1 %5176  ;;  %v5237_v23 = vsel %vm4422_vm10, %v5233_v4, %v5165_v57  ;;  %v5248_v37 = vsel %vm4449_vm12, %v5244_v10, %v5211_v63  ;;  %6260 = vmatprep.subr.bf16.mxu0 %v7153_v0  ;;  %v7132_v57 = vld [vmem:[%s9056_s7 + $0x18] sm:$0xff]  }
 0x487   : > { %v5239_v17 = vsel %vm4431_vm11, %v5235_v9, %v5177_v27  ;;  %v5241_v26 = vsel %vm4431_vm11, %v5237_v23, %v5181_v22  ;;  %v5252_v20 = vsel %vm9084_vm5, %v5248_v37, 0.0 }
 0x488   : > { %v5245_v35 = vsel %vm4440_vm4, %v5241_v26, %v5197_v1  ;;  %v5499_v1 = vld [vmem:[#allocation5 + $0x2] sm:$0x3]  ;;  %5566 = vrot.lane.b32.xlu1 %v5511_v16, %s7168_s27 }
 0x489   : > { %5524 = vrot.lane.b32.xlu0 %v5499_v1, %s7163_s18  ;;  %6261 = vmatpush3.bf16.msra.mxu0 %v7129_v15  ;;  %v7135_v1 = vld [vmem:[%s9056_s7] sm:$0xff]  }
 0x48a   : > { %v5193_v50 = vpop.permute.xlu1 %5192  ;;  %6262 = vmatprep.subr.bf16.mxu0 %v7153_v0 }
 0x48b   : > { %v5243_v13 = vsel %vm4440_vm4, %v5239_v17, %v5193_v50 }
 0x48d   : > { %6263 = vmatpush3.bf16.msra.mxu0 %v7130_v55 }
 0x48e   : > { %v5209_v33 = vpop.permute.xlu1 %5208  ;;  %6264 = vmatprep.subr.bf16.mxu0 %v7153_v0 }
 0x48f   : > { %v5247_v39 = vsel %vm4449_vm12, %v5243_v13, %v5209_v33 }
 0x490   : > { %v5251_v42 = vsel %vm9083_vm2, %v5247_v39, 0.0 }
 0x491   : > { %v5258_v12 = vcombine.low %v5250_v45, %v5251_v42  ;;  %6265 = vmatpush3.bf16.msra.mxu0 %v7131_v14  ;;  %v5517_v14 = vpop.permute.xlu0 %5516 }
 0x492   : > { %v5213_v47 = vpop.permute.xlu1 %5212  ;;  %6266 = vmatprep.subr.bf16.mxu0 %v7153_v0 }
 0x493   : > { %v5249_v5 = vsel %vm4449_vm12, %v5245_v35, %v5213_v47 }
 0x494   : > { %v5253_v29 = vsel %vm9086_vm13, %v5249_v5, 0.0 }
 0x495   : > { %v5259_v43 = vcombine.low %v5252_v20, %v5253_v29  ;;  %6267 = vmatpush3.bf16.msra.mxu0 %v7132_v57  ;;  %v7134_v29 = vld [vmem:[%s9056_s7 + $0x8] sm:$0xff]  }
 0x496   : > { %6268 = vmatprep.subr.bf16.mxu0 %v7153_v0 }
 0x497   : > { %v5262_v22 = vpack.c.bf16 %v5259_v43, %v5258_v12 }
 0x499   : > { %6255 = vmatmul.mubr.bf16.vlgmr.msra.gmra.mxu1 %v5262_v22  ;;  %6269 = vmatpush3.bf16.msra.mxu0 %v7133_v46 }
 0x49a   : > { %6270 = vmatprep.subr.bf16.mxu0 %v7153_v0 }
 0x49d   : > { %6271 = vmatpush3.bf16.msra.mxu0 %v7134_v29 }
 0x49e   : > { %6272 = vmatprep.subr.bf16.mxu0 %v7153_v0  ;;  %v5513_v0 = vld [vmem:[#allocation5 + $0xe] sm:$0x3] }
 0x4a1   : > { %6273 = vmatpush3.bf16.msra.mxu0 %v7135_v1 }
 0x4f6   : > { %v5559_v55 = vpop.permute.xlu1 %5558 }
 0x4fa   : > { %v5567_v57 = vpop.permute.xlu1 %5566 }
 0x559   : > { %v5351_v56 = vpop.f32.mrf.mxu1 }
 0x55a   : > { %v5352_v19 = vadd.f32 %v6082_v34, %v5351_v56 }
 0x55b   : > { %v6256_v60 = vpop.f32.mrf.mxu1 }
 0x55c   : > { %v5358_v61 = vmax.f32 %v5352_v19, 0.0 }
 0x55d   : > { %v5354_v28 = vpop.f32.mrf.mxu1 }
 0x55e   : > { %v5362_v58 = vcombine.high %v5358_v61, %v5358_v61  ;;  %v5369_v2 = vrot.slane %v5358_v61, %v8226_v41  ;;  %v5355_v7 = vadd.f32 %v6082_v34, %v5354_v28  ;;  %v5525_v34 = vpop.permute.xlu0 %5524 }
 0x55f   : > { %v6257_v6 = vpop.f32.mrf.mxu1 }
 0x560   : > { %v5376_v18 = vrot.slane %v5362_v58, %v8226_v41  ;;  %v5377_v11 = vcombine.high %v5369_v2, %v5369_v2  ;;  %v6091_v31 = vrot.slane %v5369_v2, 9  ;;  %v5359_v62 = vmax.f32 %v5355_v7, 0.0 }
 0x562   : > { %v5378_v40 = vcombine.high %v5376_v18, %v5376_v18  ;;  %v6092_v59 = vrot.slane %v5377_v11, 9  ;;  %v6093_v21 = vrot.slane %v5376_v18, 9  ;;  %v5379_v25 = vcombine.high %v5359_v62, %v5359_v62 }
 0x563   : > { %v5386_v38 = vrot.slane %v5359_v62, %v8226_v41  ;;  %v5428_v27 = vmax.f32 %v5369_v2, %v6091_v31  ;;  %v5495_v2 = vld [vmem:[#allocation5] sm:$0x3] }
 0x564   : > { %v6094_v44 = vrot.slane %v5378_v40, 9  ;;  %v5430_v30 = vmax.f32 %v5376_v18, %v6093_v21  ;;  %v5393_v24 = vrot.slane %v5379_v25, %v8226_v41  ;;  %v5429_v4 = vmax.f32 %v5377_v11, %v6092_v59 }
 0x565   : > { %v5394_v32 = vcombine.high %v5386_v38, %v5386_v38  ;;  %v6095_v52 = vrot.slane %v5386_v38, 9  ;;  %v5578_v7 = vsel %vm2005_vm3, %v5495_v2, %v5517_v14 }
 0x566   : > { %v5431_v8 = vmax.f32 %v5378_v40, %v6094_v44  ;;  %v5436_v50 = vmax.f32 %v5428_v27, %v5430_v30  ;;  %v5395_v53 = vcombine.high %v5393_v24, %v5393_v24  ;;  %v6097_v9 = vrot.slane %v5393_v24, 9 }
 0x567   : > { %v6096_v36 = vrot.slane %v5394_v32, 9  ;;  %v5432_v54 = vmax.f32 %v5386_v38, %v6095_v52  ;;  %v5580_v40 = vsel %vm4395_vm7, %v5578_v7, %v5525_v34 }
 0x568   : > { %v5437_v23 = vmax.f32 %v5429_v4, %v5431_v8  ;;  %v6098_v17 = vrot.slane %v5395_v53, 9  ;;  %v5434_v10 = vmax.f32 %v5393_v24, %v6097_v9  ;;  %v5475_v63 = vrot.slane %v5436_v50, %v8231_v49 }
 0x569   : > { %v5433_v33 = vmax.f32 %v5394_v32, %v6096_v36 }
 0x56a   : > { %v5479_v13 = vrot.slane %v5437_v23, %v8231_v49  ;;  %v5435_v39 = vmax.f32 %v5395_v53, %v6098_v17  ;;  %v5438_v26 = vmax.f32 %v5432_v54, %v5434_v10 }
 0x56c   : > { %v5488_v37 = vsel %vm3978_vm14, %v5479_v13, %v5475_v63  ;;  %v5439_v42 = vmax.f32 %v5433_v33, %v5435_v39  ;;  %v5483_v35 = vrot.slane %v5438_v26, %v8231_v49  ;;  %v6099_v13 = vld [vmem:[%s9057_s8] ss:$0 sm:$0xff] }
 0x56d   : > { %5493 = vst.msk [vmem:[#allocation5 + $0x5] sm:$0x3] %vm9087_vm15, %v5488_v37 }
 0x56e   : > { %v5487_v47 = vrot.slane %v5439_v42, %v8231_v49 }
 0x570   : > { %v5489_v5 = vsel %vm3978_vm14, %v5487_v47, %v5483_v35  ;;  %vm9090_vm14 = vmmov %vm9083_vm2 }
 0x571   : > { %5494 = vst.msk [vmem:[#allocation5 + $0x9] sm:$0x3] %vm9088_vm0, %v5489_v5 }
 0x574   : > { %v5501_v20 = vld [vmem:[#allocation5 + $0x4] sm:$0x3]  ;;  %v5500_v43 = vld [vmem:[#allocation5 + $0x6] sm:$0x3] }
 0x575   : > { %v5498_v45 = vld [vmem:[#allocation5 + $0x5] sm:$0x3]  ;;  %5532 = vrot.lane.b32.xlu0 %v5501_v20, %s7164_s19 }
 0x576   : > { %5518 = vrot.lane.b32.xlu1 %v5498_v45, %s7161_s13  ;;  %v5503_v12 = vld [vmem:[#allocation5 + $0x5] sm:$0x3] }
 0x577   : > { %v5505_v49 = vld [vmem:[#allocation5 + $0x6] sm:$0x3]  ;;  %v5496_v6 = vld [vmem:[#allocation5 + $0x4] sm:$0x3] }
 0x578   : > { %v5502_v22 = vld [vmem:[#allocation5 + $0x8] sm:$0x3]  ;;  %v5506_v3 = vld [vmem:[#allocation5 + $0xa] sm:$0x3] }
 0x579   : > { %5540 = vrot.lane.b32.xlu0 %v5503_v12, %s7165_s20  ;;  %v5508_v51 = vld [vmem:[#allocation5 + $0x8] sm:$0x3]  ;;  %v5512_v15 = vld [vmem:[#allocation5 + $0xa] sm:$0x3] }
 0x57a   : > { %5526 = vrot.lane.b32.xlu1 %v5500_v43, %s7163_s18  ;;  %v5504_v48 = vld [vmem:[#allocation5 + $0x9] sm:$0x3] }
 0x57b   : > { %v5510_v16 = vld [vmem:[#allocation5 + $0x9] sm:$0x3] }
 0x57d   : > { %5548 = vrot.lane.b32.xlu0 %v5505_v49, %s7166_s21 }
 0x57e   : > { %5534 = vrot.lane.b32.xlu1 %v5502_v22, %s7164_s19 }
 0x581   : > { %5556 = vrot.lane.b32.xlu0 %v5508_v51, %s7167_s26 }
 0x582   : > { %5542 = vrot.lane.b32.xlu1 %v5504_v48, %s7165_s20  ;;  %s6111_s20 = sshll.u32 %s9094_s10, 4 }
 0x585   : > { %5564 = vrot.lane.b32.xlu0 %v5510_v16, %s7168_s27  ;;  %s332_s27 = scalar_lea.vmem %s9058_s9, %s6111_s20 }
 0x586   : > { %5550 = vrot.lane.b32.xlu1 %v5506_v3, %s7166_s21 }
 0x589   : > { %5572 = vrot.lane.b32.xlu0 %v5512_v15, %s7169_s28 }
 0x58a   : > { %5574 = vrot.lane.b32.xlu1 %v5513_v0, %s7169_s28 }
 0x5e7   : > { %v5533_v56 = vpop.permute.xlu0 %5532 }
 0x5e8   : > { %v5519_v19 = vpop.permute.xlu1 %5518  ;;  %v5582_v21 = vsel %vm4404_vm8, %v5580_v40, %v5533_v56 }
 0x5e9   : > { %v5579_v31 = vsel %vm2005_vm3, %v5496_v6, %v5519_v19  ;;  %vm9089_vm3 = vmmov %vm9083_vm2 }
 0x5eb   : > { %v5541_v60 = vpop.permute.xlu0 %5540 }
 0x5ec   : > { %v5527_v61 = vpop.permute.xlu1 %5526  ;;  %v5584_v27 = vsel %vm4413_vm9, %v5582_v21, %v5541_v60 }
 0x5ed   : > { %v5581_v62 = vsel %vm4395_vm7, %v5579_v31, %v5527_v61 }
 0x5ef   : > { %v5549_v28 = vpop.permute.xlu0 %5548 }
 0x5f0   : > { %v5535_v58 = vpop.permute.xlu1 %5534  ;;  %v5586_v24 = vsel %vm4422_vm10, %v5584_v27, %v5549_v28 }
 0x5f1   : > { %v5583_v59 = vsel %vm4404_vm8, %v5581_v62, %v5535_v58 }
 0x5f3   : > { %v5557_v18 = vpop.permute.xlu0 %5556 }
 0x5f4   : > { %v5543_v11 = vpop.permute.xlu1 %5542  ;;  %v5588_v52 = vsel %vm4431_vm11, %v5586_v24, %v5557_v18 }
 0x5f5   : > { %v5585_v25 = vsel %vm4413_vm9, %v5583_v59, %v5543_v11 }
 0x5f7   : > { %v5565_v38 = vpop.permute.xlu0 %5564 }
 0x5f8   : > { %v5551_v44 = vpop.permute.xlu1 %5550  ;;  %v5590_v8 = vsel %vm4440_vm4, %v5588_v52, %v5565_v38 }
 0x5f9   : > { %v5587_v30 = vsel %vm4422_vm10, %v5585_v25, %v5551_v44 }
 0x5fa   : > { %v5589_v32 = vsel %vm4431_vm11, %v5587_v30, %v5559_v55 }
 0x5fb   : > { %v5591_v4 = vsel %vm4440_vm4, %v5589_v32, %v5567_v57  ;;  %v5573_v50 = vpop.permute.xlu0 %5572  ;;  %vm9091_vm4 = vcmask 15360  }
 0x5fc   : > { %v5575_v53 = vpop.permute.xlu1 %5574  ;;  %v5592_v36 = vsel %vm4449_vm12, %v5590_v8, %v5573_v50 }
 0x5fd   : > { %v5593_v9 = vsel %vm4449_vm12, %v5591_v4, %v5575_v53  ;;  %v5594_v23 = vsel %vm9089_vm3, %v5592_v36, 0.0  ;;  %vm9092_vm12 = vmmov %vm9091_vm4 }
 0x5fe   : > { %v5595_v17 = vsel %vm9090_vm14, %v5593_v9, 0.0 }
 0x5ff   : > { %v5598_v54 = vcombine.low %v5594_v23, %v5595_v17 }
 0x601   : > { %v5605_v10 = vrot.slane %v5598_v54, %v8226_v41 }
 0x603   : > { %v5607_v63 = vpack.c.bf16 %v5605_v10, %v5605_v10 }
 0x605   : > { %6275 = vmatmul.mubr.bf16.vlgmr.msra.gmra.mxu0 %v5607_v63 }
 0x6c5   : > { %v5696_v33 = vpop.f32.mrf.mxu0 }
 0x6c6   : > { %v5697_v39 = vadd.f32 %v6099_v13, %v5696_v33 }
 0x6c7   : > { %v6276_v26 = vpop.f32.mrf.mxu0 }
 0x6c8   : > { %v5702_v37 = vmax.f32 %v5697_v39, 0.0 }
 0x6c9   : > { %v5699_v46 = vpop.f32.mrf.mxu0 }
 0x6ca   : > { %v5710_v42 = vrot.slane %v5702_v37, %v8226_v41 }
 0x6cb   : > { %v6277_v35 = vpop.f32.mrf.mxu0 }
 0x6cc   : > { %5714 = vxpose.xlu0.b32.start.end [1/1] (short) (narrow) %v5710_v42, 8  ;;  %v5711_v47 = vcombine.high %v5710_v42, %v5710_v42 }
 0x6ce   : > { %5746 = vxpose.xlu1.b32.start.end [1/1] (short) (narrow) %v5711_v47, 8 }
 0x748   : > { %v5730_v5 = vpop.trf.xlu0 }
 0x749   : > { %5778 = vst.msk [vmem:[%s332_s27] sm:$0xff] %vm9091_vm4, %v5730_v5 }
 0x74a   : > { %v5762_v20 = vpop.trf.xlu1 }
 0x74b   : > { %5779 = vst.msk [vmem:[%s332_s27 + $0x8] sm:$0xff] %vm9092_vm12, %v5762_v20 }
 0x74c PF: > { %s19_s30 = sadd.s32 1, %s7151_s30  }
 0x74d   : > { %p16_p4 = scmp.ge.s32.totalorder %s19_s30, 4  }
 0x74f   :  { %18 = sbr.rel (!%p16_p4) target bundleno = 1 (0x1), region = 98 }

</bundles_post_ra>
